<compile_context>
chip_gen: v5e
topology: v5e:2x2
jax: 0.10.0
libtpu: 0.0.40
codegen_flags: <defaults>
</compile_context>

<pallas_src>
import jax
import jax.numpy as jnp
from jax.experimental import pallas as pl
from jax.experimental.pallas import tpu as pltpu


def attention_kernel(z_ref, w1_ref, b1_ref, w2_ref, out_ref, beta_ref):
    # z_ref   : (TB, M, D)   input views
    # w1_ref  : (D, H)       first Linear weight (x @ W layout)
    # b1_ref  : (1, H)       first Linear bias
    # w2_ref  : (1, H)       second Linear weight stored as a row (no bias)
    # out_ref : (TB, D)      attention-pooled output
    # beta_ref: (TB, M)      attention weights (trailing 1 restored in wrapper)
    tb, m, d = z_ref.shape

    w1 = w1_ref[...]
    b1 = b1_ref[...]
    w2 = w2_ref[...]

    # ---- projection: Linear -> Tanh -> Linear(H, 1) -------------------------
    # Per-view 2-D matmuls avoid materializing a (TB*M, D) relayout; the H->1
    # projection is a VPU multiply + lane reduction instead of a width-1 MXU
    # matmul (which would be >95% padding and pay result-FIFO drain latency).
    logits = []
    for j in range(m):                                       # static unroll, M small
        zj = z_ref[:, j, :]                                  # (TB, D)
        hj = jnp.tanh(
            jnp.dot(zj, w1, preferred_element_type=jnp.float32) + b1
        )                                                    # (TB, H)
        logits.append(jnp.sum(hj * w2, axis=-1, keepdims=True))  # (TB, 1)
    w = jnp.concatenate(logits, axis=-1)                     # (TB, M)

    # ---- softmax over the view axis (numerically stable) --------------------
    w_max = jnp.max(w, axis=-1, keepdims=True)               # (TB, 1)
    e = jnp.exp(w - w_max)                                   # (TB, M)
    denom = jnp.sum(e, axis=-1, keepdims=True)               # (TB, 1)
    beta = e * pl.reciprocal(denom, approx=True)             # EUP rcp, VPU mul

    # ---- weighted sum over views ---------------------------------------------
    acc = beta[:, 0:1] * z_ref[:, 0, :]
    for j in range(1, m):
        acc = acc + beta[:, j : j + 1] * z_ref[:, j, :]

    out_ref[...] = acc.astype(out_ref.dtype)
    beta_ref[...] = beta.astype(beta_ref.dtype)


def _round_up(x, mult):
    return (x + mult - 1) // mult * mult


def _choose_tb(n, m, d, h, budget_bytes):
    """Largest batch tile that divides N, keeps the (8,128) block constraint
    (tb % 8 == 0 or tb == N) and fits a double-buffered working set inside
    `budget_bytes` (sized conservatively for v7x's 64 MiB physical VMEM)."""
    itemsize = 4
    z_row = _round_up(m, 8) * _round_up(d, 128) * itemsize
    out_row = _round_up(d, 128) * itemsize
    beta_row = _round_up(m, 128) * itemsize
    per_row = 2 * (z_row + out_row + beta_row)        # x2: double-buffered pipeline
    weights = 2 * itemsize * (
        _round_up(d, 8) * _round_up(h, 128) + 2 * 8 * _round_up(h, 128)
    )
    cap = max(8, (budget_bytes - weights) // per_row)
    if n <= cap:
        return n
    cap = (cap // 8) * 8
    for tb in range(cap, 7, -8):
        if n % tb == 0:
            return tb
    return n      # no multiple-of-8 divisor fits; fall back to a single block


def attention_forward(z, w1, b1, w2, *, tb=None,
                      vmem_limit_bytes=48 * 1024 * 1024):
    """z: (N, M, D) float32; w1: (D, H); b1: (H,) or (1, H); w2: (H,) or (H, 1).

    Returns (out (N, D), beta (N, M, 1)) — same semantics as the PyTorch module.
    """
    n, m, d = z.shape
    h = w1.shape[1]

    b1 = jnp.asarray(b1).reshape(1, h)
    w2_row = jnp.asarray(w2).reshape(1, h)    # second Linear weight as a row

    if tb is None:
        # Budget the pipelined working set well inside v7x's 64 MiB VMEM
        # (v5e/v6e have 128 MiB, so this is conservative there).
        tb = _choose_tb(n, m, d, h, budget_bytes=36 * 1024 * 1024)
    assert n % tb == 0, "batch must be divisible by the batch tile"
    assert tb % 8 == 0 or tb == n, "batch tile must be a multiple of 8 (or N)"

    grid = (n // tb,)
    out_shapes = (
        jax.ShapeDtypeStruct((n, d), z.dtype),
        jax.ShapeDtypeStruct((n, m), z.dtype),   # lane-dense beta: no trailing 1
    )

    cost = pl.CostEstimate(
        flops=2 * n * m * d * h + 2 * n * m * h + 2 * n * m * d + 5 * n * m,
        transcendentals=n * m * h + n * m + n,
        bytes_accessed=4 * (n * m * d + d * h + 2 * h) + 4 * (n * d + n * m),
    )

    out, beta = pl.pallas_call(
        attention_kernel,
        out_shape=out_shapes,
        grid_spec=pltpu.PrefetchScalarGridSpec(
            num_scalar_prefetch=0,
            grid=grid,
            in_specs=[
                pl.BlockSpec((tb, m, d), lambda i: (i, 0, 0)),
                # Weights: constant index_map -> not re-fetched per grid step.
                pl.BlockSpec((d, h), lambda i: (0, 0)),
                pl.BlockSpec((1, h), lambda i: (0, 0)),
                pl.BlockSpec((1, h), lambda i: (0, 0)),
            ],
            out_specs=[
                pl.BlockSpec((tb, d), lambda i: (i, 0)),
                pl.BlockSpec((tb, m), lambda i: (i, 0)),
            ],
        ),
        compiler_params=pltpu.CompilerParams(
            dimension_semantics=("parallel",),   # megacore-shard the batch grid
            vmem_limit_bytes=vmem_limit_bytes,
        ),
        cost_estimate=cost,
    )(z, w1, b1, w2_row)

    return out, beta[:, :, None]    # restore (N, M, 1) in the wrapper (free)


def attention_ref(z, w1, b1, w2):
    """Pure-JAX reference matching the PyTorch forward."""
    h = jnp.einsum("nmd,dh->nmh", z, w1) + jnp.asarray(b1).reshape(1, 1, -1)
    h = jnp.tanh(h)
    w = jnp.einsum("nmh,hk->nmk", h, jnp.asarray(w2).reshape(-1, 1))  # (N, M, 1)
    beta = jax.nn.softmax(w, axis=1)
    out = jnp.sum(beta * z, axis=1)
    return out, beta


if __name__ == "__main__":
    key = jax.random.PRNGKey(0)

    N, M, D, H = 256, 4, 32, 16   # batch, views, in_size, hidden_size
    k_z, k_w1, k_b1, k_w2 = jax.random.split(key, 4)

    # Deterministic parameter init (PyTorch-Linear-style uniform bounds).
    bound1 = 1.0 / (D ** 0.5)
    bound2 = 1.0 / (H ** 0.5)
    w1 = jax.random.uniform(k_w1, (D, H), jnp.float32, -bound1, bound1)
    b1 = jax.random.uniform(k_b1, (H,), jnp.float32, -bound1, bound1)
    w2 = jax.random.uniform(k_w2, (H, 1), jnp.float32, -bound2, bound2)
    z = jax.random.normal(k_z, (N, M, D), jnp.float32)

    out_expected, beta_expected = attention_ref(z, w1, b1, w2)

    # Auto-sized batch tile (whole batch fits VMEM here -> single grid step).
    out, beta = attention_forward(z, w1, b1, w2)
    jax.block_until_ready((out, beta))
    # Tolerance accounts for the EUP approximate reciprocal in the softmax.
    assert jnp.allclose(out, out_expected, atol=3e-3, rtol=3e-3)
    assert jnp.allclose(beta, beta_expected, atol=3e-3, rtol=3e-3)

    # Explicit smaller tile to exercise the multi-step pipelined grid path.
    out2, beta2 = attention_forward(z, w1, b1, w2, tb=64)
    jax.block_until_ready((out2, beta2))
    assert jnp.allclose(out2, out_expected, atol=3e-3, rtol=3e-3)
    assert jnp.allclose(beta2, beta_expected, atol=3e-3, rtol=3e-3)

    print("KERNEL_OK")
</pallas_src>

<mosaic_0001>
module attributes {stable_mosaic.version = 11 : i64} {
  func.func @attention_kernel(%arg0: i32, %arg1: memref<256x4x32xf32, #tpu.memory_space<vmem>>, %arg2: memref<32x16xf32, #tpu.memory_space<vmem>>, %arg3: memref<1x16xf32, #tpu.memory_space<vmem>>, %arg4: memref<1x16xf32, #tpu.memory_space<vmem>>, %arg5: memref<256x32xf32, #tpu.memory_space<vmem>>, %arg6: memref<256x4xf32, #tpu.memory_space<vmem>>) attributes {dimension_semantics = [#tpu.dimension_semantics<parallel>], iteration_bounds = array<i64: 1>, scalar_prefetch = 0 : i64, scratch_operands = 0 : i64, tpu.core_type = #tpu.core_type<tc>, window_params = [{transform_indices = @transform_0, window_bounds = array<i64: 256, 4, 32>}, {pipeline_mode = #tpu.pipeline_mode<synchronous>, transform_indices = @transform_1, window_bounds = array<i64: 32, 16>}, {pipeline_mode = #tpu.pipeline_mode<synchronous>, transform_indices = @transform_2, window_bounds = array<i64: 1, 16>}, {pipeline_mode = #tpu.pipeline_mode<synchronous>, transform_indices = @transform_3, window_bounds = array<i64: 1, 16>}, {transform_indices = @transform_4, window_bounds = array<i64: 256, 32>}, {transform_indices = @transform_5, window_bounds = array<i64: 256, 4>}]} {
    %c0 = arith.constant 0 : index
    %c0_0 = arith.constant 0 : index
    %0 = vector.load %arg2[%c0, %c0_0] : memref<32x16xf32, #tpu.memory_space<vmem>>, vector<32x16xf32>
    %c0_1 = arith.constant 0 : index
    %c0_2 = arith.constant 0 : index
    %1 = vector.load %arg3[%c0_1, %c0_2] : memref<1x16xf32, #tpu.memory_space<vmem>>, vector<1x16xf32>
    %c0_3 = arith.constant 0 : index
    %c0_4 = arith.constant 0 : index
    %2 = vector.load %arg4[%c0_3, %c0_4] : memref<1x16xf32, #tpu.memory_space<vmem>>, vector<1x16xf32>
    %c0_5 = arith.constant 0 : index
    %c0_6 = arith.constant 0 : index
    %c0_7 = arith.constant 0 : index
    %3 = vector.load %arg1[%c0_5, %c0_6, %c0_7] : memref<256x4x32xf32, #tpu.memory_space<vmem>>, vector<256x1x32xf32>
    %4 = vector.shape_cast %3 : vector<256x1x32xf32> to vector<256x32xf32>
    %cst = arith.constant dense<0.000000e+00> : vector<256x16xf32>
    %5 = tpu.matmul %4, %0, %cst {dimension_numbers = #tpu.dot_dimension_numbers<[1], [0], [0], [1], [0, 0, 1, 1], [], []>} : vector<256x32xf32>, vector<32x16xf32>, vector<256x16xf32> -> vector<256x16xf32>
    %6 = vector.broadcast %1 : vector<1x16xf32> to vector<256x16xf32>
    %7 = arith.addf %5, %6 : vector<256x16xf32>
    %8 = math.tanh %7 : vector<256x16xf32>
    %9 = vector.broadcast %2 : vector<1x16xf32> to vector<256x16xf32>
    %10 = arith.mulf %8, %9 : vector<256x16xf32>
    %cst_8 = arith.constant dense<0.000000e+00> : vector<256xf32>
    %11 = vector.multi_reduction <add>, %10, %cst_8 [1] : vector<256x16xf32> to vector<256xf32>
    %12 = vector.shape_cast %11 : vector<256xf32> to vector<256x1xf32>
    %c0_9 = arith.constant 0 : index
    %c1 = arith.constant 1 : index
    %c0_10 = arith.constant 0 : index
    %13 = vector.load %arg1[%c0_9, %c1, %c0_10] : memref<256x4x32xf32, #tpu.memory_space<vmem>>, vector<256x1x32xf32>
    %14 = vector.shape_cast %13 : vector<256x1x32xf32> to vector<256x32xf32>
    %cst_11 = arith.constant dense<0.000000e+00> : vector<256x16xf32>
    %15 = tpu.matmul %14, %0, %cst_11 {dimension_numbers = #tpu.dot_dimension_numbers<[1], [0], [0], [1], [0, 0, 1, 1], [], []>} : vector<256x32xf32>, vector<32x16xf32>, vector<256x16xf32> -> vector<256x16xf32>
    %16 = vector.broadcast %1 : vector<1x16xf32> to vector<256x16xf32>
    %17 = arith.addf %15, %16 : vector<256x16xf32>
    %18 = math.tanh %17 : vector<256x16xf32>
    %19 = vector.broadcast %2 : vector<1x16xf32> to vector<256x16xf32>
    %20 = arith.mulf %18, %19 : vector<256x16xf32>
    %cst_12 = arith.constant dense<0.000000e+00> : vector<256xf32>
    %21 = vector.multi_reduction <add>, %20, %cst_12 [1] : vector<256x16xf32> to vector<256xf32>
    %22 = vector.shape_cast %21 : vector<256xf32> to vector<256x1xf32>
    %c0_13 = arith.constant 0 : index
    %c2 = arith.constant 2 : index
    %c0_14 = arith.constant 0 : index
    %23 = vector.load %arg1[%c0_13, %c2, %c0_14] : memref<256x4x32xf32, #tpu.memory_space<vmem>>, vector<256x1x32xf32>
    %24 = vector.shape_cast %23 : vector<256x1x32xf32> to vector<256x32xf32>
    %cst_15 = arith.constant dense<0.000000e+00> : vector<256x16xf32>
    %25 = tpu.matmul %24, %0, %cst_15 {dimension_numbers = #tpu.dot_dimension_numbers<[1], [0], [0], [1], [0, 0, 1, 1], [], []>} : vector<256x32xf32>, vector<32x16xf32>, vector<256x16xf32> -> vector<256x16xf32>
    %26 = vector.broadcast %1 : vector<1x16xf32> to vector<256x16xf32>
    %27 = arith.addf %25, %26 : vector<256x16xf32>
    %28 = math.tanh %27 : vector<256x16xf32>
    %29 = vector.broadcast %2 : vector<1x16xf32> to vector<256x16xf32>
    %30 = arith.mulf %28, %29 : vector<256x16xf32>
    %cst_16 = arith.constant dense<0.000000e+00> : vector<256xf32>
    %31 = vector.multi_reduction <add>, %30, %cst_16 [1] : vector<256x16xf32> to vector<256xf32>
    %32 = vector.shape_cast %31 : vector<256xf32> to vector<256x1xf32>
    %c0_17 = arith.constant 0 : index
    %c3 = arith.constant 3 : index
    %c0_18 = arith.constant 0 : index
    %33 = vector.load %arg1[%c0_17, %c3, %c0_18] : memref<256x4x32xf32, #tpu.memory_space<vmem>>, vector<256x1x32xf32>
    %34 = vector.shape_cast %33 : vector<256x1x32xf32> to vector<256x32xf32>
    %cst_19 = arith.constant dense<0.000000e+00> : vector<256x16xf32>
    %35 = tpu.matmul %34, %0, %cst_19 {dimension_numbers = #tpu.dot_dimension_numbers<[1], [0], [0], [1], [0, 0, 1, 1], [], []>} : vector<256x32xf32>, vector<32x16xf32>, vector<256x16xf32> -> vector<256x16xf32>
    %36 = vector.broadcast %1 : vector<1x16xf32> to vector<256x16xf32>
    %37 = arith.addf %35, %36 : vector<256x16xf32>
    %38 = math.tanh %37 : vector<256x16xf32>
    %39 = vector.broadcast %2 : vector<1x16xf32> to vector<256x16xf32>
    %40 = arith.mulf %38, %39 : vector<256x16xf32>
    %cst_20 = arith.constant dense<0.000000e+00> : vector<256xf32>
    %41 = vector.multi_reduction <add>, %40, %cst_20 [1] : vector<256x16xf32> to vector<256xf32>
    %42 = vector.shape_cast %41 : vector<256xf32> to vector<256x1xf32>
    %43 = tpu.concatenate %12, %22, %32, %42 in 1 : vector<256x1xf32>, vector<256x1xf32>, vector<256x1xf32>, vector<256x1xf32> -> vector<256x4xf32>
    %cst_21 = arith.constant dense<0xFF800000> : vector<256xf32>
    %44 = vector.multi_reduction <maximumf>, %43, %cst_21 [1] : vector<256x4xf32> to vector<256xf32>
    %45 = vector.shape_cast %44 : vector<256xf32> to vector<256x1xf32>
    %46 = vector.broadcast %45 : vector<256x1xf32> to vector<256x4xf32>
    %47 = arith.subf %43, %46 : vector<256x4xf32>
    %48 = math.exp %47 : vector<256x4xf32>
    %cst_22 = arith.constant dense<0.000000e+00> : vector<256xf32>
    %49 = vector.multi_reduction <add>, %48, %cst_22 [1] : vector<256x4xf32> to vector<256xf32>
    %50 = vector.shape_cast %49 : vector<256xf32> to vector<256x1xf32>
    %51 = tpu.reciprocal %50 {approx = true} : vector<256x1xf32> -> vector<256x1xf32>
    %52 = vector.broadcast %51 : vector<256x1xf32> to vector<256x4xf32>
    %53 = arith.mulf %48, %52 : vector<256x4xf32>
    %54 = vector.extract_strided_slice %53 {offsets = [0, 0], sizes = [256, 1], strides = [1, 1]} : vector<256x4xf32> to vector<256x1xf32>
    %c0_23 = arith.constant 0 : index
    %c0_24 = arith.constant 0 : index
    %c0_25 = arith.constant 0 : index
    %55 = vector.load %arg1[%c0_23, %c0_24, %c0_25] : memref<256x4x32xf32, #tpu.memory_space<vmem>>, vector<256x1x32xf32>
    %56 = vector.shape_cast %55 : vector<256x1x32xf32> to vector<256x32xf32>
    %57 = vector.broadcast %54 : vector<256x1xf32> to vector<256x32xf32>
    %58 = arith.mulf %57, %56 : vector<256x32xf32>
    %59 = vector.extract_strided_slice %53 {offsets = [0, 1], sizes = [256, 1], strides = [1, 1]} : vector<256x4xf32> to vector<256x1xf32>
    %c0_26 = arith.constant 0 : index
    %c1_27 = arith.constant 1 : index
    %c0_28 = arith.constant 0 : index
    %60 = vector.load %arg1[%c0_26, %c1_27, %c0_28] : memref<256x4x32xf32, #tpu.memory_space<vmem>>, vector<256x1x32xf32>
    %61 = vector.shape_cast %60 : vector<256x1x32xf32> to vector<256x32xf32>
    %62 = vector.broadcast %59 : vector<256x1xf32> to vector<256x32xf32>
    %63 = arith.mulf %62, %61 : vector<256x32xf32>
    %64 = arith.addf %58, %63 : vector<256x32xf32>
    %65 = vector.extract_strided_slice %53 {offsets = [0, 2], sizes = [256, 1], strides = [1, 1]} : vector<256x4xf32> to vector<256x1xf32>
    %c0_29 = arith.constant 0 : index
    %c2_30 = arith.constant 2 : index
    %c0_31 = arith.constant 0 : index
    %66 = vector.load %arg1[%c0_29, %c2_30, %c0_31] : memref<256x4x32xf32, #tpu.memory_space<vmem>>, vector<256x1x32xf32>
    %67 = vector.shape_cast %66 : vector<256x1x32xf32> to vector<256x32xf32>
    %68 = vector.broadcast %65 : vector<256x1xf32> to vector<256x32xf32>
    %69 = arith.mulf %68, %67 : vector<256x32xf32>
    %70 = arith.addf %64, %69 : vector<256x32xf32>
    %71 = vector.extract_strided_slice %53 {offsets = [0, 3], sizes = [256, 1], strides = [1, 1]} : vector<256x4xf32> to vector<256x1xf32>
    %c0_32 = arith.constant 0 : index
    %c3_33 = arith.constant 3 : index
    %c0_34 = arith.constant 0 : index
    %72 = vector.load %arg1[%c0_32, %c3_33, %c0_34] : memref<256x4x32xf32, #tpu.memory_space<vmem>>, vector<256x1x32xf32>
    %73 = vector.shape_cast %72 : vector<256x1x32xf32> to vector<256x32xf32>
    %74 = vector.broadcast %71 : vector<256x1xf32> to vector<256x32xf32>
    %75 = arith.mulf %74, %73 : vector<256x32xf32>
    %76 = arith.addf %70, %75 : vector<256x32xf32>
    %c0_35 = arith.constant 0 : index
    %c0_36 = arith.constant 0 : index
    %77 = vector.load %arg5[%c0_35, %c0_36] : memref<256x32xf32, #tpu.memory_space<vmem>>, vector<256x32xf32>
    tpu.vector_store %arg5[%c0_35, %c0_36], %76 {strides = array<i32>} : memref<256x32xf32, #tpu.memory_space<vmem>>, vector<256x32xf32>,
    %c0_37 = arith.constant 0 : index
    %c0_38 = arith.constant 0 : index
    %78 = vector.load %arg6[%c0_37, %c0_38] : memref<256x4xf32, #tpu.memory_space<vmem>>, vector<256x4xf32>
    tpu.vector_store %arg6[%c0_37, %c0_38], %53 {strides = array<i32>} : memref<256x4xf32, #tpu.memory_space<vmem>>, vector<256x4xf32>,
    return
  }
  func.func @transform_0(%arg0: i32) -> (i32, i32, i32) {
    %c0_i32 = arith.constant 0 : i32
    %c0_i32_0 = arith.constant 0 : i32
    %c0_i32_1 = arith.constant 0 : i32
    return %arg0, %c0_i32, %c0_i32_0 : i32, i32, i32
  }
  func.func @transform_1(%arg0: i32) -> (i32, i32) {
    %c0_i32 = arith.constant 0 : i32
    %c0_i32_0 = arith.constant 0 : i32
    %c0_i32_1 = arith.constant 0 : i32
    return %c0_i32, %c0_i32_0 : i32, i32
  }
  func.func @transform_2(%arg0: i32) -> (i32, i32) {
    %c0_i32 = arith.constant 0 : i32
    %c0_i32_0 = arith.constant 0 : i32
    %c0_i32_1 = arith.constant 0 : i32
    return %c0_i32, %c0_i32_0 : i32, i32
  }
  func.func @transform_3(%arg0: i32) -> (i32, i32) {
    %c0_i32 = arith.constant 0 : i32
    %c0_i32_0 = arith.constant 0 : i32
    %c0_i32_1 = arith.constant 0 : i32
    return %c0_i32, %c0_i32_0 : i32, i32
  }
  func.func @transform_4(%arg0: i32) -> (i32, i32) {
    %c0_i32 = arith.constant 0 : i32
    %c0_i32_0 = arith.constant 0 : i32
    return %arg0, %c0_i32 : i32, i32
  }
  func.func @transform_5(%arg0: i32) -> (i32, i32) {
    %c0_i32 = arith.constant 0 : i32
    %c0_i32_0 = arith.constant 0 : i32
    return %arg0, %c0_i32 : i32, i32
  }
}

</mosaic_0001>

<bundles_post_ra>
// kernel: tpu_custom_call.1
= control target key start
LH: loop header
LB: loop body
LE: loop exit
PB: predicated region body
PF: predicated region fallthrough
CT: control target
= control target key end

     0   :  { %vm541_vm0 = vcmask 1041409   ;;  %vm544_vm1 = vcmask 1042434   ;;  %vm547_vm2 = vcmask 1043459   ;;  %vm550_vm3 = vcmask 1044484   ;;  %s14187_s1 = inlined_call_operand.vmem [shape: f32[32,16], index: 1, kind: input, shape index: {}]   ;;  %s14188_s0 = inlined_call_operand.vmem [shape: f32[256,4,32], index: 0, kind: input, shape index: {}]   ;;  %s14189_s2 = inlined_call_operand.vmem [shape: f32[1,16], index: 2, kind: input, shape index: {}]   ;;  %s14190_s3 = inlined_call_operand.vmem [shape: f32[1,16], index: 3, kind: input, shape index: {}]   ;;  %s14191_s5 = inlined_call_operand.vmem [shape: f32[256,4], index: 5, kind: output, shape index: {1}]   ;;  %s14192_s4 = inlined_call_operand.vmem [shape: f32[256,32], index: 4, kind: output, shape index: {0}]  }
   0x1   :  { %v22_v0 = vld [vmem:[%s14187_s1 + $0x18] sm:$0xff]  ;;  %v21_v1 = vld [vmem:[%s14187_s1 + $0x10] sm:$0xff]  ;;  %v20_v2 = vld [vmem:[%s14187_s1 + $0x8] sm:$0xff]  ;;  %vm553_vm4 = vcmask 1045509   ;;  %vm556_vm5 = vcmask 1046534   ;;  %vm559_vm6 = vcmask 1047559  }
   0x2   :  { %1072 = vmatpush.msra.mxu0 %v22_v0  ;;  %2373 = vmatpush.msra.mxu1 %v22_v0  ;;  %v25_v3 = vld [vmem:[%s14188_s0] sm:$0x1]  ;;  %v26_v4 = vld [vmem:[%s14188_s0 + $0x4] sm:$0x1]  ;;  %v27_v5 = vld [vmem:[%s14188_s0 + $0x8] sm:$0x1] }
   0x3   :  { %3670 = vmatpush.msra.mxu2 %v22_v0  ;;  %4967 = vmatpush.msra.mxu3 %v22_v0  ;;  %v28_v6 = vld [vmem:[%s14188_s0 + $0xc] sm:$0x1]  ;;  %v29_v7 = vld [vmem:[%s14188_s0 + $0x10] sm:$0x1]  ;;  %v30_v8 = vld [vmem:[%s14188_s0 + $0x14] sm:$0x1] }
   0x4   :  { %1073 = vmatpush.msra.mxu0 %v21_v1  ;;  %2374 = vmatpush.msra.mxu1 %v21_v1  ;;  %v31_v9 = vld [vmem:[%s14188_s0 + $0x18] sm:$0x1]  ;;  %v32_v10 = vld [vmem:[%s14188_s0 + $0x1c] sm:$0x1]  ;;  %v19_v11 = vld [vmem:[%s14187_s1] sm:$0xff]  ;;  %v540_v12 = vrot.slane %v26_v4, 7 }
   0x5   :  { %3671 = vmatpush.msra.mxu2 %v21_v1  ;;  %4968 = vmatpush.msra.mxu3 %v21_v1  ;;  %v543_v13 = vrot.slane %v27_v5, 6  ;;  %v546_v14 = vrot.slane %v28_v6, 5  ;;  %vm995_vm7 = vcmask 261120   ;;  %v549_v15 = vrot.slane %v29_v7, 4  ;;  %v1337_v19 = vld [vmem:[%s14188_s0 + $0x1] sm:$0x1] }
   0x6   :  { %1074 = vmatpush.msra.mxu0 %v20_v2  ;;  %2375 = vmatpush.msra.mxu1 %v20_v2  ;;  %v552_v16 = vrot.slane %v30_v8, 3  ;;  %v555_v17 = vrot.slane %v31_v9, 2  ;;  %v558_v18 = vrot.slane %v32_v10, 1  ;;  %v1338_v20 = vld [vmem:[%s14188_s0 + $0x5] sm:$0x1]  ;;  %v542_v21 = vsel %vm541_vm0, %v540_v12, %v25_v3 }
   0x7   :  { %3672 = vmatpush.msra.mxu2 %v20_v2  ;;  %4969 = vmatpush.msra.mxu3 %v20_v2  ;;  %v1339_v22 = vld [vmem:[%s14188_s0 + $0x9] sm:$0x1]  ;;  %v1340_v23 = vld [vmem:[%s14188_s0 + $0xd] sm:$0x1]  ;;  %v1341_v24 = vld [vmem:[%s14188_s0 + $0x11] sm:$0x1]  ;;  %v545_v25 = vsel %vm544_vm1, %v543_v13, %v542_v21 }
   0x8   :  { %1075 = vmatpush.msra.mxu0 %v19_v11  ;;  %2376 = vmatpush.msra.mxu1 %v19_v11  ;;  %v1342_v26 = vld [vmem:[%s14188_s0 + $0x15] sm:$0x1]  ;;  %v1343_v27 = vld [vmem:[%s14188_s0 + $0x19] sm:$0x1]  ;;  %v1344_v28 = vld [vmem:[%s14188_s0 + $0x1d] sm:$0x1]  ;;  %v548_v29 = vsel %vm547_vm2, %v546_v14, %v545_v25 }
   0x9   :  { %3673 = vmatpush.msra.mxu2 %v19_v11  ;;  %4970 = vmatpush.msra.mxu3 %v19_v11  ;;  %v1849_v30 = vrot.slane %v1338_v20, 7  ;;  %v1851_v31 = vrot.slane %v1339_v22, 6  ;;  %v1853_v32 = vrot.slane %v1340_v23, 5  ;;  %v2634_v33 = vld [vmem:[%s14188_s0 + $0x2] sm:$0x1]  ;;  %v551_v34 = vsel %vm550_vm3, %v549_v15, %v548_v29 }
   0xa   :  { %v1855_v35 = vrot.slane %v1341_v24, 4  ;;  %v1857_v36 = vrot.slane %v1342_v26, 3  ;;  %v1859_v37 = vrot.slane %v1343_v27, 2  ;;  %v2635_v38 = vld [vmem:[%s14188_s0 + $0x6] sm:$0x1]  ;;  %v554_v39 = vsel %vm553_vm4, %v552_v16, %v551_v34 }
   0xb   :  { %v1850_v40 = vsel %vm541_vm0, %v1849_v30, %v1337_v19  ;;  %v1861_v41 = vrot.slane %v1344_v28, 1  ;;  %v2636_v42 = vld [vmem:[%s14188_s0 + $0xa] sm:$0x1]  ;;  %v2637_v43 = vld [vmem:[%s14188_s0 + $0xe] sm:$0x1]  ;;  %v3146_v44 = vrot.slane %v2635_v38, 7  ;;  %v557_v45 = vsel %vm556_vm5, %v555_v17, %v554_v39 }
   0xc   :  { %v1852_v46 = vsel %vm544_vm1, %v1851_v31, %v1850_v40  ;;  %v2638_v47 = vld [vmem:[%s14188_s0 + $0x12] sm:$0x1]  ;;  %v2639_v48 = vld [vmem:[%s14188_s0 + $0x16] sm:$0x1]  ;;  %v2640_v49 = vld [vmem:[%s14188_s0 + $0x1a] sm:$0x1]  ;;  %v7369_v50 = vsel %vm559_vm6, %v558_v18, %v557_v45 }
   0xd   :  { %14332 = vst [vmem:[#allocation2_spill] sm:$0xff] %v7369_v50  ;;  %v1854_v51 = vsel %vm547_vm2, %v1853_v32, %v1852_v46  ;;  %v2641_v52 = vld [vmem:[%s14188_s0 + $0x1e] sm:$0x1]  ;;  %v3147_v53 = vsel %vm541_vm0, %v3146_v44, %v2634_v33  ;;  %v3148_v54 = vrot.slane %v2636_v42, 6  ;;  %6648 = vmatmul.msk.f32.vlgmr.msra.gmra.mxu0 %vm995_vm7, %v7369_v50  ;;  %v3150_v56 = vrot.slane %v2637_v43, 5 }
   0xe   :  { %v1856_v55 = vsel %vm550_vm3, %v1855_v35, %v1854_v51  ;;  %v3152_v57 = vrot.slane %v2638_v47, 4  ;;  %v3154_v58 = vrot.slane %v2639_v48, 3  ;;  %v3931_v59 = vld [vmem:[%s14188_s0 + $0x3] sm:$0x1]  ;;  %v3932_v60 = vld [vmem:[%s14188_s0 + $0x7] sm:$0x1] }
   0xf   :  { %v1858_v61 = vsel %vm553_vm4, %v1857_v36, %v1856_v55  ;;  %v3149_v62 = vsel %vm544_vm1, %v3148_v54, %v3147_v53  ;;  %v3156_v63 = vrot.slane %v2640_v49, 2  ;;  %v3158_v0 = vrot.slane %v2641_v52, 1  ;;  %v3933_v1 = vld [vmem:[%s14188_s0 + $0xb] sm:$0x1]  ;;  %v3934_v2 = vld [vmem:[%s14188_s0 + $0xf] sm:$0x1] }
  0x10   :  { %v1860_v3 = vsel %vm556_vm5, %v1859_v37, %v1858_v61  ;;  %v3151_v4 = vsel %vm547_vm2, %v3150_v56, %v3149_v62  ;;  %v3935_v5 = vld [vmem:[%s14188_s0 + $0x13] sm:$0x1]  ;;  %v3936_v6 = vld [vmem:[%s14188_s0 + $0x17] sm:$0x1]  ;;  %v3937_v7 = vld [vmem:[%s14188_s0 + $0x1b] sm:$0x1] }
  0x11   :  { %v7405_v8 = vsel %vm559_vm6, %v1861_v41, %v1860_v3  ;;  %v3153_v9 = vsel %vm550_vm3, %v3152_v57, %v3151_v4  ;;  %v3938_v10 = vld [vmem:[%s14188_s0 + $0x1f] sm:$0x1]  ;;  %v4443_v11 = vrot.slane %v3932_v60, 7  ;;  %v4445_v12 = vrot.slane %v3933_v1, 6  ;;  %v2642_v17 = vld [vmem:[%s14188_s0 + $0x22] sm:$0x1] }
  0x12   :  { %14333 = vst [vmem:[#allocation3_spill] sm:$0xff] %v7405_v8  ;;  %6680 = vmatmul.msk.f32.vlgmr.msra.gmra.mxu1 %vm995_vm7, %v7405_v8  ;;  %v3155_v13 = vsel %vm553_vm4, %v3154_v58, %v3153_v9  ;;  %v4447_v14 = vrot.slane %v3934_v2, 5  ;;  %v4449_v15 = vrot.slane %v3935_v5, 4  ;;  %v4451_v16 = vrot.slane %v3936_v6, 3  ;;  %v2643_v18 = vld [vmem:[%s14188_s0 + $0x26] sm:$0x1] }
  0x13   :  { %v3157_v19 = vsel %vm556_vm5, %v3156_v63, %v3155_v13  ;;  %v4444_v20 = vsel %vm541_vm0, %v4443_v11, %v3931_v59  ;;  %v4453_v21 = vrot.slane %v3937_v7, 2  ;;  %v4455_v22 = vrot.slane %v3938_v10, 1  ;;  %v2644_v23 = vld [vmem:[%s14188_s0 + $0x2a] sm:$0x1]  ;;  %v2645_v24 = vld [vmem:[%s14188_s0 + $0x2e] sm:$0x1] }
  0x14   :  { %v7429_v25 = vsel %vm559_vm6, %v3158_v0, %v3157_v19  ;;  %v4446_v26 = vsel %vm544_vm1, %v4445_v12, %v4444_v20  ;;  %v2646_v27 = vld [vmem:[%s14188_s0 + $0x32] sm:$0x1]  ;;  %v2647_v28 = vld [vmem:[%s14188_s0 + $0x36] sm:$0x1]  ;;  %v2648_v29 = vld [vmem:[%s14188_s0 + $0x3a] sm:$0x1] }
  0x15   :  { %14334 = vst [vmem:[#allocation4_spill] sm:$0xff] %v7429_v25  ;;  %6712 = vmatmul.msk.f32.vlgmr.msra.gmra.mxu2 %vm995_vm7, %v7429_v25  ;;  %v4448_v30 = vsel %vm547_vm2, %v4447_v14, %v4446_v26  ;;  %v2649_v31 = vld [vmem:[%s14188_s0 + $0x3e] sm:$0x1]  ;;  %v3160_v32 = vrot.slane %v2643_v18, 7  ;;  %v3162_v33 = vrot.slane %v2644_v23, 6  ;;  %v3164_v34 = vrot.slane %v2645_v24, 5 }
  0x16   :  { %v4450_v35 = vsel %vm550_vm3, %v4449_v15, %v4448_v30  ;;  %v3166_v36 = vrot.slane %v2646_v27, 4  ;;  %v3168_v37 = vrot.slane %v2647_v28, 3  ;;  %v3939_v38 = vld [vmem:[%s14188_s0 + $0x23] sm:$0x1]  ;;  %v3170_v41 = vrot.slane %v2648_v29, 2 }
  0x17   :  { %v4452_v39 = vsel %vm553_vm4, %v4451_v16, %v4450_v35  ;;  %v3161_v40 = vsel %vm541_vm0, %v3160_v32, %v2642_v17  ;;  %v3172_v42 = vrot.slane %v2649_v31, 1  ;;  %v3940_v43 = vld [vmem:[%s14188_s0 + $0x27] sm:$0x1]  ;;  %v3941_v44 = vld [vmem:[%s14188_s0 + $0x2b] sm:$0x1]  ;;  %vm1240_vm8 = vcmask 130048  }
  0x18   :  { %v4454_v45 = vsel %vm556_vm5, %v4453_v21, %v4452_v39  ;;  %v3163_v46 = vsel %vm544_vm1, %v3162_v33, %v3161_v40  ;;  %v3942_v47 = vld [vmem:[%s14188_s0 + $0x2f] sm:$0x1]  ;;  %v3943_v48 = vld [vmem:[%s14188_s0 + $0x33] sm:$0x1]  ;;  %v3944_v49 = vld [vmem:[%s14188_s0 + $0x37] sm:$0x1] }
  0x19   :  { %v7471_v51 = vsel %vm559_vm6, %v4455_v22, %v4454_v45  ;;  %v3165_v52 = vsel %vm547_vm2, %v3164_v34, %v3163_v46  ;;  %v3945_v53 = vld [vmem:[%s14188_s0 + $0x3b] sm:$0x1]  ;;  %v3946_v54 = vld [vmem:[%s14188_s0 + $0x3f] sm:$0x1]  ;;  %v4457_v55 = vrot.slane %v3940_v43, 7  ;;  %v4459_v56 = vrot.slane %v3941_v44, 6 }
  0x1a   :  { %14335 = vst [vmem:[#allocation5_spill] sm:$0xff] %v7471_v51  ;;  %6744 = vmatmul.msk.f32.vlgmr.msra.gmra.mxu3 %vm995_vm7, %v7471_v51  ;;  %v3167_v57 = vsel %vm550_vm3, %v3166_v36, %v3165_v52  ;;  %v4461_v58 = vrot.slane %v3942_v47, 5  ;;  %v4463_v59 = vrot.slane %v3943_v48, 4  ;;  %v4465_v60 = vrot.slane %v3944_v49, 3  ;;  %v33_v61 = vld [vmem:[%s14188_s0 + $0x20] sm:$0x1] }
  0x1b   :  { %v3169_v62 = vsel %vm553_vm4, %v3168_v37, %v3167_v57  ;;  %v4458_v63 = vsel %vm541_vm0, %v4457_v55, %v3939_v38  ;;  %v4467_v0 = vrot.slane %v3945_v53, 2  ;;  %v4469_v1 = vrot.slane %v3946_v54, 1  ;;  %v34_v2 = vld [vmem:[%s14188_s0 + $0x24] sm:$0x1]  ;;  %v35_v3 = vld [vmem:[%s14188_s0 + $0x28] sm:$0x1] }
  0x1c   :  { %v3171_v4 = vsel %vm556_vm5, %v3170_v41, %v3169_v62  ;;  %v4460_v5 = vsel %vm544_vm1, %v4459_v56, %v4458_v63  ;;  %v36_v6 = vld [vmem:[%s14188_s0 + $0x2c] sm:$0x1]  ;;  %v37_v7 = vld [vmem:[%s14188_s0 + $0x30] sm:$0x1]  ;;  %v38_v9 = vld [vmem:[%s14188_s0 + $0x34] sm:$0x1] }
  0x1d   :  { %v7506_v10 = vsel %vm559_vm6, %v3172_v42, %v3171_v4  ;;  %v4462_v11 = vsel %vm547_vm2, %v4461_v58, %v4460_v5  ;;  %v39_v12 = vld [vmem:[%s14188_s0 + $0x38] sm:$0x1]  ;;  %v40_v13 = vld [vmem:[%s14188_s0 + $0x3c] sm:$0x1]  ;;  %v561_v14 = vrot.slane %v34_v2, 7  ;;  %v563_v15 = vrot.slane %v35_v3, 6 }
  0x1e   :  { %14336 = vst [vmem:[#allocation6_spill] sm:$0xff] %v7506_v10  ;;  %6713 = vmatmul.msk.f32.gmra.mxu2 %vm995_vm7, %v7506_v10  ;;  %v4464_v16 = vsel %vm550_vm3, %v4463_v59, %v4462_v11  ;;  %v565_v17 = vrot.slane %v36_v6, 5  ;;  %v567_v18 = vrot.slane %v37_v7, 4  ;;  %v569_v19 = vrot.slane %v38_v9, 3  ;;  %v1345_v20 = vld [vmem:[%s14188_s0 + $0x21] sm:$0x1] }
  0x1f   :  { %v4466_v21 = vsel %vm553_vm4, %v4465_v60, %v4464_v16  ;;  %v562_v22 = vsel %vm541_vm0, %v561_v14, %v33_v61  ;;  %v571_v23 = vrot.slane %v39_v12, 2  ;;  %v573_v24 = vrot.slane %v40_v13, 1  ;;  %v1346_v26 = vld [vmem:[%s14188_s0 + $0x25] sm:$0x1]  ;;  %v1347_v27 = vld [vmem:[%s14188_s0 + $0x29] sm:$0x1] }
  0x20   :  { %v4468_v28 = vsel %vm556_vm5, %v4467_v0, %v4466_v21  ;;  %v564_v29 = vsel %vm544_vm1, %v563_v15, %v562_v22  ;;  %v1348_v30 = vld [vmem:[%s14188_s0 + $0x2d] sm:$0x1]  ;;  %v1349_v31 = vld [vmem:[%s14188_s0 + $0x31] sm:$0x1]  ;;  %v1350_v32 = vld [vmem:[%s14188_s0 + $0x35] sm:$0x1] }
  0x21   :  { %v7541_v33 = vsel %vm559_vm6, %v4469_v1, %v4468_v28  ;;  %v566_v34 = vsel %vm547_vm2, %v565_v17, %v564_v29  ;;  %v1351_v35 = vld [vmem:[%s14188_s0 + $0x39] sm:$0x1]  ;;  %v1352_v36 = vld [vmem:[%s14188_s0 + $0x3d] sm:$0x1]  ;;  %v1863_v37 = vrot.slane %v1346_v26, 7  ;;  %v1865_v38 = vrot.slane %v1347_v27, 6 }
  0x22   :  { %14337 = vst [vmem:[#allocation7_spill] sm:$0xff] %v7541_v33  ;;  %6745 = vmatmul.msk.f32.gmra.mxu3 %vm995_vm7, %v7541_v33  ;;  %v568_v39 = vsel %vm550_vm3, %v567_v18, %v566_v34  ;;  %v1867_v40 = vrot.slane %v1348_v30, 5  ;;  %v1869_v41 = vrot.slane %v1349_v31, 4  ;;  %v1871_v42 = vrot.slane %v1350_v32, 3  ;;  %v3947_v43 = vld [vmem:[%s14188_s0 + $0x43] sm:$0x1] }
  0x23   :  { %v570_v44 = vsel %vm553_vm4, %v569_v19, %v568_v39  ;;  %v1864_v45 = vsel %vm541_vm0, %v1863_v37, %v1345_v20  ;;  %v1873_v46 = vrot.slane %v1351_v35, 2  ;;  %v1875_v47 = vrot.slane %v1352_v36, 1  ;;  %v3948_v48 = vld [vmem:[%s14188_s0 + $0x47] sm:$0x1]  ;;  %v3949_v49 = vld [vmem:[%s14188_s0 + $0x4b] sm:$0x1] }
  0x24   :  { %v572_v52 = vsel %vm556_vm5, %v571_v23, %v570_v44  ;;  %v1866_v53 = vsel %vm544_vm1, %v1865_v38, %v1864_v45  ;;  %v3950_v54 = vld [vmem:[%s14188_s0 + $0x4f] sm:$0x1]  ;;  %v3951_v55 = vld [vmem:[%s14188_s0 + $0x53] sm:$0x1]  ;;  %v3952_v56 = vld [vmem:[%s14188_s0 + $0x57] sm:$0x1] }
  0x25   :  { %v7576_v57 = vsel %vm559_vm6, %v573_v24, %v572_v52  ;;  %v1868_v58 = vsel %vm547_vm2, %v1867_v40, %v1866_v53  ;;  %v3953_v59 = vld [vmem:[%s14188_s0 + $0x5b] sm:$0x1]  ;;  %v3954_v60 = vld [vmem:[%s14188_s0 + $0x5f] sm:$0x1]  ;;  %v4471_v61 = vrot.slane %v3948_v48, 7  ;;  %v4473_v62 = vrot.slane %v3949_v49, 6 }
  0x26   :  { %14338 = vst [vmem:[#allocation8_spill] sm:$0xff] %v7576_v57  ;;  %6649 = vmatmul.msk.f32.gmra.mxu0 %vm995_vm7, %v7576_v57  ;;  %v1870_v63 = vsel %vm550_vm3, %v1869_v41, %v1868_v58  ;;  %v4475_v0 = vrot.slane %v3950_v54, 5  ;;  %v4477_v1 = vrot.slane %v3951_v55, 4  ;;  %v4479_v2 = vrot.slane %v3952_v56, 3  ;;  %v41_v3 = vld [vmem:[%s14188_s0 + $0x40] sm:$0x1] }
  0x27   :  { %v1872_v4 = vsel %vm553_vm4, %v1871_v42, %v1870_v63  ;;  %v4472_v5 = vsel %vm541_vm0, %v4471_v61, %v3947_v43  ;;  %v4481_v6 = vrot.slane %v3953_v59, 2  ;;  %v4483_v7 = vrot.slane %v3954_v60, 1  ;;  %v42_v9 = vld [vmem:[%s14188_s0 + $0x44] sm:$0x1]  ;;  %v43_v11 = vld [vmem:[%s14188_s0 + $0x48] sm:$0x1] }
  0x28   :  { %v1874_v12 = vsel %vm556_vm5, %v1873_v46, %v1872_v4  ;;  %v4474_v13 = vsel %vm544_vm1, %v4473_v62, %v4472_v5  ;;  %v44_v14 = vld [vmem:[%s14188_s0 + $0x4c] sm:$0x1]  ;;  %v45_v15 = vld [vmem:[%s14188_s0 + $0x50] sm:$0x1]  ;;  %v46_v16 = vld [vmem:[%s14188_s0 + $0x54] sm:$0x1] }
  0x29   :  { %v7611_v17 = vsel %vm559_vm6, %v1875_v47, %v1874_v12  ;;  %v4476_v18 = vsel %vm547_vm2, %v4475_v0, %v4474_v13  ;;  %v47_v19 = vld [vmem:[%s14188_s0 + $0x58] sm:$0x1]  ;;  %v48_v20 = vld [vmem:[%s14188_s0 + $0x5c] sm:$0x1]  ;;  %v575_v21 = vrot.slane %v42_v9, 7  ;;  %v577_v22 = vrot.slane %v43_v11, 6 }
  0x2a   :  { %14339 = vst [vmem:[#allocation9_spill] sm:$0xff] %v7611_v17  ;;  %6681 = vmatmul.msk.f32.gmra.mxu1 %vm995_vm7, %v7611_v17  ;;  %v4478_v23 = vsel %vm550_vm3, %v4477_v1, %v4476_v18  ;;  %v579_v24 = vrot.slane %v44_v14, 5  ;;  %v581_v26 = vrot.slane %v45_v15, 4  ;;  %v583_v27 = vrot.slane %v46_v16, 3  ;;  %v1353_v28 = vld [vmem:[%s14188_s0 + $0x41] sm:$0x1] }
  0x2b   :  { %v4480_v29 = vsel %vm553_vm4, %v4479_v2, %v4478_v23  ;;  %v576_v30 = vsel %vm541_vm0, %v575_v21, %v41_v3  ;;  %v585_v31 = vrot.slane %v47_v19, 2  ;;  %v587_v32 = vrot.slane %v48_v20, 1  ;;  %v1354_v34 = vld [vmem:[%s14188_s0 + $0x45] sm:$0x1]  ;;  %v1355_v35 = vld [vmem:[%s14188_s0 + $0x49] sm:$0x1] }
  0x2c   :  { %v4482_v36 = vsel %vm556_vm5, %v4481_v6, %v4480_v29  ;;  %v578_v37 = vsel %vm544_vm1, %v577_v22, %v576_v30  ;;  %v1356_v38 = vld [vmem:[%s14188_s0 + $0x4d] sm:$0x1]  ;;  %v1357_v39 = vld [vmem:[%s14188_s0 + $0x51] sm:$0x1]  ;;  %v1358_v40 = vld [vmem:[%s14188_s0 + $0x55] sm:$0x1] }
  0x2d   :  { %v7646_v41 = vsel %vm559_vm6, %v4483_v7, %v4482_v36  ;;  %v580_v42 = vsel %vm547_vm2, %v579_v24, %v578_v37  ;;  %v1359_v43 = vld [vmem:[%s14188_s0 + $0x59] sm:$0x1]  ;;  %v1360_v44 = vld [vmem:[%s14188_s0 + $0x5d] sm:$0x1]  ;;  %v1877_v45 = vrot.slane %v1354_v34, 7  ;;  %v1879_v46 = vrot.slane %v1355_v35, 6 }
  0x2e   :  { %14340 = vst [vmem:[#allocation10_spill] sm:$0xff] %v7646_v41  ;;  %6746 = vmatmul.msk.f32.gmra.mxu3 %vm995_vm7, %v7646_v41  ;;  %v582_v47 = vsel %vm550_vm3, %v581_v26, %v580_v42  ;;  %v1881_v48 = vrot.slane %v1356_v38, 5  ;;  %v1883_v49 = vrot.slane %v1357_v39, 4  ;;  %v1885_v52 = vrot.slane %v1358_v40, 3  ;;  %v2650_v53 = vld [vmem:[%s14188_s0 + $0x42] sm:$0x1] }
  0x2f   :  { %v584_v54 = vsel %vm553_vm4, %v583_v27, %v582_v47  ;;  %v1878_v55 = vsel %vm541_vm0, %v1877_v45, %v1353_v28  ;;  %v1887_v56 = vrot.slane %v1359_v43, 2  ;;  %v1889_v58 = vrot.slane %v1360_v44, 1  ;;  %v2651_v59 = vld [vmem:[%s14188_s0 + $0x46] sm:$0x1]  ;;  %v2652_v60 = vld [vmem:[%s14188_s0 + $0x4a] sm:$0x1] }
  0x30   :  { %v586_v61 = vsel %vm556_vm5, %v585_v31, %v584_v54  ;;  %v1880_v62 = vsel %vm544_vm1, %v1879_v46, %v1878_v55  ;;  %v2653_v63 = vld [vmem:[%s14188_s0 + $0x4e] sm:$0x1]  ;;  %v2654_v0 = vld [vmem:[%s14188_s0 + $0x52] sm:$0x1]  ;;  %v2655_v1 = vld [vmem:[%s14188_s0 + $0x56] sm:$0x1] }
  0x31   :  { %v7681_v2 = vsel %vm559_vm6, %v587_v32, %v586_v61  ;;  %v1882_v3 = vsel %vm547_vm2, %v1881_v48, %v1880_v62  ;;  %v2656_v4 = vld [vmem:[%s14188_s0 + $0x5a] sm:$0x1]  ;;  %v2657_v5 = vld [vmem:[%s14188_s0 + $0x5e] sm:$0x1]  ;;  %v3174_v6 = vrot.slane %v2651_v59, 7  ;;  %v3176_v7 = vrot.slane %v2652_v60, 6 }
  0x32   :  { %14341 = vst [vmem:[#allocation11_spill] sm:$0xff] %v7681_v2  ;;  %6650 = vmatmul.msk.f32.gmra.mxu0 %vm995_vm7, %v7681_v2  ;;  %v1884_v9 = vsel %vm550_vm3, %v1883_v49, %v1882_v3  ;;  %v3178_v11 = vrot.slane %v2653_v63, 5  ;;  %v3180_v12 = vrot.slane %v2654_v0, 4  ;;  %v3182_v13 = vrot.slane %v2655_v1, 3  ;;  %v49_v14 = vld [vmem:[%s14188_s0 + $0x60] sm:$0x1] }
  0x33   :  { %v1886_v15 = vsel %vm553_vm4, %v1885_v52, %v1884_v9  ;;  %v3175_v16 = vsel %vm541_vm0, %v3174_v6, %v2650_v53  ;;  %v3184_v18 = vrot.slane %v2656_v4, 2  ;;  %v3186_v19 = vrot.slane %v2657_v5, 1  ;;  %v50_v20 = vld [vmem:[%s14188_s0 + $0x64] sm:$0x1]  ;;  %v51_v21 = vld [vmem:[%s14188_s0 + $0x68] sm:$0x1] }
  0x34   :  { %v1888_v22 = vsel %vm556_vm5, %v1887_v56, %v1886_v15  ;;  %v3177_v23 = vsel %vm544_vm1, %v3176_v7, %v3175_v16  ;;  %v52_v24 = vld [vmem:[%s14188_s0 + $0x6c] sm:$0x1]  ;;  %v53_v26 = vld [vmem:[%s14188_s0 + $0x70] sm:$0x1]  ;;  %v54_v27 = vld [vmem:[%s14188_s0 + $0x74] sm:$0x1] }
  0x35   :  { %v7716_v28 = vsel %vm559_vm6, %v1889_v58, %v1888_v22  ;;  %v3179_v29 = vsel %vm547_vm2, %v3178_v11, %v3177_v23  ;;  %v55_v30 = vld [vmem:[%s14188_s0 + $0x78] sm:$0x1]  ;;  %v56_v31 = vld [vmem:[%s14188_s0 + $0x7c] sm:$0x1]  ;;  %v589_v32 = vrot.slane %v50_v20, 7  ;;  %v591_v34 = vrot.slane %v51_v21, 6 }
  0x36   :  { %14342 = vst [vmem:[#allocation12_spill] sm:$0xff] %v7716_v28  ;;  %6682 = vmatmul.msk.f32.gmra.mxu1 %vm995_vm7, %v7716_v28  ;;  %v3181_v35 = vsel %vm550_vm3, %v3180_v12, %v3179_v29  ;;  %v593_v36 = vrot.slane %v52_v24, 5  ;;  %v595_v37 = vrot.slane %v53_v26, 4  ;;  %v597_v38 = vrot.slane %v54_v27, 3  ;;  %v1361_v39 = vld [vmem:[%s14188_s0 + $0x61] sm:$0x1] }
  0x37   :  { %v3183_v40 = vsel %vm553_vm4, %v3182_v13, %v3181_v35  ;;  %v590_v42 = vsel %vm541_vm0, %v589_v32, %v49_v14  ;;  %v599_v43 = vrot.slane %v55_v30, 2  ;;  %v601_v44 = vrot.slane %v56_v31, 1  ;;  %v1362_v45 = vld [vmem:[%s14188_s0 + $0x65] sm:$0x1]  ;;  %v1363_v46 = vld [vmem:[%s14188_s0 + $0x69] sm:$0x1] }
  0x38   :  { %v3185_v47 = vsel %vm556_vm5, %v3184_v18, %v3183_v40  ;;  %v592_v48 = vsel %vm544_vm1, %v591_v34, %v590_v42  ;;  %v1364_v49 = vld [vmem:[%s14188_s0 + $0x6d] sm:$0x1]  ;;  %v1365_v52 = vld [vmem:[%s14188_s0 + $0x71] sm:$0x1]  ;;  %v1366_v53 = vld [vmem:[%s14188_s0 + $0x75] sm:$0x1] }
  0x39   :  { %v7751_v54 = vsel %vm559_vm6, %v3186_v19, %v3185_v47  ;;  %v594_v55 = vsel %vm547_vm2, %v593_v36, %v592_v48  ;;  %v1367_v56 = vld [vmem:[%s14188_s0 + $0x79] sm:$0x1]  ;;  %v1368_v58 = vld [vmem:[%s14188_s0 + $0x7d] sm:$0x1]  ;;  %v1891_v59 = vrot.slane %v1362_v45, 7  ;;  %v1893_v60 = vrot.slane %v1363_v46, 6 }
  0x3a   :  { %14343 = vst [vmem:[#allocation13_spill] sm:$0xff] %v7751_v54  ;;  %6714 = vmatmul.msk.f32.gmra.mxu2 %vm995_vm7, %v7751_v54  ;;  %v596_v61 = vsel %vm550_vm3, %v595_v37, %v594_v55  ;;  %v1895_v62 = vrot.slane %v1364_v49, 5  ;;  %v1897_v63 = vrot.slane %v1365_v52, 4  ;;  %v1899_v0 = vrot.slane %v1366_v53, 3  ;;  %v2658_v1 = vld [vmem:[%s14188_s0 + $0x62] sm:$0x1] }
  0x3b   :  { %v598_v3 = vsel %vm553_vm4, %v597_v38, %v596_v61  ;;  %v1892_v4 = vsel %vm541_vm0, %v1891_v59, %v1361_v39  ;;  %v1901_v5 = vrot.slane %v1367_v56, 2  ;;  %v1903_v6 = vrot.slane %v1368_v58, 1  ;;  %v2659_v7 = vld [vmem:[%s14188_s0 + $0x66] sm:$0x1]  ;;  %v2660_v9 = vld [vmem:[%s14188_s0 + $0x6a] sm:$0x1] }
  0x3c   :  { %v600_v11 = vsel %vm556_vm5, %v599_v43, %v598_v3  ;;  %v1894_v12 = vsel %vm544_vm1, %v1893_v60, %v1892_v4  ;;  %v2661_v13 = vld [vmem:[%s14188_s0 + $0x6e] sm:$0x1]  ;;  %v2662_v14 = vld [vmem:[%s14188_s0 + $0x72] sm:$0x1]  ;;  %v2663_v15 = vld [vmem:[%s14188_s0 + $0x76] sm:$0x1] }
  0x3d   :  { %v7786_v16 = vsel %vm559_vm6, %v601_v44, %v600_v11  ;;  %v1896_v18 = vsel %vm547_vm2, %v1895_v62, %v1894_v12  ;;  %v2664_v19 = vld [vmem:[%s14188_s0 + $0x7a] sm:$0x1]  ;;  %v2665_v20 = vld [vmem:[%s14188_s0 + $0x7e] sm:$0x1]  ;;  %v3188_v21 = vrot.slane %v2659_v7, 7  ;;  %v3190_v22 = vrot.slane %v2660_v9, 6 }
  0x3e   :  { %14344 = vst [vmem:[#allocation14_spill] sm:$0xff] %v7786_v16  ;;  %6651 = vmatmul.msk.f32.gmra.mxu0 %vm995_vm7, %v7786_v16  ;;  %v1898_v23 = vsel %vm550_vm3, %v1897_v63, %v1896_v18  ;;  %v3192_v24 = vrot.slane %v2661_v13, 5  ;;  %v3194_v26 = vrot.slane %v2662_v14, 4  ;;  %v3196_v27 = vrot.slane %v2663_v15, 3  ;;  %v3955_v29 = vld [vmem:[%s14188_s0 + $0x63] sm:$0x1] }
  0x3f   :  { %v1900_v30 = vsel %vm553_vm4, %v1899_v0, %v1898_v23  ;;  %v3189_v31 = vsel %vm541_vm0, %v3188_v21, %v2658_v1  ;;  %v3198_v32 = vrot.slane %v2664_v19, 2  ;;  %v3200_v34 = vrot.slane %v2665_v20, 1  ;;  %v3956_v35 = vld [vmem:[%s14188_s0 + $0x67] sm:$0x1]  ;;  %v3957_v36 = vld [vmem:[%s14188_s0 + $0x6b] sm:$0x1] }
  0x40   :  { %v1902_v37 = vsel %vm556_vm5, %v1901_v5, %v1900_v30  ;;  %v3191_v38 = vsel %vm544_vm1, %v3190_v22, %v3189_v31  ;;  %v3958_v39 = vld [vmem:[%s14188_s0 + $0x6f] sm:$0x1]  ;;  %v3959_v40 = vld [vmem:[%s14188_s0 + $0x73] sm:$0x1]  ;;  %v3960_v42 = vld [vmem:[%s14188_s0 + $0x77] sm:$0x1] }
  0x41   :  { %v7821_v43 = vsel %vm559_vm6, %v1903_v6, %v1902_v37  ;;  %v3193_v44 = vsel %vm547_vm2, %v3192_v24, %v3191_v38  ;;  %v3961_v45 = vld [vmem:[%s14188_s0 + $0x7b] sm:$0x1]  ;;  %v3962_v46 = vld [vmem:[%s14188_s0 + $0x7f] sm:$0x1]  ;;  %v4485_v47 = vrot.slane %v3956_v35, 7  ;;  %v4487_v48 = vrot.slane %v3957_v36, 6 }
  0x42   :  { %14345 = vst [vmem:[#allocation15_spill] sm:$0xff] %v7821_v43  ;;  %6683 = vmatmul.msk.f32.gmra.mxu1 %vm995_vm7, %v7821_v43  ;;  %v3195_v49 = vsel %vm550_vm3, %v3194_v26, %v3193_v44  ;;  %v4489_v52 = vrot.slane %v3958_v39, 5  ;;  %v4491_v53 = vrot.slane %v3959_v40, 4  ;;  %v4493_v55 = vrot.slane %v3960_v42, 3  ;;  %v57_v56 = vld [vmem:[%s14188_s0 + $0x80] sm:$0x1] }
  0x43   :  { %v3197_v58 = vsel %vm553_vm4, %v3196_v27, %v3195_v49  ;;  %v4486_v59 = vsel %vm541_vm0, %v4485_v47, %v3955_v29  ;;  %v4495_v60 = vrot.slane %v3961_v45, 2  ;;  %v4497_v61 = vrot.slane %v3962_v46, 1  ;;  %v58_v62 = vld [vmem:[%s14188_s0 + $0x84] sm:$0x1]  ;;  %v59_v63 = vld [vmem:[%s14188_s0 + $0x88] sm:$0x1] }
  0x44   :  { %v3199_v0 = vsel %vm556_vm5, %v3198_v32, %v3197_v58  ;;  %v4488_v1 = vsel %vm544_vm1, %v4487_v48, %v4486_v59  ;;  %v60_v3 = vld [vmem:[%s14188_s0 + $0x8c] sm:$0x1]  ;;  %v61_v4 = vld [vmem:[%s14188_s0 + $0x90] sm:$0x1]  ;;  %v62_v5 = vld [vmem:[%s14188_s0 + $0x94] sm:$0x1] }
  0x45   :  { %v7856_v6 = vsel %vm559_vm6, %v3200_v34, %v3199_v0  ;;  %v4490_v7 = vsel %vm547_vm2, %v4489_v52, %v4488_v1  ;;  %v63_v9 = vld [vmem:[%s14188_s0 + $0x98] sm:$0x1]  ;;  %v64_v11 = vld [vmem:[%s14188_s0 + $0x9c] sm:$0x1]  ;;  %v603_v12 = vrot.slane %v58_v62, 7  ;;  %v605_v13 = vrot.slane %v59_v63, 6 }
  0x46   :  { %14346 = vst [vmem:[#allocation16_spill] sm:$0xff] %v7856_v6  ;;  %6715 = vmatmul.msk.f32.gmra.mxu2 %vm995_vm7, %v7856_v6  ;;  %v4492_v14 = vsel %vm550_vm3, %v4491_v53, %v4490_v7  ;;  %v607_v15 = vrot.slane %v60_v3, 5  ;;  %v609_v18 = vrot.slane %v61_v4, 4  ;;  %v611_v19 = vrot.slane %v62_v5, 3  ;;  %v2666_v20 = vld [vmem:[%s14188_s0 + $0x82] sm:$0x1] }
  0x47   :  { %v4494_v21 = vsel %vm553_vm4, %v4493_v55, %v4492_v14  ;;  %v604_v22 = vsel %vm541_vm0, %v603_v12, %v57_v56  ;;  %v613_v23 = vrot.slane %v63_v9, 2  ;;  %v615_v24 = vrot.slane %v64_v11, 1  ;;  %v2667_v26 = vld [vmem:[%s14188_s0 + $0x86] sm:$0x1]  ;;  %v2668_v27 = vld [vmem:[%s14188_s0 + $0x8a] sm:$0x1] }
  0x48   :  { %v4496_v29 = vsel %vm556_vm5, %v4495_v60, %v4494_v21  ;;  %v606_v30 = vsel %vm544_vm1, %v605_v13, %v604_v22  ;;  %v2669_v31 = vld [vmem:[%s14188_s0 + $0x8e] sm:$0x1]  ;;  %v2670_v32 = vld [vmem:[%s14188_s0 + $0x92] sm:$0x1]  ;;  %v2671_v34 = vld [vmem:[%s14188_s0 + $0x96] sm:$0x1] }
  0x49   :  { %v7891_v35 = vsel %vm559_vm6, %v4497_v61, %v4496_v29  ;;  %v608_v36 = vsel %vm547_vm2, %v607_v15, %v606_v30  ;;  %v2672_v37 = vld [vmem:[%s14188_s0 + $0x9a] sm:$0x1]  ;;  %v2673_v38 = vld [vmem:[%s14188_s0 + $0x9e] sm:$0x1]  ;;  %v3202_v39 = vrot.slane %v2667_v26, 7  ;;  %v3204_v40 = vrot.slane %v2668_v27, 6 }
  0x4a   :  { %14347 = vst [vmem:[#allocation17_spill] sm:$0xff] %v7891_v35  ;;  %6747 = vmatmul.msk.f32.gmra.mxu3 %vm995_vm7, %v7891_v35  ;;  %v610_v42 = vsel %vm550_vm3, %v609_v18, %v608_v36  ;;  %v3206_v44 = vrot.slane %v2669_v31, 5  ;;  %v3208_v45 = vrot.slane %v2670_v32, 4  ;;  %v3210_v46 = vrot.slane %v2671_v34, 3  ;;  %v1369_v47 = vld [vmem:[%s14188_s0 + $0x81] sm:$0x1] }
  0x4b   :  { %v612_v48 = vsel %vm553_vm4, %v611_v19, %v610_v42  ;;  %v3203_v49 = vsel %vm541_vm0, %v3202_v39, %v2666_v20  ;;  %v3212_v52 = vrot.slane %v2672_v37, 2  ;;  %v3214_v53 = vrot.slane %v2673_v38, 1  ;;  %v1370_v55 = vld [vmem:[%s14188_s0 + $0x85] sm:$0x1]  ;;  %v1371_v56 = vld [vmem:[%s14188_s0 + $0x89] sm:$0x1] }
  0x4c   :  { %v614_v58 = vsel %vm556_vm5, %v613_v23, %v612_v48  ;;  %v3205_v59 = vsel %vm544_vm1, %v3204_v40, %v3203_v49  ;;  %v1372_v60 = vld [vmem:[%s14188_s0 + $0x8d] sm:$0x1]  ;;  %v1373_v61 = vld [vmem:[%s14188_s0 + $0x91] sm:$0x1]  ;;  %v1374_v62 = vld [vmem:[%s14188_s0 + $0x95] sm:$0x1] }
  0x4d   :  { %v7926_v63 = vsel %vm559_vm6, %v615_v24, %v614_v58  ;;  %v3207_v0 = vsel %vm547_vm2, %v3206_v44, %v3205_v59  ;;  %v1375_v1 = vld [vmem:[%s14188_s0 + $0x99] sm:$0x1]  ;;  %v1376_v3 = vld [vmem:[%s14188_s0 + $0x9d] sm:$0x1]  ;;  %v1905_v4 = vrot.slane %v1370_v55, 7  ;;  %v1907_v5 = vrot.slane %v1371_v56, 6 }
  0x4e   :  { %14348 = vst [vmem:[#allocation18_spill] sm:$0xff] %v7926_v63  ;;  %6652 = vmatmul.msk.f32.gmra.mxu0 %vm995_vm7, %v7926_v63  ;;  %v3209_v7 = vsel %vm550_vm3, %v3208_v45, %v3207_v0  ;;  %v1909_v9 = vrot.slane %v1372_v60, 5  ;;  %v1911_v11 = vrot.slane %v1373_v61, 4  ;;  %v1913_v12 = vrot.slane %v1374_v62, 3  ;;  %v3963_v13 = vld [vmem:[%s14188_s0 + $0x83] sm:$0x1] }
  0x4f   :  { %v3211_v14 = vsel %vm553_vm4, %v3210_v46, %v3209_v7  ;;  %v1906_v15 = vsel %vm541_vm0, %v1905_v4, %v1369_v47  ;;  %v1915_v18 = vrot.slane %v1375_v1, 2  ;;  %v1917_v19 = vrot.slane %v1376_v3, 1  ;;  %v3964_v20 = vld [vmem:[%s14188_s0 + $0x87] sm:$0x1]  ;;  %v3965_v21 = vld [vmem:[%s14188_s0 + $0x8b] sm:$0x1] }
  0x50   :  { %v3213_v22 = vsel %vm556_vm5, %v3212_v52, %v3211_v14  ;;  %v1908_v23 = vsel %vm544_vm1, %v1907_v5, %v1906_v15  ;;  %v3966_v24 = vld [vmem:[%s14188_s0 + $0x8f] sm:$0x1]  ;;  %v3967_v26 = vld [vmem:[%s14188_s0 + $0x93] sm:$0x1]  ;;  %v3968_v27 = vld [vmem:[%s14188_s0 + $0x97] sm:$0x1] }
  0x51   :  { %v7961_v29 = vsel %vm559_vm6, %v3214_v53, %v3213_v22  ;;  %v1910_v30 = vsel %vm547_vm2, %v1909_v9, %v1908_v23  ;;  %v3969_v31 = vld [vmem:[%s14188_s0 + $0x9b] sm:$0x1]  ;;  %v3970_v32 = vld [vmem:[%s14188_s0 + $0x9f] sm:$0x1]  ;;  %v4499_v34 = vrot.slane %v3964_v20, 7  ;;  %v4501_v36 = vrot.slane %v3965_v21, 6 }
  0x52   :  { %14349 = vst [vmem:[#allocation19_spill] sm:$0xff] %v7961_v29  ;;  %6716 = vmatmul.msk.f32.gmra.mxu2 %vm995_vm7, %v7961_v29  ;;  %v1912_v37 = vsel %vm550_vm3, %v1911_v11, %v1910_v30  ;;  %v4503_v38 = vrot.slane %v3966_v24, 5  ;;  %v4505_v39 = vrot.slane %v3967_v26, 4  ;;  %v4507_v40 = vrot.slane %v3968_v27, 3  ;;  %v2674_v42 = vld [vmem:[%s14188_s0 + $0xa2] sm:$0x1] }
  0x53   :  { %v1914_v44 = vsel %vm553_vm4, %v1913_v12, %v1912_v37  ;;  %v4500_v45 = vsel %vm541_vm0, %v4499_v34, %v3963_v13  ;;  %v4509_v46 = vrot.slane %v3969_v31, 2  ;;  %v4511_v47 = vrot.slane %v3970_v32, 1  ;;  %v2675_v48 = vld [vmem:[%s14188_s0 + $0xa6] sm:$0x1]  ;;  %v2676_v49 = vld [vmem:[%s14188_s0 + $0xaa] sm:$0x1] }
  0x54   :  { %v1916_v52 = vsel %vm556_vm5, %v1915_v18, %v1914_v44  ;;  %v4502_v53 = vsel %vm544_vm1, %v4501_v36, %v4500_v45  ;;  %v2677_v55 = vld [vmem:[%s14188_s0 + $0xae] sm:$0x1]  ;;  %v2678_v56 = vld [vmem:[%s14188_s0 + $0xb2] sm:$0x1]  ;;  %v2679_v58 = vld [vmem:[%s14188_s0 + $0xb6] sm:$0x1] }
  0x55   :  { %v7996_v59 = vsel %vm559_vm6, %v1917_v19, %v1916_v52  ;;  %v4504_v60 = vsel %vm547_vm2, %v4503_v38, %v4502_v53  ;;  %v2680_v61 = vld [vmem:[%s14188_s0 + $0xba] sm:$0x1]  ;;  %v2681_v62 = vld [vmem:[%s14188_s0 + $0xbe] sm:$0x1]  ;;  %v3216_v0 = vrot.slane %v2675_v48, 7  ;;  %v3218_v1 = vrot.slane %v2676_v49, 6 }
  0x56   :  { %14350 = vst [vmem:[#allocation20_spill] sm:$0xff] %v7996_v59  ;;  %6684 = vmatmul.msk.f32.gmra.mxu1 %vm995_vm7, %v7996_v59  ;;  %v4506_v3 = vsel %vm550_vm3, %v4505_v39, %v4504_v60  ;;  %v3220_v4 = vrot.slane %v2677_v55, 5  ;;  %v3222_v5 = vrot.slane %v2678_v56, 4  ;;  %v3224_v7 = vrot.slane %v2679_v58, 3  ;;  %v65_v9 = vld [vmem:[%s14188_s0 + $0xa0] sm:$0x1] }
  0x57   :  { %v4508_v11 = vsel %vm553_vm4, %v4507_v40, %v4506_v3  ;;  %v3217_v12 = vsel %vm541_vm0, %v3216_v0, %v2674_v42  ;;  %v3226_v13 = vrot.slane %v2680_v61, 2  ;;  %v3228_v14 = vrot.slane %v2681_v62, 1  ;;  %v66_v15 = vld [vmem:[%s14188_s0 + $0xa4] sm:$0x1]  ;;  %v67_v18 = vld [vmem:[%s14188_s0 + $0xa8] sm:$0x1] }
  0x58   :  { %v4510_v19 = vsel %vm556_vm5, %v4509_v46, %v4508_v11  ;;  %v3219_v20 = vsel %vm544_vm1, %v3218_v1, %v3217_v12  ;;  %v68_v21 = vld [vmem:[%s14188_s0 + $0xac] sm:$0x1]  ;;  %v69_v22 = vld [vmem:[%s14188_s0 + $0xb0] sm:$0x1]  ;;  %v70_v23 = vld [vmem:[%s14188_s0 + $0xb4] sm:$0x1] }
  0x59   :  { %v8031_v24 = vsel %vm559_vm6, %v4511_v47, %v4510_v19  ;;  %v3221_v26 = vsel %vm547_vm2, %v3220_v4, %v3219_v20  ;;  %v71_v27 = vld [vmem:[%s14188_s0 + $0xb8] sm:$0x1]  ;;  %v72_v30 = vld [vmem:[%s14188_s0 + $0xbc] sm:$0x1]  ;;  %v617_v31 = vrot.slane %v66_v15, 7  ;;  %v619_v32 = vrot.slane %v67_v18, 6 }
  0x5a   :  { %14351 = vst [vmem:[#allocation21_spill] sm:$0xff] %v8031_v24  ;;  %6748 = vmatmul.msk.f32.gmra.mxu3 %vm995_vm7, %v8031_v24  ;;  %v3223_v34 = vsel %vm550_vm3, %v3222_v5, %v3221_v26  ;;  %v621_v36 = vrot.slane %v68_v21, 5  ;;  %v623_v37 = vrot.slane %v69_v22, 4  ;;  %v625_v38 = vrot.slane %v70_v23, 3  ;;  %v3971_v39 = vld [vmem:[%s14188_s0 + $0xa3] sm:$0x1] }
  0x5b   :  { %v3225_v40 = vsel %vm553_vm4, %v3224_v7, %v3223_v34  ;;  %v618_v42 = vsel %vm541_vm0, %v617_v31, %v65_v9  ;;  %v627_v44 = vrot.slane %v71_v27, 2  ;;  %v629_v45 = vrot.slane %v72_v30, 1  ;;  %v3972_v46 = vld [vmem:[%s14188_s0 + $0xa7] sm:$0x1]  ;;  %v3973_v47 = vld [vmem:[%s14188_s0 + $0xab] sm:$0x1] }
  0x5c   :  { %v3227_v48 = vsel %vm556_vm5, %v3226_v13, %v3225_v40  ;;  %v620_v49 = vsel %vm544_vm1, %v619_v32, %v618_v42  ;;  %v3974_v52 = vld [vmem:[%s14188_s0 + $0xaf] sm:$0x1]  ;;  %v3975_v53 = vld [vmem:[%s14188_s0 + $0xb3] sm:$0x1]  ;;  %v3976_v55 = vld [vmem:[%s14188_s0 + $0xb7] sm:$0x1] }
  0x5d   :  { %v8066_v56 = vsel %vm559_vm6, %v3228_v14, %v3227_v48  ;;  %v622_v58 = vsel %vm547_vm2, %v621_v36, %v620_v49  ;;  %v3977_v60 = vld [vmem:[%s14188_s0 + $0xbb] sm:$0x1]  ;;  %v3978_v61 = vld [vmem:[%s14188_s0 + $0xbf] sm:$0x1]  ;;  %v4513_v62 = vrot.slane %v3972_v46, 7  ;;  %v4515_v0 = vrot.slane %v3973_v47, 6 }
  0x5e   :  { %14352 = vst [vmem:[#allocation22_spill] sm:$0xff] %v8066_v56  ;;  %6717 = vmatmul.msk.f32.gmra.mxu2 %vm995_vm7, %v8066_v56  ;;  %v624_v1 = vsel %vm550_vm3, %v623_v37, %v622_v58  ;;  %v4517_v3 = vrot.slane %v3974_v52, 5  ;;  %v4519_v4 = vrot.slane %v3975_v53, 4  ;;  %v4521_v5 = vrot.slane %v3976_v55, 3  ;;  %v1377_v7 = vld [vmem:[%s14188_s0 + $0xa1] sm:$0x1] }
  0x5f   :  { %v626_v9 = vsel %vm553_vm4, %v625_v38, %v624_v1  ;;  %v4514_v11 = vsel %vm541_vm0, %v4513_v62, %v3971_v39  ;;  %v4523_v12 = vrot.slane %v3977_v60, 2  ;;  %v4525_v13 = vrot.slane %v3978_v61, 1  ;;  %v1378_v14 = vld [vmem:[%s14188_s0 + $0xa5] sm:$0x1]  ;;  %v1379_v15 = vld [vmem:[%s14188_s0 + $0xa9] sm:$0x1] }
  0x60   :  { %v628_v18 = vsel %vm556_vm5, %v627_v44, %v626_v9  ;;  %v4516_v19 = vsel %vm544_vm1, %v4515_v0, %v4514_v11  ;;  %v1380_v20 = vld [vmem:[%s14188_s0 + $0xad] sm:$0x1]  ;;  %v1381_v21 = vld [vmem:[%s14188_s0 + $0xb1] sm:$0x1]  ;;  %v1382_v22 = vld [vmem:[%s14188_s0 + $0xb5] sm:$0x1] }
  0x61   :  { %v8101_v23 = vsel %vm559_vm6, %v629_v45, %v628_v18  ;;  %v4518_v26 = vsel %vm547_vm2, %v4517_v3, %v4516_v19  ;;  %v1383_v27 = vld [vmem:[%s14188_s0 + $0xb9] sm:$0x1]  ;;  %v1384_v30 = vld [vmem:[%s14188_s0 + $0xbd] sm:$0x1]  ;;  %v1919_v31 = vrot.slane %v1378_v14, 7  ;;  %v1921_v32 = vrot.slane %v1379_v15, 6 }
  0x62   :  { %14353 = vst [vmem:[#allocation23_spill] sm:$0xff] %v8101_v23  ;;  %6653 = vmatmul.msk.f32.gmra.mxu0 %vm995_vm7, %v8101_v23  ;;  %v4520_v34 = vsel %vm550_vm3, %v4519_v4, %v4518_v26  ;;  %v1923_v36 = vrot.slane %v1380_v20, 5  ;;  %v1925_v37 = vrot.slane %v1381_v21, 4  ;;  %v1927_v38 = vrot.slane %v1382_v22, 3  ;;  %v73_v39 = vld [vmem:[%s14188_s0 + $0xc0] sm:$0x1] }
  0x63   :  { %v4522_v40 = vsel %vm553_vm4, %v4521_v5, %v4520_v34  ;;  %v1920_v42 = vsel %vm541_vm0, %v1919_v31, %v1377_v7  ;;  %v1929_v44 = vrot.slane %v1383_v27, 2  ;;  %v1931_v45 = vrot.slane %v1384_v30, 1  ;;  %v74_v46 = vld [vmem:[%s14188_s0 + $0xc4] sm:$0x1]  ;;  %v75_v47 = vld [vmem:[%s14188_s0 + $0xc8] sm:$0x1] }
  0x64   :  { %v4524_v48 = vsel %vm556_vm5, %v4523_v12, %v4522_v40  ;;  %v1922_v49 = vsel %vm544_vm1, %v1921_v32, %v1920_v42  ;;  %v76_v52 = vld [vmem:[%s14188_s0 + $0xcc] sm:$0x1]  ;;  %v77_v53 = vld [vmem:[%s14188_s0 + $0xd0] sm:$0x1]  ;;  %v78_v55 = vld [vmem:[%s14188_s0 + $0xd4] sm:$0x1] }
  0x65   :  { %v8136_v58 = vsel %vm559_vm6, %v4525_v13, %v4524_v48  ;;  %v1924_v60 = vsel %vm547_vm2, %v1923_v36, %v1922_v49  ;;  %v79_v61 = vld [vmem:[%s14188_s0 + $0xd8] sm:$0x1]  ;;  %v80_v62 = vld [vmem:[%s14188_s0 + $0xdc] sm:$0x1]  ;;  %v631_v0 = vrot.slane %v74_v46, 7  ;;  %v633_v1 = vrot.slane %v75_v47, 6 }
  0x66   :  { %14354 = vst [vmem:[#allocation24_spill] sm:$0xff] %v8136_v58  ;;  %6749 = vmatmul.msk.f32.gmra.mxu3 %vm995_vm7, %v8136_v58  ;;  %v1926_v3 = vsel %vm550_vm3, %v1925_v37, %v1924_v60  ;;  %v635_v4 = vrot.slane %v76_v52, 5  ;;  %v637_v5 = vrot.slane %v77_v53, 4  ;;  %v639_v7 = vrot.slane %v78_v55, 3  ;;  %v2682_v9 = vld [vmem:[%s14188_s0 + $0xc2] sm:$0x1] }
  0x67   :  { %v1928_v11 = vsel %vm553_vm4, %v1927_v38, %v1926_v3  ;;  %v632_v12 = vsel %vm541_vm0, %v631_v0, %v73_v39  ;;  %v641_v13 = vrot.slane %v79_v61, 2  ;;  %v643_v14 = vrot.slane %v80_v62, 1  ;;  %v2683_v15 = vld [vmem:[%s14188_s0 + $0xc6] sm:$0x1]  ;;  %v2684_v18 = vld [vmem:[%s14188_s0 + $0xca] sm:$0x1] }
  0x68   :  { %v1930_v19 = vsel %vm556_vm5, %v1929_v44, %v1928_v11  ;;  %v634_v20 = vsel %vm544_vm1, %v633_v1, %v632_v12  ;;  %v2685_v21 = vld [vmem:[%s14188_s0 + $0xce] sm:$0x1]  ;;  %v2686_v22 = vld [vmem:[%s14188_s0 + $0xd2] sm:$0x1]  ;;  %v2687_v26 = vld [vmem:[%s14188_s0 + $0xd6] sm:$0x1] }
  0x69   :  { %v8171_v27 = vsel %vm559_vm6, %v1931_v45, %v1930_v19  ;;  %v636_v30 = vsel %vm547_vm2, %v635_v4, %v634_v20  ;;  %v2688_v31 = vld [vmem:[%s14188_s0 + $0xda] sm:$0x1]  ;;  %v2689_v32 = vld [vmem:[%s14188_s0 + $0xde] sm:$0x1]  ;;  %v3230_v34 = vrot.slane %v2683_v15, 7  ;;  %v3232_v36 = vrot.slane %v2684_v18, 6 }
  0x6a   :  { %14355 = vst [vmem:[#allocation25_spill] sm:$0xff] %v8171_v27  ;;  %6685 = vmatmul.msk.f32.gmra.mxu1 %vm995_vm7, %v8171_v27  ;;  %v638_v37 = vsel %vm550_vm3, %v637_v5, %v636_v30  ;;  %v3234_v38 = vrot.slane %v2685_v21, 5  ;;  %v3236_v39 = vrot.slane %v2686_v22, 4  ;;  %v3238_v40 = vrot.slane %v2687_v26, 3  ;;  %v3979_v42 = vld [vmem:[%s14188_s0 + $0xc3] sm:$0x1] }
  0x6b   :  { %v640_v44 = vsel %vm553_vm4, %v639_v7, %v638_v37  ;;  %v3231_v45 = vsel %vm541_vm0, %v3230_v34, %v2682_v9  ;;  %v3240_v46 = vrot.slane %v2688_v31, 2  ;;  %v3242_v47 = vrot.slane %v2689_v32, 1  ;;  %v3980_v48 = vld [vmem:[%s14188_s0 + $0xc7] sm:$0x1]  ;;  %v3981_v49 = vld [vmem:[%s14188_s0 + $0xcb] sm:$0x1] }
  0x6c   :  { %v642_v52 = vsel %vm556_vm5, %v641_v13, %v640_v44  ;;  %v3233_v53 = vsel %vm544_vm1, %v3232_v36, %v3231_v45  ;;  %v3982_v55 = vld [vmem:[%s14188_s0 + $0xcf] sm:$0x1]  ;;  %v3983_v60 = vld [vmem:[%s14188_s0 + $0xd3] sm:$0x1]  ;;  %v3984_v61 = vld [vmem:[%s14188_s0 + $0xd7] sm:$0x1] }
  0x6d   :  { %v8206_v62 = vsel %vm559_vm6, %v643_v14, %v642_v52  ;;  %v3235_v0 = vsel %vm547_vm2, %v3234_v38, %v3233_v53  ;;  %v3985_v1 = vld [vmem:[%s14188_s0 + $0xdb] sm:$0x1]  ;;  %v3986_v3 = vld [vmem:[%s14188_s0 + $0xdf] sm:$0x1]  ;;  %v4527_v4 = vrot.slane %v3980_v48, 7  ;;  %v4529_v5 = vrot.slane %v3981_v49, 6 }
  0x6e   :  { %14356 = vst [vmem:[#allocation26_spill] sm:$0xff] %v8206_v62  ;;  %6654 = vmatmul.msk.f32.gmra.mxu0 %vm995_vm7, %v8206_v62  ;;  %v3237_v7 = vsel %vm550_vm3, %v3236_v39, %v3235_v0  ;;  %v4531_v9 = vrot.slane %v3982_v55, 5  ;;  %v4533_v11 = vrot.slane %v3983_v60, 4  ;;  %v4535_v12 = vrot.slane %v3984_v61, 3  ;;  %v1385_v13 = vld [vmem:[%s14188_s0 + $0xc1] sm:$0x1] }
  0x6f   :  { %v3239_v14 = vsel %vm553_vm4, %v3238_v40, %v3237_v7  ;;  %v4528_v15 = vsel %vm541_vm0, %v4527_v4, %v3979_v42  ;;  %v4537_v18 = vrot.slane %v3985_v1, 2  ;;  %v4539_v19 = vrot.slane %v3986_v3, 1  ;;  %v1386_v20 = vld [vmem:[%s14188_s0 + $0xc5] sm:$0x1]  ;;  %v1387_v21 = vld [vmem:[%s14188_s0 + $0xc9] sm:$0x1] }
  0x70   :  { %v3241_v22 = vsel %vm556_vm5, %v3240_v46, %v3239_v14  ;;  %v4530_v26 = vsel %vm544_vm1, %v4529_v5, %v4528_v15  ;;  %v1388_v30 = vld [vmem:[%s14188_s0 + $0xcd] sm:$0x1]  ;;  %v1389_v31 = vld [vmem:[%s14188_s0 + $0xd1] sm:$0x1]  ;;  %v1390_v32 = vld [vmem:[%s14188_s0 + $0xd5] sm:$0x1] }
  0x71   :  { %v8241_v34 = vsel %vm559_vm6, %v3242_v47, %v3241_v22  ;;  %v4532_v36 = vsel %vm547_vm2, %v4531_v9, %v4530_v26  ;;  %v1391_v37 = vld [vmem:[%s14188_s0 + $0xd9] sm:$0x1]  ;;  %v1392_v38 = vld [vmem:[%s14188_s0 + $0xdd] sm:$0x1]  ;;  %v1933_v39 = vrot.slane %v1386_v20, 7  ;;  %v1935_v40 = vrot.slane %v1387_v21, 6 }
  0x72   :  { %14357 = vst [vmem:[#allocation27_spill] sm:$0xff] %v8241_v34  ;;  %6718 = vmatmul.msk.f32.gmra.mxu2 %vm995_vm7, %v8241_v34  ;;  %v4534_v42 = vsel %vm550_vm3, %v4533_v11, %v4532_v36  ;;  %v1937_v44 = vrot.slane %v1388_v30, 5  ;;  %v1939_v45 = vrot.slane %v1389_v31, 4  ;;  %v1941_v46 = vrot.slane %v1390_v32, 3  ;;  %v2690_v47 = vld [vmem:[%s14188_s0 + $0xe2] sm:$0x1] }
  0x73   :  { %v4536_v48 = vsel %vm553_vm4, %v4535_v12, %v4534_v42  ;;  %v1934_v49 = vsel %vm541_vm0, %v1933_v39, %v1385_v13  ;;  %v1943_v52 = vrot.slane %v1391_v37, 2  ;;  %v1945_v53 = vrot.slane %v1392_v38, 1  ;;  %v2691_v55 = vld [vmem:[%s14188_s0 + $0xe6] sm:$0x1]  ;;  %v2692_v60 = vld [vmem:[%s14188_s0 + $0xea] sm:$0x1] }
  0x74   :  { %v4538_v61 = vsel %vm556_vm5, %v4537_v18, %v4536_v48  ;;  %v1936_v0 = vsel %vm544_vm1, %v1935_v40, %v1934_v49  ;;  %v2693_v1 = vld [vmem:[%s14188_s0 + $0xee] sm:$0x1]  ;;  %v2694_v3 = vld [vmem:[%s14188_s0 + $0xf2] sm:$0x1]  ;;  %v2695_v4 = vld [vmem:[%s14188_s0 + $0xf6] sm:$0x1] }
  0x75   :  { %v8276_v5 = vsel %vm559_vm6, %v4539_v19, %v4538_v61  ;;  %v1938_v7 = vsel %vm547_vm2, %v1937_v44, %v1936_v0  ;;  %v2696_v9 = vld [vmem:[%s14188_s0 + $0xfa] sm:$0x1]  ;;  %v2697_v11 = vld [vmem:[%s14188_s0 + $0xfe] sm:$0x1]  ;;  %v3244_v12 = vrot.slane %v2691_v55, 7  ;;  %v3246_v13 = vrot.slane %v2692_v60, 6 }
  0x76   :  { %14358 = vst [vmem:[#allocation28_spill] sm:$0xff] %v8276_v5  ;;  %6750 = vmatmul.msk.f32.gmra.mxu3 %vm995_vm7, %v8276_v5  ;;  %v1940_v14 = vsel %vm550_vm3, %v1939_v45, %v1938_v7  ;;  %v3248_v15 = vrot.slane %v2693_v1, 5  ;;  %v3250_v18 = vrot.slane %v2694_v3, 4  ;;  %v3252_v19 = vrot.slane %v2695_v4, 3  ;;  %v81_v20 = vld [vmem:[%s14188_s0 + $0xe0] sm:$0x1] }
  0x77   :  { %v1942_v21 = vsel %vm553_vm4, %v1941_v46, %v1940_v14  ;;  %v3245_v22 = vsel %vm541_vm0, %v3244_v12, %v2690_v47  ;;  %v3254_v26 = vrot.slane %v2696_v9, 2  ;;  %v3256_v30 = vrot.slane %v2697_v11, 1  ;;  %v82_v31 = vld [vmem:[%s14188_s0 + $0xe4] sm:$0x1]  ;;  %v83_v32 = vld [vmem:[%s14188_s0 + $0xe8] sm:$0x1] }
  0x78   :  { %v1944_v36 = vsel %vm556_vm5, %v1943_v52, %v1942_v21  ;;  %v3247_v37 = vsel %vm544_vm1, %v3246_v13, %v3245_v22  ;;  %v84_v38 = vld [vmem:[%s14188_s0 + $0xec] sm:$0x1]  ;;  %v85_v39 = vld [vmem:[%s14188_s0 + $0xf0] sm:$0x1]  ;;  %v86_v40 = vld [vmem:[%s14188_s0 + $0xf4] sm:$0x1] }
  0x79   :  { %v8311_v42 = vsel %vm559_vm6, %v1945_v53, %v1944_v36  ;;  %v3249_v44 = vsel %vm547_vm2, %v3248_v15, %v3247_v37  ;;  %v87_v45 = vld [vmem:[%s14188_s0 + $0xf8] sm:$0x1]  ;;  %v88_v46 = vld [vmem:[%s14188_s0 + $0xfc] sm:$0x1]  ;;  %v645_v47 = vrot.slane %v82_v31, 7  ;;  %v647_v48 = vrot.slane %v83_v32, 6 }
  0x7a   :  { %14359 = vst [vmem:[#allocation29_spill] sm:$0xff] %v8311_v42  ;;  %6686 = vmatmul.msk.f32.gmra.mxu1 %vm995_vm7, %v8311_v42  ;;  %v3251_v49 = vsel %vm550_vm3, %v3250_v18, %v3249_v44  ;;  %v649_v52 = vrot.slane %v84_v38, 5  ;;  %v651_v53 = vrot.slane %v85_v39, 4  ;;  %v653_v55 = vrot.slane %v86_v40, 3  ;;  %v1393_v60 = vld [vmem:[%s14188_s0 + $0xe1] sm:$0x1] }
  0x7b   :  { %v3253_v61 = vsel %vm553_vm4, %v3252_v19, %v3251_v49  ;;  %v646_v0 = vsel %vm541_vm0, %v645_v47, %v81_v20  ;;  %v655_v1 = vrot.slane %v87_v45, 2  ;;  %v657_v3 = vrot.slane %v88_v46, 1  ;;  %v1394_v4 = vld [vmem:[%s14188_s0 + $0xe5] sm:$0x1]  ;;  %v1395_v7 = vld [vmem:[%s14188_s0 + $0xe9] sm:$0x1] }
  0x7c   :  { %v3255_v9 = vsel %vm556_vm5, %v3254_v26, %v3253_v61  ;;  %v648_v11 = vsel %vm544_vm1, %v647_v48, %v646_v0  ;;  %v1396_v12 = vld [vmem:[%s14188_s0 + $0xed] sm:$0x1]  ;;  %v1397_v13 = vld [vmem:[%s14188_s0 + $0xf1] sm:$0x1]  ;;  %v1398_v14 = vld [vmem:[%s14188_s0 + $0xf5] sm:$0x1] }
  0x7d   :  { %v8346_v15 = vsel %vm559_vm6, %v3256_v30, %v3255_v9  ;;  %v650_v18 = vsel %vm547_vm2, %v649_v52, %v648_v11  ;;  %v1399_v19 = vld [vmem:[%s14188_s0 + $0xf9] sm:$0x1]  ;;  %v1400_v20 = vld [vmem:[%s14188_s0 + $0xfd] sm:$0x1]  ;;  %v1947_v21 = vrot.slane %v1394_v4, 7  ;;  %v1949_v22 = vrot.slane %v1395_v7, 6 }
  0x7e   :  { %14360 = vst [vmem:[#allocation30_spill] sm:$0xff] %v8346_v15  ;;  %6719 = vmatmul.msk.f32.gmra.mxu2 %vm995_vm7, %v8346_v15  ;;  %v652_v26 = vsel %vm550_vm3, %v651_v53, %v650_v18  ;;  %v1951_v31 = vrot.slane %v1396_v12, 5  ;;  %v1953_v30 = vrot.slane %v1397_v13, 4  ;;  %v1955_v32 = vrot.slane %v1398_v14, 3  ;;  %v3987_v36 = vld [vmem:[%s14188_s0 + $0xe3] sm:$0x1] }
  0x7f   :  { %v654_v37 = vsel %vm553_vm4, %v653_v55, %v652_v26  ;;  %v1948_v38 = vsel %vm541_vm0, %v1947_v21, %v1393_v60  ;;  %v1957_v39 = vrot.slane %v1399_v19, 2  ;;  %v1959_v40 = vrot.slane %v1400_v20, 1  ;;  %v3988_v44 = vld [vmem:[%s14188_s0 + $0xe7] sm:$0x1]  ;;  %v3989_v45 = vld [vmem:[%s14188_s0 + $0xeb] sm:$0x1] }
  0x80   :  { %v656_v46 = vsel %vm556_vm5, %v655_v1, %v654_v37  ;;  %v1950_v47 = vsel %vm544_vm1, %v1949_v22, %v1948_v38  ;;  %v3990_v48 = vld [vmem:[%s14188_s0 + $0xef] sm:$0x1]  ;;  %v3991_v49 = vld [vmem:[%s14188_s0 + $0xf3] sm:$0x1]  ;;  %v3992_v52 = vld [vmem:[%s14188_s0 + $0xf7] sm:$0x1] }
  0x81   :  { %v8381_v53 = vsel %vm559_vm6, %v657_v3, %v656_v46  ;;  %v1952_v55 = vsel %vm547_vm2, %v1951_v31, %v1950_v47  ;;  %v3993_v60 = vld [vmem:[%s14188_s0 + $0xfb] sm:$0x1]  ;;  %v3994_v61 = vld [vmem:[%s14188_s0 + $0xff] sm:$0x1]  ;;  %v4541_v0 = vrot.slane %v3988_v44, 7  ;;  %v4543_v1 = vrot.slane %v3989_v45, 6 }
  0x82   :  { %14361 = vst [vmem:[#allocation31_spill] sm:$0xff] %v8381_v53  ;;  %6655 = vmatmul.msk.f32.gmra.mxu0 %vm995_vm7, %v8381_v53  ;;  %v1954_v4 = vsel %vm550_vm3, %v1953_v30, %v1952_v55  ;;  %v4545_v7 = vrot.slane %v3990_v48, 5  ;;  %v4547_v3 = vrot.slane %v3991_v49, 4  ;;  %v4549_v9 = vrot.slane %v3992_v52, 3  ;;  %v2698_v11 = vld [vmem:[%s14188_s0 + $0x102] sm:$0x1] }
  0x83   :  { %v1956_v12 = vsel %vm553_vm4, %v1955_v32, %v1954_v4  ;;  %v4542_v13 = vsel %vm541_vm0, %v4541_v0, %v3987_v36  ;;  %v4551_v14 = vrot.slane %v3993_v60, 2  ;;  %v4553_v18 = vrot.slane %v3994_v61, 1  ;;  %v2699_v19 = vld [vmem:[%s14188_s0 + $0x106] sm:$0x1]  ;;  %v2700_v20 = vld [vmem:[%s14188_s0 + $0x10a] sm:$0x1] }
  0x84   :  { %v1958_v21 = vsel %vm556_vm5, %v1957_v39, %v1956_v12  ;;  %v4544_v22 = vsel %vm544_vm1, %v4543_v1, %v4542_v13  ;;  %v2701_v26 = vld [vmem:[%s14188_s0 + $0x10e] sm:$0x1]  ;;  %v2702_v31 = vld [vmem:[%s14188_s0 + $0x112] sm:$0x1]  ;;  %v2703_v30 = vld [vmem:[%s14188_s0 + $0x116] sm:$0x1] }
  0x85   :  { %v8416_v32 = vsel %vm559_vm6, %v1959_v40, %v1958_v21  ;;  %v4546_v36 = vsel %vm547_vm2, %v4545_v7, %v4544_v22  ;;  %v2704_v37 = vld [vmem:[%s14188_s0 + $0x11a] sm:$0x1]  ;;  %v2705_v38 = vld [vmem:[%s14188_s0 + $0x11e] sm:$0x1]  ;;  %v3258_v39 = vrot.slane %v2699_v19, 7  ;;  %v3260_v44 = vrot.slane %v2700_v20, 6 }
  0x86   :  { %14362 = vst [vmem:[#allocation32_spill] sm:$0xff] %v8416_v32  ;;  %6687 = vmatmul.msk.f32.gmra.mxu1 %vm995_vm7, %v8416_v32  ;;  %v4548_v45 = vsel %vm550_vm3, %v4547_v3, %v4546_v36  ;;  %v3262_v46 = vrot.slane %v2701_v26, 5  ;;  %v3264_v40 = vrot.slane %v2702_v31, 4  ;;  %v3266_v47 = vrot.slane %v2703_v30, 3  ;;  %v89_v48 = vld [vmem:[%s14188_s0 + $0x100] sm:$0x1] }
  0x87   :  { %v4550_v49 = vsel %vm553_vm4, %v4549_v9, %v4548_v45  ;;  %v3259_v52 = vsel %vm541_vm0, %v3258_v39, %v2698_v11  ;;  %v3268_v55 = vrot.slane %v2704_v37, 2  ;;  %v3270_v60 = vrot.slane %v2705_v38, 1  ;;  %v90_v61 = vld [vmem:[%s14188_s0 + $0x104] sm:$0x1]  ;;  %v91_v0 = vld [vmem:[%s14188_s0 + $0x108] sm:$0x1] }
  0x88   :  { %v4552_v1 = vsel %vm556_vm5, %v4551_v14, %v4550_v49  ;;  %v3261_v4 = vsel %vm544_vm1, %v3260_v44, %v3259_v52  ;;  %v92_v7 = vld [vmem:[%s14188_s0 + $0x10c] sm:$0x1]  ;;  %v93_v3 = vld [vmem:[%s14188_s0 + $0x110] sm:$0x1]  ;;  %v94_v9 = vld [vmem:[%s14188_s0 + $0x114] sm:$0x1] }
  0x89   :  { %v8451_v11 = vsel %vm559_vm6, %v4553_v18, %v4552_v1  ;;  %v3263_v12 = vsel %vm547_vm2, %v3262_v46, %v3261_v4  ;;  %v95_v13 = vld [vmem:[%s14188_s0 + $0x118] sm:$0x1]  ;;  %v96_v14 = vld [vmem:[%s14188_s0 + $0x11c] sm:$0x1]  ;;  %v659_v19 = vrot.slane %v90_v61, 7  ;;  %v661_v20 = vrot.slane %v91_v0, 6 }
  0x8a   :  { %14363 = vst [vmem:[#allocation33_spill] sm:$0xff] %v8451_v11  ;;  %6751 = vmatmul.msk.f32.gmra.mxu3 %vm995_vm7, %v8451_v11  ;;  %v3265_v21 = vsel %vm550_vm3, %v3264_v40, %v3263_v12  ;;  %v663_v22 = vrot.slane %v92_v7, 5  ;;  %v665_v18 = vrot.slane %v93_v3, 4  ;;  %v667_v26 = vrot.slane %v94_v9, 3  ;;  %v3995_v31 = vld [vmem:[%s14188_s0 + $0x103] sm:$0x1] }
  0x8b   :  { %v3267_v30 = vsel %vm553_vm4, %v3266_v47, %v3265_v21  ;;  %v660_v36 = vsel %vm541_vm0, %v659_v19, %v89_v48  ;;  %v669_v37 = vrot.slane %v95_v13, 2  ;;  %v671_v38 = vrot.slane %v96_v14, 1  ;;  %v3996_v39 = vld [vmem:[%s14188_s0 + $0x107] sm:$0x1]  ;;  %v3997_v44 = vld [vmem:[%s14188_s0 + $0x10b] sm:$0x1] }
  0x8c   :  { %v3269_v45 = vsel %vm556_vm5, %v3268_v55, %v3267_v30  ;;  %v662_v46 = vsel %vm544_vm1, %v661_v20, %v660_v36  ;;  %v3998_v40 = vld [vmem:[%s14188_s0 + $0x10f] sm:$0x1]  ;;  %v3999_v47 = vld [vmem:[%s14188_s0 + $0x113] sm:$0x1]  ;;  %v4000_v48 = vld [vmem:[%s14188_s0 + $0x117] sm:$0x1] }
  0x8d   :  { %v8486_v49 = vsel %vm559_vm6, %v3270_v60, %v3269_v45  ;;  %v664_v52 = vsel %vm547_vm2, %v663_v22, %v662_v46  ;;  %v4001_v55 = vld [vmem:[%s14188_s0 + $0x11b] sm:$0x1]  ;;  %v4002_v61 = vld [vmem:[%s14188_s0 + $0x11f] sm:$0x1]  ;;  %v4555_v0 = vrot.slane %v3996_v39, 7  ;;  %v4557_v1 = vrot.slane %v3997_v44, 6 }
  0x8e   :  { %14364 = vst [vmem:[#allocation34_spill] sm:$0xff] %v8486_v49  ;;  %6720 = vmatmul.msk.f32.gmra.mxu2 %vm995_vm7, %v8486_v49  ;;  %v666_v4 = vsel %vm550_vm3, %v665_v18, %v664_v52  ;;  %v4559_v7 = vrot.slane %v3998_v40, 5  ;;  %v4561_v60 = vrot.slane %v3999_v47, 4  ;;  %v4563_v3 = vrot.slane %v4000_v48, 3  ;;  %v1401_v9 = vld [vmem:[%s14188_s0 + $0x101] sm:$0x1] }
  0x8f   :  { %v668_v12 = vsel %vm553_vm4, %v667_v26, %v666_v4  ;;  %v4556_v13 = vsel %vm541_vm0, %v4555_v0, %v3995_v31  ;;  %v4565_v14 = vrot.slane %v4001_v55, 2  ;;  %v4567_v19 = vrot.slane %v4002_v61, 1  ;;  %v1402_v20 = vld [vmem:[%s14188_s0 + $0x105] sm:$0x1]  ;;  %v1403_v21 = vld [vmem:[%s14188_s0 + $0x109] sm:$0x1] }
  0x90   :  { %v670_v22 = vsel %vm556_vm5, %v669_v37, %v668_v12  ;;  %v4558_v18 = vsel %vm544_vm1, %v4557_v1, %v4556_v13  ;;  %v1404_v26 = vld [vmem:[%s14188_s0 + $0x10d] sm:$0x1]  ;;  %v1405_v31 = vld [vmem:[%s14188_s0 + $0x111] sm:$0x1]  ;;  %v1406_v30 = vld [vmem:[%s14188_s0 + $0x115] sm:$0x1] }
  0x91   :  { %v8521_v36 = vsel %vm559_vm6, %v671_v38, %v670_v22  ;;  %v4560_v39 = vsel %vm547_vm2, %v4559_v7, %v4558_v18  ;;  %v1407_v37 = vld [vmem:[%s14188_s0 + $0x119] sm:$0x1]  ;;  %v1408_v44 = vld [vmem:[%s14188_s0 + $0x11d] sm:$0x1]  ;;  %v1961_v45 = vrot.slane %v1402_v20, 7  ;;  %v1963_v46 = vrot.slane %v1403_v21, 6 }
  0x92   :  { %14365 = vst [vmem:[#allocation35_spill] sm:$0xff] %v8521_v36  ;;  %6656 = vmatmul.msk.f32.gmra.mxu0 %vm995_vm7, %v8521_v36  ;;  %v4562_v40 = vsel %vm550_vm3, %v4561_v60, %v4560_v39  ;;  %v1965_v47 = vrot.slane %v1404_v26, 5  ;;  %v1967_v38 = vrot.slane %v1405_v31, 4  ;;  %v1969_v48 = vrot.slane %v1406_v30, 3  ;;  %v97_v52 = vld [vmem:[%s14188_s0 + $0x120] sm:$0x1] }
  0x93   :  { %v4564_v55 = vsel %vm553_vm4, %v4563_v3, %v4562_v40  ;;  %v1962_v61 = vsel %vm541_vm0, %v1961_v45, %v1401_v9  ;;  %v1971_v0 = vrot.slane %v1407_v37, 2  ;;  %v1973_v1 = vrot.slane %v1408_v44, 1  ;;  %v98_v4 = vld [vmem:[%s14188_s0 + $0x124] sm:$0x1]  ;;  %v99_v7 = vld [vmem:[%s14188_s0 + $0x128] sm:$0x1] }
  0x94   :  { %v4566_v60 = vsel %vm556_vm5, %v4565_v14, %v4564_v55  ;;  %v1964_v12 = vsel %vm544_vm1, %v1963_v46, %v1962_v61  ;;  %v100_v3 = vld [vmem:[%s14188_s0 + $0x12c] sm:$0x1]  ;;  %v101_v9 = vld [vmem:[%s14188_s0 + $0x130] sm:$0x1]  ;;  %v102_v13 = vld [vmem:[%s14188_s0 + $0x134] sm:$0x1] }
  0x95   :  { %v8556_v20 = vsel %vm559_vm6, %v4567_v19, %v4566_v60  ;;  %v1966_v21 = vsel %vm547_vm2, %v1965_v47, %v1964_v12  ;;  %v103_v14 = vld [vmem:[%s14188_s0 + $0x138] sm:$0x1]  ;;  %v104_v22 = vld [vmem:[%s14188_s0 + $0x13c] sm:$0x1]  ;;  %v673_v18 = vrot.slane %v98_v4, 7  ;;  %v675_v26 = vrot.slane %v99_v7, 6 }
  0x96   :  { %14366 = vst [vmem:[#allocation36_spill] sm:$0xff] %v8556_v20  ;;  %6752 = vmatmul.msk.f32.gmra.mxu3 %vm995_vm7, %v8556_v20  ;;  %v1968_v31 = vsel %vm550_vm3, %v1967_v38, %v1966_v21  ;;  %v677_v30 = vrot.slane %v100_v3, 5  ;;  %v679_v19 = vrot.slane %v101_v9, 4  ;;  %v681_v39 = vrot.slane %v102_v13, 3  ;;  %v2706_v37 = vld [vmem:[%s14188_s0 + $0x122] sm:$0x1] }
  0x97   :  { %v1970_v44 = vsel %vm553_vm4, %v1969_v48, %v1968_v31  ;;  %v674_v45 = vsel %vm541_vm0, %v673_v18, %v97_v52  ;;  %v683_v46 = vrot.slane %v103_v14, 2  ;;  %v685_v40 = vrot.slane %v104_v22, 1  ;;  %v2707_v47 = vld [vmem:[%s14188_s0 + $0x126] sm:$0x1]  ;;  %v2708_v38 = vld [vmem:[%s14188_s0 + $0x12a] sm:$0x1] }
  0x98   :  { %v1972_v55 = vsel %vm556_vm5, %v1971_v0, %v1970_v44  ;;  %v676_v61 = vsel %vm544_vm1, %v675_v26, %v674_v45  ;;  %v2709_v48 = vld [vmem:[%s14188_s0 + $0x12e] sm:$0x1]  ;;  %v2710_v52 = vld [vmem:[%s14188_s0 + $0x132] sm:$0x1]  ;;  %v2711_v4 = vld [vmem:[%s14188_s0 + $0x136] sm:$0x1] }
  0x99   :  { %v8591_v7 = vsel %vm559_vm6, %v1973_v1, %v1972_v55  ;;  %v678_v60 = vsel %vm547_vm2, %v677_v30, %v676_v61  ;;  %v2712_v0 = vld [vmem:[%s14188_s0 + $0x13a] sm:$0x1]  ;;  %v2713_v12 = vld [vmem:[%s14188_s0 + $0x13e] sm:$0x1]  ;;  %v3272_v3 = vrot.slane %v2707_v47, 7  ;;  %v3274_v9 = vrot.slane %v2708_v38, 6 }
  0x9a   :  { %14367 = vst [vmem:[#allocation37_spill] sm:$0xff] %v8591_v7  ;;  %6688 = vmatmul.msk.f32.gmra.mxu1 %vm995_vm7, %v8591_v7  ;;  %v680_v13 = vsel %vm550_vm3, %v679_v19, %v678_v60  ;;  %v3276_v21 = vrot.slane %v2709_v48, 5  ;;  %v3278_v1 = vrot.slane %v2710_v52, 4  ;;  %v3280_v14 = vrot.slane %v2711_v4, 3  ;;  %v4003_v22 = vld [vmem:[%s14188_s0 + $0x123] sm:$0x1] }
  0x9b   :  { %v682_v18 = vsel %vm553_vm4, %v681_v39, %v680_v13  ;;  %v3273_v26 = vsel %vm541_vm0, %v3272_v3, %v2706_v37  ;;  %v3282_v31 = vrot.slane %v2712_v0, 2  ;;  %v3284_v30 = vrot.slane %v2713_v12, 1  ;;  %v4004_v44 = vld [vmem:[%s14188_s0 + $0x127] sm:$0x1]  ;;  %v4005_v19 = vld [vmem:[%s14188_s0 + $0x12b] sm:$0x1] }
  0x9c   :  { %v684_v45 = vsel %vm556_vm5, %v683_v46, %v682_v18  ;;  %v3275_v47 = vsel %vm544_vm1, %v3274_v9, %v3273_v26  ;;  %v4006_v39 = vld [vmem:[%s14188_s0 + $0x12f] sm:$0x1]  ;;  %v4007_v37 = vld [vmem:[%s14188_s0 + $0x133] sm:$0x1]  ;;  %v4008_v38 = vld [vmem:[%s14188_s0 + $0x137] sm:$0x1] }
  0x9d   :  { %v8626_v55 = vsel %vm559_vm6, %v685_v40, %v684_v45  ;;  %v3277_v61 = vsel %vm547_vm2, %v3276_v21, %v3275_v47  ;;  %v4009_v46 = vld [vmem:[%s14188_s0 + $0x13b] sm:$0x1]  ;;  %v4010_v48 = vld [vmem:[%s14188_s0 + $0x13f] sm:$0x1]  ;;  %v4569_v52 = vrot.slane %v4004_v44, 7  ;;  %v4571_v4 = vrot.slane %v4005_v19, 6 }
  0x9e   :  { %14368 = vst [vmem:[#allocation38_spill] sm:$0xff] %v8626_v55  ;;  %6657 = vmatmul.msk.f32.gmra.mxu0 %vm995_vm7, %v8626_v55  ;;  %v3279_v60 = vsel %vm550_vm3, %v3278_v1, %v3277_v61  ;;  %v4573_v0 = vrot.slane %v4006_v39, 5  ;;  %v4575_v40 = vrot.slane %v4007_v37, 4  ;;  %v4577_v12 = vrot.slane %v4008_v38, 3  ;;  %v1409_v3 = vld [vmem:[%s14188_s0 + $0x121] sm:$0x1] }
  0x9f   :  { %v3281_v9 = vsel %vm553_vm4, %v3280_v14, %v3279_v60  ;;  %v4570_v13 = vsel %vm541_vm0, %v4569_v52, %v4003_v22  ;;  %v4579_v21 = vrot.slane %v4009_v46, 2  ;;  %v4581_v18 = vrot.slane %v4010_v48, 1  ;;  %v1410_v26 = vld [vmem:[%s14188_s0 + $0x125] sm:$0x1]  ;;  %v1411_v1 = vld [vmem:[%s14188_s0 + $0x129] sm:$0x1] }
  0xa0   :  { %v3283_v44 = vsel %vm556_vm5, %v3282_v31, %v3281_v9  ;;  %v4572_v19 = vsel %vm544_vm1, %v4571_v4, %v4570_v13  ;;  %v1412_v14 = vld [vmem:[%s14188_s0 + $0x12d] sm:$0x1]  ;;  %v1413_v22 = vld [vmem:[%s14188_s0 + $0x131] sm:$0x1]  ;;  %v1414_v45 = vld [vmem:[%s14188_s0 + $0x135] sm:$0x1] }
  0xa1   :  { %v8661_v47 = vsel %vm559_vm6, %v3284_v30, %v3283_v44  ;;  %v4574_v39 = vsel %vm547_vm2, %v4573_v0, %v4572_v19  ;;  %v1415_v31 = vld [vmem:[%s14188_s0 + $0x139] sm:$0x1]  ;;  %v1416_v37 = vld [vmem:[%s14188_s0 + $0x13d] sm:$0x1]  ;;  %v1975_v38 = vrot.slane %v1410_v26, 7  ;;  %v1977_v61 = vrot.slane %v1411_v1, 6 }
  0xa2   :  { %14369 = vst [vmem:[#allocation39_spill] sm:$0xff] %v8661_v47  ;;  %6721 = vmatmul.msk.f32.gmra.mxu2 %vm995_vm7, %v8661_v47  ;;  %v4576_v46 = vsel %vm550_vm3, %v4575_v40, %v4574_v39  ;;  %v1979_v48 = vrot.slane %v1412_v14, 5  ;;  %v1981_v30 = vrot.slane %v1413_v22, 4  ;;  %v1983_v52 = vrot.slane %v1414_v45, 3  ;;  %v2714_v4 = vld [vmem:[%s14188_s0 + $0x142] sm:$0x1] }
  0xa3   :  { %v4578_v60 = vsel %vm553_vm4, %v4577_v12, %v4576_v46  ;;  %v1976_v0 = vsel %vm541_vm0, %v1975_v38, %v1409_v3  ;;  %v1985_v9 = vrot.slane %v1415_v31, 2  ;;  %v1987_v13 = vrot.slane %v1416_v37, 1  ;;  %v2715_v26 = vld [vmem:[%s14188_s0 + $0x146] sm:$0x1]  ;;  %v2716_v40 = vld [vmem:[%s14188_s0 + $0x14a] sm:$0x1] }
  0xa4   :  { %v4580_v1 = vsel %vm556_vm5, %v4579_v21, %v4578_v60  ;;  %v1978_v44 = vsel %vm544_vm1, %v1977_v61, %v1976_v0  ;;  %v2717_v12 = vld [vmem:[%s14188_s0 + $0x14e] sm:$0x1]  ;;  %v2718_v3 = vld [vmem:[%s14188_s0 + $0x152] sm:$0x1]  ;;  %v2719_v19 = vld [vmem:[%s14188_s0 + $0x156] sm:$0x1] }
  0xa5   :  { %v8696_v14 = vsel %vm559_vm6, %v4581_v18, %v4580_v1  ;;  %v1980_v22 = vsel %vm547_vm2, %v1979_v48, %v1978_v44  ;;  %v2720_v21 = vld [vmem:[%s14188_s0 + $0x15a] sm:$0x1]  ;;  %v2721_v45 = vld [vmem:[%s14188_s0 + $0x15e] sm:$0x1]  ;;  %v3286_v39 = vrot.slane %v2715_v26, 7  ;;  %v3288_v31 = vrot.slane %v2716_v40, 6 }
  0xa6   :  { %14370 = vst [vmem:[#allocation40_spill] sm:$0xff] %v8696_v14  ;;  %6753 = vmatmul.msk.f32.gmra.mxu3 %vm995_vm7, %v8696_v14  ;;  %v1982_v37 = vsel %vm550_vm3, %v1981_v30, %v1980_v22  ;;  %v3290_v38 = vrot.slane %v2717_v12, 5  ;;  %v3292_v18 = vrot.slane %v2718_v3, 4  ;;  %v3294_v61 = vrot.slane %v2719_v19, 3  ;;  %v105_v46 = vld [vmem:[%s14188_s0 + $0x140] sm:$0x1] }
  0xa7   :  { %v1984_v48 = vsel %vm553_vm4, %v1983_v52, %v1982_v37  ;;  %v3287_v60 = vsel %vm541_vm0, %v3286_v39, %v2714_v4  ;;  %v3296_v0 = vrot.slane %v2720_v21, 2  ;;  %v3298_v1 = vrot.slane %v2721_v45, 1  ;;  %v106_v26 = vld [vmem:[%s14188_s0 + $0x144] sm:$0x1]  ;;  %v107_v30 = vld [vmem:[%s14188_s0 + $0x148] sm:$0x1] }
  0xa8   :  { %v1986_v40 = vsel %vm556_vm5, %v1985_v9, %v1984_v48  ;;  %v3289_v44 = vsel %vm544_vm1, %v3288_v31, %v3287_v60  ;;  %v108_v52 = vld [vmem:[%s14188_s0 + $0x14c] sm:$0x1]  ;;  %v109_v4 = vld [vmem:[%s14188_s0 + $0x150] sm:$0x1]  ;;  %v110_v12 = vld [vmem:[%s14188_s0 + $0x154] sm:$0x1] }
  0xa9   :  { %v8731_v3 = vsel %vm559_vm6, %v1987_v13, %v1986_v40  ;;  %v3291_v19 = vsel %vm547_vm2, %v3290_v38, %v3289_v44  ;;  %v111_v9 = vld [vmem:[%s14188_s0 + $0x158] sm:$0x1]  ;;  %v112_v22 = vld [vmem:[%s14188_s0 + $0x15c] sm:$0x1]  ;;  %v687_v21 = vrot.slane %v106_v26, 7  ;;  %v689_v45 = vrot.slane %v107_v30, 6 }
  0xaa   :  { %14371 = vst [vmem:[#allocation41_spill] sm:$0xff] %v8731_v3  ;;  %6689 = vmatmul.msk.f32.gmra.mxu1 %vm995_vm7, %v8731_v3  ;;  %v3293_v39 = vsel %vm550_vm3, %v3292_v18, %v3291_v19  ;;  %v691_v31 = vrot.slane %v108_v52, 5  ;;  %v693_v13 = vrot.slane %v109_v4, 4  ;;  %v695_v37 = vrot.slane %v110_v12, 3  ;;  %v1417_v38 = vld [vmem:[%s14188_s0 + $0x141] sm:$0x1] }
  0xab   :  { %v3295_v48 = vsel %vm553_vm4, %v3294_v61, %v3293_v39  ;;  %v688_v60 = vsel %vm541_vm0, %v687_v21, %v105_v46  ;;  %v697_v40 = vrot.slane %v111_v9, 2  ;;  %v699_v44 = vrot.slane %v112_v22, 1  ;;  %v1418_v26 = vld [vmem:[%s14188_s0 + $0x145] sm:$0x1]  ;;  %v1419_v18 = vld [vmem:[%s14188_s0 + $0x149] sm:$0x1] }
  0xac   :  { %v3297_v30 = vsel %vm556_vm5, %v3296_v0, %v3295_v48  ;;  %v690_v52 = vsel %vm544_vm1, %v689_v45, %v688_v60  ;;  %v1420_v61 = vld [vmem:[%s14188_s0 + $0x14d] sm:$0x1]  ;;  %v1421_v46 = vld [vmem:[%s14188_s0 + $0x151] sm:$0x1]  ;;  %v1422_v4 = vld [vmem:[%s14188_s0 + $0x155] sm:$0x1] }
  0xad   :  { %v8766_v12 = vsel %vm559_vm6, %v3298_v1, %v3297_v30  ;;  %v692_v19 = vsel %vm547_vm2, %v691_v31, %v690_v52  ;;  %v1423_v0 = vld [vmem:[%s14188_s0 + $0x159] sm:$0x1]  ;;  %v1424_v9 = vld [vmem:[%s14188_s0 + $0x15d] sm:$0x1]  ;;  %v1989_v22 = vrot.slane %v1418_v26, 7  ;;  %v1991_v21 = vrot.slane %v1419_v18, 6 }
  0xae   :  { %14372 = vst [vmem:[#allocation42_spill] sm:$0xff] %v8766_v12  ;;  %6722 = vmatmul.msk.f32.gmra.mxu2 %vm995_vm7, %v8766_v12  ;;  %v694_v45 = vsel %vm550_vm3, %v693_v13, %v692_v19  ;;  %v1993_v39 = vrot.slane %v1420_v61, 5  ;;  %v1995_v1 = vrot.slane %v1421_v46, 4  ;;  %v1997_v48 = vrot.slane %v1422_v4, 3  ;;  %v4011_v31 = vld [vmem:[%s14188_s0 + $0x143] sm:$0x1] }
  0xaf   :  { %v696_v60 = vsel %vm553_vm4, %v695_v37, %v694_v45  ;;  %v1990_v30 = vsel %vm541_vm0, %v1989_v22, %v1417_v38  ;;  %v1999_v52 = vrot.slane %v1423_v0, 2  ;;  %v2001_v11 = vrot.slane %v1424_v9, 1  ;;  %v4012_v26 = vld [vmem:[%s14188_s0 + $0x147] sm:$0x1]  ;;  %v4013_v13 = vld [vmem:[%s14188_s0 + $0x14b] sm:$0x1] }
  0xb0   :  { %v698_v18 = vsel %vm556_vm5, %v697_v40, %v696_v60  ;;  %v1992_v61 = vsel %vm544_vm1, %v1991_v21, %v1990_v30  ;;  %v4014_v37 = vld [vmem:[%s14188_s0 + $0x14f] sm:$0x1]  ;;  %v4015_v38 = vld [vmem:[%s14188_s0 + $0x153] sm:$0x1]  ;;  %v4016_v46 = vld [vmem:[%s14188_s0 + $0x157] sm:$0x1] }
  0xb1   :  { %v8801_v4 = vsel %vm559_vm6, %v699_v44, %v698_v18  ;;  %v1994_v19 = vsel %vm547_vm2, %v1993_v39, %v1992_v61  ;;  %v4017_v40 = vld [vmem:[%s14188_s0 + $0x15b] sm:$0x1]  ;;  %v4018_v0 = vld [vmem:[%s14188_s0 + $0x15f] sm:$0x1]  ;;  %v4583_v9 = vrot.slane %v4012_v26, 7  ;;  %v4585_v22 = vrot.slane %v4013_v13, 6 }
  0xb2   :  { %14373 = vst [vmem:[#allocation43_spill] sm:$0xff] %v8801_v4  ;;  %6658 = vmatmul.msk.f32.gmra.mxu0 %vm995_vm7, %v8801_v4  ;;  %v1996_v21 = vsel %vm550_vm3, %v1995_v1, %v1994_v19  ;;  %v4587_v45 = vrot.slane %v4014_v37, 5  ;;  %v4589_v44 = vrot.slane %v4015_v38, 4  ;;  %v4591_v60 = vrot.slane %v4016_v46, 3  ;;  %v2722_v39 = vld [vmem:[%s14188_s0 + $0x162] sm:$0x1] }
  0xb3   :  { %v1998_v30 = vsel %vm553_vm4, %v1997_v48, %v1996_v21  ;;  %v4584_v18 = vsel %vm541_vm0, %v4583_v9, %v4011_v31  ;;  %v4593_v61 = vrot.slane %v4017_v40, 2  ;;  %v4595_v41 = vrot.slane %v4018_v0, 1  ;;  %v2723_v26 = vld [vmem:[%s14188_s0 + $0x166] sm:$0x1]  ;;  %v2724_v1 = vld [vmem:[%s14188_s0 + $0x16a] sm:$0x1] }
  0xb4   :  { %v2000_v13 = vsel %vm556_vm5, %v1999_v52, %v1998_v30  ;;  %v4586_v37 = vsel %vm544_vm1, %v4585_v22, %v4584_v18  ;;  %v2725_v48 = vld [vmem:[%s14188_s0 + $0x16e] sm:$0x1]  ;;  %v2726_v31 = vld [vmem:[%s14188_s0 + $0x172] sm:$0x1]  ;;  %v2727_v38 = vld [vmem:[%s14188_s0 + $0x176] sm:$0x1] }
  0xb5   :  { %v8836_v46 = vsel %vm559_vm6, %v2001_v11, %v2000_v13  ;;  %v4588_v19 = vsel %vm547_vm2, %v4587_v45, %v4586_v37  ;;  %v2728_v52 = vld [vmem:[%s14188_s0 + $0x17a] sm:$0x1]  ;;  %v2729_v40 = vld [vmem:[%s14188_s0 + $0x17e] sm:$0x1]  ;;  %v3300_v0 = vrot.slane %v2723_v26, 7  ;;  %v3302_v9 = vrot.slane %v2724_v1, 6 }
  0xb6   :  { %14374 = vst [vmem:[#allocation44_spill] sm:$0xff] %v8836_v46  ;;  %6690 = vmatmul.msk.f32.gmra.mxu1 %vm995_vm7, %v8836_v46  ;;  %v4590_v22 = vsel %vm550_vm3, %v4589_v44, %v4588_v19  ;;  %v3304_v21 = vrot.slane %v2725_v48, 5  ;;  %v3306_v11 = vrot.slane %v2726_v31, 4  ;;  %v3308_v30 = vrot.slane %v2727_v38, 3  ;;  %v113_v45 = vld [vmem:[%s14188_s0 + $0x160] sm:$0x1] }
  0xb7   :  { %v4592_v18 = vsel %vm553_vm4, %v4591_v60, %v4590_v22  ;;  %v3301_v13 = vsel %vm541_vm0, %v3300_v0, %v2722_v39  ;;  %v3310_v37 = vrot.slane %v2728_v52, 2  ;;  %v3312_v20 = vrot.slane %v2729_v40, 1  ;;  %v114_v26 = vld [vmem:[%s14188_s0 + $0x164] sm:$0x1]  ;;  %v115_v44 = vld [vmem:[%s14188_s0 + $0x168] sm:$0x1] }
  0xb8   :  { %v4594_v1 = vsel %vm556_vm5, %v4593_v61, %v4592_v18  ;;  %v3303_v48 = vsel %vm544_vm1, %v3302_v9, %v3301_v13  ;;  %v116_v60 = vld [vmem:[%s14188_s0 + $0x16c] sm:$0x1]  ;;  %v117_v39 = vld [vmem:[%s14188_s0 + $0x170] sm:$0x1]  ;;  %v118_v31 = vld [vmem:[%s14188_s0 + $0x174] sm:$0x1] }
  0xb9   :  { %v8871_v38 = vsel %vm559_vm6, %v4595_v41, %v4594_v1  ;;  %v3305_v19 = vsel %vm547_vm2, %v3304_v21, %v3303_v48  ;;  %v119_v61 = vld [vmem:[%s14188_s0 + $0x178] sm:$0x1]  ;;  %v120_v52 = vld [vmem:[%s14188_s0 + $0x17c] sm:$0x1]  ;;  %v701_v40 = vrot.slane %v114_v26, 7  ;;  %v703_v0 = vrot.slane %v115_v44, 6 }
  0xba   :  { %14375 = vst [vmem:[#allocation45_spill] sm:$0xff] %v8871_v38  ;;  %6754 = vmatmul.msk.f32.gmra.mxu3 %vm995_vm7, %v8871_v38  ;;  %v3307_v9 = vsel %vm550_vm3, %v3306_v11, %v3305_v19  ;;  %v705_v22 = vrot.slane %v116_v60, 5  ;;  %v707_v41 = vrot.slane %v117_v39, 4  ;;  %v709_v18 = vrot.slane %v118_v31, 3  ;;  %v4019_v21 = vld [vmem:[%s14188_s0 + $0x163] sm:$0x1] }
  0xbb   :  { %v3309_v13 = vsel %vm553_vm4, %v3308_v30, %v3307_v9  ;;  %v702_v1 = vsel %vm541_vm0, %v701_v40, %v113_v45  ;;  %v711_v48 = vrot.slane %v119_v61, 2  ;;  %v713_v14 = vrot.slane %v120_v52, 1  ;;  %v4020_v26 = vld [vmem:[%s14188_s0 + $0x167] sm:$0x1]  ;;  %v4021_v11 = vld [vmem:[%s14188_s0 + $0x16b] sm:$0x1] }
  0xbc   :  { %v3311_v44 = vsel %vm556_vm5, %v3310_v37, %v3309_v13  ;;  %v704_v60 = vsel %vm544_vm1, %v703_v0, %v702_v1  ;;  %v4022_v30 = vld [vmem:[%s14188_s0 + $0x16f] sm:$0x1]  ;;  %v4023_v45 = vld [vmem:[%s14188_s0 + $0x173] sm:$0x1]  ;;  %v4024_v39 = vld [vmem:[%s14188_s0 + $0x177] sm:$0x1]  ;;  %v1077_v1 = vpop.f32.mrf.mxu0 }
  0xbd   :  { %v8906_v31 = vsel %vm559_vm6, %v3312_v20, %v3311_v44  ;;  %v706_v19 = vsel %vm547_vm2, %v705_v22, %v704_v60  ;;  %v4025_v37 = vld [vmem:[%s14188_s0 + $0x17b] sm:$0x1]  ;;  %v4026_v61 = vld [vmem:[%s14188_s0 + $0x17f] sm:$0x1]  ;;  %v4597_v52 = vrot.slane %v4020_v26, 7  ;;  %v4599_v40 = vrot.slane %v4021_v11, 6  ;;  %v2378_v22 = vpop.f32.mrf.mxu1 }
  0xbe   :  { %14376 = vst [vmem:[#allocation46_spill] sm:$0xff] %v8906_v31  ;;  %6723 = vmatmul.msk.f32.gmra.mxu2 %vm995_vm7, %v8906_v31  ;;  %v708_v0 = vsel %vm550_vm3, %v707_v41, %v706_v19  ;;  %v4601_v9 = vrot.slane %v4022_v30, 5  ;;  %v4603_v20 = vrot.slane %v4023_v45, 4  ;;  %v4605_v13 = vrot.slane %v4024_v39, 3  ;;  %v8923_v26 = vld [vmem:[%s14189_s2] ss:$0 sm:$0xff] }
  0xbf   :  { %v710_v44 = vsel %vm553_vm4, %v709_v18, %v708_v0  ;;  %v4598_v60 = vsel %vm541_vm0, %v4597_v52, %v4019_v21  ;;  %v4607_v38 = vrot.slane %v4025_v37, 2  ;;  %v4609_v58 = vrot.slane %v4026_v61, 1  ;;  %v1425_v41 = vld [vmem:[%s14188_s0 + $0x161] sm:$0x1]  ;;  %v1426_v18 = vld [vmem:[%s14188_s0 + $0x165] sm:$0x1] }
  0xc0   :  { %v712_v11 = vsel %vm556_vm5, %v711_v48, %v710_v44  ;;  %v4600_v30 = vsel %vm544_vm1, %v4599_v40, %v4598_v60  ;;  %v1427_v21 = vld [vmem:[%s14188_s0 + $0x169] sm:$0x1]  ;;  %v1428_v45 = vld [vmem:[%s14188_s0 + $0x16d] sm:$0x1]  ;;  %v1078_v48 = vadd.f32 %v8923_v26, %v1077_v1  ;;  %v2379_v37 = vadd.f32 %v8923_v26, %v2378_v22  ;;  %v1429_v61 = vld [vmem:[%s14188_s0 + $0x171] sm:$0x1] }
  0xc1   :  { %v8940_v39 = vsel %vm559_vm6, %v713_v14, %v712_v11  ;;  %v4602_v19 = vsel %vm547_vm2, %v4601_v9, %v4600_v30  ;;  %v1430_v52 = vld [vmem:[%s14188_s0 + $0x175] sm:$0x1]  ;;  %v1431_v40 = vld [vmem:[%s14188_s0 + $0x179] sm:$0x1]  ;;  %v1432_v0 = vld [vmem:[%s14188_s0 + $0x17d] sm:$0x1] }
  0xc2   :  { %14377 = vst [vmem:[#allocation47_spill] sm:$0xff] %v8940_v39  ;;  %6659 = vmatmul.msk.f32.gmra.mxu0 %vm995_vm7, %v8940_v39  ;;  %v4604_v14 = vsel %vm550_vm3, %v4603_v20, %v4602_v19  ;;  %v2003_v9 = vrot.slane %v1426_v18, 7  ;;  %v2005_v1 = vrot.slane %v1427_v21, 6  ;;  %v2007_v22 = vrot.slane %v1428_v45, 5  ;;  %v121_v11 = vld [vmem:[%s14188_s0 + $0x180] sm:$0x1] }
  0xc3   :  { %v4606_v44 = vsel %vm553_vm4, %v4605_v13, %v4604_v14  ;;  %6851 = vtanh.f32 %v1078_v48  ;;  %v2009_v60 = vrot.slane %v1429_v61, 4  ;;  %v122_v30 = vld [vmem:[%s14188_s0 + $0x184] sm:$0x1]  ;;  %v2011_v5 = vrot.slane %v1430_v52, 3  ;;  %v123_v13 = vld [vmem:[%s14188_s0 + $0x188] sm:$0x1] }
  0xc4   :  { %v4608_v20 = vsel %vm556_vm5, %v4607_v38, %v4606_v44  ;;  %v2004_v19 = vsel %vm541_vm0, %v2003_v9, %v1425_v41  ;;  %v2013_v18 = vrot.slane %v1431_v40, 2  ;;  %v124_v21 = vld [vmem:[%s14188_s0 + $0x18c] sm:$0x1]  ;;  %v2015_v61 = vrot.slane %v1432_v0, 1  ;;  %v125_v38 = vld [vmem:[%s14188_s0 + $0x190] sm:$0x1]  ;;  %v4972_v44 = vpop.f32.mrf.mxu3 }
  0xc5   :  { %v8976_v45 = vsel %vm559_vm6, %v4609_v58, %v4608_v20  ;;  %v2006_v48 = vsel %vm544_vm1, %v2005_v1, %v2004_v19  ;;  %v126_v41 = vld [vmem:[%s14188_s0 + $0x194] sm:$0x1]  ;;  %v715_v52 = vrot.slane %v122_v30, 7  ;;  %6853 = vtanh.f32 %v2379_v37  ;;  %v127_v58 = vld [vmem:[%s14188_s0 + $0x198] sm:$0x1]  ;;  %v3675_v1 = vpop.f32.mrf.mxu2 }
  0xc6   :  { %14378 = vst [vmem:[#allocation48_spill] sm:$0xff] %v8976_v45  ;;  %6755 = vmatmul.msk.f32.gmra.mxu3 %vm995_vm7, %v8976_v45  ;;  %v2008_v40 = vsel %vm547_vm2, %v2007_v22, %v2006_v48  ;;  %v128_v14 = vld [vmem:[%s14188_s0 + $0x19c] sm:$0x1]  ;;  %v717_v0 = vrot.slane %v123_v13, 6  ;;  %v719_v9 = vrot.slane %v124_v21, 5  ;;  %v721_v19 = vrot.slane %v125_v38, 4 }
  0xc7   :  { %v2010_v30 = vsel %vm550_vm3, %v2009_v60, %v2008_v40  ;;  %v716_v20 = vsel %vm541_vm0, %v715_v52, %v121_v11  ;;  %v723_v37 = vrot.slane %v126_v41, 3  ;;  %v2730_v22 = vld [vmem:[%s14188_s0 + $0x182] sm:$0x1]  ;;  %v2731_v48 = vld [vmem:[%s14188_s0 + $0x186] sm:$0x1]  ;;  %v725_v21 = vrot.slane %v127_v58, 2 }
  0xc8   :  { %v2012_v45 = vsel %vm553_vm4, %v2011_v5, %v2010_v30  ;;  %v718_v13 = vsel %vm544_vm1, %v717_v0, %v716_v20  ;;  %v727_v35 = vrot.slane %v128_v14, 1  ;;  %v2732_v60 = vld [vmem:[%s14188_s0 + $0x18a] sm:$0x1]  ;;  %v2733_v11 = vld [vmem:[%s14188_s0 + $0x18e] sm:$0x1]  ;;  %v3676_v14 = vadd.f32 %v8923_v26, %v3675_v1 }
  0xc9   :  { %v9010_v38 = vpop.eup %6851  ;;  %v2014_v41 = vsel %vm556_vm5, %v2013_v18, %v2012_v45  ;;  %v720_v52 = vsel %vm547_vm2, %v719_v9, %v718_v13  ;;  %v2734_v5 = vld [vmem:[%s14188_s0 + $0x192] sm:$0x1]  ;;  %v2735_v40 = vld [vmem:[%s14188_s0 + $0x196] sm:$0x1]  ;;  %v2736_v58 = vld [vmem:[%s14188_s0 + $0x19a] sm:$0x1]  ;;  %v4973_v0 = vadd.f32 %v8923_v26, %v4972_v44  ;;  %v1080_v13 = vpop.f32.mrf.mxu0 }
  0xca   :  { %v9026_v18 = vsel %vm559_vm6, %v2015_v61, %v2014_v41  ;;  %v722_v45 = vsel %vm550_vm3, %v721_v19, %v720_v52  ;;  %v2737_v9 = vld [vmem:[%s14188_s0 + $0x19e] sm:$0x1]  ;;  %v3314_v30 = vrot.slane %v2731_v48, 7  ;;  %v3316_v20 = vrot.slane %v2732_v60, 6  ;;  %v4027_v61 = vld [vmem:[%s14188_s0 + $0x183] sm:$0x1] }
  0xcb   :  { %14379 = vst [vmem:[#allocation49_spill] sm:$0xff] %v9026_v18  ;;  %6691 = vmatmul.msk.f32.gmra.mxu1 %vm995_vm7, %v9026_v18  ;;  %v724_v24 = vsel %vm553_vm4, %v723_v37, %v722_v45  ;;  %v3318_v1 = vrot.slane %v2733_v11, 5  ;;  %v3320_v51 = vrot.slane %v2734_v5, 4  ;;  %v3322_v44 = vrot.slane %v2735_v40, 3  ;;  %v4028_v19 = vld [vmem:[%s14188_s0 + $0x187] sm:$0x1]  ;;  %v9041_v41 = vpop.eup %6853 }
  0xcc   :  { %v726_v48 = vsel %vm556_vm5, %v725_v21, %v724_v24  ;;  %v3315_v60 = vsel %vm541_vm0, %v3314_v30, %v2730_v22  ;;  %v3324_v52 = vrot.slane %v2736_v58, 2  ;;  %v3326_v33 = vrot.slane %v2737_v9, 1  ;;  %v4029_v37 = vld [vmem:[%s14188_s0 + $0x18b] sm:$0x1]  ;;  %v4030_v11 = vld [vmem:[%s14188_s0 + $0x18f] sm:$0x1] }
  0xcd   :  { %v9052_v5 = vsel %vm559_vm6, %v727_v35, %v726_v48  ;;  %v3317_v40 = vsel %vm544_vm1, %v3316_v20, %v3315_v60  ;;  %v4031_v24 = vld [vmem:[%s14188_s0 + $0x193] sm:$0x1]  ;;  %v4032_v22 = vld [vmem:[%s14188_s0 + $0x197] sm:$0x1]  ;;  %v4033_v21 = vld [vmem:[%s14188_s0 + $0x19b] sm:$0x1]  ;;  %6855 = vtanh.f32 %v3676_v14  ;;  %v1081_v58 = vadd.f32 %v8923_v26, %v1080_v13  ;;  %v2381_v48 = vpop.f32.mrf.mxu1 }
  0xce   :  { %14380 = vst [vmem:[#allocation50_spill] sm:$0xff] %v9052_v5  ;;  %6660 = vmatmul.msk.f32.gmra.mxu0 %vm995_vm7, %v9052_v5  ;;  %v3319_v35 = vsel %vm547_vm2, %v3318_v1, %v3317_v40  ;;  %v4034_v45 = vld [vmem:[%s14188_s0 + $0x19f] sm:$0x1]  ;;  %v4611_v9 = vrot.slane %v4028_v19, 7  ;;  %v4613_v30 = vrot.slane %v4029_v37, 6  ;;  %v4615_v20 = vrot.slane %v4030_v11, 5 }
  0xcf   :  { %v3321_v60 = vsel %vm550_vm3, %v3320_v51, %v3319_v35  ;;  %v4617_v12 = vrot.slane %v4031_v24, 4  ;;  %v4619_v15 = vrot.slane %v4032_v22, 3  ;;  %6857 = vtanh.f32 %v4973_v0  ;;  %v1433_v14 = vld [vmem:[%s14188_s0 + $0x181] sm:$0x1]  ;;  %v1434_v19 = vld [vmem:[%s14188_s0 + $0x185] sm:$0x1] }
  0xd0   :  { %v3323_v13 = vsel %vm553_vm4, %v3322_v44, %v3321_v60  ;;  %v4612_v1 = vsel %vm541_vm0, %v4611_v9, %v4027_v61  ;;  %v4621_v40 = vrot.slane %v4033_v21, 2  ;;  %v4623_v25 = vrot.slane %v4034_v45, 1  ;;  %v1435_v51 = vld [vmem:[%s14188_s0 + $0x189] sm:$0x1]  ;;  %v1436_v44 = vld [vmem:[%s14188_s0 + $0x18d] sm:$0x1] }
  0xd1   :  { %v3325_v0 = vsel %vm556_vm5, %v3324_v52, %v3323_v13  ;;  %v4614_v37 = vsel %vm544_vm1, %v4613_v30, %v4612_v1  ;;  %v1437_v61 = vld [vmem:[%s14188_s0 + $0x191] sm:$0x1]  ;;  %v1438_v11 = vld [vmem:[%s14188_s0 + $0x195] sm:$0x1]  ;;  %6859 = vtanh.f32 %v1081_v58  ;;  %v2382_v24 = vadd.f32 %v8923_v26, %v2381_v48  ;;  %v1439_v21 = vld [vmem:[%s14188_s0 + $0x199] sm:$0x1]  ;;  %v3678_v30 = vpop.f32.mrf.mxu2 }
  0xd2   :  { %v9096_v52 = vsel %vm559_vm6, %v3326_v33, %v3325_v0  ;;  %v4616_v22 = vsel %vm547_vm2, %v4615_v20, %v4614_v37  ;;  %v1440_v35 = vld [vmem:[%s14188_s0 + $0x19d] sm:$0x1]  ;;  %v2017_v45 = vrot.slane %v1434_v19, 7  ;;  %v2019_v9 = vrot.slane %v1435_v51, 6  ;;  %v2738_v13 = vld [vmem:[%s14188_s0 + $0x1a2] sm:$0x1] }
  0xd3   :  { %14381 = vst [vmem:[#allocation51_spill] sm:$0xff] %v9096_v52  ;;  %v9105_v60 = vpop.eup %6855  ;;  %6724 = vmatmul.msk.f32.gmra.mxu2 %vm995_vm7, %v9096_v52  ;;  %v4618_v33 = vsel %vm550_vm3, %v4617_v12, %v4616_v22  ;;  %v2021_v58 = vrot.slane %v1436_v44, 5  ;;  %v2023_v20 = vrot.slane %v1437_v61, 4  ;;  %v2025_v48 = vrot.slane %v1438_v11, 3  ;;  %v2739_v37 = vld [vmem:[%s14188_s0 + $0x1a6] sm:$0x1] }
  0xd4   :  { %v4620_v1 = vsel %vm553_vm4, %v4619_v15, %v4618_v33  ;;  %v2018_v19 = vsel %vm541_vm0, %v2017_v45, %v1433_v14  ;;  %v2027_v51 = vrot.slane %v1439_v21, 2  ;;  %v2029_v0 = vrot.slane %v1440_v35, 1  ;;  %v2740_v12 = vld [vmem:[%s14188_s0 + $0x1aa] sm:$0x1]  ;;  %v2741_v15 = vld [vmem:[%s14188_s0 + $0x1ae] sm:$0x1] }
  0xd5   :  { %v9121_v44 = vpop.eup %6857  ;;  %v4622_v61 = vsel %vm556_vm5, %v4621_v40, %v4620_v1  ;;  %v2020_v11 = vsel %vm544_vm1, %v2019_v9, %v2018_v19  ;;  %v2742_v14 = vld [vmem:[%s14188_s0 + $0x1b2] sm:$0x1]  ;;  %v2743_v22 = vld [vmem:[%s14188_s0 + $0x1b6] sm:$0x1]  ;;  %6861 = vtanh.f32 %v2382_v24  ;;  %v3679_v21 = vadd.f32 %v8923_v26, %v3678_v30  ;;  %v2744_v45 = vld [vmem:[%s14188_s0 + $0x1ba] sm:$0x1]  ;;  %v4975_v19 = vpop.f32.mrf.mxu3 }
  0xd6   :  { %v9136_v35 = vsel %vm559_vm6, %v4623_v25, %v4622_v61  ;;  %v2022_v40 = vsel %vm547_vm2, %v2021_v58, %v2020_v11  ;;  %v2745_v9 = vld [vmem:[%s14188_s0 + $0x1be] sm:$0x1]  ;;  %v3328_v33 = vrot.slane %v2739_v37, 7  ;;  %v3330_v1 = vrot.slane %v2740_v12, 6  ;;  %v9155_v37 = vld [vmem:[%s14190_s3] ss:$0 sm:$0xff] }
  0xd7   :  { %14382 = vst [vmem:[#allocation52_spill] sm:$0xff] %v9136_v35  ;;  %v9145_v8 = vpop.eup %6859  ;;  %6756 = vmatmul.msk.f32.gmra.mxu3 %vm995_vm7, %v9136_v35  ;;  %v2024_v25 = vsel %vm550_vm3, %v2023_v20, %v2022_v40  ;;  %v3332_v24 = vrot.slane %v2741_v15, 5  ;;  %v3334_v30 = vrot.slane %v2742_v14, 4  ;;  %v3336_v58 = vrot.slane %v2743_v22, 3  ;;  %v132_v15 = vld [vmem:[%s14188_s0 + $0x1ac] sm:$0x1] }
  0xd8   :  { %v2026_v61 = vsel %vm553_vm4, %v2025_v48, %v2024_v25  ;;  %v3329_v11 = vsel %vm541_vm0, %v3328_v33, %v2738_v13  ;;  %v3338_v50 = vrot.slane %v2744_v45, 2  ;;  %v3340_v4 = vrot.slane %v2745_v9, 1  ;;  %v130_v48 = vld [vmem:[%s14188_s0 + $0x1a4] sm:$0x1]  ;;  %v131_v13 = vld [vmem:[%s14188_s0 + $0x1a8] sm:$0x1] }
  0xd9   :  { %v2028_v12 = vsel %vm556_vm5, %v2027_v51, %v2026_v61  ;;  %v3331_v35 = vsel %vm544_vm1, %v3330_v1, %v3329_v11  ;;  %6863 = vtanh.f32 %v3679_v21  ;;  %v4976_v20 = vadd.f32 %v8923_v26, %v4975_v19  ;;  %v129_v40 = vld [vmem:[%s14188_s0 + $0x1a0] sm:$0x1]  ;;  %v133_v45 = vld [vmem:[%s14188_s0 + $0x1b0] sm:$0x1]  ;;  %v4036_v11 = vld [vmem:[%s14188_s0 + $0x1a7] sm:$0x1] }
  0xda   :  { %v9170_v14 = vsel %vm559_vm6, %v2029_v0, %v2028_v12  ;;  %v3333_v51 = vsel %vm547_vm2, %v3332_v24, %v3331_v35  ;;  %v2506_v22 = vmul.f32 %v9041_v41, %v9155_v37  ;;  %v1208_v21 = vmul.f32 %v9010_v38, %v9155_v37  ;;  %v134_v0 = vld [vmem:[%s14188_s0 + $0x1b4] sm:$0x1]  ;;  %v135_v38 = vld [vmem:[%s14188_s0 + $0x1b8] sm:$0x1]  ;;  %v136_v35 = vld [vmem:[%s14188_s0 + $0x1bc] sm:$0x1] }
  0xdb   :  { %14383 = vst [vmem:[#allocation53_spill] sm:$0xff] %v9170_v14  ;;  %v9186_v9 = vpop.eup %6861  ;;  %6692 = vmatmul.msk.f32.gmra.mxu1 %vm995_vm7, %v9170_v14  ;;  %v3335_v41 = vsel %vm550_vm3, %v3334_v30, %v3333_v51  ;;  %6865 = vtanh.f32 %v4976_v20  ;;  %v729_v33 = vrot.slane %v130_v48, 7  ;;  %v731_v1 = vrot.slane %v131_v13, 6  ;;  %v4035_v30 = vld [vmem:[%s14188_s0 + $0x1a3] sm:$0x1] }
  0xdc   :  { %v3337_v19 = vsel %vm553_vm4, %v3336_v58, %v3335_v41  ;;  %v2538_v25 = vsel %vm1240_vm8, %v2506_v22, 0.0  ;;  %v1241_v24 = vsel %vm1240_vm8, %v1208_v21, 0.0  ;;  %v733_v61 = vrot.slane %v132_v15, 5  ;;  %v4037_v13 = vld [vmem:[%s14188_s0 + $0x1ab] sm:$0x1] }
  0xdd   :  { %v3339_v12 = vsel %vm556_vm5, %v3338_v50, %v3337_v19  ;;  %2539 = vadd.xlane.f32.xlu2 %v2538_v25  ;;  %1242 = vadd.xlane.f32.xlu0 %v1241_v24  ;;  %v730_v20 = vsel %vm541_vm0, %v729_v33, %v129_v40  ;;  %v735_v58 = vrot.slane %v133_v45, 4  ;;  %v737_v48 = vrot.slane %v134_v0, 3  ;;  %v4038_v15 = vld [vmem:[%s14188_s0 + $0x1af] sm:$0x1]  ;;  %v4039_v40 = vld [vmem:[%s14188_s0 + $0x1b3] sm:$0x1] }
  0xde   :  { %v9215_v51 = vsel %vm559_vm6, %v3340_v4, %v3339_v12  ;;  %v732_v22 = vsel %vm544_vm1, %v731_v1, %v730_v20  ;;  %v739_v50 = vrot.slane %v135_v38, 2  ;;  %v741_v21 = vrot.slane %v136_v35, 1  ;;  %v4040_v45 = vld [vmem:[%s14188_s0 + $0x1b7] sm:$0x1]  ;;  %v4041_v41 = vld [vmem:[%s14188_s0 + $0x1bb] sm:$0x1]  ;;  %v1083_v20 = vpop.f32.mrf.mxu0 }
  0xdf   :  { %14384 = vst [vmem:[#allocation54_spill] sm:$0xff] %v9215_v51  ;;  %v9224_v0 = vpop.eup %6863  ;;  %6725 = vmatmul.msk.f32.gmra.mxu2 %vm995_vm7, %v9215_v51  ;;  %v734_v4 = vsel %vm547_vm2, %v733_v61, %v732_v22  ;;  %v4042_v38 = vld [vmem:[%s14188_s0 + $0x1bf] sm:$0x1]  ;;  %v4625_v35 = vrot.slane %v4036_v11, 7  ;;  %v4627_v33 = vrot.slane %v4037_v13, 6  ;;  %v3803_v1 = vmul.f32 %v9105_v60, %v9155_v37 }
  0xe0   :  { %v736_v19 = vsel %vm550_vm3, %v735_v58, %v734_v4  ;;  %v4629_v25 = vrot.slane %v4038_v15, 5  ;;  %v4631_v24 = vrot.slane %v4039_v40, 4  ;;  %v4633_v12 = vrot.slane %v4040_v45, 3  ;;  %v1441_v61 = vld [vmem:[%s14188_s0 + $0x1a1] sm:$0x1] }
  0xe1   :  { %v9241_v22 = vpop.eup %6865  ;;  %v738_v51 = vsel %vm553_vm4, %v737_v48, %v736_v19  ;;  %v4626_v11 = vsel %vm541_vm0, %v4625_v35, %v4035_v30  ;;  %v4635_v13 = vrot.slane %v4041_v41, 2  ;;  %v4637_v46 = vrot.slane %v4042_v38, 1  ;;  %v1442_v60 = vld [vmem:[%s14188_s0 + $0x1a5] sm:$0x1]  ;;  %v1443_v58 = vld [vmem:[%s14188_s0 + $0x1a9] sm:$0x1] }
  0xe2   :  { %v740_v15 = vsel %vm556_vm5, %v739_v50, %v738_v51  ;;  %v4628_v40 = vsel %vm544_vm1, %v4627_v33, %v4626_v11  ;;  %v3835_v45 = vsel %vm1240_vm8, %v3803_v1, 0.0  ;;  %v1444_v30 = vld [vmem:[%s14188_s0 + $0x1ad] sm:$0x1]  ;;  %v1445_v48 = vld [vmem:[%s14188_s0 + $0x1b1] sm:$0x1]  ;;  %v2031_v4 = vrot.slane %v1442_v60, 7 }
  0xe3   :  { %v9261_v41 = vsel %vm559_vm6, %v741_v21, %v740_v15  ;;  %v4630_v38 = vsel %vm547_vm2, %v4629_v25, %v4628_v40  ;;  %3836 = vadd.xlane.f32.xlu1 %v3835_v45  ;;  %v1446_v51 = vld [vmem:[%s14188_s0 + $0x1b5] sm:$0x1]  ;;  %v1447_v50 = vld [vmem:[%s14188_s0 + $0x1b9] sm:$0x1]  ;;  %v1448_v35 = vld [vmem:[%s14188_s0 + $0x1bd] sm:$0x1]  ;;  %v5100_v33 = vmul.f32 %v9121_v44, %v9155_v37  ;;  %v1084_v21 = vadd.f32 %v8923_v26, %v1083_v20  ;;  %v2384_v44 = vpop.f32.mrf.mxu1 }
  0xe4   :  { %14385 = vst [vmem:[#allocation55_spill] sm:$0xff] %v9261_v41  ;;  %6661 = vmatmul.msk.f32.gmra.mxu0 %vm995_vm7, %v9261_v41  ;;  %v4632_v1 = vsel %vm550_vm3, %v4631_v24, %v4630_v38  ;;  %v2032_v19 = vsel %vm541_vm0, %v2031_v4, %v1441_v61  ;;  %v2033_v25 = vrot.slane %v1443_v58, 6  ;;  %v2035_v11 = vrot.slane %v1444_v30, 5  ;;  %v2746_v60 = vld [vmem:[%s14188_s0 + $0x1c2] sm:$0x1] }
  0xe5   :  { %v2747_v15 = vld [vmem:[%s14188_s0 + $0x1c6] sm:$0x1]  ;;  %v4634_v20 = vsel %vm553_vm4, %v4633_v12, %v4632_v1  ;;  %v2037_v40 = vrot.slane %v1445_v48, 4  ;;  %v2039_v45 = vrot.slane %v1446_v51, 3  ;;  %v2041_v41 = vrot.slane %v1447_v50, 2 }
  0xe6   :  { %v2748_v24 = vld [vmem:[%s14188_s0 + $0x1ca] sm:$0x1]  ;;  %v4636_v61 = vsel %vm556_vm5, %v4635_v13, %v4634_v20  ;;  %v2034_v58 = vsel %vm544_vm1, %v2033_v25, %v2032_v19  ;;  %v2043_v30 = vrot.slane %v1448_v35, 1  ;;  %v2749_v4 = vld [vmem:[%s14188_s0 + $0x1ce] sm:$0x1]  ;;  %v3342_v48 = vrot.slane %v2747_v15, 7  ;;  %v4978_v15 = vpop.f32.mrf.mxu3  ;;  %v1086_v32 = vpop.f32.mrf.mxu0 }
  0xe7   :  { %v2750_v12 = vld [vmem:[%s14188_s0 + $0x1d2] sm:$0x1]  ;;  %v9299_v38 = vsel %vm559_vm6, %v4637_v46, %v4636_v61  ;;  %v2036_v51 = vsel %vm547_vm2, %v2035_v11, %v2034_v58  ;;  %v2751_v13 = vld [vmem:[%s14188_s0 + $0x1d6] sm:$0x1]  ;;  %v2752_v50 = vld [vmem:[%s14188_s0 + $0x1da] sm:$0x1]  ;;  %6867 = vtanh.f32 %v1084_v21  ;;  %v2385_v1 = vadd.f32 %v8923_v26, %v2384_v44 }
  0xe8   :  { %14386 = vst [vmem:[#allocation56_spill] sm:$0xff] %v9299_v38  ;;  %v2753_v35 = vld [vmem:[%s14188_s0 + $0x1de] sm:$0x1]  ;;  %6757 = vmatmul.msk.f32.gmra.mxu3 %vm995_vm7, %v9299_v38  ;;  %v2038_v46 = vsel %vm550_vm3, %v2037_v40, %v2036_v51  ;;  %v3343_v19 = vsel %vm541_vm0, %v3342_v48, %v2746_v60  ;;  %v3344_v25 = vrot.slane %v2748_v24, 6  ;;  %v3346_v11 = vrot.slane %v2749_v4, 5 }
  0xe9   :  { %v138_v20 = vld [vmem:[%s14188_s0 + $0x1c4] sm:$0x1]  ;;  %v2040_v61 = vsel %vm553_vm4, %v2039_v45, %v2038_v46  ;;  %v3348_v58 = vrot.slane %v2750_v12, 4  ;;  %v3350_v21 = vrot.slane %v2751_v13, 3  ;;  %v3352_v53 = vrot.slane %v2752_v50, 2 }
  0xea   :  { %v137_v44 = vld [vmem:[%s14188_s0 + $0x1c0] sm:$0x1]  ;;  %v139_v60 = vld [vmem:[%s14188_s0 + $0x1c8] sm:$0x1]  ;;  %v2042_v40 = vsel %vm556_vm5, %v2041_v41, %v2040_v61  ;;  %v3345_v24 = vsel %vm544_vm1, %v3344_v25, %v3343_v19  ;;  %v3354_v4 = vrot.slane %v2753_v35, 1  ;;  %v5132_v48 = vsel %vm1240_vm8, %v5100_v33, 0.0 }
  0xeb   :  { %v140_v45 = vld [vmem:[%s14188_s0 + $0x1cc] sm:$0x1]  ;;  %v141_v12 = vld [vmem:[%s14188_s0 + $0x1d0] sm:$0x1]  ;;  %v9336_v51 = vsel %vm559_vm6, %v2043_v30, %v2042_v40  ;;  %v3347_v13 = vsel %vm547_vm2, %v3346_v11, %v3345_v24  ;;  %5133 = vadd.xlane.f32.xlu0 %v5132_v48  ;;  %6869 = vtanh.f32 %v2385_v1  ;;  %v4979_v41 = vadd.f32 %v8923_v26, %v4978_v15  ;;  %v142_v33 = vld [vmem:[%s14188_s0 + $0x1d4] sm:$0x1] }
  0xec   :  { %14387 = vst [vmem:[#allocation57_spill] sm:$0xff] %v9336_v51  ;;  %v143_v50 = vld [vmem:[%s14188_s0 + $0x1d8] sm:$0x1]  ;;  %v144_v35 = vld [vmem:[%s14188_s0 + $0x1dc] sm:$0x1]  ;;  %6693 = vmatmul.msk.f32.gmra.mxu1 %vm995_vm7, %v9336_v51  ;;  %v3349_v30 = vsel %vm550_vm3, %v3348_v58, %v3347_v13  ;;  %v743_v1 = vrot.slane %v138_v20, 7 }
  0xed   :  { %v745_v46 = vrot.slane %v139_v60, 6  ;;  %v747_v19 = vrot.slane %v140_v45, 5  ;;  %v9352_v25 = vpop.eup %6867  ;;  %v3351_v11 = vsel %vm553_vm4, %v3350_v21, %v3349_v30  ;;  %6871 = vtanh.f32 %v4979_v41  ;;  %v4043_v40 = vld [vmem:[%s14188_s0 + $0x1c3] sm:$0x1]  ;;  %v4044_v24 = vld [vmem:[%s14188_s0 + $0x1c7] sm:$0x1] }
  0xee   :  { %v749_v15 = vrot.slane %v141_v12, 4  ;;  %v751_v61 = vrot.slane %v142_v33, 3  ;;  %v4045_v20 = vld [vmem:[%s14188_s0 + $0x1cb] sm:$0x1]  ;;  %v3353_v58 = vsel %vm556_vm5, %v3352_v53, %v3351_v11  ;;  %v744_v60 = vsel %vm541_vm0, %v743_v1, %v137_v44  ;;  %v4046_v45 = vld [vmem:[%s14188_s0 + $0x1cf] sm:$0x1]  ;;  %v4981_v52 = vpop.f32.mrf.mxu3 }
  0xef   :  { %v753_v21 = vrot.slane %v143_v50, 2  ;;  %v755_v48 = vrot.slane %v144_v35, 1  ;;  %v4047_v12 = vld [vmem:[%s14188_s0 + $0x1d3] sm:$0x1]  ;;  %v9373_v13 = vsel %vm559_vm6, %v3354_v4, %v3353_v58  ;;  %v746_v41 = vsel %vm544_vm1, %v745_v46, %v744_v60  ;;  %v4048_v53 = vld [vmem:[%s14188_s0 + $0x1d7] sm:$0x1] }
  0xf0   :  { %14388 = vst [vmem:[#allocation58_spill] sm:$0xff] %v9373_v13  ;;  %v4049_v44 = vld [vmem:[%s14188_s0 + $0x1db] sm:$0x1]  ;;  %v4050_v33 = vld [vmem:[%s14188_s0 + $0x1df] sm:$0x1]  ;;  %v5101_v50 = vmul.f32 %v9241_v22, %v9155_v37  ;;  %v3804_v4 = vmul.f32 %v9224_v0, %v9155_v37  ;;  %6726 = vmatmul.msk.f32.gmra.mxu2 %vm995_vm7, %v9373_v13  ;;  %v748_v35 = vsel %vm547_vm2, %v747_v19, %v746_v41  ;;  %v4639_v30 = vrot.slane %v4044_v24, 7  ;;  %v2387_v22 = vpop.f32.mrf.mxu1  ;;  %v3681_v19 = vpop.f32.mrf.mxu2 }
  0xf1   :  { %v4641_v1 = vrot.slane %v4045_v20, 6  ;;  %v4643_v46 = vrot.slane %v4046_v45, 5  ;;  %v9392_v11 = vpop.eup %6869  ;;  %v750_v58 = vsel %vm550_vm3, %v749_v15, %v748_v35  ;;  %v4645_v60 = vrot.slane %v4047_v12, 4  ;;  %v1449_v24 = vld [vmem:[%s14188_s0 + $0x1c1] sm:$0x1] }
  0xf2   :  { %v4647_v38 = vrot.slane %v4048_v53, 3  ;;  %v4649_v51 = vrot.slane %v4049_v44, 2  ;;  %v752_v31 = vsel %vm553_vm4, %v751_v61, %v750_v58  ;;  %v4640_v0 = vsel %vm541_vm0, %v4639_v30, %v4043_v40  ;;  %v1450_v15 = vld [vmem:[%s14188_s0 + $0x1c5] sm:$0x1]  ;;  %v1451_v41 = vld [vmem:[%s14188_s0 + $0x1c9] sm:$0x1] }
  0xf3   :  { %v4651_v49 = vrot.slane %v4050_v33, 1  ;;  %v5135_v13 = vsel %vm1240_vm8, %v5101_v50, 0.0  ;;  %v9404_v20 = vpop.eup %6871  ;;  %v754_v45 = vsel %vm556_vm5, %v753_v21, %v752_v31  ;;  %v4642_v61 = vsel %vm544_vm1, %v4641_v1, %v4640_v0  ;;  %v1452_v53 = vld [vmem:[%s14188_s0 + $0x1cd] sm:$0x1]  ;;  %v1454_v33 = vld [vmem:[%s14188_s0 + $0x1d5] sm:$0x1] }
  0xf4   :  { %5136 = vadd.xlane.f32.xlu1 %v5135_v13  ;;  %v3838_v40 = vsel %vm1240_vm8, %v3804_v4, 0.0  ;;  %v1209_v12 = vmul.f32 %v9145_v8, %v9155_v37  ;;  %v9418_v44 = vsel %vm559_vm6, %v755_v48, %v754_v45  ;;  %v4644_v31 = vsel %vm547_vm2, %v4643_v46, %v4642_v61  ;;  %v1453_v8 = vld [vmem:[%s14188_s0 + $0x1d1] sm:$0x1]  ;;  %v1455_v48 = vld [vmem:[%s14188_s0 + $0x1d9] sm:$0x1] }
  0xf5   :  { %14389 = vst [vmem:[#allocation59_spill] sm:$0xff] %v9418_v44  ;;  %3839 = vadd.xlane.f32.xlu2 %v3838_v40  ;;  %v1087_v21 = vadd.f32 %v8923_v26, %v1086_v32  ;;  %v2388_v13 = vadd.f32 %v8923_v26, %v2387_v22  ;;  %6662 = vmatmul.msk.f32.gmra.mxu0 %vm995_vm7, %v9418_v44  ;;  %v1456_v35 = vld [vmem:[%s14188_s0 + $0x1dd] sm:$0x1]  ;;  %v2045_v30 = vrot.slane %v1450_v15, 7  ;;  %v2755_v1 = vld [vmem:[%s14188_s0 + $0x1e6] sm:$0x1] }
  0xf6   :  { %v4646_v50 = vsel %vm550_vm3, %v4645_v60, %v4644_v31  ;;  %v1244_v32 = vsel %vm1240_vm8, %v1209_v12, 0.0  ;;  %v3682_v4 = vadd.f32 %v8923_v26, %v3681_v19  ;;  %v2047_v58 = vrot.slane %v1451_v41, 6  ;;  %v2754_v60 = vld [vmem:[%s14188_s0 + $0x1e2] sm:$0x1]  ;;  %v2756_v0 = vld [vmem:[%s14188_s0 + $0x1ea] sm:$0x1] }
  0xf7   :  { %v4648_v46 = vsel %vm553_vm4, %v4647_v38, %v4646_v50  ;;  %1245 = vadd.xlane.f32.xlu0 %v1244_v32  ;;  %6873 = vtanh.f32 %v1087_v21  ;;  %v2049_v22 = vrot.slane %v1452_v53, 5  ;;  %v2757_v19 = vld [vmem:[%s14188_s0 + $0x1ee] sm:$0x1]  ;;  %v2046_v38 = vsel %vm541_vm0, %v2045_v30, %v1449_v24  ;;  %v2758_v61 = vld [vmem:[%s14188_s0 + $0x1f2] sm:$0x1] }
  0xf8   :  { %v4650_v15 = vsel %vm556_vm5, %v4649_v51, %v4648_v46  ;;  %6875 = vtanh.f32 %v2388_v13  ;;  %v2051_v45 = vrot.slane %v1453_v8, 4  ;;  %v2759_v40 = vld [vmem:[%s14188_s0 + $0x1f6] sm:$0x1]  ;;  %v2048_v41 = vsel %vm544_vm1, %v2047_v58, %v2046_v38  ;;  %v2760_v51 = vld [vmem:[%s14188_s0 + $0x1fa] sm:$0x1] }
  0xf9   :  { %v9462_v12 = vsel %vm559_vm6, %v4651_v49, %v4650_v15  ;;  %6877 = vtanh.f32 %v3682_v4  ;;  %v2053_v53 = vrot.slane %v1454_v33, 3  ;;  %v2761_v24 = vld [vmem:[%s14188_s0 + $0x1fe] sm:$0x1]  ;;  %v2050_v31 = vsel %vm547_vm2, %v2049_v22, %v2048_v41  ;;  %v146_v8 = vld [vmem:[%s14188_s0 + $0x1e4] sm:$0x1] }
  0xfa   :  { %14390 = vst [vmem:[#allocation60_spill] sm:$0xff] %v9462_v12  ;;  %6758 = vmatmul.msk.f32.gmra.mxu3 %vm995_vm7, %v9462_v12  ;;  %v2055_v21 = vrot.slane %v1455_v48, 2  ;;  %v2057_v49 = vrot.slane %v1456_v35, 1  ;;  %v3356_v13 = vrot.slane %v2755_v1, 7  ;;  %v2052_v33 = vsel %vm550_vm3, %v2051_v45, %v2050_v31  ;;  %v145_v30 = vld [vmem:[%s14188_s0 + $0x1e0] sm:$0x1] }
  0xfb   :  { %v3358_v50 = vrot.slane %v2756_v0, 6  ;;  %v3360_v32 = vrot.slane %v2757_v19, 5  ;;  %v3362_v4 = vrot.slane %v2758_v61, 4  ;;  %v147_v46 = vld [vmem:[%s14188_s0 + $0x1e8] sm:$0x1]  ;;  %v2054_v48 = vsel %vm553_vm4, %v2053_v53, %v2052_v33 }
  0xfc   :  { %v3357_v35 = vsel %vm541_vm0, %v3356_v13, %v2754_v60  ;;  %v3364_v1 = vrot.slane %v2759_v40, 3  ;;  %v3366_v58 = vrot.slane %v2760_v51, 2  ;;  %v148_v22 = vld [vmem:[%s14188_s0 + $0x1ec] sm:$0x1]  ;;  %v149_v0 = vld [vmem:[%s14188_s0 + $0x1f0] sm:$0x1]  ;;  %v2056_v15 = vsel %vm556_vm5, %v2055_v21, %v2054_v48 }
  0xfd   :  { %v9492_v19 = vpop.eup %6873  ;;  %v3359_v38 = vsel %vm544_vm1, %v3358_v50, %v3357_v35  ;;  %v3368_v45 = vrot.slane %v2761_v24, 1  ;;  %v5102_v60 = vmul.f32 %v9404_v20, %v9155_v37  ;;  %v150_v61 = vld [vmem:[%s14188_s0 + $0x1f4] sm:$0x1]  ;;  %v151_v40 = vld [vmem:[%s14188_s0 + $0x1f8] sm:$0x1]  ;;  %v9507_v53 = vsel %vm559_vm6, %v2057_v49, %v2056_v15 }
  0xfe   :  { %v9504_v41 = vpop.eup %6875  ;;  %14391 = vst [vmem:[#allocation61_spill] sm:$0xff] %v9507_v53  ;;  %v3361_v51 = vsel %vm547_vm2, %v3360_v32, %v3359_v38  ;;  %v152_v24 = vld [vmem:[%s14188_s0 + $0x1fc] sm:$0x1]  ;;  %v757_v20 = vrot.slane %v146_v8, 7  ;;  %v759_v31 = vrot.slane %v147_v46, 6  ;;  %6694 = vmatmul.msk.f32.gmra.mxu1 %vm995_vm7, %v9507_v53  ;;  %v761_v50 = vrot.slane %v148_v22, 5  ;;  %v3684_v46 = vpop.f32.mrf.mxu2 }
  0xff   :  { %v9513_v21 = vpop.eup %6877  ;;  %v3363_v13 = vsel %vm550_vm3, %v3362_v4, %v3361_v51  ;;  %v5138_v33 = vsel %vm1240_vm8, %v5102_v60, 0.0  ;;  %v763_v49 = vrot.slane %v149_v0, 4  ;;  %v4051_v32 = vld [vmem:[%s14188_s0 + $0x1e3] sm:$0x1]  ;;  %v4052_v8 = vld [vmem:[%s14188_s0 + $0x1e7] sm:$0x1] }
 0x100   :  { %v3365_v48 = vsel %vm553_vm4, %v3364_v1, %v3363_v13  ;;  %5139 = vadd.xlane.f32.xlu2 %v5138_v33  ;;  %v758_v35 = vsel %vm541_vm0, %v757_v20, %v145_v30  ;;  %v765_v15 = vrot.slane %v150_v61, 3  ;;  %v767_v4 = vrot.slane %v151_v40, 2  ;;  %v4053_v22 = vld [vmem:[%s14188_s0 + $0x1eb] sm:$0x1]  ;;  %v4054_v0 = vld [vmem:[%s14188_s0 + $0x1ef] sm:$0x1] }
 0x101   :  { %v3367_v38 = vsel %vm556_vm5, %v3366_v58, %v3365_v48  ;;  %v760_v60 = vsel %vm544_vm1, %v759_v31, %v758_v35  ;;  %v769_v51 = vrot.slane %v152_v24, 1  ;;  %v1210_v1 = vmul.f32 %v9352_v25, %v9155_v37  ;;  %v4055_v30 = vld [vmem:[%s14188_s0 + $0x1f3] sm:$0x1]  ;;  %v4056_v61 = vld [vmem:[%s14188_s0 + $0x1f7] sm:$0x1] }
 0x102   :  { %v9544_v40 = vsel %vm559_vm6, %v3368_v45, %v3367_v38  ;;  %v762_v20 = vsel %vm547_vm2, %v761_v50, %v760_v60  ;;  %v4057_v58 = vld [vmem:[%s14188_s0 + $0x1fb] sm:$0x1]  ;;  %v4058_v25 = vld [vmem:[%s14188_s0 + $0x1ff] sm:$0x1]  ;;  %v4653_v24 = vrot.slane %v4052_v8, 7  ;;  %v4655_v31 = vrot.slane %v4053_v22, 6  ;;  %v1089_v50 = vpop.f32.mrf.mxu0 }
 0x103   :  { %14392 = vst [vmem:[#allocation62_spill] sm:$0xff] %v9544_v40  ;;  %6727 = vmatmul.msk.f32.gmra.mxu2 %vm995_vm7, %v9544_v40  ;;  %v764_v13 = vsel %vm550_vm3, %v763_v49, %v762_v20  ;;  %v1247_v45 = vsel %vm1240_vm8, %v1210_v1, 0.0  ;;  %v4657_v33 = vrot.slane %v4054_v0, 5  ;;  %v4659_v48 = vrot.slane %v4055_v30, 4  ;;  %v1458_v8 = vld [vmem:[%s14188_s0 + $0x1e5] sm:$0x1] }
 0x104   :  { %v766_v35 = vsel %vm553_vm4, %v765_v15, %v764_v13  ;;  %1248 = vadd.xlane.f32.xlu1 %v1247_v45  ;;  %v4654_v38 = vsel %vm541_vm0, %v4653_v24, %v4051_v32  ;;  %v4661_v60 = vrot.slane %v4056_v61, 3  ;;  %v4663_v12 = vrot.slane %v4057_v58, 2  ;;  %v1459_v15 = vld [vmem:[%s14188_s0 + $0x1e9] sm:$0x1]  ;;  %v1460_v32 = vld [vmem:[%s14188_s0 + $0x1ed] sm:$0x1] }
 0x105   :  { %v768_v22 = vsel %vm556_vm5, %v767_v4, %v766_v35  ;;  %v4656_v49 = vsel %vm544_vm1, %v4655_v31, %v4654_v38  ;;  %v4665_v1 = vrot.slane %v4058_v25, 1  ;;  %v2507_v0 = vmul.f32 %v9186_v9, %v9155_v37  ;;  %v1457_v9 = vld [vmem:[%s14188_s0 + $0x1e1] sm:$0x1]  ;;  %v1461_v58 = vld [vmem:[%s14188_s0 + $0x1f1] sm:$0x1] }
 0x106   :  { %v9573_v30 = vsel %vm559_vm6, %v769_v51, %v768_v22  ;;  %v4658_v61 = vsel %vm547_vm2, %v4657_v33, %v4656_v49  ;;  %v1090_v4 = vadd.f32 %v8923_v26, %v1089_v50  ;;  %v3685_v20 = vadd.f32 %v8923_v26, %v3684_v46  ;;  %v1462_v46 = vld [vmem:[%s14188_s0 + $0x1f5] sm:$0x1]  ;;  %v1463_v45 = vld [vmem:[%s14188_s0 + $0x1f9] sm:$0x1]  ;;  %v1464_v33 = vld [vmem:[%s14188_s0 + $0x1fd] sm:$0x1] }
 0x107   :  { %14393 = vst [vmem:[#allocation63_spill] sm:$0xff] %v9573_v30  ;;  %6663 = vmatmul.msk.f32.gmra.mxu0 %vm995_vm7, %v9573_v30  ;;  %v4660_v51 = vsel %vm550_vm3, %v4659_v48, %v4658_v61  ;;  %v2541_v25 = vsel %vm1240_vm8, %v2507_v0, 0.0  ;;  %v4982_v24 = vadd.f32 %v8923_v26, %v4981_v52  ;;  %v2059_v31 = vrot.slane %v1458_v8, 7  ;;  %v3687_v8 = vpop.f32.mrf.mxu2  ;;  %v2390_v0 = vpop.f32.mrf.mxu1  ;;  %v2765_v40 = vld [vmem:[%s14188_s0 + $0x20e] sm:$0x1] }
 0x108   :  { %v4662_v13 = vsel %vm553_vm4, %v4661_v60, %v4660_v51  ;;  %2542 = vadd.xlane.f32.xlu0 %v2541_v25  ;;  %6879 = vtanh.f32 %v1090_v4  ;;  %v2061_v48 = vrot.slane %v1459_v15, 6  ;;  %v2063_v50 = vrot.slane %v1460_v32, 5  ;;  %v153_v15 = vld [vmem:[%s14188_s0 + $0x200] sm:$0x1]  ;;  %v155_v32 = vld [vmem:[%s14188_s0 + $0x208] sm:$0x1] }
 0x109   :  { %v4664_v52 = vsel %vm556_vm5, %v4663_v12, %v4662_v13  ;;  %6881 = vtanh.f32 %v3685_v20  ;;  %v2060_v35 = vsel %vm541_vm0, %v2059_v31, %v1457_v9  ;;  %v2065_v38 = vrot.slane %v1461_v58, 4  ;;  %v154_v12 = vld [vmem:[%s14188_s0 + $0x204] sm:$0x1]  ;;  %v156_v9 = vld [vmem:[%s14188_s0 + $0x20c] sm:$0x1] }
 0x10a   :  { %v9602_v60 = vsel %vm559_vm6, %v4665_v1, %v4664_v52  ;;  %6883 = vtanh.f32 %v4982_v24  ;;  %v2062_v22 = vsel %vm544_vm1, %v2061_v48, %v2060_v35  ;;  %v2067_v49 = vrot.slane %v1462_v46, 3  ;;  %v157_v58 = vld [vmem:[%s14188_s0 + $0x210] sm:$0x1]  ;;  %v158_v51 = vld [vmem:[%s14188_s0 + $0x214] sm:$0x1] }
 0x10b   :  { %14394 = vst [vmem:[#allocation64_spill] sm:$0xff] %v9602_v60  ;;  %6759 = vmatmul.msk.f32.gmra.mxu3 %vm995_vm7, %v9602_v60  ;;  %v2064_v1 = vsel %vm547_vm2, %v2063_v50, %v2062_v22  ;;  %v2069_v61 = vrot.slane %v1463_v45, 2  ;;  %v2071_v4 = vrot.slane %v1464_v33, 1  ;;  %v2509_v20 = vmul.f32 %v9504_v41, %v9155_v37  ;;  %v9631_v25 = vld [vmem:[%s14188_s0 + $0x218] sm:$0x1] }
 0x10c   :  { %v2066_v24 = vsel %vm550_vm3, %v2065_v38, %v2064_v1  ;;  %v2508_v41 = vmul.f32 %v9392_v11, %v9155_v37  ;;  %v3805_v46 = vmul.f32 %v9513_v21, %v9155_v37  ;;  %v3688_v31 = vadd.f32 %v8923_v26, %v3687_v8  ;;  %v9642_v13 = vld [vmem:[%s14188_s0 + $0x21c] sm:$0x1]  ;;  %v1466_v45 = vld [vmem:[%s14188_s0 + $0x205] sm:$0x1]  ;;  %v1467_v33 = vld [vmem:[%s14188_s0 + $0x209] sm:$0x1] }
 0x10d   :  { %v2068_v11 = vsel %vm553_vm4, %v2067_v49, %v2066_v24  ;;  %v2547_v48 = vsel %vm1240_vm8, %v2509_v20, 0.0  ;;  %v9655_v26 = vld [vmem:[%s14189_s2] ss:$0 sm:$0xff]  ;;  %v771_v50 = vrot.slane %v154_v12, 7  ;;  %v1468_v52 = vld [vmem:[%s14188_s0 + $0x20d] sm:$0x1] }
 0x10e   :  { %v2391_v21 = vadd.f32 %v9655_v26, %v2390_v0  ;;  %v1469_v35 = vld [vmem:[%s14188_s0 + $0x211] sm:$0x1]  ;;  %v9664_v38 = vpop.eup %6879  ;;  %v2070_v8 = vsel %vm556_vm5, %v2069_v61, %v2068_v11  ;;  %2548 = vadd.xlane.f32.xlu2 %v2547_v48  ;;  %v2544_v22 = vsel %vm1240_vm8, %v2508_v41, 0.0  ;;  %v3841_v49 = vsel %vm1240_vm8, %v3805_v46, 0.0  ;;  %v1465_v0 = vld [vmem:[%s14188_s0 + $0x201] sm:$0x1] }
 0x10f   :  { %6885 = vtanh.f32 %v3688_v31  ;;  %v1470_v12 = vld [vmem:[%s14188_s0 + $0x215] sm:$0x1]  ;;  %v9678_v1 = vld [vmem:[%s14188_s0 + $0x219] sm:$0x1]  ;;  %v9680_v61 = vpop.eup %6881  ;;  %v9683_v20 = vsel %vm559_vm6, %v2071_v4, %v2070_v8  ;;  %2545 = vadd.xlane.f32.xlu1 %v2544_v22  ;;  %v772_v24 = vsel %vm541_vm0, %v771_v50, %v153_v15  ;;  %v773_v41 = vrot.slane %v155_v32, 6 }
 0x110   :  { %14395 = vst [vmem:[#allocation65_spill] sm:$0xff] %v9683_v20  ;;  %6887 = vtanh.f32 %v2391_v21  ;;  %v1472_v46 = vld [vmem:[%s14188_s0 + $0x21d] sm:$0x1]  ;;  %v2763_v31 = vld [vmem:[%s14188_s0 + $0x206] sm:$0x1]  ;;  %v9692_v11 = vpop.eup %6883  ;;  %6695 = vmatmul.msk.f32.gmra.mxu1 %vm995_vm7, %v9683_v20  ;;  %3842 = vadd.xlane.f32.xlu0 %v3841_v49  ;;  %v775_v4 = vrot.slane %v156_v9, 5  ;;  %v1092_v20 = vpop.f32.mrf.mxu0 }
 0x111   :  { %v777_v48 = vrot.slane %v157_v58, 4  ;;  %v779_v21 = vrot.slane %v158_v51, 3  ;;  %v781_v15 = vrot.slane %v9631_v25, 2  ;;  %v2764_v32 = vld [vmem:[%s14188_s0 + $0x20a] sm:$0x1]  ;;  %v774_v50 = vsel %vm544_vm1, %v773_v41, %v772_v24 }
 0x112   :  { %v783_v8 = vrot.slane %v9642_v13, 1  ;;  %v2073_v22 = vrot.slane %v1466_v45, 7  ;;  %v2075_v60 = vrot.slane %v1467_v33, 6  ;;  %v776_v9 = vsel %vm547_vm2, %v775_v4, %v774_v50  ;;  %v2766_v25 = vld [vmem:[%s14188_s0 + $0x212] sm:$0x1] }
 0x113   :  { %v2077_v58 = vrot.slane %v1468_v52, 5  ;;  %v2079_v51 = vrot.slane %v1469_v35, 4  ;;  %v2081_v49 = vrot.slane %v1470_v12, 3  ;;  %v778_v47 = vsel %vm550_vm3, %v777_v48, %v776_v9  ;;  %v2762_v33 = vld [vmem:[%s14188_s0 + $0x202] sm:$0x1] }
 0x114   :  { %v2074_v24 = vsel %vm541_vm0, %v2073_v22, %v1465_v0  ;;  %v2083_v13 = vrot.slane %v9678_v1, 2  ;;  %v2085_v45 = vrot.slane %v1472_v46, 1  ;;  %v2767_v52 = vld [vmem:[%s14188_s0 + $0x216] sm:$0x1]  ;;  %v780_v12 = vsel %vm553_vm4, %v779_v21, %v778_v47  ;;  %v2768_v0 = vld [vmem:[%s14188_s0 + $0x21a] sm:$0x1] }
 0x115   :  { %v9718_v35 = vpop.eup %6885  ;;  %v2076_v41 = vsel %vm544_vm1, %v2075_v60, %v2074_v24  ;;  %v2769_v1 = vld [vmem:[%s14188_s0 + $0x21e] sm:$0x1]  ;;  %v3370_v46 = vrot.slane %v2763_v31, 7  ;;  %v3372_v4 = vrot.slane %v2764_v32, 6  ;;  %v782_v50 = vsel %vm556_vm5, %v781_v15, %v780_v12  ;;  %v4059_v60 = vld [vmem:[%s14188_s0 + $0x203] sm:$0x1] }
 0x116   :  { %v9728_v48 = vpop.eup %6887  ;;  %v2078_v22 = vsel %vm547_vm2, %v2077_v58, %v2076_v41  ;;  %v3374_v9 = vrot.slane %v2765_v40, 5  ;;  %v3376_v47 = vrot.slane %v2766_v25, 4  ;;  %v4060_v21 = vld [vmem:[%s14188_s0 + $0x207] sm:$0x1]  ;;  %v4061_v31 = vld [vmem:[%s14188_s0 + $0x20b] sm:$0x1]  ;;  %v9742_v32 = vsel %vm559_vm6, %v783_v8, %v782_v50 }
 0x117   :  { %14396 = vst [vmem:[#allocation66_spill] sm:$0xff] %v9742_v32  ;;  %v2080_v15 = vsel %vm550_vm3, %v2079_v51, %v2078_v22  ;;  %v3371_v40 = vsel %vm541_vm0, %v3370_v46, %v2762_v33  ;;  %v3378_v58 = vrot.slane %v2767_v52, 3  ;;  %v4062_v25 = vld [vmem:[%s14188_s0 + $0x20f] sm:$0x1]  ;;  %v4063_v24 = vld [vmem:[%s14188_s0 + $0x213] sm:$0x1]  ;;  %6664 = vmatmul.msk.f32.gmra.mxu0 %vm995_vm7, %v9742_v32  ;;  %v4984_v46 = vpop.f32.mrf.mxu3 }
 0x118   :  { %v2082_v12 = vsel %vm553_vm4, %v2081_v49, %v2080_v15  ;;  %v3373_v8 = vsel %vm544_vm1, %v3372_v4, %v3371_v40  ;;  %v3380_v41 = vrot.slane %v2768_v0, 2  ;;  %v3382_v51 = vrot.slane %v2769_v1, 1  ;;  %v4064_v33 = vld [vmem:[%s14188_s0 + $0x217] sm:$0x1]  ;;  %v4065_v52 = vld [vmem:[%s14188_s0 + $0x21b] sm:$0x1] }
 0x119   :  { %v2084_v50 = vsel %vm556_vm5, %v2083_v13, %v2082_v12  ;;  %v3375_v22 = vsel %vm547_vm2, %v3374_v9, %v3373_v8  ;;  %v4066_v49 = vld [vmem:[%s14188_s0 + $0x21f] sm:$0x1]  ;;  %v4667_v4 = vrot.slane %v4060_v21, 7  ;;  %v4669_v0 = vrot.slane %v4061_v31, 6  ;;  %v1525_v44 = vld [vmem:[%s14188_s0 + $0x2f1] sm:$0x1] }
 0x11a   :  { %v9768_v1 = vsel %vm559_vm6, %v2085_v45, %v2084_v50  ;;  %v3377_v15 = vsel %vm550_vm3, %v3376_v47, %v3375_v22  ;;  %v4671_v40 = vrot.slane %v4062_v25, 5  ;;  %v4673_v32 = vrot.slane %v4063_v24, 4  ;;  %v3690_v25 = vpop.f32.mrf.mxu2  ;;  %v4143_v56 = vld [vmem:[%s14188_s0 + $0x353] sm:$0x1] }
 0x11b   :  { %14397 = vst [vmem:[#allocation67_spill] sm:$0xff] %v9768_v1  ;;  %6696 = vmatmul.msk.f32.gmra.mxu1 %vm995_vm7, %v9768_v1  ;;  %v3379_v13 = vsel %vm553_vm4, %v3378_v58, %v3377_v15  ;;  %v4668_v9 = vsel %vm541_vm0, %v4667_v4, %v4059_v60  ;;  %v4675_v12 = vrot.slane %v4064_v33, 3  ;;  %v4677_v8 = vrot.slane %v4065_v52, 2  ;;  %v2770_v52 = vld [vmem:[%s14188_s0 + $0x222] sm:$0x1] }
 0x11c   :  { %v3381_v21 = vsel %vm556_vm5, %v3380_v41, %v3379_v13  ;;  %v4670_v31 = vsel %vm544_vm1, %v4669_v0, %v4668_v9  ;;  %v4679_v45 = vrot.slane %v4066_v49, 1  ;;  %v1212_v47 = vmul.f32 %v9664_v38, %v9155_v37  ;;  %v2773_v49 = vld [vmem:[%s14188_s0 + $0x22e] sm:$0x1]  ;;  %v2774_v4 = vld [vmem:[%s14188_s0 + $0x232] sm:$0x1] }
 0x11d   :  { %v9780_v24 = vsel %vm559_vm6, %v3382_v51, %v3381_v21  ;;  %v4672_v50 = vsel %vm547_vm2, %v4671_v40, %v4670_v31  ;;  %v1211_v58 = vmul.f32 %v9492_v19, %v9155_v37  ;;  %v5103_v60 = vmul.f32 %v9692_v11, %v9155_v37  ;;  %v2771_v19 = vld [vmem:[%s14188_s0 + $0x226] sm:$0x1]  ;;  %v2772_v11 = vld [vmem:[%s14188_s0 + $0x22a] sm:$0x1]  ;;  %v2775_v13 = vld [vmem:[%s14188_s0 + $0x236] sm:$0x1]  ;;  %v2393_v31 = vpop.f32.mrf.mxu1 }
 0x11e   :  { %14398 = vst [vmem:[#allocation68_spill] sm:$0xff] %v9780_v24  ;;  %6728 = vmatmul.msk.f32.gmra.mxu2 %vm995_vm7, %v9780_v24  ;;  %v4674_v41 = vsel %vm550_vm3, %v4673_v32, %v4672_v50  ;;  %v1253_v33 = vsel %vm1240_vm8, %v1212_v47, 0.0  ;;  %v1093_v38 = vadd.f32 %v9655_v26, %v1092_v20  ;;  %v4985_v51 = vadd.f32 %v9655_v26, %v4984_v46  ;;  %v2776_v9 = vld [vmem:[%s14188_s0 + $0x23a] sm:$0x1]  ;;  %v163_v47 = vld [vmem:[%s14188_s0 + $0x228] sm:$0x1] }
 0x11f   :  { %v4676_v32 = vsel %vm553_vm4, %v4675_v12, %v4674_v41  ;;  %1254 = vadd.xlane.f32.xlu2 %v1253_v33  ;;  %v1250_v22 = vsel %vm1240_vm8, %v1211_v58, 0.0  ;;  %v5141_v20 = vsel %vm1240_vm8, %v5103_v60, 0.0  ;;  %v3691_v46 = vadd.f32 %v9655_v26, %v3690_v25  ;;  %v2777_v12 = vld [vmem:[%s14188_s0 + $0x23e] sm:$0x1]  ;;  %v4987_v58 = vpop.f32.mrf.mxu3  ;;  %v1095_v60 = vpop.f32.mrf.mxu0  ;;  %v161_v41 = vld [vmem:[%s14188_s0 + $0x220] sm:$0x1] }
 0x120   :  { %v4678_v0 = vsel %vm556_vm5, %v4677_v8, %v4676_v32  ;;  %1251 = vadd.xlane.f32.xlu1 %v1250_v22  ;;  %5142 = vadd.xlane.f32.xlu0 %v5141_v20  ;;  %6889 = vtanh.f32 %v1093_v38  ;;  %v3807_v15 = vmul.f32 %v9718_v35, %v9155_v37  ;;  %v3806_v40 = vmul.f32 %v9680_v61, %v9155_v37  ;;  %v162_v61 = vld [vmem:[%s14188_s0 + $0x224] sm:$0x1]  ;;  %v164_v33 = vld [vmem:[%s14188_s0 + $0x22c] sm:$0x1]  ;;  %v165_v32 = vld [vmem:[%s14188_s0 + $0x230] sm:$0x1] }
 0x121   :  { %v9827_v8 = vsel %vm559_vm6, %v4679_v45, %v4678_v0  ;;  %6891 = vtanh.f32 %v4985_v51  ;;  %v3384_v35 = vrot.slane %v2771_v19, 7  ;;  %v3386_v21 = vrot.slane %v2772_v11, 6  ;;  %v166_v0 = vld [vmem:[%s14188_s0 + $0x234] sm:$0x1] }
 0x122   :  { %14399 = vst [vmem:[#allocation69_spill] sm:$0xff] %v9827_v8  ;;  %6760 = vmatmul.msk.f32.gmra.mxu3 %vm995_vm7, %v9827_v8  ;;  %6893 = vtanh.f32 %v3691_v46  ;;  %v3847_v25 = vsel %vm1240_vm8, %v3807_v15, 0.0  ;;  %v3844_v45 = vsel %vm1240_vm8, %v3806_v40, 0.0  ;;  %v3388_v50 = vrot.slane %v2773_v49, 5  ;;  %v4073_v8 = vld [vmem:[%s14188_s0 + $0x23b] sm:$0x1] }
 0x123   :  { %v3385_v38 = vsel %vm541_vm0, %v3384_v35, %v2770_v52  ;;  %v3390_v51 = vrot.slane %v2774_v4, 4  ;;  %v3392_v19 = vrot.slane %v2775_v13, 3  ;;  %v3394_v11 = vrot.slane %v2776_v9, 2  ;;  %v167_v52 = vld [vmem:[%s14188_s0 + $0x238] sm:$0x1] }
 0x124   :  { %v3387_v22 = vsel %vm544_vm1, %v3386_v21, %v3385_v38  ;;  %v3396_v20 = vrot.slane %v2777_v12, 1  ;;  %v2510_v46 = vmul.f32 %v9728_v48, %v9155_v37  ;;  %v2394_v49 = vadd.f32 %v9655_v26, %v2393_v31  ;;  %v168_v37 = vld [vmem:[%s14188_s0 + $0x23c] sm:$0x1]  ;;  %v1474_v13 = vld [vmem:[%s14188_s0 + $0x225] sm:$0x1] }
 0x125   :  { %v3389_v4 = vsel %vm547_vm2, %v3388_v50, %v3387_v22  ;;  %v4988_v15 = vadd.f32 %v9655_v26, %v4987_v58  ;;  %v1096_v40 = vadd.f32 %v9655_v26, %v1095_v60  ;;  %v785_v48 = vrot.slane %v162_v61, 7  ;;  %v1475_v9 = vld [vmem:[%s14188_s0 + $0x229] sm:$0x1]  ;;  %v1476_v61 = vld [vmem:[%s14188_s0 + $0x22d] sm:$0x1]  ;;  %v2396_v24 = vpop.f32.mrf.mxu1 }
 0x126   :  { %v9871_v12 = vpop.eup %6889  ;;  %v3391_v35 = vsel %vm550_vm3, %v3390_v51, %v3389_v4  ;;  %v2550_v21 = vsel %vm1240_vm8, %v2510_v46, 0.0  ;;  %6895 = vtanh.f32 %v2394_v49  ;;  %v787_v31 = vrot.slane %v163_v47, 6  ;;  %v1477_v50 = vld [vmem:[%s14188_s0 + $0x231] sm:$0x1]  ;;  %v1473_v47 = vld [vmem:[%s14188_s0 + $0x221] sm:$0x1] }
 0x127   :  { %v9881_v58 = vpop.eup %6891  ;;  %3848 = vadd.xlane.f32.xlu2 %v3847_v25  ;;  %v3393_v60 = vsel %vm553_vm4, %v3392_v19, %v3391_v35  ;;  %6897 = vtanh.f32 %v4988_v15  ;;  %v786_v38 = vsel %vm541_vm0, %v785_v48, %v161_v41  ;;  %v789_v51 = vrot.slane %v164_v33, 5  ;;  %v1478_v22 = vld [vmem:[%s14188_s0 + $0x235] sm:$0x1]  ;;  %v1479_v46 = vld [vmem:[%s14188_s0 + $0x239] sm:$0x1] }
 0x128   :  { %v6894_v49 = vpop.eup %6893  ;;  %3845 = vadd.xlane.f32.xlu1 %v3844_v45  ;;  %v3395_v25 = vsel %vm556_vm5, %v3394_v11, %v3393_v60  ;;  %2551 = vadd.xlane.f32.xlu0 %v2550_v21  ;;  %6899 = vtanh.f32 %v1096_v40  ;;  %v788_v41 = vsel %vm544_vm1, %v787_v31, %v786_v38  ;;  %v791_v33 = vrot.slane %v165_v32, 4  ;;  %v1480_v19 = vld [vmem:[%s14188_s0 + $0x23d] sm:$0x1]  ;;  %v4068_v4 = vld [vmem:[%s14188_s0 + $0x227] sm:$0x1] }
 0x129   :  { %v9903_v15 = vsel %vm559_vm6, %v3396_v20, %v3395_v25  ;;  %v790_v45 = vsel %vm547_vm2, %v789_v51, %v788_v41  ;;  %v793_v48 = vrot.slane %v166_v0, 3  ;;  %v795_v11 = vrot.slane %v167_v52, 2  ;;  %v4069_v40 = vld [vmem:[%s14188_s0 + $0x22b] sm:$0x1]  ;;  %v4070_v32 = vld [vmem:[%s14188_s0 + $0x22f] sm:$0x1] }
 0x12a   :  { %14400 = vst [vmem:[#allocation70_spill] sm:$0xff] %v9903_v15  ;;  %6729 = vmatmul.msk.f32.gmra.mxu2 %vm995_vm7, %v9903_v15  ;;  %v792_v35 = vsel %vm550_vm3, %v791_v33, %v790_v45  ;;  %v797_v21 = vrot.slane %v168_v37, 1  ;;  %v2087_v20 = vrot.slane %v1474_v13, 7  ;;  %v2089_v31 = vrot.slane %v1475_v9, 6  ;;  %v4067_v0 = vld [vmem:[%s14188_s0 + $0x223] sm:$0x1] }
 0x12b   :  { %v4071_v52 = vld [vmem:[%s14188_s0 + $0x233] sm:$0x1]  ;;  %v794_v60 = vsel %vm553_vm4, %v793_v48, %v792_v35  ;;  %v2091_v38 = vrot.slane %v1476_v61, 5  ;;  %v2093_v51 = vrot.slane %v1477_v50, 4  ;;  %v2095_v25 = vrot.slane %v1478_v22, 3 }
 0x12c   :  { %v4072_v41 = vld [vmem:[%s14188_s0 + $0x237] sm:$0x1]  ;;  %v9925_v37 = vpop.eup %6895  ;;  %v796_v13 = vsel %vm556_vm5, %v795_v11, %v794_v60  ;;  %v2088_v9 = vsel %vm541_vm0, %v2087_v20, %v1473_v47  ;;  %v2097_v33 = vrot.slane %v1479_v46, 2  ;;  %v2099_v45 = vrot.slane %v1480_v19, 1  ;;  %v4074_v61 = vld [vmem:[%s14188_s0 + $0x23f] sm:$0x1] }
 0x12d   :  { %v9935_v50 = vpop.eup %6897  ;;  %v9938_v22 = vsel %vm559_vm6, %v797_v21, %v796_v13  ;;  %v2090_v48 = vsel %vm544_vm1, %v2089_v31, %v2088_v9  ;;  %v4681_v11 = vrot.slane %v4068_v4, 7  ;;  %v4683_v35 = vrot.slane %v4069_v40, 6  ;;  %v9953_v31 = vld [vmem:[%s14190_s3] ss:$0 sm:$0xff]  ;;  %v172_v9 = vld [vmem:[%s14188_s0 + $0x24c] sm:$0x1] }
 0x12e   :  { %14401 = vst [vmem:[#allocation71_spill] sm:$0xff] %v9938_v22  ;;  %v9941_v47 = vpop.eup %6899  ;;  %6665 = vmatmul.msk.f32.gmra.mxu0 %vm995_vm7, %v9938_v22  ;;  %v2092_v46 = vsel %vm547_vm2, %v2091_v38, %v2090_v48  ;;  %v4685_v19 = vrot.slane %v4070_v32, 5  ;;  %v4687_v20 = vrot.slane %v4071_v52, 4  ;;  %v4689_v60 = vrot.slane %v4072_v41, 3  ;;  %v3693_v38 = vpop.f32.mrf.mxu2 }
 0x12f   :  { %v2094_v1 = vsel %vm550_vm3, %v2093_v51, %v2092_v46  ;;  %v4682_v21 = vsel %vm541_vm0, %v4681_v11, %v4067_v0  ;;  %v4691_v13 = vrot.slane %v4073_v8, 2  ;;  %v4693_v15 = vrot.slane %v4074_v61, 1  ;;  %v170_v8 = vld [vmem:[%s14188_s0 + $0x244] sm:$0x1]  ;;  %v4990_v41 = vpop.f32.mrf.mxu3  ;;  %v174_v11 = vld [vmem:[%s14188_s0 + $0x254] sm:$0x1] }
 0x130   :  { %v2096_v4 = vsel %vm553_vm4, %v2095_v25, %v2094_v1  ;;  %v4684_v40 = vsel %vm544_vm1, %v4683_v35, %v4682_v21  ;;  %v1213_v32 = vmul.f32 %v9953_v31, %v9871_v12  ;;  %v5104_v52 = vmul.f32 %v9953_v31, %v9881_v58  ;;  %v169_v12 = vld [vmem:[%s14188_s0 + $0x240] sm:$0x1]  ;;  %v171_v58 = vld [vmem:[%s14188_s0 + $0x248] sm:$0x1]  ;;  %v175_v35 = vld [vmem:[%s14188_s0 + $0x258] sm:$0x1] }
 0x131   :  { %v2098_v1 = vsel %vm556_vm5, %v2097_v33, %v2096_v4  ;;  %v4686_v0 = vsel %vm547_vm2, %v4685_v19, %v4684_v40  ;;  %v3808_v51 = vmul.f32 %v9953_v31, %v6894_v49  ;;  %v2397_v25 = vadd.f32 %v9655_v26, %v2396_v24  ;;  %v173_v33 = vld [vmem:[%s14188_s0 + $0x250] sm:$0x1]  ;;  %v2779_v21 = vld [vmem:[%s14188_s0 + $0x246] sm:$0x1] }
 0x132   :  { %v9979_v49 = vsel %vm559_vm6, %v2099_v45, %v2098_v1  ;;  %v4688_v24 = vsel %vm550_vm3, %v4687_v20, %v4686_v0  ;;  %v1256_v61 = vsel %vm1240_vm8, %v1213_v32, 0.0  ;;  %v5144_v48 = vsel %vm1240_vm8, %v5104_v52, 0.0  ;;  %v176_v20 = vld [vmem:[%s14188_s0 + $0x25c] sm:$0x1]  ;;  %v2778_v52 = vld [vmem:[%s14188_s0 + $0x242] sm:$0x1] }
 0x133   :  { %14402 = vst [vmem:[#allocation72_spill] sm:$0xff] %v9979_v49  ;;  %6697 = vmatmul.msk.f32.gmra.mxu1 %vm995_vm7, %v9979_v49  ;;  %v4690_v45 = vsel %vm553_vm4, %v4689_v60, %v4688_v24  ;;  %1257 = vadd.xlane.f32.xlu2 %v1256_v61  ;;  %v3850_v46 = vsel %vm1240_vm8, %v3808_v51, 0.0  ;;  %6901 = vtanh.f32 %v2397_v25  ;;  %v3694_v19 = vadd.f32 %v9655_v26, %v3693_v38  ;;  %v2780_v38 = vld [vmem:[%s14188_s0 + $0x24a] sm:$0x1]  ;;  %v2781_v1 = vld [vmem:[%s14188_s0 + $0x24e] sm:$0x1] }
 0x134   :  { %v4692_v4 = vsel %vm556_vm5, %v4691_v13, %v4690_v45  ;;  %5145 = vadd.xlane.f32.xlu1 %v5144_v48  ;;  %3851 = vadd.xlane.f32.xlu0 %v3850_v46  ;;  %v4991_v60 = vadd.f32 %v9655_v26, %v4990_v41  ;;  %v799_v40 = vrot.slane %v170_v8, 7  ;;  %v801_v32 = vrot.slane %v171_v58, 6  ;;  %v2782_v8 = vld [vmem:[%s14188_s0 + $0x252] sm:$0x1]  ;;  %v2783_v25 = vld [vmem:[%s14188_s0 + $0x256] sm:$0x1] }
 0x135   :  { %v10013_v13 = vsel %vm559_vm6, %v4693_v15, %v4692_v4  ;;  %6903 = vtanh.f32 %v3694_v19  ;;  %v803_v0 = vrot.slane %v172_v9, 5  ;;  %v805_v51 = vrot.slane %v173_v33, 4  ;;  %v2784_v9 = vld [vmem:[%s14188_s0 + $0x25a] sm:$0x1]  ;;  %v2785_v33 = vld [vmem:[%s14188_s0 + $0x25e] sm:$0x1] }
 0x136   :  { %14403 = vst [vmem:[#allocation73_spill] sm:$0xff] %v10013_v13  ;;  %6761 = vmatmul.msk.f32.gmra.mxu3 %vm995_vm7, %v10013_v13  ;;  %6905 = vtanh.f32 %v4991_v60  ;;  %v800_v41 = vsel %vm541_vm0, %v799_v40, %v169_v12  ;;  %v807_v58 = vrot.slane %v174_v11, 3  ;;  %v809_v15 = vrot.slane %v175_v35, 2  ;;  %v4076_v46 = vld [vmem:[%s14188_s0 + $0x247] sm:$0x1] }
 0x137   :  { %v802_v24 = vsel %vm544_vm1, %v801_v32, %v800_v41  ;;  %v811_v61 = vrot.slane %v176_v20, 1  ;;  %v3398_v48 = vrot.slane %v2779_v21, 7  ;;  %v3400_v45 = vrot.slane %v2780_v38, 6  ;;  %v4077_v4 = vld [vmem:[%s14188_s0 + $0x24b] sm:$0x1]  ;;  %v1098_v38 = vpop.f32.mrf.mxu0 }
 0x138   :  { %v804_v12 = vsel %vm547_vm2, %v803_v0, %v802_v24  ;;  %v3402_v11 = vrot.slane %v2781_v1, 5  ;;  %v3404_v35 = vrot.slane %v2782_v8, 4  ;;  %v3406_v19 = vrot.slane %v2783_v25, 3  ;;  %v4075_v25 = vld [vmem:[%s14188_s0 + $0x243] sm:$0x1] }
 0x139   :  { %v10038_v60 = vpop.eup %6901  ;;  %v806_v40 = vsel %vm550_vm3, %v805_v51, %v804_v12  ;;  %v3399_v20 = vsel %vm541_vm0, %v3398_v48, %v2778_v52  ;;  %v3408_v21 = vrot.slane %v2784_v9, 2  ;;  %v3410_v32 = vrot.slane %v2785_v33, 1  ;;  %v4078_v52 = vld [vmem:[%s14188_s0 + $0x24f] sm:$0x1]  ;;  %v4079_v51 = vld [vmem:[%s14188_s0 + $0x253] sm:$0x1] }
 0x13a   :  { %v808_v41 = vsel %vm553_vm4, %v807_v58, %v806_v40  ;;  %v3401_v0 = vsel %vm544_vm1, %v3400_v45, %v3399_v20  ;;  %v5105_v1 = vmul.f32 %v9953_v31, %v9935_v50  ;;  %v2511_v8 = vmul.f32 %v9953_v31, %v9925_v37  ;;  %v4080_v37 = vld [vmem:[%s14188_s0 + $0x257] sm:$0x1]  ;;  %v4081_v33 = vld [vmem:[%s14188_s0 + $0x25b] sm:$0x1]  ;;  %v3696_v45 = vpop.f32.mrf.mxu2  ;;  %v1482_v13 = vld [vmem:[%s14188_s0 + $0x245] sm:$0x1] }
 0x13b   :  { %v10057_v58 = vpop.eup %6903  ;;  %v810_v9 = vsel %vm556_vm5, %v809_v15, %v808_v41  ;;  %v3403_v50 = vsel %vm547_vm2, %v3402_v11, %v3401_v0  ;;  %v4695_v24 = vrot.slane %v4076_v46, 7  ;;  %v4697_v48 = vrot.slane %v4077_v4, 6  ;;  %v4082_v41 = vld [vmem:[%s14188_s0 + $0x25f] sm:$0x1]  ;;  %v2790_v49 = vld [vmem:[%s14188_s0 + $0x272] sm:$0x1] }
 0x13c   :  { %v6906_v12 = vpop.eup %6905  ;;  %v10068_v40 = vsel %vm559_vm6, %v811_v61, %v810_v9  ;;  %v3405_v20 = vsel %vm550_vm3, %v3404_v35, %v3403_v50  ;;  %v5147_v15 = vsel %vm1240_vm8, %v5105_v1, 0.0  ;;  %v2553_v11 = vsel %vm1240_vm8, %v2511_v8, 0.0  ;;  %v2399_v9 = vpop.f32.mrf.mxu1 }
 0x13d   :  { %14404 = vst [vmem:[#allocation74_spill] sm:$0xff] %v10068_v40  ;;  %6666 = vmatmul.msk.f32.gmra.mxu0 %vm995_vm7, %v10068_v40  ;;  %v3407_v46 = vsel %vm553_vm4, %v3406_v19, %v3405_v20  ;;  %5148 = vadd.xlane.f32.xlu2 %v5147_v15  ;;  %v4696_v4 = vsel %vm541_vm0, %v4695_v24, %v4075_v25  ;;  %v4699_v61 = vrot.slane %v4078_v52, 5  ;;  %v4701_v0 = vrot.slane %v4079_v51, 4  ;;  %v1483_v19 = vld [vmem:[%s14188_s0 + $0x249] sm:$0x1] }
 0x13e   :  { %v3409_v35 = vsel %vm556_vm5, %v3408_v21, %v3407_v46  ;;  %2554 = vadd.xlane.f32.xlu1 %v2553_v11  ;;  %v4698_v1 = vsel %vm544_vm1, %v4697_v48, %v4696_v4  ;;  %v4703_v8 = vrot.slane %v4080_v37, 3  ;;  %v4705_v50 = vrot.slane %v4081_v33, 2  ;;  %v1484_v37 = vld [vmem:[%s14188_s0 + $0x24d] sm:$0x1]  ;;  %v1485_v33 = vld [vmem:[%s14188_s0 + $0x251] sm:$0x1] }
 0x13f   :  { %v10089_v25 = vsel %vm559_vm6, %v3410_v32, %v3409_v35  ;;  %v4700_v52 = vsel %vm547_vm2, %v4699_v61, %v4698_v1  ;;  %v4707_v51 = vrot.slane %v4082_v41, 1  ;;  %v1214_v21 = vmul.f32 %v9953_v31, %v9941_v47  ;;  %v1481_v47 = vld [vmem:[%s14188_s0 + $0x241] sm:$0x1]  ;;  %v1486_v15 = vld [vmem:[%s14188_s0 + $0x255] sm:$0x1]  ;;  %v4993_v35 = vpop.f32.mrf.mxu3 }
 0x140   :  { %14405 = vst [vmem:[#allocation75_spill] sm:$0xff] %v10089_v25  ;;  %6730 = vmatmul.msk.f32.gmra.mxu2 %vm995_vm7, %v10089_v25  ;;  %v4702_v32 = vsel %vm550_vm3, %v4701_v0, %v4700_v52  ;;  %v1099_v24 = vadd.f32 %v9655_v26, %v1098_v38  ;;  %v3697_v48 = vadd.f32 %v9655_v26, %v3696_v45  ;;  %v1487_v11 = vld [vmem:[%s14188_s0 + $0x259] sm:$0x1]  ;;  %v1488_v45 = vld [vmem:[%s14188_s0 + $0x25d] sm:$0x1]  ;;  %v2101_v46 = vrot.slane %v1482_v13, 7 }
 0x141   :  { %v2400_v20 = vadd.f32 %v9655_v26, %v2399_v9  ;;  %v4704_v41 = vsel %vm553_vm4, %v4703_v8, %v4702_v32  ;;  %v1259_v38 = vsel %vm1240_vm8, %v1214_v21, 0.0  ;;  %v2103_v4 = vrot.slane %v1483_v19, 6  ;;  %v1101_v21 = vpop.f32.mrf.mxu0  ;;  %v178_v13 = vld [vmem:[%s14188_s0 + $0x264] sm:$0x1] }
 0x142   :  { %v4706_v61 = vsel %vm556_vm5, %v4705_v50, %v4704_v41  ;;  %1260 = vadd.xlane.f32.xlu0 %v1259_v38  ;;  %6907 = vtanh.f32 %v1099_v24  ;;  %v2105_v0 = vrot.slane %v1484_v37, 5  ;;  %v2107_v9 = vrot.slane %v1485_v33, 4  ;;  %v3699_v32 = vpop.f32.mrf.mxu2  ;;  %v180_v33 = vld [vmem:[%s14188_s0 + $0x26c] sm:$0x1]  ;;  %v182_v41 = vld [vmem:[%s14188_s0 + $0x274] sm:$0x1] }
 0x143   :  { %v10122_v1 = vsel %vm559_vm6, %v4707_v51, %v4706_v61  ;;  %6909 = vtanh.f32 %v3697_v48  ;;  %v2102_v8 = vsel %vm541_vm0, %v2101_v46, %v1481_v47  ;;  %v2109_v52 = vrot.slane %v1486_v15, 3  ;;  %v179_v51 = vld [vmem:[%s14188_s0 + $0x268] sm:$0x1]  ;;  %v177_v15 = vld [vmem:[%s14188_s0 + $0x260] sm:$0x1] }
 0x144   :  { %14406 = vst [vmem:[#allocation76_spill] sm:$0xff] %v10122_v1  ;;  %6762 = vmatmul.msk.f32.gmra.mxu3 %vm995_vm7, %v10122_v1  ;;  %6911 = vtanh.f32 %v2400_v20  ;;  %v2104_v50 = vsel %vm544_vm1, %v2103_v4, %v2102_v8  ;;  %v2111_v19 = vrot.slane %v1487_v11, 2  ;;  %v2113_v37 = vrot.slane %v1488_v45, 1  ;;  %v181_v11 = vld [vmem:[%s14188_s0 + $0x270] sm:$0x1] }
 0x145   :  { %v2106_v24 = vsel %vm547_vm2, %v2105_v0, %v2104_v50  ;;  %v2512_v48 = vmul.f32 %v9953_v31, %v10038_v60  ;;  %v3809_v20 = vmul.f32 %v9953_v31, %v10057_v58  ;;  %v5106_v47 = vmul.f32 %v9953_v31, %v6906_v12  ;;  %v10155_v60 = vld [vmem:[%s14188_s0 + $0x278] sm:$0x1]  ;;  %v10164_v46 = vld [vmem:[%s14188_s0 + $0x27c] sm:$0x1]  ;;  %v1490_v4 = vld [vmem:[%s14188_s0 + $0x265] sm:$0x1] }
 0x146   :  { %v2108_v58 = vsel %vm550_vm3, %v2107_v9, %v2106_v24  ;;  %v1102_v12 = vadd.f32 %v9655_v26, %v1101_v21  ;;  %v4994_v38 = vadd.f32 %v9655_v26, %v4993_v35  ;;  %v3700_v45 = vadd.f32 %v9655_v26, %v3699_v32  ;;  %v1491_v61 = vld [vmem:[%s14188_s0 + $0x269] sm:$0x1]  ;;  %v1492_v21 = vld [vmem:[%s14188_s0 + $0x26d] sm:$0x1] }
 0x147   :  { %v2110_v0 = vsel %vm553_vm4, %v2109_v52, %v2108_v58  ;;  %v2556_v9 = vsel %vm1240_vm8, %v2512_v48, 0.0  ;;  %v3853_v35 = vsel %vm1240_vm8, %v3809_v20, 0.0  ;;  %v5150_v8 = vsel %vm1240_vm8, %v5106_v47, 0.0  ;;  %v1489_v52 = vld [vmem:[%s14188_s0 + $0x261] sm:$0x1]  ;;  %v4996_v40 = vpop.f32.mrf.mxu3 }
 0x148   :  { %v10179_v32 = vpop.eup %6907  ;;  %v2112_v50 = vsel %vm556_vm5, %v2111_v19, %v2110_v0  ;;  %2557 = vadd.xlane.f32.xlu2 %v2556_v9  ;;  %3854 = vadd.xlane.f32.xlu1 %v3853_v35  ;;  %6913 = vtanh.f32 %v1102_v12  ;;  %v813_v24 = vrot.slane %v178_v13, 7  ;;  %v815_v1 = vrot.slane %v179_v51, 6  ;;  %v1493_v48 = vld [vmem:[%s14188_s0 + $0x271] sm:$0x1]  ;;  %v1494_v20 = vld [vmem:[%s14188_s0 + $0x275] sm:$0x1] }
 0x149   :  { %v10191_v47 = vpop.eup %6909  ;;  %v10194_v19 = vsel %vm559_vm6, %v2113_v37, %v2112_v50  ;;  %6915 = vtanh.f32 %v4994_v38  ;;  %v817_v13 = vrot.slane %v180_v33, 5  ;;  %v819_v51 = vrot.slane %v181_v11, 4  ;;  %v1495_v58 = vld [vmem:[%s14188_s0 + $0x279] sm:$0x1]  ;;  %v10202_v12 = vld [vmem:[%s14188_s0 + $0x27d] sm:$0x1] }
 0x14a   :  { %14407 = vst [vmem:[#allocation77_spill] sm:$0xff] %v10194_v19  ;;  %v10204_v0 = vpop.eup %6911  ;;  %6698 = vmatmul.msk.f32.gmra.mxu1 %vm995_vm7, %v10194_v19  ;;  %5151 = vadd.xlane.f32.xlu0 %v5150_v8  ;;  %6917 = vtanh.f32 %v3700_v45  ;;  %v814_v37 = vsel %vm541_vm0, %v813_v24, %v177_v15  ;;  %v821_v33 = vrot.slane %v182_v41, 3  ;;  %v823_v11 = vrot.slane %v10155_v60, 2  ;;  %v2787_v38 = vld [vmem:[%s14188_s0 + $0x266] sm:$0x1] }
 0x14b   :  { %v2788_v9 = vld [vmem:[%s14188_s0 + $0x26a] sm:$0x1]  ;;  %v816_v35 = vsel %vm544_vm1, %v815_v1, %v814_v37  ;;  %v825_v50 = vrot.slane %v10164_v46, 1  ;;  %v2115_v25 = vrot.slane %v1490_v4, 7  ;;  %v2117_v8 = vrot.slane %v1491_v61, 6 }
 0x14c   :  { %v2789_v15 = vld [vmem:[%s14188_s0 + $0x26e] sm:$0x1]  ;;  %v818_v41 = vsel %vm547_vm2, %v817_v13, %v816_v35  ;;  %v2119_v60 = vrot.slane %v1492_v21, 5  ;;  %v2121_v45 = vrot.slane %v1493_v48, 4  ;;  %v2123_v24 = vrot.slane %v1494_v20, 3 }
 0x14d   :  { %v820_v22 = vsel %vm550_vm3, %v819_v51, %v818_v41  ;;  %v2116_v1 = vsel %vm541_vm0, %v2115_v25, %v1489_v52  ;;  %v2125_v46 = vrot.slane %v1495_v58, 2  ;;  %v2127_v4 = vrot.slane %v10202_v12, 1  ;;  %v2786_v61 = vld [vmem:[%s14188_s0 + $0x262] sm:$0x1]  ;;  %v2791_v21 = vld [vmem:[%s14188_s0 + $0x276] sm:$0x1] }
 0x14e   :  { %v10234_v48 = vpop.eup %6913  ;;  %v822_v20 = vsel %vm553_vm4, %v821_v33, %v820_v22  ;;  %v2118_v13 = vsel %vm544_vm1, %v2117_v8, %v2116_v1  ;;  %v2792_v25 = vld [vmem:[%s14188_s0 + $0x27a] sm:$0x1]  ;;  %v2793_v52 = vld [vmem:[%s14188_s0 + $0x27e] sm:$0x1]  ;;  %v3412_v51 = vrot.slane %v2787_v38, 7  ;;  %v3414_v58 = vrot.slane %v2788_v9, 6 }
 0x14f   :  { %v10244_v12 = vpop.eup %6915  ;;  %v824_v37 = vsel %vm556_vm5, %v823_v11, %v822_v20  ;;  %v2120_v35 = vsel %vm547_vm2, %v2119_v60, %v2118_v13  ;;  %v3416_v41 = vrot.slane %v2789_v15, 5  ;;  %v3418_v22 = vrot.slane %v2790_v49, 4  ;;  %v4083_v33 = vld [vmem:[%s14188_s0 + $0x263] sm:$0x1]  ;;  %v4084_v8 = vld [vmem:[%s14188_s0 + $0x267] sm:$0x1]  ;;  %v2402_v13 = vpop.f32.mrf.mxu1 }
 0x150   :  { %v4085_v38 = vld [vmem:[%s14188_s0 + $0x26b] sm:$0x1]  ;;  %v10257_v9 = vpop.eup %6917  ;;  %v10260_v11 = vsel %vm559_vm6, %v825_v50, %v824_v37  ;;  %v2122_v15 = vsel %vm550_vm3, %v2121_v45, %v2120_v35  ;;  %v3413_v49 = vsel %vm541_vm0, %v3412_v51, %v2786_v61  ;;  %v3420_v60 = vrot.slane %v2791_v21, 3  ;;  %v4086_v1 = vld [vmem:[%s14188_s0 + $0x26f] sm:$0x1] }
 0x151   :  { %14408 = vst [vmem:[#allocation78_spill] sm:$0xff] %v10260_v11  ;;  %v4087_v20 = vld [vmem:[%s14188_s0 + $0x273] sm:$0x1]  ;;  %6667 = vmatmul.msk.f32.gmra.mxu0 %vm995_vm7, %v10260_v11  ;;  %v2124_v50 = vsel %vm553_vm4, %v2123_v24, %v2122_v15  ;;  %v3415_v37 = vsel %vm544_vm1, %v3414_v58, %v3413_v49  ;;  %v3422_v45 = vrot.slane %v2792_v25, 2  ;;  %v3424_v35 = vrot.slane %v2793_v52, 1 }
 0x152   :  { %v4088_v61 = vld [vmem:[%s14188_s0 + $0x277] sm:$0x1]  ;;  %v4089_v21 = vld [vmem:[%s14188_s0 + $0x27b] sm:$0x1]  ;;  %v2126_v51 = vsel %vm556_vm5, %v2125_v46, %v2124_v50  ;;  %v3417_v19 = vsel %vm547_vm2, %v3416_v41, %v3415_v37  ;;  %v4090_v24 = vld [vmem:[%s14188_s0 + $0x27f] sm:$0x1] }
 0x153   :  { %v4709_v15 = vrot.slane %v4084_v8, 7  ;;  %v4711_v58 = vrot.slane %v4085_v38, 6  ;;  %v10286_v25 = vsel %vm559_vm6, %v2127_v4, %v2126_v51  ;;  %v3419_v52 = vsel %vm550_vm3, %v3418_v22, %v3417_v19  ;;  %v1104_v22 = vpop.f32.mrf.mxu0 }
 0x154   :  { %14409 = vst [vmem:[#allocation79_spill] sm:$0xff] %v10286_v25  ;;  %v4713_v49 = vrot.slane %v4086_v1, 5  ;;  %v4715_v11 = vrot.slane %v4087_v20, 4  ;;  %6699 = vmatmul.msk.f32.gmra.mxu1 %vm995_vm7, %v10286_v25  ;;  %v3421_v46 = vsel %vm553_vm4, %v3420_v60, %v3419_v52  ;;  %v4717_v50 = vrot.slane %v4088_v61, 3 }
 0x155   :  { %v4710_v41 = vsel %vm541_vm0, %v4709_v15, %v4083_v33  ;;  %v4719_v37 = vrot.slane %v4089_v21, 2  ;;  %v3423_v8 = vsel %vm556_vm5, %v3422_v45, %v3421_v46  ;;  %v4721_v4 = vrot.slane %v4090_v24, 1  ;;  %v2794_v21 = vld [vmem:[%s14188_s0 + $0x282] sm:$0x1]  ;;  %v2797_v24 = vld [vmem:[%s14188_s0 + $0x28e] sm:$0x1] }
 0x156   :  { %v4712_v38 = vsel %vm544_vm1, %v4711_v58, %v4710_v41  ;;  %v3810_v19 = vmul.f32 %v9953_v31, %v10191_v47  ;;  %v10298_v1 = vsel %vm559_vm6, %v3424_v35, %v3423_v8  ;;  %v1215_v60 = vmul.f32 %v9953_v31, %v10179_v32  ;;  %v2795_v32 = vld [vmem:[%s14188_s0 + $0x286] sm:$0x1]  ;;  %v2798_v15 = vld [vmem:[%s14188_s0 + $0x292] sm:$0x1]  ;;  %v2800_v46 = vld [vmem:[%s14188_s0 + $0x29a] sm:$0x1] }
 0x157   :  { %14410 = vst [vmem:[#allocation80_spill] sm:$0xff] %v10298_v1  ;;  %v4714_v20 = vsel %vm547_vm2, %v4713_v49, %v4712_v38  ;;  %v2513_v33 = vmul.f32 %v9953_v31, %v10204_v0  ;;  %6731 = vmatmul.msk.f32.gmra.mxu2 %vm995_vm7, %v10298_v1  ;;  %v2403_v47 = vadd.f32 %v9655_v26, %v2402_v13  ;;  %v2796_v0 = vld [vmem:[%s14188_s0 + $0x28a] sm:$0x1]  ;;  %v10344_v41 = vld [vmem:[%s14188_s0 + $0x29e] sm:$0x1]  ;;  %vm5228_vm9 = vcmask 7168  }
 0x158   :  { %v4716_v45 = vsel %vm550_vm3, %v4715_v11, %v4714_v20  ;;  %v3856_v61 = vsel %vm1240_vm8, %v3810_v19, 0.0  ;;  %v4997_v35 = vadd.f32 %v9655_v26, %v4996_v40  ;;  %v1262_v51 = vsel %vm1240_vm8, %v1215_v60, 0.0  ;;  %v186_v8 = vld [vmem:[%s14188_s0 + $0x284] sm:$0x1]  ;;  %v187_v38 = vld [vmem:[%s14188_s0 + $0x288] sm:$0x1]  ;;  %v3702_v20 = vpop.f32.mrf.mxu2  ;;  %v4999_v60 = vpop.f32.mrf.mxu3 }
 0x159   :  { %v4718_v11 = vsel %vm553_vm4, %v4717_v50, %v4716_v45  ;;  %3857 = vadd.xlane.f32.xlu2 %v3856_v61  ;;  %v2559_v13 = vsel %vm1240_vm8, %v2513_v33, 0.0  ;;  %v1105_v40 = vadd.f32 %v9655_v26, %v1104_v22  ;;  %1263 = vadd.xlane.f32.xlu1 %v1262_v51  ;;  %6919 = vtanh.f32 %v2403_v47  ;;  %v2799_v26 = vld [vmem:[%s14188_s0 + $0x296] sm:$0x1]  ;;  %v185_v33 = vld [vmem:[%s14188_s0 + $0x280] sm:$0x1] }
 0x15a   :  { %v4720_v58 = vsel %vm556_vm5, %v4719_v37, %v4718_v11  ;;  %2560 = vadd.xlane.f32.xlu0 %v2559_v13  ;;  %v1216_v52 = vmul.f32 %v9953_v31, %v10234_v48  ;;  %v5107_v49 = vmul.f32 %v9953_v31, %v10244_v12  ;;  %6921 = vtanh.f32 %v4997_v35  ;;  %v2405_v12 = vpop.f32.mrf.mxu1  ;;  %v188_v45 = vld [vmem:[%s14188_s0 + $0x28c] sm:$0x1]  ;;  %v4097_v1 = vld [vmem:[%s14188_s0 + $0x29b] sm:$0x1] }
 0x15b   :  { %v10347_v50 = vsel %vm559_vm6, %v4721_v4, %v4720_v58  ;;  %v3426_v48 = vrot.slane %v2795_v32, 7  ;;  %v3428_v37 = vrot.slane %v2796_v0, 6  ;;  %6923 = vtanh.f32 %v1105_v40  ;;  %v189_v0 = vld [vmem:[%s14188_s0 + $0x290] sm:$0x1]  ;;  %v10376_v40 = vld [vmem:[%s14189_s2] ss:$0 sm:$0xff] }
 0x15c   :  { %14411 = vst [vmem:[#allocation81_spill] sm:$0xff] %v10347_v50  ;;  %6763 = vmatmul.msk.f32.gmra.mxu3 %vm995_vm7, %v10347_v50  ;;  %v1265_v19 = vsel %vm1240_vm8, %v1216_v52, 0.0  ;;  %v5153_v4 = vsel %vm1240_vm8, %v5107_v49, 0.0  ;;  %v3430_v22 = vrot.slane %v2797_v24, 5  ;;  %v3432_v47 = vrot.slane %v2798_v15, 4 }
 0x15d   :  { %v3427_v61 = vsel %vm541_vm0, %v3426_v48, %v2794_v21  ;;  %v3434_v35 = vrot.slane %v2799_v26, 3  ;;  %v3436_v32 = vrot.slane %v2800_v46, 2  ;;  %v3438_v51 = vrot.slane %v10344_v41, 1  ;;  %v190_v24 = vld [vmem:[%s14188_s0 + $0x294] sm:$0x1] }
 0x15e   :  { %v3429_v11 = vsel %vm544_vm1, %v3428_v37, %v3427_v61  ;;  %v3811_v13 = vmul.f32 %v9953_v31, %v10257_v9  ;;  %v2406_v21 = vadd.f32 %v10376_v40, %v2405_v12  ;;  %v191_v15 = vld [vmem:[%s14188_s0 + $0x298] sm:$0x1]  ;;  %v3703_v52 = vadd.f32 %v10376_v40, %v3702_v20  ;;  %v192_v49 = vld [vmem:[%s14188_s0 + $0x29c] sm:$0x1]  ;;  %v1498_v46 = vld [vmem:[%s14188_s0 + $0x285] sm:$0x1] }
 0x15f   :  { %v3431_v58 = vsel %vm547_vm2, %v3430_v22, %v3429_v11  ;;  %v5000_v9 = vadd.f32 %v10376_v40, %v4999_v60  ;;  %v827_v26 = vrot.slane %v186_v8, 7  ;;  %v1499_v41 = vld [vmem:[%s14188_s0 + $0x289] sm:$0x1]  ;;  %v10397_v48 = vpop.eup %6919  ;;  %v829_v22 = vrot.slane %v187_v38, 6  ;;  %v1500_v8 = vld [vmem:[%s14188_s0 + $0x28d] sm:$0x1] }
 0x160   :  { %v3433_v37 = vsel %vm550_vm3, %v3432_v47, %v3431_v58  ;;  %v3859_v12 = vsel %vm1240_vm8, %v3811_v13, 0.0  ;;  %6925 = vtanh.f32 %v2406_v21  ;;  %v1501_v20 = vld [vmem:[%s14188_s0 + $0x291] sm:$0x1]  ;;  %v6922_v60 = vpop.eup %6921  ;;  %v831_v47 = vrot.slane %v188_v45, 5  ;;  %v1497_v38 = vld [vmem:[%s14188_s0 + $0x281] sm:$0x1] }
 0x161   :  { %1266 = vadd.xlane.f32.xlu2 %v1265_v19  ;;  %v3435_v61 = vsel %vm553_vm4, %v3434_v35, %v3433_v37  ;;  %6927 = vtanh.f32 %v3703_v52  ;;  %v828_v11 = vsel %vm541_vm0, %v827_v26, %v185_v33  ;;  %v1502_v13 = vld [vmem:[%s14188_s0 + $0x295] sm:$0x1]  ;;  %v1503_v21 = vld [vmem:[%s14188_s0 + $0x299] sm:$0x1]  ;;  %v6924_v58 = vpop.eup %6923  ;;  %5154 = vadd.xlane.f32.xlu1 %v5153_v4  ;;  %v833_v45 = vrot.slane %v189_v0, 4 }
 0x162   :  { %v3437_v19 = vsel %vm556_vm5, %v3436_v32, %v3435_v61  ;;  %3860 = vadd.xlane.f32.xlu0 %v3859_v12  ;;  %6929 = vtanh.f32 %v5000_v9  ;;  %v830_v33 = vsel %vm544_vm1, %v829_v22, %v828_v11  ;;  %v1504_v35 = vld [vmem:[%s14188_s0 + $0x29d] sm:$0x1]  ;;  %v4092_v52 = vld [vmem:[%s14188_s0 + $0x287] sm:$0x1]  ;;  %v835_v37 = vrot.slane %v190_v24, 3 }
 0x163   :  { %v10427_v26 = vsel %vm559_vm6, %v3438_v51, %v3437_v19  ;;  %v832_v4 = vsel %vm547_vm2, %v831_v47, %v830_v33  ;;  %v837_v32 = vrot.slane %v191_v15, 2  ;;  %v4093_v9 = vld [vmem:[%s14188_s0 + $0x28b] sm:$0x1]  ;;  %v4094_v0 = vld [vmem:[%s14188_s0 + $0x28f] sm:$0x1]  ;;  %v839_v22 = vrot.slane %v192_v49, 1 }
 0x164   :  { %14412 = vst [vmem:[#allocation82_spill] sm:$0xff] %v10427_v26  ;;  %6732 = vmatmul.msk.f32.gmra.mxu2 %vm995_vm7, %v10427_v26  ;;  %v834_v12 = vsel %vm550_vm3, %v833_v45, %v832_v4  ;;  %v2129_v51 = vrot.slane %v1498_v46, 7  ;;  %v2131_v61 = vrot.slane %v1499_v41, 6  ;;  %v4091_v24 = vld [vmem:[%s14188_s0 + $0x283] sm:$0x1]  ;;  %v2133_v47 = vrot.slane %v1500_v8, 5  ;;  %v1107_v26 = vpop.f32.mrf.mxu0 }
 0x165   :  { %v4095_v15 = vld [vmem:[%s14188_s0 + $0x293] sm:$0x1]  ;;  %v836_v11 = vsel %vm553_vm4, %v835_v37, %v834_v12  ;;  %v2135_v19 = vrot.slane %v1501_v20, 4  ;;  %v2137_v33 = vrot.slane %v1502_v13, 3  ;;  %v4096_v45 = vld [vmem:[%s14188_s0 + $0x297] sm:$0x1] }
 0x166   :  { %v10449_v49 = vpop.eup %6925  ;;  %v838_v46 = vsel %vm556_vm5, %v837_v32, %v836_v11  ;;  %v2130_v41 = vsel %vm541_vm0, %v2129_v51, %v1497_v38  ;;  %v2139_v4 = vrot.slane %v1503_v21, 2  ;;  %v2141_v50 = vrot.slane %v1504_v35, 1  ;;  %v4098_v8 = vld [vmem:[%s14188_s0 + $0x29f] sm:$0x1] }
 0x167   :  { %v10459_v20 = vpop.eup %6927  ;;  %v10462_v13 = vsel %vm559_vm6, %v839_v22, %v838_v46  ;;  %v2132_v37 = vsel %vm544_vm1, %v2131_v61, %v2130_v41  ;;  %v4723_v32 = vrot.slane %v4092_v52, 7  ;;  %v4725_v12 = vrot.slane %v4093_v9, 6 }
 0x168   :  { %14413 = vst [vmem:[#allocation83_spill] sm:$0xff] %v10462_v13  ;;  %v10465_v38 = vpop.eup %6929  ;;  %6668 = vmatmul.msk.f32.gmra.mxu0 %vm995_vm7, %v10462_v13  ;;  %v2134_v21 = vsel %vm547_vm2, %v2133_v47, %v2132_v37  ;;  %v4727_v35 = vrot.slane %v4094_v0, 5  ;;  %v4729_v51 = vrot.slane %v4095_v15, 4  ;;  %v4731_v11 = vrot.slane %v4096_v45, 3  ;;  %v3705_v47 = vpop.f32.mrf.mxu2  ;;  %v194_v0 = vld [vmem:[%s14188_s0 + $0x2a4] sm:$0x1] }
 0x169   :  { %v2136_v25 = vsel %vm550_vm3, %v2135_v19, %v2134_v21  ;;  %v4724_v22 = vsel %vm541_vm0, %v4723_v32, %v4091_v24  ;;  %v4733_v46 = vrot.slane %v4097_v1, 2  ;;  %v4735_v30 = vrot.slane %v4098_v8, 1  ;;  %v2408_v19 = vpop.f32.mrf.mxu1  ;;  %v197_v45 = vld [vmem:[%s14188_s0 + $0x2b0] sm:$0x1]  ;;  %v198_v37 = vld [vmem:[%s14188_s0 + $0x2b4] sm:$0x1] }
 0x16a   :  { %v2138_v52 = vsel %vm553_vm4, %v2137_v33, %v2136_v25  ;;  %v4726_v9 = vsel %vm544_vm1, %v4725_v12, %v4724_v22  ;;  %v5108_v61 = vmul.f32 %v9953_v31, %v6922_v60  ;;  %v2514_v41 = vmul.f32 %v9953_v31, %v10397_v48  ;;  %v193_v60 = vld [vmem:[%s14188_s0 + $0x2a0] sm:$0x1]  ;;  %v195_v48 = vld [vmem:[%s14188_s0 + $0x2a8] sm:$0x1]  ;;  %v196_v33 = vld [vmem:[%s14188_s0 + $0x2ac] sm:$0x1] }
 0x16b   :  { %v2140_v15 = vsel %vm556_vm5, %v2139_v4, %v2138_v52  ;;  %v4728_v24 = vsel %vm547_vm2, %v4727_v35, %v4726_v9  ;;  %v1217_v1 = vmul.f32 %v9953_v31, %v6924_v58  ;;  %v1108_v25 = vadd.f32 %v10376_v40, %v1107_v26  ;;  %v199_v32 = vld [vmem:[%s14188_s0 + $0x2b8] sm:$0x1]  ;;  %v200_v35 = vld [vmem:[%s14188_s0 + $0x2bc] sm:$0x1] }
 0x16c   :  { %v10497_v58 = vsel %vm559_vm6, %v2141_v50, %v2140_v15  ;;  %v4730_v26 = vsel %vm550_vm3, %v4729_v51, %v4728_v24  ;;  %v5156_v4 = vsel %vm1240_vm8, %v5108_v61, 0.0  ;;  %v2562_v8 = vsel %vm1240_vm8, %v2514_v41, 0.0  ;;  %v2803_v51 = vld [vmem:[%s14188_s0 + $0x2a6] sm:$0x1]  ;;  %v2802_v61 = vld [vmem:[%s14188_s0 + $0x2a2] sm:$0x1] }
 0x16d   :  { %14414 = vst [vmem:[#allocation84_spill] sm:$0xff] %v10497_v58  ;;  %6700 = vmatmul.msk.f32.gmra.mxu1 %vm995_vm7, %v10497_v58  ;;  %v4732_v50 = vsel %vm553_vm4, %v4731_v11, %v4730_v26  ;;  %5157 = vadd.xlane.f32.xlu2 %v5156_v4  ;;  %v1268_v12 = vsel %vm1240_vm8, %v1217_v1, 0.0  ;;  %6931 = vtanh.f32 %v1108_v25  ;;  %v3706_v21 = vadd.f32 %v10376_v40, %v3705_v47  ;;  %v2804_v41 = vld [vmem:[%s14188_s0 + $0x2aa] sm:$0x1]  ;;  %v2805_v47 = vld [vmem:[%s14188_s0 + $0x2ae] sm:$0x1] }
 0x16e   :  { %v4734_v22 = vsel %vm556_vm5, %v4733_v46, %v4732_v50  ;;  %2563 = vadd.xlane.f32.xlu1 %v2562_v8  ;;  %1269 = vadd.xlane.f32.xlu0 %v1268_v12  ;;  %v2409_v11 = vadd.f32 %v10376_v40, %v2408_v19  ;;  %v841_v52 = vrot.slane %v194_v0, 7  ;;  %v843_v9 = vrot.slane %v195_v48, 6  ;;  %v2806_v0 = vld [vmem:[%s14188_s0 + $0x2b2] sm:$0x1]  ;;  %v2807_v1 = vld [vmem:[%s14188_s0 + $0x2b6] sm:$0x1] }
 0x16f   :  { %v10531_v46 = vsel %vm559_vm6, %v4735_v30, %v4734_v22  ;;  %6933 = vtanh.f32 %v3706_v21  ;;  %v845_v15 = vrot.slane %v196_v33, 5  ;;  %v847_v24 = vrot.slane %v197_v45, 4  ;;  %v2808_v48 = vld [vmem:[%s14188_s0 + $0x2ba] sm:$0x1]  ;;  %v2809_v33 = vld [vmem:[%s14188_s0 + $0x2be] sm:$0x1] }
 0x170   :  { %14415 = vst [vmem:[#allocation85_spill] sm:$0xff] %v10531_v46  ;;  %6764 = vmatmul.msk.f32.gmra.mxu3 %vm995_vm7, %v10531_v46  ;;  %6935 = vtanh.f32 %v2409_v11  ;;  %v842_v25 = vsel %vm541_vm0, %v841_v52, %v193_v60  ;;  %v849_v19 = vrot.slane %v198_v37, 3  ;;  %v851_v30 = vrot.slane %v199_v32, 2  ;;  %v4100_v50 = vld [vmem:[%s14188_s0 + $0x2a7] sm:$0x1] }
 0x171   :  { %v844_v45 = vsel %vm544_vm1, %v843_v9, %v842_v25  ;;  %v853_v26 = vrot.slane %v200_v35, 1  ;;  %v3440_v4 = vrot.slane %v2803_v51, 7  ;;  %v3442_v8 = vrot.slane %v2804_v41, 6  ;;  %v4101_v21 = vld [vmem:[%s14188_s0 + $0x2ab] sm:$0x1]  ;;  %v5002_v9 = vpop.f32.mrf.mxu3 }
 0x172   :  { %v846_v60 = vsel %vm547_vm2, %v845_v15, %v844_v45  ;;  %v3444_v37 = vrot.slane %v2805_v47, 5  ;;  %v3446_v32 = vrot.slane %v2806_v0, 4  ;;  %v3448_v12 = vrot.slane %v2807_v1, 3  ;;  %v4099_v1 = vld [vmem:[%s14188_s0 + $0x2a3] sm:$0x1] }
 0x173   :  { %v10556_v22 = vpop.eup %6931  ;;  %v848_v11 = vsel %vm550_vm3, %v847_v24, %v846_v60  ;;  %v3441_v35 = vsel %vm541_vm0, %v3440_v4, %v2802_v61  ;;  %v3450_v51 = vrot.slane %v2808_v48, 2  ;;  %v3452_v52 = vrot.slane %v2809_v33, 1  ;;  %v4102_v61 = vld [vmem:[%s14188_s0 + $0x2af] sm:$0x1]  ;;  %v4103_v24 = vld [vmem:[%s14188_s0 + $0x2b3] sm:$0x1]  ;;  %v1110_v4 = vpop.f32.mrf.mxu0 }
 0x174   :  { %v850_v41 = vsel %vm553_vm4, %v849_v19, %v848_v11  ;;  %v3443_v15 = vsel %vm544_vm1, %v3442_v8, %v3441_v35  ;;  %v2515_v47 = vmul.f32 %v9953_v31, %v10449_v49  ;;  %v3812_v0 = vmul.f32 %v9953_v31, %v10459_v20  ;;  %v4104_v20 = vld [vmem:[%s14188_s0 + $0x2b7] sm:$0x1]  ;;  %v4105_v48 = vld [vmem:[%s14188_s0 + $0x2bb] sm:$0x1]  ;;  %v4106_v35 = vld [vmem:[%s14188_s0 + $0x2bf] sm:$0x1] }
 0x175   :  { %v10575_v25 = vpop.eup %6933  ;;  %v852_v19 = vsel %vm556_vm5, %v851_v30, %v850_v41  ;;  %v3445_v49 = vsel %vm547_vm2, %v3444_v37, %v3443_v15  ;;  %v4737_v33 = vrot.slane %v4100_v50, 7  ;;  %v4739_v45 = vrot.slane %v4101_v21, 6  ;;  %v3708_v15 = vpop.f32.mrf.mxu2  ;;  %v2814_v58 = vld [vmem:[%s14188_s0 + $0x2d2] sm:$0x1] }
 0x176   :  { %v6936_v8 = vpop.eup %6935  ;;  %v10586_v60 = vsel %vm559_vm6, %v853_v26, %v852_v19  ;;  %v3447_v11 = vsel %vm550_vm3, %v3446_v32, %v3445_v49  ;;  %v2565_v30 = vsel %vm1240_vm8, %v2515_v47, 0.0  ;;  %v3862_v37 = vsel %vm1240_vm8, %v3812_v0, 0.0  ;;  %v1506_v49 = vld [vmem:[%s14188_s0 + $0x2a5] sm:$0x1] }
 0x177   :  { %14416 = vst [vmem:[#allocation86_spill] sm:$0xff] %v10586_v60  ;;  %6669 = vmatmul.msk.f32.gmra.mxu0 %vm995_vm7, %v10586_v60  ;;  %v3449_v50 = vsel %vm553_vm4, %v3448_v12, %v3447_v11  ;;  %2566 = vadd.xlane.f32.xlu2 %v2565_v30  ;;  %v4738_v21 = vsel %vm541_vm0, %v4737_v33, %v4099_v1  ;;  %v4741_v26 = vrot.slane %v4102_v61, 5  ;;  %v4743_v41 = vrot.slane %v4103_v24, 4  ;;  %v1507_v12 = vld [vmem:[%s14188_s0 + $0x2a9] sm:$0x1]  ;;  %v10815_v60 = vpop.xlane.xlu1 %3836 }
 0x178   :  { %v3451_v32 = vsel %vm556_vm5, %v3450_v51, %v3449_v50  ;;  %3863 = vadd.xlane.f32.xlu1 %v3862_v37  ;;  %v4740_v47 = vsel %vm544_vm1, %v4739_v45, %v4738_v21  ;;  %v4745_v0 = vrot.slane %v4104_v20, 3  ;;  %v4747_v19 = vrot.slane %v4105_v48, 2  ;;  %v1508_v20 = vld [vmem:[%s14188_s0 + $0x2ad] sm:$0x1]  ;;  %v1509_v48 = vld [vmem:[%s14188_s0 + $0x2b1] sm:$0x1] }
 0x179   :  { %v10607_v1 = vsel %vm559_vm6, %v3452_v52, %v3451_v32  ;;  %v4742_v61 = vsel %vm547_vm2, %v4741_v26, %v4740_v47  ;;  %v4749_v24 = vrot.slane %v4106_v35, 1  ;;  %v5109_v51 = vmul.f32 %v9953_v31, %v10465_v38  ;;  %v1505_v31 = vld [vmem:[%s14188_s0 + $0x2a1] sm:$0x1]  ;;  %v1510_v38 = vld [vmem:[%s14188_s0 + $0x2b5] sm:$0x1] }
 0x17a   :  { %14417 = vst [vmem:[#allocation87_spill] sm:$0xff] %v10607_v1  ;;  %6733 = vmatmul.msk.f32.gmra.mxu2 %vm995_vm7, %v10607_v1  ;;  %v4744_v52 = vsel %vm550_vm3, %v4743_v41, %v4742_v61  ;;  %v1111_v33 = vadd.f32 %v10376_v40, %v1110_v4  ;;  %v5003_v45 = vadd.f32 %v10376_v40, %v5002_v9  ;;  %v1511_v30 = vld [vmem:[%s14188_s0 + $0x2b9] sm:$0x1]  ;;  %v1512_v9 = vld [vmem:[%s14188_s0 + $0x2bd] sm:$0x1]  ;;  %v2143_v35 = vrot.slane %v1506_v49, 7  ;;  %v5005_v61 = vpop.f32.mrf.mxu3 }
 0x17b   :  { %v3709_v11 = vadd.f32 %v10376_v40, %v3708_v15  ;;  %v4746_v37 = vsel %vm553_vm4, %v4745_v0, %v4744_v52  ;;  %v5159_v4 = vsel %vm1240_vm8, %v5109_v51, 0.0  ;;  %v2145_v50 = vrot.slane %v1507_v12, 6  ;;  %v2411_v15 = vpop.f32.mrf.mxu1  ;;  %v1113_v51 = vpop.f32.mrf.mxu0 }
 0x17c   :  { %v4748_v21 = vsel %vm556_vm5, %v4747_v19, %v4746_v37  ;;  %5160 = vadd.xlane.f32.xlu0 %v5159_v4  ;;  %6937 = vtanh.f32 %v1111_v33  ;;  %v2147_v26 = vrot.slane %v1508_v20, 5  ;;  %v2149_v41 = vrot.slane %v1509_v48, 4  ;;  %v202_v20 = vld [vmem:[%s14188_s0 + $0x2c4] sm:$0x1]  ;;  %v10653_v48 = vld [vmem:[%s14190_s3] ss:$0 sm:$0xff] }
 0x17d   :  { %v10640_v32 = vsel %vm559_vm6, %v4749_v24, %v4748_v21  ;;  %6939 = vtanh.f32 %v5003_v45  ;;  %v2144_v47 = vsel %vm541_vm0, %v2143_v35, %v1505_v31  ;;  %v2151_v0 = vrot.slane %v1510_v38, 3  ;;  %v203_v31 = vld [vmem:[%s14188_s0 + $0x2c8] sm:$0x1]  ;;  %v204_v38 = vld [vmem:[%s14188_s0 + $0x2cc] sm:$0x1] }
 0x17e   :  { %14418 = vst [vmem:[#allocation88_spill] sm:$0xff] %v10640_v32  ;;  %6765 = vmatmul.msk.f32.gmra.mxu3 %vm995_vm7, %v10640_v32  ;;  %6941 = vtanh.f32 %v3709_v11  ;;  %v2146_v19 = vsel %vm544_vm1, %v2145_v50, %v2144_v47  ;;  %v2153_v49 = vrot.slane %v1511_v30, 2  ;;  %v2155_v12 = vrot.slane %v1512_v9, 1  ;;  %v201_v11 = vld [vmem:[%s14188_s0 + $0x2c0] sm:$0x1] }
 0x17f   :  { %v2148_v24 = vsel %vm547_vm2, %v2147_v26, %v2146_v19  ;;  %v3813_v52 = vmul.f32 %v10653_v48, %v10575_v25  ;;  %v1218_v33 = vmul.f32 %v10653_v48, %v10556_v22  ;;  %v2516_v45 = vmul.f32 %v10653_v48, %v6936_v8  ;;  %v205_v25 = vld [vmem:[%s14188_s0 + $0x2d0] sm:$0x1]  ;;  %v206_v4 = vld [vmem:[%s14188_s0 + $0x2d4] sm:$0x1]  ;;  %v207_v9 = vld [vmem:[%s14188_s0 + $0x2d8] sm:$0x1] }
 0x180   :  { %v2150_v22 = vsel %vm550_vm3, %v2149_v41, %v2148_v24  ;;  %v2412_v8 = vadd.f32 %v10376_v40, %v2411_v15  ;;  %v5006_v30 = vadd.f32 %v10376_v40, %v5005_v61  ;;  %v1114_v37 = vadd.f32 %v10376_v40, %v1113_v51  ;;  %v10685_v35 = vld [vmem:[%s14188_s0 + $0x2dc] sm:$0x1]  ;;  %v1514_v15 = vld [vmem:[%s14188_s0 + $0x2c5] sm:$0x1]  ;;  %v1515_v47 = vld [vmem:[%s14188_s0 + $0x2c9] sm:$0x1] }
 0x181   :  { %v2152_v50 = vsel %vm553_vm4, %v2151_v0, %v2150_v22  ;;  %v3865_v21 = vsel %vm1240_vm8, %v3813_v52, 0.0  ;;  %v1271_v26 = vsel %vm1240_vm8, %v1218_v33, 0.0  ;;  %v2568_v41 = vsel %vm1240_vm8, %v2516_v45, 0.0  ;;  %v1516_v19 = vld [vmem:[%s14188_s0 + $0x2cd] sm:$0x1] }
 0x182   :  { %v10697_v61 = vpop.eup %6937  ;;  %v2154_v51 = vsel %vm556_vm5, %v2153_v49, %v2152_v50  ;;  %3866 = vadd.xlane.f32.xlu2 %v3865_v21  ;;  %1272 = vadd.xlane.f32.xlu1 %v1271_v26  ;;  %6943 = vtanh.f32 %v2412_v8  ;;  %v855_v0 = vrot.slane %v202_v20, 7  ;;  %v1517_v24 = vld [vmem:[%s14188_s0 + $0x2d1] sm:$0x1]  ;;  %v857_v45 = vrot.slane %v203_v31, 6  ;;  %v1513_v49 = vld [vmem:[%s14188_s0 + $0x2c1] sm:$0x1]  ;;  %v10733_v26 = vpop.xlane.xlu0 %1242 }
 0x183   :  { %v10706_v52 = vpop.eup %6939  ;;  %v10709_v33 = vsel %vm559_vm6, %v2155_v12, %v2154_v51  ;;  %6945 = vtanh.f32 %v5006_v30  ;;  %v1518_v20 = vld [vmem:[%s14188_s0 + $0x2d5] sm:$0x1]  ;;  %v10720_v22 = vld [vmem:[%s14188_s0 + $0x2d9] sm:$0x1]  ;;  %v859_v31 = vrot.slane %v204_v38, 5  ;;  %v861_v30 = vrot.slane %v205_v25, 4 }
 0x184   :  { %14419 = vst [vmem:[#allocation89_spill] sm:$0xff] %v10709_v33  ;;  %v10722_v8 = vpop.eup %6941  ;;  %6701 = vmatmul.msk.f32.gmra.mxu1 %vm995_vm7, %v10709_v33  ;;  %2569 = vadd.xlane.f32.xlu0 %v2568_v41  ;;  %6947 = vtanh.f32 %v1114_v37  ;;  %v856_v12 = vsel %vm541_vm0, %v855_v0, %v201_v11  ;;  %v1520_v50 = vld [vmem:[%s14188_s0 + $0x2dd] sm:$0x1]  ;;  %v2811_v21 = vld [vmem:[%s14188_s0 + $0x2c6] sm:$0x1]  ;;  %v863_v46 = vrot.slane %v206_v4, 3 }
 0x185   :  { %v858_v51 = vsel %vm544_vm1, %v857_v45, %v856_v12  ;;  %v865_v32 = vrot.slane %v207_v9, 2  ;;  %v867_v37 = vrot.slane %v10685_v35, 1  ;;  %v2810_v11 = vld [vmem:[%s14188_s0 + $0x2c2] sm:$0x1]  ;;  %v2812_v38 = vld [vmem:[%s14188_s0 + $0x2ca] sm:$0x1] }
 0x186   :  { %v860_v25 = vsel %vm547_vm2, %v859_v31, %v858_v51  ;;  %v2157_v41 = vrot.slane %v1514_v15, 7  ;;  %v2159_v0 = vrot.slane %v1515_v47, 6  ;;  %v2161_v1 = vrot.slane %v1516_v19, 5  ;;  %v2813_v4 = vld [vmem:[%s14188_s0 + $0x2ce] sm:$0x1] }
 0x187   :  { %v862_v9 = vsel %vm550_vm3, %v861_v30, %v860_v25  ;;  %v2163_v35 = vrot.slane %v1517_v24, 4  ;;  %v2165_v45 = vrot.slane %v1518_v20, 3  ;;  %v2167_v12 = vrot.slane %v10720_v22, 2  ;;  %v2815_v31 = vld [vmem:[%s14188_s0 + $0x2d6] sm:$0x1] }
 0x188   :  { %v10752_v33 = vpop.eup %6943  ;;  %v864_v15 = vsel %vm553_vm4, %v863_v46, %v862_v9  ;;  %v2158_v47 = vsel %vm541_vm0, %v2157_v41, %v1513_v49  ;;  %v2169_v19 = vrot.slane %v1520_v50, 1  ;;  %v2816_v24 = vld [vmem:[%s14188_s0 + $0x2da] sm:$0x1]  ;;  %v3454_v20 = vrot.slane %v2811_v21, 7  ;;  %v2817_v46 = vld [vmem:[%s14188_s0 + $0x2de] sm:$0x1] }
 0x189   :  { %v10762_v22 = vpop.eup %6945  ;;  %v866_v30 = vsel %vm556_vm5, %v865_v32, %v864_v15  ;;  %v2160_v51 = vsel %vm544_vm1, %v2159_v0, %v2158_v47  ;;  %v3456_v49 = vrot.slane %v2812_v38, 6  ;;  %v3458_v50 = vrot.slane %v2813_v4, 5  ;;  %v4108_v25 = vld [vmem:[%s14188_s0 + $0x2c7] sm:$0x1]  ;;  %v4109_v15 = vld [vmem:[%s14188_s0 + $0x2cb] sm:$0x1] }
 0x18a   :  { %v10772_v41 = vpop.eup %6947  ;;  %v10775_v21 = vsel %vm559_vm6, %v867_v37, %v866_v30  ;;  %v2162_v9 = vsel %vm547_vm2, %v2161_v1, %v2160_v51  ;;  %v3455_v32 = vsel %vm541_vm0, %v3454_v20, %v2810_v11  ;;  %v3460_v0 = vrot.slane %v2814_v58, 4  ;;  %v4110_v38 = vld [vmem:[%s14188_s0 + $0x2cf] sm:$0x1]  ;;  %v4107_v58 = vld [vmem:[%s14188_s0 + $0x2c3] sm:$0x1]  ;;  %v3711_v20 = vpop.f32.mrf.mxu2 }
 0x18b   :  { %14420 = vst [vmem:[#allocation90_spill] sm:$0xff] %v10775_v21  ;;  %6670 = vmatmul.msk.f32.gmra.mxu0 %vm995_vm7, %v10775_v21  ;;  %v2164_v4 = vsel %vm550_vm3, %v2163_v35, %v2162_v9  ;;  %v3457_v37 = vsel %vm544_vm1, %v3456_v49, %v3455_v32  ;;  %v3462_v47 = vrot.slane %v2815_v31, 3  ;;  %v3464_v1 = vrot.slane %v2816_v24, 2  ;;  %v4111_v11 = vld [vmem:[%s14188_s0 + $0x2d3] sm:$0x1] }
 0x18c   :  { %v2166_v30 = vsel %vm553_vm4, %v2165_v45, %v2164_v4  ;;  %v3459_v51 = vsel %vm547_vm2, %v3458_v50, %v3457_v37  ;;  %v3466_v21 = vrot.slane %v2817_v46, 1  ;;  %v4112_v35 = vld [vmem:[%s14188_s0 + $0x2d7] sm:$0x1]  ;;  %v4113_v31 = vld [vmem:[%s14188_s0 + $0x2db] sm:$0x1]  ;;  %v4751_v24 = vrot.slane %v4108_v25, 7  ;;  %v10808_v46 = vpop.xlane.xlu2 %2539 }
 0x18d   :  { %v2168_v49 = vsel %vm556_vm5, %v2167_v12, %v2166_v30  ;;  %v3461_v9 = vsel %vm550_vm3, %v3460_v0, %v3459_v51  ;;  %v4114_v45 = vld [vmem:[%s14188_s0 + $0x2df] sm:$0x1]  ;;  %v4753_v32 = vrot.slane %v4109_v15, 6  ;;  %v4755_v50 = vrot.slane %v4110_v38, 5  ;;  %v2414_v30 = vpop.f32.mrf.mxu1  ;;  %v10821_v51 = vpop.xlane.xlu0 %5133 }
 0x18e   :  { %v10811_v4 = vsel %vm559_vm6, %v2169_v19, %v2168_v49  ;;  %v3463_v37 = vsel %vm553_vm4, %v3462_v47, %v3461_v9  ;;  %v4752_v13 = vsel %vm541_vm0, %v4751_v24, %v4107_v58  ;;  %v4757_v25 = vrot.slane %v4111_v11, 4  ;;  %v2819_v9 = vld [vmem:[%s14188_s0 + $0x2e6] sm:$0x1] }
 0x18f   :  { %14421 = vst [vmem:[#allocation91_spill] sm:$0xff] %v10811_v4  ;;  %6702 = vmatmul.msk.f32.gmra.mxu1 %vm995_vm7, %v10811_v4  ;;  %v3465_v12 = vsel %vm556_vm5, %v3464_v1, %v3463_v37  ;;  %v4754_v0 = vsel %vm544_vm1, %v4753_v32, %v4752_v13  ;;  %v4759_v15 = vrot.slane %v4112_v35, 3  ;;  %v4761_v38 = vrot.slane %v4113_v31, 2  ;;  %v5008_v31 = vpop.f32.mrf.mxu3  ;;  %v2821_v32 = vld [vmem:[%s14188_s0 + $0x2ee] sm:$0x1] }
 0x190   :  { %v10824_v19 = vsel %vm559_vm6, %v3466_v21, %v3465_v12  ;;  %v4756_v47 = vsel %vm547_vm2, %v4755_v50, %v4754_v0  ;;  %v4763_v58 = vrot.slane %v4114_v45, 1  ;;  %v1219_v11 = vmul.f32 %v10653_v48, %v10697_v61  ;;  %v2822_v50 = vld [vmem:[%s14188_s0 + $0x2f2] sm:$0x1]  ;;  %v2818_v12 = vld [vmem:[%s14188_s0 + $0x2e2] sm:$0x1] }
 0x191   :  { %14422 = vst [vmem:[#allocation92_spill] sm:$0xff] %v10824_v19  ;;  %6734 = vmatmul.msk.f32.gmra.mxu2 %vm995_vm7, %v10824_v19  ;;  %v4758_v1 = vsel %vm550_vm3, %v4757_v25, %v4756_v47  ;;  %v5110_v13 = vmul.f32 %v10653_v48, %v10706_v52  ;;  %v3814_v35 = vmul.f32 %v10653_v48, %v10722_v8  ;;  %v2820_v52 = vld [vmem:[%s14188_s0 + $0x2ea] sm:$0x1]  ;;  %v2823_v0 = vld [vmem:[%s14188_s0 + $0x2f6] sm:$0x1]  ;;  %vm5261_vm10 = vcmask 15360  }
 0x192   :  { %v3712_v21 = vadd.f32 %v10376_v40, %v3711_v20  ;;  %v4760_v24 = vsel %vm553_vm4, %v4759_v15, %v4758_v1  ;;  %v1274_v49 = vsel %vm1240_vm8, %v1219_v11, 0.0  ;;  %v2415_v61 = vadd.f32 %v10376_v40, %v2414_v30  ;;  %v2824_v15 = vld [vmem:[%s14188_s0 + $0x2fa] sm:$0x1]  ;;  %v2825_v47 = vld [vmem:[%s14188_s0 + $0x2fe] sm:$0x1]  ;;  %v3714_v1 = vpop.f32.mrf.mxu2 }
 0x193   :  { %v4762_v45 = vsel %vm556_vm5, %v4761_v38, %v4760_v24  ;;  %1275 = vadd.xlane.f32.xlu2 %v1274_v49  ;;  %v5162_v8 = vsel %vm1240_vm8, %v5110_v13, 0.0  ;;  %v3868_v20 = vsel %vm1240_vm8, %v3814_v35, 0.0  ;;  %v5009_v25 = vadd.f32 %v10376_v40, %v5008_v31  ;;  %v210_v13 = vld [vmem:[%s14188_s0 + $0x2e4] sm:$0x1]  ;;  %v1116_v31 = vpop.f32.mrf.mxu0  ;;  %v212_v24 = vld [vmem:[%s14188_s0 + $0x2ec] sm:$0x1] }
 0x194   :  { %6949 = vtanh.f32 %v3712_v21  ;;  %v10856_v37 = vsel %vm559_vm6, %v4763_v58, %v4762_v45  ;;  %5163 = vadd.xlane.f32.xlu1 %v5162_v8  ;;  %3869 = vadd.xlane.f32.xlu0 %v3868_v20  ;;  %v5111_v38 = vmul.f32 %v10653_v48, %v10762_v22  ;;  %v2517_v30 = vmul.f32 %v10653_v48, %v10752_v33  ;;  %v209_v22 = vld [vmem:[%s14188_s0 + $0x2e0] sm:$0x1]  ;;  %v211_v33 = vld [vmem:[%s14188_s0 + $0x2e8] sm:$0x1]  ;;  %v10892_v45 = vpop.xlane.xlu2 %3839  ;;  %v213_v20 = vld [vmem:[%s14188_s0 + $0x2f0] sm:$0x1] }
 0x195   :  { %14423 = vst [vmem:[#allocation93_spill] sm:$0xff] %v10856_v37  ;;  %6951 = vtanh.f32 %v2415_v61  ;;  %6766 = vmatmul.msk.f32.gmra.mxu3 %vm995_vm7, %v10856_v37  ;;  %v3468_v58 = vrot.slane %v2819_v9, 7  ;;  %v3470_v11 = vrot.slane %v2820_v52, 6  ;;  %v3472_v35 = vrot.slane %v2821_v32, 5  ;;  %v2417_v8 = vpop.f32.mrf.mxu1  ;;  %v10901_v37 = vpop.xlane.xlu1 %5136  ;;  %v1522_v19 = vld [vmem:[%s14188_s0 + $0x2e5] sm:$0x1] }
 0x196   :  { %6953 = vtanh.f32 %v5009_v25  ;;  %v3474_v21 = vrot.slane %v2822_v50, 4  ;;  %v5165_v49 = vsel %vm1240_vm8, %v5111_v38, 0.0  ;;  %v2571_v61 = vsel %vm1240_vm8, %v2517_v30, 0.0  ;;  %v1523_v4 = vld [vmem:[%s14188_s0 + $0x2e9] sm:$0x1] }
 0x197   :  { %v3469_v9 = vsel %vm541_vm0, %v3468_v58, %v2818_v12  ;;  %v3476_v52 = vrot.slane %v2823_v0, 3  ;;  %v3478_v50 = vrot.slane %v2824_v15, 2  ;;  %v1220_v25 = vmul.f32 %v10653_v48, %v10772_v41  ;;  %v214_v12 = vld [vmem:[%s14188_s0 + $0x2f4] sm:$0x1]  ;;  %v215_v0 = vld [vmem:[%s14188_s0 + $0x2f8] sm:$0x1]  ;;  %v10913_v41 = vpop.xlane.xlu0 %1245  ;;  %v5011_v39 = vpop.f32.mrf.mxu3 }
 0x198   :  { %v3471_v32 = vsel %vm544_vm1, %v3470_v11, %v3469_v9  ;;  %v3715_v38 = vadd.f32 %v10376_v40, %v3714_v1  ;;  %v3480_v15 = vrot.slane %v2825_v47, 1  ;;  %v1117_v11 = vadd.f32 %v10376_v40, %v1116_v31  ;;  %v216_v1 = vld [vmem:[%s14188_s0 + $0x2fc] sm:$0x1] }
 0x199   :  { %v3473_v58 = vsel %vm547_vm2, %v3472_v35, %v3471_v32  ;;  %v869_v9 = vrot.slane %v210_v13, 7  ;;  %v1277_v35 = vsel %vm1240_vm8, %v1220_v25, 0.0  ;;  %v10929_v31 = vadd.f32 %v10376_v40, %v2417_v8  ;;  %v1524_v13 = vld [vmem:[%s14188_s0 + $0x2ed] sm:$0x1]  ;;  %v1521_v8 = vld [vmem:[%s14188_s0 + $0x2e1] sm:$0x1] }
 0x19a   :  { %v10909_v30 = vpop.eup %6949  ;;  %v3475_v47 = vsel %vm550_vm3, %v3474_v21, %v3473_v58  ;;  %v871_v32 = vrot.slane %v211_v33, 6  ;;  %6955 = vtanh.f32 %v3715_v38  ;;  %v873_v58 = vrot.slane %v212_v24, 5  ;;  %v1526_v33 = vld [vmem:[%s14188_s0 + $0x2f5] sm:$0x1]  ;;  %v1527_v25 = vld [vmem:[%s14188_s0 + $0x2f9] sm:$0x1] }
 0x19b   :  { %v10924_v53 = vpop.eup %6951  ;;  %5166 = vadd.xlane.f32.xlu2 %v5165_v49  ;;  %v3477_v14 = vsel %vm553_vm4, %v3476_v52, %v3475_v47  ;;  %v870_v21 = vsel %vm541_vm0, %v869_v9, %v209_v22  ;;  %6957 = vtanh.f32 %v1117_v11  ;;  %v875_v24 = vrot.slane %v213_v20, 4  ;;  %v1528_v52 = vld [vmem:[%s14188_s0 + $0x2fd] sm:$0x1]  ;;  %v4116_v38 = vld [vmem:[%s14188_s0 + $0x2e7] sm:$0x1] }
 0x19c   :  { %v6954_v5 = vpop.eup %6953  ;;  %2572 = vadd.xlane.f32.xlu1 %v2571_v61  ;;  %v3479_v49 = vsel %vm556_vm5, %v3478_v50, %v3477_v14  ;;  %1278 = vadd.xlane.f32.xlu0 %v1277_v35  ;;  %v872_v22 = vsel %vm544_vm1, %v871_v32, %v870_v21  ;;  %v877_v47 = vrot.slane %v214_v12, 3  ;;  %v879_v14 = vrot.slane %v215_v0, 2  ;;  %v4117_v50 = vld [vmem:[%s14188_s0 + $0x2eb] sm:$0x1]  ;;  %v4118_v20 = vld [vmem:[%s14188_s0 + $0x2ef] sm:$0x1] }
 0x19d   :  { %v10957_v9 = vsel %vm559_vm6, %v3480_v15, %v3479_v49  ;;  %v874_v61 = vsel %vm547_vm2, %v873_v58, %v872_v22  ;;  %v881_v35 = vrot.slane %v216_v1, 1  ;;  %v2171_v15 = vrot.slane %v1522_v19, 7  ;;  %v4115_v12 = vld [vmem:[%s14188_s0 + $0x2e3] sm:$0x1]  ;;  %v4119_v0 = vld [vmem:[%s14188_s0 + $0x2f3] sm:$0x1]  ;;  %v11000_v54 = vpop.xlane.xlu1 %1248 }
 0x19e   :  { %14424 = vst [vmem:[#allocation94_spill] sm:$0xff] %v10957_v9  ;;  %6735 = vmatmul.msk.f32.gmra.mxu2 %vm995_vm7, %v10957_v9  ;;  %v876_v11 = vsel %vm550_vm3, %v875_v24, %v874_v61  ;;  %v2173_v32 = vrot.slane %v1523_v4, 6  ;;  %v2175_v58 = vrot.slane %v1524_v13, 5  ;;  %v2177_v49 = vrot.slane %v1525_v44, 4  ;;  %v4120_v24 = vld [vmem:[%s14188_s0 + $0x2f7] sm:$0x1] }
 0x19f   :  { %v878_v21 = vsel %vm553_vm4, %v877_v47, %v876_v11  ;;  %v2179_v22 = vrot.slane %v1526_v33, 3  ;;  %v2172_v4 = vsel %vm541_vm0, %v2171_v15, %v1521_v8  ;;  %v2181_v1 = vrot.slane %v1527_v25, 2  ;;  %v4121_v9 = vld [vmem:[%s14188_s0 + $0x2fb] sm:$0x1]  ;;  %v4122_v13 = vld [vmem:[%s14188_s0 + $0x2ff] sm:$0x1]  ;;  %v10993_v8 = vpop.xlane.xlu2 %5139 }
 0x1a0   :  { %v880_v19 = vsel %vm556_vm5, %v879_v14, %v878_v21  ;;  %v2183_v61 = vrot.slane %v1528_v52, 1  ;;  %v10987_v44 = vpop.eup %6955  ;;  %v2174_v47 = vsel %vm544_vm1, %v2173_v32, %v2172_v4  ;;  %v4765_v14 = vrot.slane %v4116_v38, 7 }
 0x1a1   :  { %v10990_v33 = vsel %vm559_vm6, %v881_v35, %v880_v19  ;;  %v4767_v11 = vrot.slane %v4117_v50, 6  ;;  %v10995_v25 = vpop.eup %6957  ;;  %v2176_v52 = vsel %vm547_vm2, %v2175_v58, %v2174_v47  ;;  %v4769_v15 = vrot.slane %v4118_v20, 5  ;;  %v11004_v19 = vpop.xlane.xlu0 %2542 }
 0x1a2   :  { %14425 = vst [vmem:[#allocation95_spill] sm:$0xff] %v10990_v33  ;;  %6671 = vmatmul.msk.f32.gmra.mxu0 %vm995_vm7, %v10990_v33  ;;  %v4771_v21 = vrot.slane %v4119_v0, 4  ;;  %v4773_v18 = vrot.slane %v4120_v24, 3  ;;  %v2178_v35 = vsel %vm550_vm3, %v2177_v49, %v2176_v52  ;;  %v4766_v38 = vsel %vm541_vm0, %v4765_v14, %v4115_v12  ;;  %v1119_v58 = vpop.f32.mrf.mxu0  ;;  %v221_v14 = vld [vmem:[%s14188_s0 + $0x310] sm:$0x1] }
 0x1a3   :  { %v4775_v50 = vrot.slane %v4121_v9, 2  ;;  %v4777_v32 = vrot.slane %v4122_v13, 1  ;;  %v2180_v4 = vsel %vm553_vm4, %v2179_v22, %v2178_v35  ;;  %v4768_v33 = vsel %vm544_vm1, %v4767_v11, %v4766_v38  ;;  %v3717_v13 = vpop.f32.mrf.mxu2  ;;  %v217_v22 = vld [vmem:[%s14188_s0 + $0x300] sm:$0x1]  ;;  %v222_v11 = vld [vmem:[%s14188_s0 + $0x314] sm:$0x1] }
 0x1a4   :  { %v2518_v20 = vmul.f32 %v10653_v48, %v10924_v53  ;;  %v3815_v0 = vmul.f32 %v10653_v48, %v10909_v30  ;;  %v2182_v24 = vsel %vm556_vm5, %v2181_v1, %v2180_v4  ;;  %v4770_v49 = vsel %vm547_vm2, %v4769_v15, %v4768_v33  ;;  %v218_v53 = vld [vmem:[%s14188_s0 + $0x304] sm:$0x1]  ;;  %v219_v30 = vld [vmem:[%s14188_s0 + $0x308] sm:$0x1]  ;;  %v220_v1 = vld [vmem:[%s14188_s0 + $0x30c] sm:$0x1] }
 0x1a5   :  { %v5112_v9 = vmul.f32 %v10653_v48, %v6954_v5  ;;  %v5012_v12 = vadd.f32 %v10376_v40, %v5011_v39  ;;  %v11029_v5 = vsel %vm559_vm6, %v2183_v61, %v2182_v24  ;;  %v4772_v39 = vsel %vm550_vm3, %v4771_v21, %v4770_v49  ;;  %v223_v21 = vld [vmem:[%s14188_s0 + $0x318] sm:$0x1]  ;;  %v224_v35 = vld [vmem:[%s14188_s0 + $0x31c] sm:$0x1]  ;;  %v2826_v4 = vld [vmem:[%s14188_s0 + $0x302] sm:$0x1] }
 0x1a6   :  { %14426 = vst [vmem:[#allocation96_spill] sm:$0xff] %v11029_v5  ;;  %v2574_v33 = vsel %vm1240_vm8, %v2518_v20, 0.0  ;;  %v3871_v47 = vsel %vm1240_vm8, %v3815_v0, 0.0  ;;  %6959 = vtanh.f32 %v10929_v31  ;;  %6703 = vmatmul.msk.f32.gmra.mxu1 %vm995_vm7, %v11029_v5  ;;  %v4774_v61 = vsel %vm553_vm4, %v4773_v18, %v4772_v39  ;;  %v2827_v20 = vld [vmem:[%s14188_s0 + $0x306] sm:$0x1] }
 0x1a7   :  { %2575 = vadd.xlane.f32.xlu2 %v2574_v33  ;;  %v5168_v52 = vsel %vm1240_vm8, %v5112_v9, 0.0  ;;  %v1120_v15 = vadd.f32 %v10376_v40, %v1119_v58  ;;  %v4776_v31 = vsel %vm556_vm5, %v4775_v50, %v4774_v61  ;;  %3872 = vadd.xlane.f32.xlu1 %v3871_v47  ;;  %6961 = vtanh.f32 %v5012_v12  ;;  %v2828_v0 = vld [vmem:[%s14188_s0 + $0x30a] sm:$0x1]  ;;  %v2830_v49 = vld [vmem:[%s14188_s0 + $0x312] sm:$0x1]  ;;  %v11085_v47 = vpop.xlane.xlu2 %2548 }
 0x1a8   :  { %5169 = vadd.xlane.f32.xlu0 %v5168_v52  ;;  %v3718_v18 = vadd.f32 %v10376_v40, %v3717_v13  ;;  %v883_v38 = vrot.slane %v218_v53, 7  ;;  %v11064_v50 = vsel %vm559_vm6, %v4777_v32, %v4776_v31  ;;  %v885_v58 = vrot.slane %v219_v30, 6  ;;  %v2829_v40 = vld [vmem:[%s14188_s0 + $0x30e] sm:$0x1]  ;;  %v2831_v13 = vld [vmem:[%s14188_s0 + $0x316] sm:$0x1]  ;;  %v11091_v31 = vpop.xlane.xlu1 %2545 }
 0x1a9   :  { %14427 = vst [vmem:[#allocation97_spill] sm:$0xff] %v11064_v50  ;;  %6963 = vtanh.f32 %v1120_v15  ;;  %v887_v24 = vrot.slane %v220_v1, 5  ;;  %6767 = vmatmul.msk.f32.gmra.mxu3 %vm995_vm7, %v11064_v50  ;;  %v889_v12 = vrot.slane %v221_v14, 4  ;;  %v891_v32 = vrot.slane %v222_v11, 3  ;;  %v2832_v53 = vld [vmem:[%s14188_s0 + $0x31a] sm:$0x1] }
 0x1aa   :  { %6965 = vtanh.f32 %v3718_v18  ;;  %v884_v9 = vsel %vm541_vm0, %v883_v38, %v217_v22  ;;  %v893_v1 = vrot.slane %v223_v21, 2  ;;  %v895_v39 = vrot.slane %v224_v35, 1  ;;  %v2833_v33 = vld [vmem:[%s14188_s0 + $0x31e] sm:$0x1]  ;;  %v4124_v15 = vld [vmem:[%s14188_s0 + $0x307] sm:$0x1] }
 0x1ab   :  { %v886_v30 = vsel %vm544_vm1, %v885_v58, %v884_v9  ;;  %v3482_v22 = vrot.slane %v2827_v20, 7  ;;  %v3484_v11 = vrot.slane %v2828_v0, 6  ;;  %v3486_v61 = vrot.slane %v2829_v40, 5  ;;  %v4125_v58 = vld [vmem:[%s14188_s0 + $0x30b] sm:$0x1]  ;;  %v2420_v0 = vpop.f32.mrf.mxu1 }
 0x1ac   :  { %v888_v14 = vsel %vm547_vm2, %v887_v24, %v886_v30  ;;  %v3488_v52 = vrot.slane %v2830_v49, 4  ;;  %v6960_v21 = vpop.eup %6959  ;;  %v3490_v38 = vrot.slane %v2831_v13, 3  ;;  %v3492_v20 = vrot.slane %v2832_v53, 2  ;;  %v11098_v24 = vpop.xlane.xlu0 %3842  ;;  %v4126_v13 = vld [vmem:[%s14188_s0 + $0x30f] sm:$0x1] }
 0x1ad   :  { %v890_v35 = vsel %vm550_vm3, %v889_v12, %v888_v14  ;;  %v3483_v18 = vsel %vm541_vm0, %v3482_v22, %v2826_v4  ;;  %v11100_v40 = vpop.eup %6961  ;;  %v3494_v30 = vrot.slane %v2833_v33, 1  ;;  %v3816_v12 = vmul.f32 %v10653_v48, %v10987_v44  ;;  %v4123_v4 = vld [vmem:[%s14188_s0 + $0x303] sm:$0x1]  ;;  %v4127_v44 = vld [vmem:[%s14188_s0 + $0x313] sm:$0x1] }
 0x1ae   :  { %v892_v49 = vsel %vm553_vm4, %v891_v32, %v890_v35  ;;  %v3485_v9 = vsel %vm544_vm1, %v3484_v11, %v3483_v18  ;;  %v1221_v33 = vmul.f32 %v10653_v48, %v10995_v25  ;;  %v4128_v14 = vld [vmem:[%s14188_s0 + $0x317] sm:$0x1]  ;;  %v4779_v11 = vrot.slane %v4124_v15, 7  ;;  %v4129_v25 = vld [vmem:[%s14188_s0 + $0x31b] sm:$0x1] }
 0x1af   :  { %v11112_v53 = vpop.eup %6963  ;;  %v894_v22 = vsel %vm556_vm5, %v893_v1, %v892_v49  ;;  %v3487_v32 = vsel %vm547_vm2, %v3486_v61, %v3485_v9  ;;  %v3874_v61 = vsel %vm1240_vm8, %v3816_v12, 0.0  ;;  %v4130_v49 = vld [vmem:[%s14188_s0 + $0x31f] sm:$0x1]  ;;  %v4781_v9 = vrot.slane %v4125_v58, 6  ;;  %v1530_v58 = vld [vmem:[%s14188_s0 + $0x305] sm:$0x1] }
 0x1b0   :  { %v11124_v35 = vpop.eup %6965  ;;  %v11127_v18 = vsel %vm559_vm6, %v895_v39, %v894_v22  ;;  %v3489_v1 = vsel %vm550_vm3, %v3488_v52, %v3487_v32  ;;  %3875 = vadd.xlane.f32.xlu2 %v3874_v61  ;;  %v1280_v39 = vsel %vm1240_vm8, %v1221_v33, 0.0  ;;  %v4780_v52 = vsel %vm541_vm0, %v4779_v11, %v4123_v4  ;;  %v5014_v22 = vpop.f32.mrf.mxu3  ;;  %v1531_v61 = vld [vmem:[%s14188_s0 + $0x309] sm:$0x1] }
 0x1b1   :  { %14428 = vst [vmem:[#allocation98_spill] sm:$0xff] %v11127_v18  ;;  %6672 = vmatmul.msk.f32.gmra.mxu0 %vm995_vm7, %v11127_v18  ;;  %v3491_v15 = vsel %vm553_vm4, %v3490_v38, %v3489_v1  ;;  %v4783_v12 = vrot.slane %v4126_v13, 5  ;;  %1281 = vadd.xlane.f32.xlu1 %v1280_v39  ;;  %v4782_v50 = vsel %vm544_vm1, %v4781_v9, %v4780_v52  ;;  %v4785_v5 = vrot.slane %v4127_v44, 4  ;;  %v1122_v13 = vpop.f32.mrf.mxu0  ;;  %v11178_v9 = vpop.xlane.xlu2 %1254 }
 0x1b2   :  { %v3493_v32 = vsel %vm556_vm5, %v3492_v20, %v3491_v15  ;;  %v4787_v3 = vrot.slane %v4128_v14, 3  ;;  %v4789_v1 = vrot.slane %v4129_v25, 2  ;;  %v4791_v4 = vrot.slane %v4130_v49, 1  ;;  %v11158_v14 = vld [vmem:[%s14189_s2] ss:$0 sm:$0xff] }
 0x1b3   :  { %v11148_v38 = vsel %vm559_vm6, %v3494_v30, %v3493_v32  ;;  %v4784_v33 = vsel %vm547_vm2, %v4783_v12, %v4782_v50  ;;  %v2519_v44 = vmul.f32 %v10653_v48, %v6960_v21  ;;  %v2421_v30 = vadd.f32 %v11158_v14, %v2420_v0  ;;  %v1529_v50 = vld [vmem:[%s14188_s0 + $0x301] sm:$0x1]  ;;  %v1533_v0 = vld [vmem:[%s14188_s0 + $0x311] sm:$0x1]  ;;  %v1534_v25 = vld [vmem:[%s14188_s0 + $0x315] sm:$0x1]  ;;  %v11194_v32 = vpop.xlane.xlu1 %1251 }
 0x1b4   :  { %14429 = vst [vmem:[#allocation99_spill] sm:$0xff] %v11148_v38  ;;  %6736 = vmatmul.msk.f32.gmra.mxu2 %vm995_vm7, %v11148_v38  ;;  %v4786_v20 = vsel %vm550_vm3, %v4785_v5, %v4784_v33  ;;  %v5015_v11 = vadd.f32 %v11158_v14, %v5014_v22  ;;  %v1532_v5 = vld [vmem:[%s14188_s0 + $0x30d] sm:$0x1]  ;;  %v2185_v49 = vrot.slane %v1530_v58, 7  ;;  %v11183_v15 = vsel %vm5228_vm9, %v10733_v26, %v10808_v46  ;;  %v1535_v12 = vld [vmem:[%s14188_s0 + $0x319] sm:$0x1]  ;;  %v2423_v33 = vpop.f32.mrf.mxu1 }
 0x1b5   :  { %v4788_v21 = vsel %vm553_vm4, %v4787_v3, %v4786_v20  ;;  %v2577_v3 = vsel %vm1240_vm8, %v2519_v44, 0.0  ;;  %v1123_v52 = vadd.f32 %v11158_v14, %v1122_v13  ;;  %v1536_v22 = vld [vmem:[%s14188_s0 + $0x31d] sm:$0x1]  ;;  %6967 = vtanh.f32 %v2421_v30 }
 0x1b6   :  { %v4790_v39 = vsel %vm556_vm5, %v4789_v1, %v4788_v21  ;;  %2578 = vadd.xlane.f32.xlu0 %v2577_v3  ;;  %v2186_v26 = vsel %vm541_vm0, %v2185_v49, %v1529_v50  ;;  %v2187_v46 = vrot.slane %v1531_v61, 6  ;;  %v11200_v1 = vpop.xlane.xlu0 %5142  ;;  %6969 = vtanh.f32 %v5015_v11  ;;  %v3720_v21 = vpop.f32.mrf.mxu2  ;;  %v227_v49 = vld [vmem:[%s14188_s0 + $0x328] sm:$0x1]  ;;  %v228_v11 = vld [vmem:[%s14188_s0 + $0x32c] sm:$0x1] }
 0x1b7   :  { %v11197_v58 = vsel %vm559_vm6, %v4791_v4, %v4790_v39  ;;  %v2189_v13 = vrot.slane %v1532_v5, 5  ;;  %v2191_v20 = vrot.slane %v1533_v0, 4  ;;  %v2193_v44 = vrot.slane %v1534_v25, 3  ;;  %v226_v4 = vld [vmem:[%s14188_s0 + $0x324] sm:$0x1] }
 0x1b8   :  { %14430 = vst [vmem:[#allocation100_spill] sm:$0xff] %v11197_v58  ;;  %6768 = vmatmul.msk.f32.gmra.mxu3 %vm995_vm7, %v11197_v58  ;;  %v2188_v30 = vsel %vm544_vm1, %v2187_v46, %v2186_v26  ;;  %v2195_v39 = vrot.slane %v1535_v12, 2  ;;  %v2197_v50 = vrot.slane %v1536_v22, 1  ;;  %v1222_v61 = vmul.f32 %v10653_v48, %v11112_v53  ;;  %v5017_v12 = vpop.f32.mrf.mxu3  ;;  %v225_v53 = vld [vmem:[%s14188_s0 + $0x320] sm:$0x1] }
 0x1b9   :  { %v2190_v5 = vsel %vm547_vm2, %v2189_v13, %v2188_v30  ;;  %v5113_v0 = vmul.f32 %v10653_v48, %v11100_v40  ;;  %v3817_v25 = vmul.f32 %v10653_v48, %v11124_v35  ;;  %v2424_v3 = vadd.f32 %v11158_v14, %v2423_v33  ;;  %v229_v22 = vld [vmem:[%s14188_s0 + $0x330] sm:$0x1]  ;;  %v11231_v26 = vld [vmem:[%s14188_s0 + $0x334] sm:$0x1]  ;;  %v11236_v48 = vld [vmem:[%s14188_s0 + $0x338] sm:$0x1] }
 0x1ba   :  { %6971 = vtanh.f32 %v1123_v52  ;;  %v2192_v40 = vsel %vm550_vm3, %v2191_v20, %v2190_v5  ;;  %v1283_v35 = vsel %vm1240_vm8, %v1222_v61, 0.0  ;;  %v3721_v46 = vadd.f32 %v11158_v14, %v3720_v21  ;;  %v11244_v33 = vld [vmem:[%s14188_s0 + $0x33c] sm:$0x1]  ;;  %v1538_v13 = vld [vmem:[%s14188_s0 + $0x325] sm:$0x1] }
 0x1bb   :  { %v1539_v30 = vld [vmem:[%s14188_s0 + $0x329] sm:$0x1]  ;;  %v2194_v52 = vsel %vm553_vm4, %v2193_v44, %v2192_v40  ;;  %1284 = vadd.xlane.f32.xlu2 %v1283_v35  ;;  %v5171_v20 = vsel %vm1240_vm8, %v5113_v0, 0.0  ;;  %v3877_v21 = vsel %vm1240_vm8, %v3817_v25, 0.0  ;;  %6973 = vtanh.f32 %v2424_v3  ;;  %v1540_v61 = vld [vmem:[%s14188_s0 + $0x32d] sm:$0x1]  ;;  %v11263_v58 = vpop.eup %6967 }
 0x1bc   :  { %v11261_v5 = vld [vmem:[%s14188_s0 + $0x331] sm:$0x1]  ;;  %v2196_v38 = vsel %vm556_vm5, %v2195_v39, %v2194_v52  ;;  %5172 = vadd.xlane.f32.xlu1 %v5171_v20  ;;  %6975 = vtanh.f32 %v3721_v46  ;;  %v5018_v44 = vadd.f32 %v11158_v14, %v5017_v12  ;;  %v897_v0 = vrot.slane %v226_v4, 7  ;;  %v1537_v25 = vld [vmem:[%s14188_s0 + $0x321] sm:$0x1]  ;;  %v11278_v35 = vpop.eup %6969 }
 0x1bd   :  { %v1542_v3 = vld [vmem:[%s14188_s0 + $0x335] sm:$0x1]  ;;  %v11276_v40 = vld [vmem:[%s14188_s0 + $0x339] sm:$0x1]  ;;  %v11281_v39 = vsel %vm559_vm6, %v2197_v50, %v2196_v38  ;;  %v899_v12 = vrot.slane %v227_v49, 6  ;;  %v901_v4 = vrot.slane %v228_v11, 5  ;;  %v11299_v11 = vpop.xlane.xlu2 %3848 }
 0x1be   :  { %14431 = vst [vmem:[#allocation101_spill] sm:$0xff] %v11281_v39  ;;  %v903_v46 = vrot.slane %v229_v22, 4  ;;  %v11286_v52 = vld [vmem:[%s14188_s0 + $0x33d] sm:$0x1]  ;;  %6704 = vmatmul.msk.f32.gmra.mxu1 %vm995_vm7, %v11281_v39  ;;  %3878 = vadd.xlane.f32.xlu0 %v3877_v21  ;;  %6977 = vtanh.f32 %v5018_v44  ;;  %v898_v20 = vsel %vm541_vm0, %v897_v0, %v225_v53  ;;  %v905_v18 = vrot.slane %v11231_v26, 3 }
 0x1bf   :  { %v907_v38 = vrot.slane %v11236_v48, 2  ;;  %v2835_v50 = vld [vmem:[%s14188_s0 + $0x326] sm:$0x1]  ;;  %v2836_v49 = vld [vmem:[%s14188_s0 + $0x32a] sm:$0x1]  ;;  %v900_v22 = vsel %vm544_vm1, %v899_v12, %v898_v20  ;;  %v909_v21 = vrot.slane %v11244_v33, 1  ;;  %v11306_v48 = vpop.xlane.xlu1 %3845 }
 0x1c0   :  { %v2199_v44 = vrot.slane %v1538_v13, 7  ;;  %v2201_v53 = vrot.slane %v1539_v30, 6  ;;  %v2837_v26 = vld [vmem:[%s14188_s0 + $0x32e] sm:$0x1]  ;;  %v11308_v0 = vpop.eup %6971  ;;  %v902_v39 = vsel %vm547_vm2, %v901_v4, %v900_v22  ;;  %v2203_v55 = vrot.slane %v1540_v61, 5  ;;  %v11315_v13 = vpop.xlane.xlu0 %2551 }
 0x1c1   :  { %v2205_v28 = vrot.slane %v11261_v5, 4  ;;  %v2207_v2 = vrot.slane %v1542_v3, 3  ;;  %v2838_v33 = vld [vmem:[%s14188_s0 + $0x332] sm:$0x1]  ;;  %v11317_v30 = vpop.eup %6973  ;;  %v904_v12 = vsel %vm550_vm3, %v903_v46, %v902_v39  ;;  %v2209_v7 = vrot.slane %v11276_v40, 2 }
 0x1c2   :  { %v2200_v20 = vsel %vm541_vm0, %v2199_v44, %v1537_v25  ;;  %v2211_v4 = vrot.slane %v11286_v52, 1  ;;  %v2834_v61 = vld [vmem:[%s14188_s0 + $0x322] sm:$0x1]  ;;  %v2839_v5 = vld [vmem:[%s14188_s0 + $0x336] sm:$0x1]  ;;  %v11329_v3 = vpop.eup %6975  ;;  %v906_v22 = vsel %vm553_vm4, %v905_v18, %v904_v12  ;;  %v3496_v46 = vrot.slane %v2835_v50, 7 }
 0x1c3   :  { %v2202_v39 = vsel %vm544_vm1, %v2201_v53, %v2200_v20  ;;  %v2840_v25 = vld [vmem:[%s14188_s0 + $0x33a] sm:$0x1]  ;;  %v2841_v40 = vld [vmem:[%s14188_s0 + $0x33e] sm:$0x1]  ;;  %v3498_v52 = vrot.slane %v2836_v49, 6  ;;  %v908_v44 = vsel %vm556_vm5, %v907_v38, %v906_v22  ;;  %v3500_v34 = vrot.slane %v2837_v26, 5 }
 0x1c4   :  { %v2204_v36 = vsel %vm547_vm2, %v2203_v55, %v2202_v39  ;;  %v3502_v42 = vrot.slane %v2838_v33, 4  ;;  %v4131_v18 = vld [vmem:[%s14188_s0 + $0x323] sm:$0x1]  ;;  %v4132_v53 = vld [vmem:[%s14188_s0 + $0x327] sm:$0x1]  ;;  %v11350_v50 = vpop.eup %6977  ;;  %v11353_v38 = vsel %vm559_vm6, %v909_v21, %v908_v44  ;;  %v3497_v49 = vsel %vm541_vm0, %v3496_v46, %v2834_v61 }
 0x1c5   :  { %v4133_v12 = vld [vmem:[%s14188_s0 + $0x32b] sm:$0x1]  ;;  %14432 = vst [vmem:[#allocation102_spill] sm:$0xff] %v11353_v38  ;;  %v2206_v55 = vsel %vm550_vm3, %v2205_v28, %v2204_v36  ;;  %v3504_v26 = vrot.slane %v2839_v5, 3  ;;  %v4134_v33 = vld [vmem:[%s14188_s0 + $0x32f] sm:$0x1]  ;;  %6673 = vmatmul.msk.f32.gmra.mxu0 %vm995_vm7, %v11353_v38  ;;  %v3499_v21 = vsel %vm544_vm1, %v3498_v52, %v3497_v49  ;;  %v1125_v38 = vpop.f32.mrf.mxu0  ;;  %v11386_v62 = vpop.xlane.xlu2 %1257 }
 0x1c6   :  { %v4135_v20 = vld [vmem:[%s14188_s0 + $0x333] sm:$0x1]  ;;  %v2208_v22 = vsel %vm553_vm4, %v2207_v2, %v2206_v55  ;;  %v3506_v39 = vrot.slane %v2840_v25, 2  ;;  %v3508_v28 = vrot.slane %v2841_v40, 1  ;;  %v4136_v36 = vld [vmem:[%s14188_s0 + $0x337] sm:$0x1]  ;;  %v3501_v46 = vsel %vm547_vm2, %v3500_v34, %v3499_v21 }
 0x1c7   :  { %v4137_v61 = vld [vmem:[%s14188_s0 + $0x33b] sm:$0x1]  ;;  %v2210_v5 = vsel %vm556_vm5, %v2209_v7, %v2208_v22  ;;  %v4138_v2 = vld [vmem:[%s14188_s0 + $0x33f] sm:$0x1]  ;;  %v4793_v44 = vrot.slane %v4132_v53, 7  ;;  %v4795_v52 = vrot.slane %v4133_v12, 6  ;;  %v3503_v40 = vsel %vm550_vm3, %v3502_v42, %v3501_v46 }
 0x1c8   :  { %v11379_v25 = vsel %vm559_vm6, %v2211_v4, %v2210_v5  ;;  %v4797_v55 = vrot.slane %v4134_v33, 5  ;;  %v4799_v49 = vrot.slane %v4135_v20, 4  ;;  %v3505_v7 = vsel %vm553_vm4, %v3504_v26, %v3503_v40  ;;  %v11393_v42 = vld [vmem:[%s14190_s3] ss:$0 sm:$0xff]  ;;  %v2426_v33 = vpop.f32.mrf.mxu1  ;;  %v2843_v5 = vld [vmem:[%s14188_s0 + $0x346] sm:$0x1]  ;;  %v11410_v46 = vpop.xlane.xlu0 %3851 }
 0x1c9   :  { %14433 = vst [vmem:[#allocation103_spill] sm:$0xff] %v11379_v25  ;;  %6705 = vmatmul.msk.f32.gmra.mxu1 %vm995_vm7, %v11379_v25  ;;  %v4794_v34 = vsel %vm541_vm0, %v4793_v44, %v4131_v18  ;;  %v4801_v22 = vrot.slane %v4136_v36, 3  ;;  %v4803_v21 = vrot.slane %v4137_v61, 2  ;;  %v3507_v53 = vsel %vm556_vm5, %v3506_v39, %v3505_v7  ;;  %v11397_v18 = vpop.xlane.xlu1 %5145  ;;  %v2844_v44 = vld [vmem:[%s14188_s0 + $0x34a] sm:$0x1] }
 0x1ca   :  { %v4796_v4 = vsel %vm544_vm1, %v4795_v52, %v4794_v34  ;;  %v4805_v12 = vrot.slane %v4138_v2, 1  ;;  %v5114_v26 = vmul.f32 %v11393_v42, %v11278_v35  ;;  %v11400_v20 = vsel %vm559_vm6, %v3508_v28, %v3507_v53  ;;  %v2842_v2 = vld [vmem:[%s14188_s0 + $0x342] sm:$0x1]  ;;  %v2848_v53 = vld [vmem:[%s14188_s0 + $0x35a] sm:$0x1] }
 0x1cb   :  { %14434 = vst [vmem:[#allocation104_spill] sm:$0xff] %v11400_v20  ;;  %v4798_v36 = vsel %vm547_vm2, %v4797_v55, %v4796_v4  ;;  %v2520_v39 = vmul.f32 %v11393_v42, %v11263_v58  ;;  %v1223_v61 = vmul.f32 %v11393_v42, %v11308_v0  ;;  %v11415_v35 = vsel %vm5261_vm10, %v11183_v15, %v10815_v60  ;;  %v2846_v55 = vld [vmem:[%s14188_s0 + $0x352] sm:$0x1] }
 0x1cc   :  { %6737 = vmatmul.msk.f32.gmra.mxu2 %vm995_vm7, %v11400_v20  ;;  %v4800_v28 = vsel %vm550_vm3, %v4799_v49, %v4798_v36  ;;  %v5174_v58 = vsel %vm1240_vm8, %v5114_v26, 0.0  ;;  %v1126_v0 = vadd.f32 %v11158_v14, %v1125_v38  ;;  %v2427_v40 = vadd.f32 %v11158_v14, %v2426_v33  ;;  %v2845_v38 = vld [vmem:[%s14188_s0 + $0x34e] sm:$0x1]  ;;  %v3723_v26 = vpop.f32.mrf.mxu2  ;;  %v235_v33 = vld [vmem:[%s14188_s0 + $0x348] sm:$0x1] }
 0x1cd   :  { %v4802_v60 = vsel %vm553_vm4, %v4801_v22, %v4800_v28  ;;  %5175 = vadd.xlane.f32.xlu2 %v5174_v58  ;;  %v2580_v15 = vsel %vm1240_vm8, %v2520_v39, 0.0  ;;  %v1286_v52 = vsel %vm1240_vm8, %v1223_v61, 0.0  ;;  %v11441_v49 = vsel %vm5228_vm9, %v10913_v41, %v11004_v19  ;;  %v2847_v22 = vld [vmem:[%s14188_s0 + $0x356] sm:$0x1]  ;;  %v234_v41 = vld [vmem:[%s14188_s0 + $0x344] sm:$0x1]  ;;  %v5020_v28 = vpop.f32.mrf.mxu3 }
 0x1ce   :  { %v4804_v7 = vsel %vm556_vm5, %v4803_v21, %v4802_v60  ;;  %2581 = vadd.xlane.f32.xlu1 %v2580_v15  ;;  %1287 = vadd.xlane.f32.xlu0 %v1286_v52  ;;  %6979 = vtanh.f32 %v1126_v0  ;;  %v2521_v34 = vmul.f32 %v11393_v42, %v11317_v30  ;;  %v3818_v21 = vmul.f32 %v11393_v42, %v11329_v3  ;;  %v2849_v30 = vld [vmem:[%s14188_s0 + $0x35e] sm:$0x1]  ;;  %v233_v3 = vld [vmem:[%s14188_s0 + $0x340] sm:$0x1]  ;;  %v236_v15 = vld [vmem:[%s14188_s0 + $0x34c] sm:$0x1] }
 0x1cf   :  { %v11456_v19 = vsel %vm559_vm6, %v4805_v12, %v4804_v7  ;;  %6981 = vtanh.f32 %v2427_v40  ;;  %v3510_v4 = vrot.slane %v2843_v5, 7  ;;  %v3512_v36 = vrot.slane %v2844_v44, 6  ;;  %v1546_v7 = vld [vmem:[%s14188_s0 + $0x345] sm:$0x1] }
 0x1d0   :  { %14435 = vst [vmem:[#allocation105_spill] sm:$0xff] %v11456_v19  ;;  %6769 = vmatmul.msk.f32.gmra.mxu3 %vm995_vm7, %v11456_v19  ;;  %v2583_v12 = vsel %vm1240_vm8, %v2521_v34, 0.0  ;;  %v3514_v39 = vrot.slane %v2845_v38, 5  ;;  %v3516_v61 = vrot.slane %v2846_v55, 4  ;;  %v3880_v5 = vsel %vm1240_vm8, %v3818_v21, 0.0  ;;  %v11525_v20 = vpop.xlane.xlu0 %1260 }
 0x1d1   :  { %v3511_v58 = vsel %vm541_vm0, %v3510_v4, %v2842_v2  ;;  %v3518_v0 = vrot.slane %v2847_v22, 3  ;;  %v3520_v60 = vrot.slane %v2848_v53, 2  ;;  %v3522_v44 = vrot.slane %v2849_v30, 1  ;;  %v237_v55 = vld [vmem:[%s14188_s0 + $0x350] sm:$0x1]  ;;  %v11498_v4 = vpop.xlane.xlu2 %5148 }
 0x1d2   :  { %v3513_v52 = vsel %vm544_vm1, %v3512_v36, %v3511_v58  ;;  %v5115_v40 = vmul.f32 %v11393_v42, %v11350_v50  ;;  %v3724_v38 = vadd.f32 %v11158_v14, %v3723_v26  ;;  %v238_v2 = vld [vmem:[%s14188_s0 + $0x354] sm:$0x1]  ;;  %v5021_v22 = vadd.f32 %v11158_v14, %v5020_v28  ;;  %v239_v50 = vld [vmem:[%s14188_s0 + $0x358] sm:$0x1]  ;;  %v240_v53 = vld [vmem:[%s14188_s0 + $0x35c] sm:$0x1] }
 0x1d3   :  { %v3515_v34 = vsel %vm547_vm2, %v3514_v39, %v3513_v52  ;;  %v911_v21 = vrot.slane %v234_v41, 7  ;;  %v913_v30 = vrot.slane %v235_v33, 6  ;;  %v915_v28 = vrot.slane %v236_v15, 5  ;;  %v1545_v58 = vld [vmem:[%s14188_s0 + $0x341] sm:$0x1]  ;;  %v11513_v33 = vpop.xlane.xlu1 %2554 }
 0x1d4   :  { %v11500_v26 = vpop.eup %6979  ;;  %v3517_v36 = vsel %vm550_vm3, %v3516_v61, %v3515_v34  ;;  %v5177_v39 = vsel %vm1240_vm8, %v5115_v40, 0.0  ;;  %6983 = vtanh.f32 %v3724_v38  ;;  %v1547_v52 = vld [vmem:[%s14188_s0 + $0x349] sm:$0x1]  ;;  %v1548_v41 = vld [vmem:[%s14188_s0 + $0x34d] sm:$0x1]  ;;  %v917_v40 = vrot.slane %v237_v55, 4 }
 0x1d5   :  { %v11515_v19 = vpop.eup %6981  ;;  %2584 = vadd.xlane.f32.xlu2 %v2583_v12  ;;  %v3519_v61 = vsel %vm553_vm4, %v3518_v0, %v3517_v36  ;;  %6985 = vtanh.f32 %v5021_v22  ;;  %v912_v15 = vsel %vm541_vm0, %v911_v21, %v233_v3  ;;  %v1549_v38 = vld [vmem:[%s14188_s0 + $0x351] sm:$0x1]  ;;  %v1550_v34 = vld [vmem:[%s14188_s0 + $0x355] sm:$0x1]  ;;  %v919_v0 = vrot.slane %v238_v2, 3 }
 0x1d6   :  { %3881 = vadd.xlane.f32.xlu1 %v3880_v5  ;;  %v3521_v25 = vsel %vm556_vm5, %v3520_v60, %v3519_v61  ;;  %5178 = vadd.xlane.f32.xlu0 %v5177_v39  ;;  %v914_v12 = vsel %vm544_vm1, %v913_v30, %v912_v15  ;;  %v921_v22 = vrot.slane %v239_v50, 2  ;;  %v1551_v3 = vld [vmem:[%s14188_s0 + $0x359] sm:$0x1]  ;;  %v1552_v55 = vld [vmem:[%s14188_s0 + $0x35d] sm:$0x1]  ;;  %v923_v36 = vrot.slane %v240_v53, 1 }
 0x1d7   :  { %v11536_v21 = vsel %vm559_vm6, %v3522_v44, %v3521_v25  ;;  %v916_v5 = vsel %vm547_vm2, %v915_v28, %v914_v12  ;;  %v2213_v60 = vrot.slane %v1546_v7, 7  ;;  %v4139_v2 = vld [vmem:[%s14188_s0 + $0x343] sm:$0x1]  ;;  %v4140_v50 = vld [vmem:[%s14188_s0 + $0x347] sm:$0x1]  ;;  %v2215_v44 = vrot.slane %v1547_v52, 6 }
 0x1d8   :  { %14436 = vst [vmem:[#allocation106_spill] sm:$0xff] %v11536_v21  ;;  %v4141_v30 = vld [vmem:[%s14188_s0 + $0x34b] sm:$0x1]  ;;  %6738 = vmatmul.msk.f32.gmra.mxu2 %vm995_vm7, %v11536_v21  ;;  %v918_v25 = vsel %vm550_vm3, %v917_v40, %v916_v5  ;;  %v2217_v53 = vrot.slane %v1548_v41, 5  ;;  %v2219_v7 = vrot.slane %v1549_v38, 4  ;;  %v2221_v15 = vrot.slane %v1550_v34, 3 }
 0x1d9   :  { %v4142_v39 = vld [vmem:[%s14188_s0 + $0x34f] sm:$0x1]  ;;  %v920_v28 = vsel %vm553_vm4, %v919_v0, %v918_v25  ;;  %v2214_v61 = vsel %vm541_vm0, %v2213_v60, %v1545_v58  ;;  %v2223_v12 = vrot.slane %v1551_v3, 2  ;;  %v4144_v52 = vld [vmem:[%s14188_s0 + $0x357] sm:$0x1]  ;;  %v2225_v5 = vrot.slane %v1552_v55, 1  ;;  %v11584_v29 = vpop.xlane.xlu2 %2557 }
 0x1da   :  { %v11562_v41 = vpop.eup %6983  ;;  %v922_v40 = vsel %vm556_vm5, %v921_v22, %v920_v28  ;;  %v2216_v38 = vsel %vm544_vm1, %v2215_v44, %v2214_v61  ;;  %v4145_v58 = vld [vmem:[%s14188_s0 + $0x35b] sm:$0x1]  ;;  %v4146_v34 = vld [vmem:[%s14188_s0 + $0x35f] sm:$0x1]  ;;  %v4807_v0 = vrot.slane %v4140_v50, 7  ;;  %v4809_v22 = vrot.slane %v4141_v30, 6 }
 0x1db   :  { %v11572_v3 = vpop.eup %6985  ;;  %v11575_v60 = vsel %vm559_vm6, %v923_v36, %v922_v40  ;;  %v2218_v25 = vsel %vm547_vm2, %v2217_v53, %v2216_v38  ;;  %v4811_v28 = vrot.slane %v4142_v39, 5  ;;  %v4813_v61 = vrot.slane %v4143_v56, 4  ;;  %v1128_v40 = vpop.f32.mrf.mxu0  ;;  %v241_v56 = vld [vmem:[%s14188_s0 + $0x360] sm:$0x1]  ;;  %v242_v39 = vld [vmem:[%s14188_s0 + $0x364] sm:$0x1] }
 0x1dc   :  { %14437 = vst [vmem:[#allocation107_spill] sm:$0xff] %v11575_v60  ;;  %6674 = vmatmul.msk.f32.gmra.mxu0 %vm995_vm7, %v11575_v60  ;;  %v2220_v55 = vsel %vm550_vm3, %v2219_v7, %v2218_v25  ;;  %v4808_v44 = vsel %vm541_vm0, %v4807_v0, %v4139_v2  ;;  %v4815_v21 = vrot.slane %v4144_v52, 3  ;;  %v4817_v23 = vrot.slane %v4145_v58, 2  ;;  %v2429_v2 = vpop.f32.mrf.mxu1  ;;  %v3726_v38 = vpop.f32.mrf.mxu2  ;;  %v244_v58 = vld [vmem:[%s14188_s0 + $0x36c] sm:$0x1] }
 0x1dd   :  { %v2222_v50 = vsel %vm553_vm4, %v2221_v15, %v2220_v55  ;;  %v4810_v27 = vsel %vm544_vm1, %v4809_v22, %v4808_v44  ;;  %v4819_v36 = vrot.slane %v4146_v34, 1  ;;  %v1224_v7 = vmul.f32 %v11393_v42, %v11500_v26  ;;  %v243_v15 = vld [vmem:[%s14188_s0 + $0x368] sm:$0x1]  ;;  %v245_v34 = vld [vmem:[%s14188_s0 + $0x370] sm:$0x1]  ;;  %v11616_v0 = vpop.xlane.xlu0 %5151 }
 0x1de   :  { %v2224_v30 = vsel %vm556_vm5, %v2223_v12, %v2222_v50  ;;  %v4812_v53 = vsel %vm547_vm2, %v4811_v28, %v4810_v27  ;;  %vm5294_vm11 = vcmask 23552   ;;  %v11599_v12 = vpop.xlane.xlu1 %3854  ;;  %vm5327_vm12 = vcmask 31744   ;;  %v246_v22 = vld [vmem:[%s14188_s0 + $0x374] sm:$0x1]  ;;  %v247_v28 = vld [vmem:[%s14188_s0 + $0x378] sm:$0x1] }
 0x1df   :  { %v11602_v27 = vsel %vm559_vm6, %v2225_v5, %v2224_v30  ;;  %v4814_v26 = vsel %vm550_vm3, %v4813_v61, %v4812_v53  ;;  %v11608_v52 = vsel %vm5294_vm11, %v11415_v35, %v10821_v51  ;;  %v1289_v51 = vsel %vm1240_vm8, %v1224_v7, 0.0  ;;  %v2851_v50 = vld [vmem:[%s14188_s0 + $0x366] sm:$0x1]  ;;  %v2850_v7 = vld [vmem:[%s14188_s0 + $0x362] sm:$0x1] }
 0x1e0   :  { %14438 = vst [vmem:[#allocation108_spill] sm:$0xff] %v11602_v27  ;;  %6706 = vmatmul.msk.f32.gmra.mxu1 %vm995_vm7, %v11602_v27  ;;  %v4816_v5 = vsel %vm553_vm4, %v4815_v21, %v4814_v26  ;;  %v5328_v35 = vsel %vm5327_vm12, %v11608_v52, -inf  ;;  %v2522_v25 = vmul.f32 %v11393_v42, %v11515_v19  ;;  %1290 = vadd.xlane.f32.xlu1 %v1289_v51  ;;  %v248_v19 = vld [vmem:[%s14188_s0 + $0x37c] sm:$0x1]  ;;  %v925_v61 = vrot.slane %v242_v39, 7 }
 0x1e1   :  { %14439 = vst [vmem:[#allocation109_spill] sm:$0xff] %v11608_v52  ;;  %v4818_v55 = vsel %vm556_vm5, %v4817_v23, %v4816_v5  ;;  %5329 = vmax.xlane.f32.xlu2 %v5328_v35  ;;  %v1129_v21 = vadd.f32 %v11158_v14, %v1128_v40  ;;  %v2430_v44 = vadd.f32 %v11158_v14, %v2429_v2  ;;  %v2852_v2 = vld [vmem:[%s14188_s0 + $0x36a] sm:$0x1]  ;;  %v929_v39 = vrot.slane %v244_v58, 5  ;;  %v2854_v26 = vld [vmem:[%s14188_s0 + $0x372] sm:$0x1] }
 0x1e2   :  { %v11644_v30 = vsel %vm5228_vm9, %v11000_v54, %v11091_v31  ;;  %v11647_v23 = vsel %vm559_vm6, %v4819_v36, %v4818_v55  ;;  %v2586_v40 = vsel %vm1240_vm8, %v2522_v25, 0.0  ;;  %v3727_v53 = vadd.f32 %v11158_v14, %v3726_v38  ;;  %v2853_v54 = vld [vmem:[%s14188_s0 + $0x36e] sm:$0x1]  ;;  %v2855_v38 = vld [vmem:[%s14188_s0 + $0x376] sm:$0x1] }
 0x1e3   :  { %14440 = vst [vmem:[#allocation110_spill] sm:$0xff] %v11647_v23  ;;  %6770 = vmatmul.msk.f32.gmra.mxu3 %vm995_vm7, %v11647_v23  ;;  %2587 = vadd.xlane.f32.xlu0 %v2586_v40  ;;  %6987 = vtanh.f32 %v1129_v21  ;;  %v926_v31 = vsel %vm541_vm0, %v925_v61, %v241_v56  ;;  %v927_v36 = vrot.slane %v243_v15, 6  ;;  %v931_v5 = vrot.slane %v245_v34, 4  ;;  %v2856_v25 = vld [vmem:[%s14188_s0 + $0x37a] sm:$0x1]  ;;  %v1131_v60 = vpop.f32.mrf.mxu0 }
 0x1e4   :  { %6989 = vtanh.f32 %v2430_v44  ;;  %v933_v51 = vrot.slane %v246_v22, 3  ;;  %v935_v35 = vrot.slane %v247_v28, 2  ;;  %v937_v15 = vrot.slane %v248_v19, 1  ;;  %v2857_v58 = vld [vmem:[%s14188_s0 + $0x37e] sm:$0x1] }
 0x1e5   :  { %6991 = vtanh.f32 %v3727_v53  ;;  %v928_v56 = vsel %vm544_vm1, %v927_v36, %v926_v31  ;;  %v3524_v55 = vrot.slane %v2851_v50, 7  ;;  %v3526_v61 = vrot.slane %v2852_v2, 6  ;;  %v4148_v22 = vld [vmem:[%s14188_s0 + $0x367] sm:$0x1]  ;;  %v4149_v31 = vld [vmem:[%s14188_s0 + $0x36b] sm:$0x1]  ;;  %v11685_v50 = vpop.xlane.xlu2 %3857 }
 0x1e6   :  { %v930_v21 = vsel %vm547_vm2, %v929_v39, %v928_v56  ;;  %v3528_v44 = vrot.slane %v2853_v54, 5  ;;  %v3530_v34 = vrot.slane %v2854_v26, 4  ;;  %v3532_v53 = vrot.slane %v2855_v38, 3  ;;  %v4150_v26 = vld [vmem:[%s14188_s0 + $0x36f] sm:$0x1]  ;;  %v11697_v38 = vpop.xlane.xlu1 %1263 }
 0x1e7   :  { %v932_v28 = vsel %vm550_vm3, %v931_v5, %v930_v21  ;;  %v3525_v40 = vsel %vm541_vm0, %v3524_v55, %v2850_v7  ;;  %v3534_v19 = vrot.slane %v2856_v25, 2  ;;  %v3536_v36 = vrot.slane %v2857_v58, 1  ;;  %v4147_v7 = vld [vmem:[%s14188_s0 + $0x363] sm:$0x1]  ;;  %v4152_v58 = vld [vmem:[%s14188_s0 + $0x377] sm:$0x1]  ;;  %v11711_v21 = vpop.xlane.xlu0 %2560 }
 0x1e8   :  { %v934_v2 = vsel %vm553_vm4, %v933_v51, %v932_v28  ;;  %v3527_v54 = vsel %vm544_vm1, %v3526_v61, %v3525_v40  ;;  %v5116_v39 = vmul.f32 %v11393_v42, %v11572_v3  ;;  %v3819_v56 = vmul.f32 %v11393_v42, %v11562_v41  ;;  %v4151_v3 = vld [vmem:[%s14188_s0 + $0x373] sm:$0x1]  ;;  %v4153_v28 = vld [vmem:[%s14188_s0 + $0x37b] sm:$0x1]  ;;  %v4154_v40 = vld [vmem:[%s14188_s0 + $0x37f] sm:$0x1] }
 0x1e9   :  { %v11699_v5 = vpop.eup %6987  ;;  %v936_v51 = vsel %vm556_vm5, %v935_v35, %v934_v2  ;;  %v3529_v25 = vsel %vm547_vm2, %v3528_v44, %v3527_v54  ;;  %v4821_v55 = vrot.slane %v4148_v22, 7  ;;  %v4823_v22 = vrot.slane %v4149_v31, 6  ;;  %v5023_v2 = vpop.f32.mrf.mxu3 }
 0x1ea   :  { %v11713_v61 = vpop.eup %6989  ;;  %v11716_v35 = vsel %vm559_vm6, %v937_v15, %v936_v51  ;;  %v3531_v44 = vsel %vm550_vm3, %v3530_v34, %v3529_v25  ;;  %v5180_v41 = vsel %vm1240_vm8, %v5116_v39, 0.0  ;;  %v3883_v34 = vsel %vm1240_vm8, %v3819_v56, 0.0  ;;  %v1555_v56 = vld [vmem:[%s14188_s0 + $0x369] sm:$0x1] }
 0x1eb   :  { %14441 = vst [vmem:[#allocation111_spill] sm:$0xff] %v11716_v35  ;;  %v11726_v54 = vpop.eup %6991  ;;  %6675 = vmatmul.msk.f32.gmra.mxu0 %vm995_vm7, %v11716_v35  ;;  %v3533_v15 = vsel %vm553_vm4, %v3532_v53, %v3531_v44  ;;  %5181 = vadd.xlane.f32.xlu1 %v5180_v41  ;;  %v4822_v39 = vsel %vm541_vm0, %v4821_v55, %v4147_v7  ;;  %v4825_v51 = vrot.slane %v4150_v26, 5  ;;  %v4827_v31 = vrot.slane %v4151_v3, 4  ;;  %v1554_v7 = vld [vmem:[%s14188_s0 + $0x365] sm:$0x1] }
 0x1ec   :  { %v3535_v25 = vsel %vm556_vm5, %v3534_v19, %v3533_v15  ;;  %3884 = vadd.xlane.f32.xlu2 %v3883_v34  ;;  %v4824_v23 = vsel %vm544_vm1, %v4823_v22, %v4822_v39  ;;  %v4829_v27 = vrot.slane %v4152_v58, 3  ;;  %v4831_v53 = vrot.slane %v4153_v28, 2  ;;  %v1556_v3 = vld [vmem:[%s14188_s0 + $0x36d] sm:$0x1]  ;;  %v1558_v41 = vld [vmem:[%s14188_s0 + $0x375] sm:$0x1]  ;;  %v2432_v28 = vpop.f32.mrf.mxu1  ;;  %v3729_v15 = vpop.f32.mrf.mxu2 }
 0x1ed   :  { %v11736_v59 = vsel %vm559_vm6, %v3536_v36, %v3535_v25  ;;  %v4826_v35 = vsel %vm547_vm2, %v4825_v51, %v4824_v23  ;;  %v4833_v44 = vrot.slane %v4154_v40, 1  ;;  %v5263_v26 = vsel %vm5261_vm10, %v11441_v49, %v10892_v45  ;;  %v1553_v23 = vld [vmem:[%s14188_s0 + $0x361] sm:$0x1]  ;;  %v11787_v34 = vpop.xlane.xlu2 %1266 }
 0x1ee   :  { %14442 = vst [vmem:[#allocation112_spill] sm:$0xff] %v11736_v59  ;;  %6739 = vmatmul.msk.f32.gmra.mxu2 %vm995_vm7, %v11736_v59  ;;  %v4828_v19 = vsel %vm550_vm3, %v4827_v31, %v4826_v35  ;;  %v5024_v36 = vadd.f32 %v11158_v14, %v5023_v2  ;;  %v11761_v58 = vsel %vm5261_vm10, %v11644_v30, %v11098_v24  ;;  %v1557_v35 = vld [vmem:[%s14188_s0 + $0x371] sm:$0x1]  ;;  %v1559_v24 = vld [vmem:[%s14188_s0 + $0x379] sm:$0x1]  ;;  %v2227_v30 = vrot.slane %v1554_v7, 7 }
 0x1ef   :  { %v4830_v45 = vsel %vm553_vm4, %v4829_v27, %v4828_v19  ;;  %v11766_v49 = vsel %vm5294_vm11, %v5263_v26, %v10901_v37  ;;  %v1132_v55 = vadd.f32 %v11158_v14, %v1131_v60  ;;  %v1560_v60 = vld [vmem:[%s14188_s0 + $0x37d] sm:$0x1]  ;;  %v2229_v22 = vrot.slane %v1555_v56, 6  ;;  %v251_v7 = vld [vmem:[%s14188_s0 + $0x388] sm:$0x1]  ;;  %v11798_v19 = vpop.xlane.xlu1 %5154 }
 0x1f0   :  { %14443 = vst [vmem:[#allocation113_spill] sm:$0xff] %v11766_v49  ;;  %v4832_v27 = vsel %vm556_vm5, %v4831_v53, %v4830_v45  ;;  %v5331_v37 = vsel %vm5327_vm12, %v11766_v49, -inf  ;;  %6993 = vtanh.f32 %v5024_v36  ;;  %v2231_v2 = vrot.slane %v1556_v3, 5  ;;  %v252_v3 = vld [vmem:[%s14188_s0 + $0x38c] sm:$0x1] }
 0x1f1   :  { %v11785_v40 = vsel %vm559_vm6, %v4833_v44, %v4832_v27  ;;  %5332 = vmax.xlane.f32.xlu0 %v5331_v37  ;;  %6995 = vtanh.f32 %v1132_v55  ;;  %v2228_v39 = vsel %vm541_vm0, %v2227_v30, %v1553_v23  ;;  %v2233_v51 = vrot.slane %v1557_v35, 4  ;;  %v5026_v53 = vpop.f32.mrf.mxu3  ;;  %v250_v44 = vld [vmem:[%s14188_s0 + $0x384] sm:$0x1]  ;;  %v253_v45 = vld [vmem:[%s14188_s0 + $0x390] sm:$0x1]  ;;  %v11811_v55 = vpop.xlane.xlu0 %3860 }
 0x1f2   :  { %14444 = vst [vmem:[#allocation114_spill] sm:$0xff] %v11785_v40  ;;  %6771 = vmatmul.msk.f32.gmra.mxu3 %vm995_vm7, %v11785_v40  ;;  %v2235_v25 = vrot.slane %v1558_v41, 3  ;;  %v2237_v31 = vrot.slane %v1559_v24, 2  ;;  %v2230_v26 = vsel %vm544_vm1, %v2229_v22, %v2228_v39  ;;  %v2239_v36 = vrot.slane %v1560_v60, 1  ;;  %v254_v27 = vld [vmem:[%s14188_s0 + $0x394] sm:$0x1] }
 0x1f3   :  { %v2523_v23 = vmul.f32 %v11393_v42, %v11713_v61  ;;  %v1225_v56 = vmul.f32 %v11393_v42, %v11699_v5  ;;  %v2232_v35 = vsel %vm547_vm2, %v2231_v2, %v2230_v26  ;;  %v3820_v41 = vmul.f32 %v11393_v42, %v11726_v54  ;;  %v249_v5 = vld [vmem:[%s14188_s0 + $0x380] sm:$0x1]  ;;  %v11827_v37 = vld [vmem:[%s14188_s0 + $0x398] sm:$0x1]  ;;  %v11832_v54 = vld [vmem:[%s14188_s0 + $0x39c] sm:$0x1] }
 0x1f4   :  { %v2433_v61 = vadd.f32 %v11158_v14, %v2432_v28  ;;  %v3730_v24 = vadd.f32 %v11158_v14, %v3729_v15  ;;  %v2234_v60 = vsel %vm550_vm3, %v2233_v51, %v2232_v35  ;;  %v5027_v22 = vadd.f32 %v11158_v14, %v5026_v53  ;;  %v1562_v2 = vld [vmem:[%s14188_s0 + $0x385] sm:$0x1]  ;;  %v1563_v15 = vld [vmem:[%s14188_s0 + $0x389] sm:$0x1]  ;;  %v1564_v53 = vld [vmem:[%s14188_s0 + $0x38d] sm:$0x1]  ;;  %v2435_v43 = vpop.f32.mrf.mxu1 }
 0x1f5   :  { %v2589_v30 = vsel %vm1240_vm8, %v2523_v23, 0.0  ;;  %v1292_v28 = vsel %vm1240_vm8, %v1225_v56, 0.0  ;;  %v11849_v51 = vsel %vm5228_vm9, %v11194_v32, %v11085_v47  ;;  %v2236_v26 = vsel %vm553_vm4, %v2235_v25, %v2234_v60  ;;  %v1565_v23 = vld [vmem:[%s14188_s0 + $0x391] sm:$0x1]  ;;  %v1561_v35 = vld [vmem:[%s14188_s0 + $0x381] sm:$0x1] }
 0x1f6   :  { %v11844_v39 = vpop.eup %6993  ;;  %2590 = vadd.xlane.f32.xlu1 %v2589_v30  ;;  %1293 = vadd.xlane.f32.xlu2 %v1292_v28  ;;  %v3886_v14 = vsel %vm1240_vm8, %v3820_v41, 0.0  ;;  %6997 = vtanh.f32 %v2433_v61  ;;  %v2238_v47 = vsel %vm556_vm5, %v2237_v31, %v2236_v26  ;;  %v939_v32 = vrot.slane %v250_v44, 7  ;;  %v1566_v41 = vld [vmem:[%s14188_s0 + $0x395] sm:$0x1]  ;;  %v11871_v61 = vld [vmem:[%s14188_s0 + $0x399] sm:$0x1] }
 0x1f7   :  { %v11859_v56 = vpop.eup %6995  ;;  %6999 = vtanh.f32 %v3730_v24  ;;  %v941_v25 = vrot.slane %v251_v7, 6  ;;  %v11874_v60 = vsel %vm559_vm6, %v2239_v36, %v2238_v47  ;;  %v943_v31 = vrot.slane %v252_v3, 5  ;;  %v11879_v7 = vld [vmem:[%s14188_s0 + $0x39d] sm:$0x1]  ;;  %v2859_v24 = vld [vmem:[%s14188_s0 + $0x386] sm:$0x1] }
 0x1f8   :  { %14445 = vst [vmem:[#allocation115_spill] sm:$0xff] %v11874_v60  ;;  %7001 = vtanh.f32 %v5027_v22  ;;  %v945_v44 = vrot.slane %v253_v45, 4  ;;  %6707 = vmatmul.msk.f32.gmra.mxu1 %vm995_vm7, %v11874_v60  ;;  %v940_v30 = vsel %vm541_vm0, %v939_v32, %v249_v5  ;;  %v947_v36 = vrot.slane %v254_v27, 3  ;;  %v2858_v45 = vld [vmem:[%s14188_s0 + $0x382] sm:$0x1]  ;;  %v11904_v60 = vpop.xlane.xlu2 %5157 }
 0x1f9   :  { %3887 = vadd.xlane.f32.xlu0 %v3886_v14  ;;  %v949_v28 = vrot.slane %v11827_v37, 2  ;;  %v951_v3 = vrot.slane %v11832_v54, 1  ;;  %v2860_v22 = vld [vmem:[%s14188_s0 + $0x38a] sm:$0x1]  ;;  %v942_v26 = vsel %vm544_vm1, %v941_v25, %v940_v30  ;;  %v2241_v47 = vrot.slane %v1562_v2, 7 }
 0x1fa   :  { %v2243_v40 = vrot.slane %v1563_v15, 6  ;;  %v2245_v14 = vrot.slane %v1564_v53, 5  ;;  %v2861_v5 = vld [vmem:[%s14188_s0 + $0x38e] sm:$0x1]  ;;  %v944_v27 = vsel %vm547_vm2, %v943_v31, %v942_v26  ;;  %v2247_v37 = vrot.slane %v1565_v23, 4 }
 0x1fb   :  { %v2249_v54 = vrot.slane %v1566_v41, 3  ;;  %v2251_v32 = vrot.slane %v11871_v61, 2  ;;  %v2862_v59 = vld [vmem:[%s14188_s0 + $0x392] sm:$0x1]  ;;  %v946_v2 = vsel %vm550_vm3, %v945_v44, %v944_v27  ;;  %v2242_v15 = vsel %vm541_vm0, %v2241_v47, %v1561_v35  ;;  %v2863_v23 = vld [vmem:[%s14188_s0 + $0x396] sm:$0x1]  ;;  %v11914_v61 = vpop.xlane.xlu1 %2563  ;;  %v11926_v27 = vpop.xlane.xlu0 %1269 }
 0x1fc   :  { %v11906_v25 = vpop.eup %6997  ;;  %v2253_v53 = vrot.slane %v11879_v7, 1  ;;  %v3538_v41 = vrot.slane %v2859_v24, 7  ;;  %v948_v30 = vsel %vm553_vm4, %v947_v36, %v946_v2  ;;  %v2244_v26 = vsel %vm544_vm1, %v2243_v40, %v2242_v15  ;;  %v2864_v44 = vld [vmem:[%s14188_s0 + $0x39a] sm:$0x1]  ;;  %v2865_v35 = vld [vmem:[%s14188_s0 + $0x39e] sm:$0x1] }
 0x1fd   :  { %v11916_v31 = vpop.eup %6999  ;;  %v3540_v7 = vrot.slane %v2860_v22, 6  ;;  %v3542_v47 = vrot.slane %v2861_v5, 5  ;;  %v950_v63 = vsel %vm556_vm5, %v949_v28, %v948_v30  ;;  %v2246_v36 = vsel %vm547_vm2, %v2245_v14, %v2244_v26  ;;  %v4155_v15 = vld [vmem:[%s14188_s0 + $0x383] sm:$0x1]  ;;  %v4156_v22 = vld [vmem:[%s14188_s0 + $0x387] sm:$0x1] }
 0x1fe   :  { %v11928_v24 = vpop.eup %7001  ;;  %v3539_v40 = vsel %vm541_vm0, %v3538_v41, %v2858_v45  ;;  %v3544_v2 = vrot.slane %v2862_v59, 4  ;;  %v4157_v5 = vld [vmem:[%s14188_s0 + $0x38b] sm:$0x1]  ;;  %v11943_v6 = vsel %vm559_vm6, %v951_v3, %v950_v63  ;;  %v2248_v28 = vsel %vm550_vm3, %v2247_v37, %v2246_v36  ;;  %v4158_v14 = vld [vmem:[%s14188_s0 + $0x38f] sm:$0x1] }
 0x1ff   :  { %14446 = vst [vmem:[#allocation116_spill] sm:$0xff] %v11943_v6  ;;  %v3541_v45 = vsel %vm544_vm1, %v3540_v7, %v3539_v40  ;;  %v3546_v59 = vrot.slane %v2863_v23, 3  ;;  %v4159_v41 = vld [vmem:[%s14188_s0 + $0x393] sm:$0x1]  ;;  %6676 = vmatmul.msk.f32.gmra.mxu0 %vm995_vm7, %v11943_v6  ;;  %v2250_v30 = vsel %vm553_vm4, %v2249_v54, %v2248_v28  ;;  %v3548_v3 = vrot.slane %v2864_v44, 2  ;;  %v1134_v6 = vpop.f32.mrf.mxu0 }
 0x200   :  { %v3543_v63 = vsel %vm547_vm2, %v3542_v47, %v3541_v45  ;;  %v3550_v37 = vrot.slane %v2865_v35, 1  ;;  %v4160_v23 = vld [vmem:[%s14188_s0 + $0x397] sm:$0x1]  ;;  %v4161_v26 = vld [vmem:[%s14188_s0 + $0x39b] sm:$0x1]  ;;  %v2252_v7 = vsel %vm556_vm5, %v2251_v32, %v2250_v30  ;;  %v4835_v40 = vrot.slane %v4156_v22, 7 }
 0x201   :  { %v3545_v36 = vsel %vm550_vm3, %v3544_v2, %v3543_v63  ;;  %v4162_v54 = vld [vmem:[%s14188_s0 + $0x39f] sm:$0x1]  ;;  %v4837_v47 = vrot.slane %v4157_v5, 6  ;;  %v11969_v44 = vsel %vm559_vm6, %v2253_v53, %v2252_v7  ;;  %v4839_v28 = vrot.slane %v4158_v14, 5 }
 0x202   :  { %14447 = vst [vmem:[#allocation117_spill] sm:$0xff] %v11969_v44  ;;  %v3547_v35 = vsel %vm553_vm4, %v3546_v59, %v3545_v36  ;;  %v4841_v45 = vrot.slane %v4159_v41, 4  ;;  %6708 = vmatmul.msk.f32.gmra.mxu1 %vm995_vm7, %v11969_v44  ;;  %v4836_v2 = vsel %vm541_vm0, %v4835_v40, %v4155_v15  ;;  %v4843_v30 = vrot.slane %v4160_v23, 3  ;;  %v2867_v23 = vld [vmem:[%s14188_s0 + $0x3a6] sm:$0x1] }
 0x203   :  { %v3549_v32 = vsel %vm556_vm5, %v3548_v3, %v3547_v35  ;;  %v4845_v63 = vrot.slane %v4161_v26, 2  ;;  %v4838_v53 = vsel %vm544_vm1, %v4837_v47, %v4836_v2  ;;  %v4847_v5 = vrot.slane %v4162_v54, 1  ;;  %v11995_v3 = vld [vmem:[%s14189_s2] ss:$0 sm:$0xff]  ;;  %v2870_v54 = vld [vmem:[%s14188_s0 + $0x3b2] sm:$0x1]  ;;  %v12023_v47 = vpop.xlane.xlu1 %3863 }
 0x204   :  { %v11977_v22 = vsel %vm559_vm6, %v3550_v37, %v3549_v32  ;;  %v5117_v59 = vmul.f32 %v11393_v42, %v11844_v39  ;;  %v4840_v14 = vsel %vm547_vm2, %v4839_v28, %v4838_v53  ;;  %v11988_v15 = vsel %vm5294_vm11, %v11761_v58, %v10993_v8  ;;  %v2866_v37 = vld [vmem:[%s14188_s0 + $0x3a2] sm:$0x1]  ;;  %v2868_v8 = vld [vmem:[%s14188_s0 + $0x3aa] sm:$0x1]  ;;  %v2869_v58 = vld [vmem:[%s14188_s0 + $0x3ae] sm:$0x1]  ;;  %v12040_v53 = vpop.xlane.xlu0 %5160 }
 0x205   :  { %14448 = vst [vmem:[#allocation118_spill] sm:$0xff] %v11977_v22  ;;  %6740 = vmatmul.msk.f32.gmra.mxu2 %vm995_vm7, %v11977_v22  ;;  %v1226_v41 = vmul.f32 %v11393_v42, %v11859_v56  ;;  %v1135_v39 = vadd.f32 %v11995_v3, %v1134_v6  ;;  %v12010_v56 = vpop.xlane.xlu2 %2566  ;;  %v4842_v6 = vsel %vm550_vm3, %v4841_v45, %v4840_v14  ;;  %v5334_v7 = vsel %vm5327_vm12, %v11988_v15, -inf  ;;  %v2871_v40 = vld [vmem:[%s14188_s0 + $0x3b6] sm:$0x1]  ;;  %v2872_v32 = vld [vmem:[%s14188_s0 + $0x3ba] sm:$0x1] }
 0x206   :  { %14449 = vst [vmem:[#allocation119_spill] sm:$0xff] %v11988_v15  ;;  %v5183_v26 = vsel %vm1240_vm8, %v5117_v59, 0.0  ;;  %v2436_v36 = vadd.f32 %v11995_v3, %v2435_v43  ;;  %v12028_v35 = vsel %vm5261_vm10, %v11849_v51, %v11306_v48  ;;  %v4844_v28 = vsel %vm553_vm4, %v4843_v30, %v4842_v6  ;;  %5335 = vmax.xlane.f32.xlu1 %v5334_v7  ;;  %v2873_v2 = vld [vmem:[%s14188_s0 + $0x3be] sm:$0x1]  ;;  %v259_v59 = vld [vmem:[%s14188_s0 + $0x3a8] sm:$0x1]  ;;  %v3732_v6 = vpop.f32.mrf.mxu2 }
 0x207   :  { %5184 = vadd.xlane.f32.xlu2 %v5183_v26  ;;  %v1295_v43 = vsel %vm1240_vm8, %v1226_v41, 0.0  ;;  %v2524_v45 = vmul.f32 %v11393_v42, %v11906_v25  ;;  %v4846_v48 = vsel %vm556_vm5, %v4845_v63, %v4844_v28  ;;  %7003 = vtanh.f32 %v1135_v39  ;;  %v258_v25 = vld [vmem:[%s14188_s0 + $0x3a4] sm:$0x1]  ;;  %v5029_v39 = vpop.f32.mrf.mxu3  ;;  %v1569_v44 = vld [vmem:[%s14188_s0 + $0x3a1] sm:$0x1] }
 0x208   :  { %1296 = vadd.xlane.f32.xlu0 %v1295_v43  ;;  %v3821_v51 = vmul.f32 %v11393_v42, %v11916_v31  ;;  %v3552_v30 = vrot.slane %v2867_v23, 7  ;;  %v12052_v14 = vsel %vm559_vm6, %v4847_v5, %v4846_v48  ;;  %7005 = vtanh.f32 %v2436_v36  ;;  %v260_v31 = vld [vmem:[%s14188_s0 + $0x3ac] sm:$0x1]  ;;  %v261_v23 = vld [vmem:[%s14188_s0 + $0x3b0] sm:$0x1] }
 0x209   :  { %14450 = vst [vmem:[#allocation120_spill] sm:$0xff] %v12052_v14  ;;  %v3554_v41 = vrot.slane %v2868_v8, 6  ;;  %v3556_v63 = vrot.slane %v2869_v58, 5  ;;  %6772 = vmatmul.msk.f32.gmra.mxu3 %vm995_vm7, %v12052_v14  ;;  %v2592_v26 = vsel %vm1240_vm8, %v2524_v45, 0.0  ;;  %v3558_v7 = vrot.slane %v2870_v54, 4 }
 0x20a   :  { %v3553_v5 = vsel %vm541_vm0, %v3552_v30, %v2866_v37  ;;  %v3560_v8 = vrot.slane %v2871_v40, 3  ;;  %v257_v58 = vld [vmem:[%s14188_s0 + $0x3a0] sm:$0x1]  ;;  %v262_v36 = vld [vmem:[%s14188_s0 + $0x3b4] sm:$0x1]  ;;  %v3889_v28 = vsel %vm1240_vm8, %v3821_v51, 0.0  ;;  %v5118_v45 = vmul.f32 %v11393_v42, %v11928_v24 }
 0x20b   :  { %v3555_v43 = vsel %vm544_vm1, %v3554_v41, %v3553_v5  ;;  %v3562_v48 = vrot.slane %v2872_v32, 2  ;;  %v263_v37 = vld [vmem:[%s14188_s0 + $0x3b8] sm:$0x1]  ;;  %v12080_v54 = vld [vmem:[%s14188_s0 + $0x3bc] sm:$0x1]  ;;  %v3564_v30 = vrot.slane %v2873_v2, 1  ;;  %v3733_v51 = vadd.f32 %v11995_v3, %v3732_v6 }
 0x20c   :  { %v3557_v40 = vsel %vm547_vm2, %v3556_v63, %v3555_v43  ;;  %v5030_v41 = vadd.f32 %v11995_v3, %v5029_v39  ;;  %v1570_v42 = vld [vmem:[%s14188_s0 + $0x3a5] sm:$0x1]  ;;  %v1571_v24 = vld [vmem:[%s14188_s0 + $0x3a9] sm:$0x1]  ;;  %v5186_v5 = vsel %vm1240_vm8, %v5118_v45, 0.0  ;;  %v953_v14 = vrot.slane %v258_v25, 7 }
 0x20d   :  { %v3559_v32 = vsel %vm550_vm3, %v3558_v7, %v3557_v40  ;;  %v955_v22 = vrot.slane %v259_v59, 6  ;;  %v1572_v2 = vld [vmem:[%s14188_s0 + $0x3ad] sm:$0x1]  ;;  %v12096_v63 = vpop.eup %7003  ;;  %7007 = vtanh.f32 %v3733_v51  ;;  %v957_v39 = vrot.slane %v260_v31, 5  ;;  %v1573_v25 = vld [vmem:[%s14188_s0 + $0x3b1] sm:$0x1]  ;;  %v12120_v51 = vpop.xlane.xlu2 %3866 }
 0x20e   :  { %v3561_v6 = vsel %vm553_vm4, %v3560_v8, %v3559_v32  ;;  %v959_v43 = vrot.slane %v261_v23, 4  ;;  %v1574_v59 = vld [vmem:[%s14188_s0 + $0x3b5] sm:$0x1]  ;;  %v12108_v7 = vpop.eup %7005  ;;  %3890 = vadd.xlane.f32.xlu1 %v3889_v28  ;;  %7009 = vtanh.f32 %v5030_v41  ;;  %v954_v31 = vsel %vm541_vm0, %v953_v14, %v257_v58  ;;  %v1575_v45 = vld [vmem:[%s14188_s0 + $0x3b9] sm:$0x1] }
 0x20f   :  { %2593 = vadd.xlane.f32.xlu2 %v2592_v26  ;;  %v3563_v8 = vsel %vm556_vm5, %v3562_v48, %v3561_v6  ;;  %v961_v23 = vrot.slane %v262_v36, 3  ;;  %v12118_v40 = vld [vmem:[%s14188_s0 + $0x3bd] sm:$0x1]  ;;  %v956_v28 = vsel %vm544_vm1, %v955_v22, %v954_v31  ;;  %v963_v48 = vrot.slane %v263_v37, 2  ;;  %v4163_v58 = vld [vmem:[%s14188_s0 + $0x3a3] sm:$0x1]  ;;  %v12144_v6 = vpop.xlane.xlu0 %2569 }
 0x210   :  { %v12123_v26 = vsel %vm559_vm6, %v3564_v30, %v3563_v8  ;;  %5187 = vadd.xlane.f32.xlu0 %v5186_v5  ;;  %v965_v14 = vrot.slane %v12080_v54, 1  ;;  %v4164_v36 = vld [vmem:[%s14188_s0 + $0x3a7] sm:$0x1]  ;;  %v4165_v41 = vld [vmem:[%s14188_s0 + $0x3ab] sm:$0x1]  ;;  %v12136_v30 = vpop.xlane.xlu1 %1272  ;;  %v958_v22 = vsel %vm547_vm2, %v957_v39, %v956_v28  ;;  %v2255_v37 = vrot.slane %v1570_v42, 7 }
 0x211   :  { %14451 = vst [vmem:[#allocation121_spill] sm:$0xff] %v12123_v26  ;;  %6741 = vmatmul.msk.f32.gmra.mxu2 %vm995_vm7, %v12123_v26  ;;  %v2257_v54 = vrot.slane %v1571_v24, 6  ;;  %v2259_v32 = vrot.slane %v1572_v2, 5  ;;  %v4166_v5 = vld [vmem:[%s14188_s0 + $0x3af] sm:$0x1]  ;;  %v960_v8 = vsel %vm550_vm3, %v959_v43, %v958_v22  ;;  %v2261_v31 = vrot.slane %v1573_v25, 4 }
 0x212   :  { %v2263_v16 = vrot.slane %v1574_v59, 3  ;;  %v2265_v10 = vrot.slane %v1575_v45, 2  ;;  %v4167_v26 = vld [vmem:[%s14188_s0 + $0x3b3] sm:$0x1]  ;;  %v962_v39 = vsel %vm553_vm4, %v961_v23, %v960_v8  ;;  %v2256_v42 = vsel %vm541_vm0, %v2255_v37, %v1569_v44  ;;  %v4168_v2 = vld [vmem:[%s14188_s0 + $0x3b7] sm:$0x1] }
 0x213   :  { %v2267_v24 = vrot.slane %v12118_v40, 1  ;;  %v4169_v43 = vld [vmem:[%s14188_s0 + $0x3bb] sm:$0x1]  ;;  %v4849_v25 = vrot.slane %v4164_v36, 7  ;;  %v12159_v59 = vpop.eup %7007  ;;  %v964_v45 = vsel %vm556_vm5, %v963_v48, %v962_v39  ;;  %v2258_v28 = vsel %vm544_vm1, %v2257_v54, %v2256_v42  ;;  %v4170_v44 = vld [vmem:[%s14188_s0 + $0x3bf] sm:$0x1] }
 0x214   :  { %v4851_v23 = vrot.slane %v4165_v41, 6  ;;  %v4853_v40 = vrot.slane %v4166_v5, 5  ;;  %v12166_v22 = vpop.eup %7009  ;;  %v12169_v37 = vsel %vm559_vm6, %v965_v14, %v964_v45  ;;  %v2260_v8 = vsel %vm547_vm2, %v2259_v32, %v2258_v28  ;;  %v12182_v32 = vld [vmem:[%s14190_s3] ss:$0 sm:$0xff]  ;;  %v3735_v45 = vpop.f32.mrf.mxu2 }
 0x215   :  { %14452 = vst [vmem:[#allocation122_spill] sm:$0xff] %v12169_v37  ;;  %v4850_v36 = vsel %vm541_vm0, %v4849_v25, %v4163_v58  ;;  %v4855_v17 = vrot.slane %v4167_v26, 4  ;;  %6677 = vmatmul.msk.f32.gmra.mxu0 %vm995_vm7, %v12169_v37  ;;  %v2262_v48 = vsel %vm550_vm3, %v2261_v31, %v2260_v8  ;;  %v4857_v39 = vrot.slane %v4168_v2, 3  ;;  %v1137_v58 = vpop.f32.mrf.mxu0  ;;  %v2438_v25 = vpop.f32.mrf.mxu1  ;;  %v265_v28 = vld [vmem:[%s14188_s0 + $0x3c0] sm:$0x1] }
 0x216   :  { %v4852_v54 = vsel %vm544_vm1, %v4851_v23, %v4850_v36  ;;  %v4859_v41 = vrot.slane %v4169_v43, 2  ;;  %v2264_v5 = vsel %vm553_vm4, %v2263_v16, %v2262_v48  ;;  %v4861_v14 = vrot.slane %v4170_v44, 1  ;;  %v269_v23 = vld [vmem:[%s14188_s0 + $0x3d0] sm:$0x1]  ;;  %v12220_v8 = vpop.xlane.xlu2 %1275 }
 0x217   :  { %v4854_v42 = vsel %vm547_vm2, %v4853_v40, %v4852_v54  ;;  %v1227_v26 = vmul.f32 %v12182_v32, %v12096_v63  ;;  %v2266_v31 = vsel %vm556_vm5, %v2265_v10, %v2264_v5  ;;  %v12191_v16 = vsel %vm5294_vm11, %v12028_v35, %v11200_v1  ;;  %v266_v63 = vld [vmem:[%s14188_s0 + $0x3c4] sm:$0x1]  ;;  %v267_v10 = vld [vmem:[%s14188_s0 + $0x3c8] sm:$0x1]  ;;  %v270_v40 = vld [vmem:[%s14188_s0 + $0x3d4] sm:$0x1] }
 0x218   :  { %v4856_v2 = vsel %vm550_vm3, %v4855_v17, %v4854_v42  ;;  %14453 = vst [vmem:[#allocation123_spill] sm:$0xff] %v12191_v16  ;;  %v2525_v43 = vmul.f32 %v12182_v32, %v12108_v7  ;;  %v268_v17 = vld [vmem:[%s14188_s0 + $0x3cc] sm:$0x1]  ;;  %v12208_v1 = vsel %vm559_vm6, %v2267_v24, %v2266_v31  ;;  %v5337_v44 = vsel %vm5327_vm12, %v12191_v16, -inf  ;;  %v272_v5 = vld [vmem:[%s14188_s0 + $0x3dc] sm:$0x1]  ;;  %v12234_v42 = vpop.xlane.xlu1 %5163 }
 0x219   :  { %14454 = vst [vmem:[#allocation124_spill] sm:$0xff] %v12208_v1  ;;  %v4858_v35 = vsel %vm553_vm4, %v4857_v39, %v4856_v2  ;;  %v1298_v7 = vsel %vm1240_vm8, %v1227_v26, 0.0  ;;  %6709 = vmatmul.msk.f32.gmra.mxu1 %vm995_vm7, %v12208_v1  ;;  %v1138_v48 = vadd.f32 %v11995_v3, %v1137_v58  ;;  %v2439_v54 = vadd.f32 %v11995_v3, %v2438_v25  ;;  %v271_v39 = vld [vmem:[%s14188_s0 + $0x3d8] sm:$0x1]  ;;  %v2875_v25 = vld [vmem:[%s14188_s0 + $0x3c6] sm:$0x1]  ;;  %v12246_v2 = vpop.xlane.xlu0 %3869 }
 0x21a   :  { %v4860_v24 = vsel %vm556_vm5, %v4859_v41, %v4858_v35  ;;  %1299 = vadd.xlane.f32.xlu1 %v1298_v7  ;;  %v2595_v36 = vsel %vm1240_vm8, %v2525_v43, 0.0  ;;  %5338 = vmax.xlane.f32.xlu2 %v5337_v44  ;;  %v3736_v41 = vadd.f32 %v11995_v3, %v3735_v45  ;;  %v967_v58 = vrot.slane %v266_v63, 7  ;;  %v2876_v31 = vld [vmem:[%s14188_s0 + $0x3ca] sm:$0x1]  ;;  %v2877_v63 = vld [vmem:[%s14188_s0 + $0x3ce] sm:$0x1] }
 0x21b   :  { %v12237_v26 = vsel %vm559_vm6, %v4861_v14, %v4860_v24  ;;  %2596 = vadd.xlane.f32.xlu0 %v2595_v36  ;;  %v12251_v14 = vsel %vm5228_vm9, %v11178_v9, %v11315_v13  ;;  %7011 = vtanh.f32 %v1138_v48  ;;  %v969_v43 = vrot.slane %v267_v10, 6  ;;  %v2878_v35 = vld [vmem:[%s14188_s0 + $0x3d2] sm:$0x1]  ;;  %v2879_v13 = vld [vmem:[%s14188_s0 + $0x3d6] sm:$0x1] }
 0x21c   :  { %14455 = vst [vmem:[#allocation125_spill] sm:$0xff] %v12237_v26  ;;  %6773 = vmatmul.msk.f32.gmra.mxu3 %vm995_vm7, %v12237_v26  ;;  %v971_v45 = vrot.slane %v268_v17, 5  ;;  %7013 = vtanh.f32 %v2439_v54  ;;  %v968_v7 = vsel %vm541_vm0, %v967_v58, %v265_v28  ;;  %v973_v44 = vrot.slane %v269_v23, 4  ;;  %v2880_v10 = vld [vmem:[%s14188_s0 + $0x3da] sm:$0x1] }
 0x21d   :  { %v975_v9 = vrot.slane %v270_v40, 3  ;;  %7015 = vtanh.f32 %v3736_v41  ;;  %v970_v17 = vsel %vm544_vm1, %v969_v43, %v968_v7  ;;  %v977_v24 = vrot.slane %v271_v39, 2  ;;  %v2874_v48 = vld [vmem:[%s14188_s0 + $0x3c2] sm:$0x1]  ;;  %v2881_v28 = vld [vmem:[%s14188_s0 + $0x3de] sm:$0x1]  ;;  %v1140_v15 = vpop.f32.mrf.mxu0 }
 0x21e   :  { %v979_v36 = vrot.slane %v272_v5, 1  ;;  %v972_v23 = vsel %vm547_vm2, %v971_v45, %v970_v17  ;;  %v3566_v40 = vrot.slane %v2875_v25, 7  ;;  %v3568_v54 = vrot.slane %v2876_v31, 6  ;;  %v4172_v41 = vld [vmem:[%s14188_s0 + $0x3c7] sm:$0x1] }
 0x21f   :  { %v3570_v58 = vrot.slane %v2877_v63, 5  ;;  %v974_v39 = vsel %vm550_vm3, %v973_v44, %v972_v23  ;;  %v3572_v5 = vrot.slane %v2878_v35, 4  ;;  %v3574_v43 = vrot.slane %v2879_v13, 3  ;;  %v4173_v26 = vld [vmem:[%s14188_s0 + $0x3cb] sm:$0x1] }
 0x220   :  { %v3576_v7 = vrot.slane %v2880_v10, 2  ;;  %v976_v1 = vsel %vm553_vm4, %v975_v9, %v974_v39  ;;  %v3567_v45 = vsel %vm541_vm0, %v3566_v40, %v2874_v48  ;;  %v3578_v25 = vrot.slane %v2881_v28, 1  ;;  %v4171_v63 = vld [vmem:[%s14188_s0 + $0x3c3] sm:$0x1]  ;;  %v4174_v35 = vld [vmem:[%s14188_s0 + $0x3cf] sm:$0x1]  ;;  %v5032_v39 = vpop.f32.mrf.mxu3 }
 0x221   :  { %v5119_v31 = vmul.f32 %v12182_v32, %v12166_v22  ;;  %v12293_v44 = vpop.eup %7011  ;;  %v978_v13 = vsel %vm556_vm5, %v977_v24, %v976_v1  ;;  %v3569_v9 = vsel %vm544_vm1, %v3568_v54, %v3567_v45  ;;  %v3822_v10 = vmul.f32 %v12182_v32, %v12159_v59  ;;  %v4175_v22 = vld [vmem:[%s14188_s0 + $0x3d3] sm:$0x1]  ;;  %v4176_v17 = vld [vmem:[%s14188_s0 + $0x3d7] sm:$0x1]  ;;  %v4177_v59 = vld [vmem:[%s14188_s0 + $0x3db] sm:$0x1]  ;;  %v12331_v49 = vpop.xlane.xlu0 %1278 }
 0x222   :  { %v4863_v48 = vrot.slane %v4172_v41, 7  ;;  %v12305_v28 = vpop.eup %7013  ;;  %v12308_v23 = vsel %vm559_vm6, %v979_v36, %v978_v13  ;;  %v3571_v1 = vsel %vm547_vm2, %v3570_v58, %v3569_v9  ;;  %v4178_v40 = vld [vmem:[%s14188_s0 + $0x3df] sm:$0x1]  ;;  %v4865_v54 = vrot.slane %v4173_v26, 6  ;;  %v12318_v41 = vpop.xlane.xlu2 %5166 }
 0x223   :  { %14456 = vst [vmem:[#allocation126_spill] sm:$0xff] %v12308_v23  ;;  %v5189_v24 = vsel %vm1240_vm8, %v5119_v31, 0.0  ;;  %v12320_v45 = vpop.eup %7015  ;;  %6678 = vmatmul.msk.f32.gmra.mxu0 %vm995_vm7, %v12308_v23  ;;  %v3573_v36 = vsel %vm550_vm3, %v3572_v5, %v3571_v1  ;;  %v3892_v58 = vsel %vm1240_vm8, %v3822_v10, 0.0  ;;  %v4867_v13 = vrot.slane %v4174_v35, 5  ;;  %v12327_v9 = vpop.xlane.xlu1 %2572 }
 0x224   :  { %5190 = vadd.xlane.f32.xlu1 %v5189_v24  ;;  %v4864_v31 = vsel %vm541_vm0, %v4863_v48, %v4171_v63  ;;  %v3575_v26 = vsel %vm553_vm4, %v3574_v43, %v3573_v36  ;;  %3893 = vadd.xlane.f32.xlu2 %v3892_v58  ;;  %v4869_v57 = vrot.slane %v4175_v22, 4  ;;  %v4871_v16 = vrot.slane %v4176_v17, 3  ;;  %v1578_v63 = vld [vmem:[%s14188_s0 + $0x3c5] sm:$0x1]  ;;  %v2441_v58 = vpop.f32.mrf.mxu1 }
 0x225   :  { %v4866_v37 = vsel %vm544_vm1, %v4865_v54, %v4864_v31  ;;  %v3577_v5 = vsel %vm556_vm5, %v3576_v7, %v3575_v26  ;;  %v4873_v10 = vrot.slane %v4177_v59, 2  ;;  %v4875_v24 = vrot.slane %v4178_v40, 1  ;;  %v1579_v7 = vld [vmem:[%s14188_s0 + $0x3c9] sm:$0x1]  ;;  %v1581_v59 = vld [vmem:[%s14188_s0 + $0x3d1] sm:$0x1]  ;;  %v3738_v31 = vpop.f32.mrf.mxu2 }
 0x226   :  { %v4868_v1 = vsel %vm547_vm2, %v4867_v13, %v4866_v37  ;;  %v12339_v43 = vsel %vm559_vm6, %v3578_v25, %v3577_v5  ;;  %v5266_v22 = vsel %vm5261_vm10, %v12251_v14, %v11299_v11  ;;  %v5033_v17 = vadd.f32 %v11995_v3, %v5032_v39  ;;  %v1577_v37 = vld [vmem:[%s14188_s0 + $0x3c1] sm:$0x1]  ;;  %v1580_v25 = vld [vmem:[%s14188_s0 + $0x3cd] sm:$0x1]  ;;  %v274_v13 = vld [vmem:[%s14188_s0 + $0x3e4] sm:$0x1] }
 0x227   :  { %14457 = vst [vmem:[#allocation127_spill] sm:$0xff] %v12339_v43  ;;  %v4870_v35 = vsel %vm550_vm3, %v4869_v57, %v4868_v1  ;;  %v12358_v57 = vsel %vm5228_vm9, %v11386_v62, %v11513_v33  ;;  %6742 = vmatmul.msk.f32.gmra.mxu2 %vm995_vm7, %v12339_v43  ;;  %v12365_v14 = vsel %vm5294_vm11, %v5266_v22, %v11397_v18  ;;  %v1582_v62 = vld [vmem:[%s14188_s0 + $0x3d5] sm:$0x1]  ;;  %v1583_v33 = vld [vmem:[%s14188_s0 + $0x3d9] sm:$0x1]  ;;  %v2269_v40 = vrot.slane %v1578_v63, 7 }
 0x228   :  { %v4872_v11 = vsel %vm553_vm4, %v4871_v16, %v4870_v35  ;;  %14458 = vst [vmem:[#allocation128_spill] sm:$0xff] %v12365_v14  ;;  %v1141_v48 = vadd.f32 %v11995_v3, %v1140_v15  ;;  %v5340_v18 = vsel %vm5327_vm12, %v12365_v14, -inf  ;;  %7017 = vtanh.f32 %v5033_v17  ;;  %v1584_v15 = vld [vmem:[%s14188_s0 + $0x3dd] sm:$0x1]  ;;  %v275_v63 = vld [vmem:[%s14188_s0 + $0x3e8] sm:$0x1] }
 0x229   :  { %v4874_v16 = vsel %vm556_vm5, %v4873_v10, %v4872_v11  ;;  %5341 = vmax.xlane.f32.xlu0 %v5340_v18  ;;  %v2271_v39 = vrot.slane %v1579_v7, 6  ;;  %v2273_v36 = vrot.slane %v1580_v25, 5  ;;  %v2270_v26 = vsel %vm541_vm0, %v2269_v40, %v1577_v37  ;;  %v273_v37 = vld [vmem:[%s14188_s0 + $0x3e0] sm:$0x1]  ;;  %v276_v25 = vld [vmem:[%s14188_s0 + $0x3ec] sm:$0x1] }
 0x22a   :  { %v12384_v54 = vsel %vm559_vm6, %v4875_v24, %v4874_v16  ;;  %7019 = vtanh.f32 %v1141_v48  ;;  %v2275_v5 = vrot.slane %v1581_v59, 4  ;;  %v2277_v1 = vrot.slane %v1582_v62, 3  ;;  %v5035_v24 = vpop.f32.mrf.mxu3  ;;  %v277_v11 = vld [vmem:[%s14188_s0 + $0x3f0] sm:$0x1]  ;;  %v278_v62 = vld [vmem:[%s14188_s0 + $0x3f4] sm:$0x1]  ;;  %v12425_v18 = vpop.xlane.xlu2 %2575 }
 0x22b   :  { %14459 = vst [vmem:[#allocation129_spill] sm:$0xff] %v12384_v54  ;;  %6774 = vmatmul.msk.f32.gmra.mxu3 %vm995_vm7, %v12384_v54  ;;  %v2279_v10 = vrot.slane %v1583_v33, 2  ;;  %v2272_v35 = vsel %vm544_vm1, %v2271_v39, %v2270_v26  ;;  %v2281_v22 = vrot.slane %v1584_v15, 1  ;;  %v2526_v17 = vmul.f32 %v12182_v32, %v12305_v28  ;;  %v279_v33 = vld [vmem:[%s14188_s0 + $0x3f8] sm:$0x1] }
 0x22c   :  { %v1228_v7 = vmul.f32 %v12182_v32, %v12293_v44  ;;  %v2274_v48 = vsel %vm547_vm2, %v2273_v36, %v2272_v35  ;;  %v3823_v28 = vmul.f32 %v12182_v32, %v12320_v45  ;;  %v2442_v59 = vadd.f32 %v11995_v3, %v2441_v58  ;;  %v12423_v16 = vld [vmem:[%s14188_s0 + $0x3fc] sm:$0x1]  ;;  %v1586_v36 = vld [vmem:[%s14188_s0 + $0x3e5] sm:$0x1]  ;;  %v1587_v58 = vld [vmem:[%s14188_s0 + $0x3e9] sm:$0x1] }
 0x22d   :  { %v3739_v44 = vadd.f32 %v11995_v3, %v3738_v31  ;;  %v2276_v45 = vsel %vm550_vm3, %v2275_v5, %v2274_v48  ;;  %v2598_v15 = vsel %vm1240_vm8, %v2526_v17, 0.0  ;;  %v5036_v39 = vadd.f32 %v11995_v3, %v5035_v24  ;;  %v12437_v31 = vpop.xlane.xlu1 %3872  ;;  %v1588_v17 = vld [vmem:[%s14188_s0 + $0x3ed] sm:$0x1]  ;;  %v12449_v48 = vpop.xlane.xlu0 %5169 }
 0x22e   :  { %v1301_v40 = vsel %vm1240_vm8, %v1228_v7, 0.0  ;;  %v12439_v26 = vpop.eup %7017  ;;  %v2278_v5 = vsel %vm553_vm4, %v2277_v1, %v2276_v45  ;;  %2599 = vadd.xlane.f32.xlu1 %v2598_v15  ;;  %v3895_v35 = vsel %vm1240_vm8, %v3823_v28, 0.0  ;;  %7021 = vtanh.f32 %v2442_v59  ;;  %v1589_v7 = vld [vmem:[%s14188_s0 + $0x3f1] sm:$0x1]  ;;  %14460 = vst [vmem:[#allocation130_spill] sm:$0xff] %v12449_v48 }
 0x22f   :  { %1302 = vadd.xlane.f32.xlu2 %v1301_v40  ;;  %v981_v24 = vrot.slane %v274_v13, 7  ;;  %v2280_v1 = vsel %vm556_vm5, %v2279_v10, %v2278_v5  ;;  %7023 = vtanh.f32 %v3739_v44  ;;  %v983_v45 = vrot.slane %v275_v63, 6  ;;  %v1585_v13 = vld [vmem:[%s14188_s0 + $0x3e1] sm:$0x1]  ;;  %v1590_v28 = vld [vmem:[%s14188_s0 + $0x3f5] sm:$0x1] }
 0x230   :  { %v12451_v54 = vpop.eup %7019  ;;  %v985_v15 = vrot.slane %v276_v25, 5  ;;  %v1591_v59 = vld [vmem:[%s14188_s0 + $0x3f9] sm:$0x1]  ;;  %v12464_v40 = vsel %vm559_vm6, %v2281_v22, %v2280_v1  ;;  %7025 = vtanh.f32 %v5036_v39  ;;  %v987_v63 = vrot.slane %v277_v11, 4  ;;  %v1592_v25 = vld [vmem:[%s14188_s0 + $0x3fd] sm:$0x1] }
 0x231   :  { %14461 = vst [vmem:[#allocation131_spill] sm:$0xff] %v12464_v40  ;;  %v982_v10 = vsel %vm541_vm0, %v981_v24, %v273_v37  ;;  %v2883_v44 = vld [vmem:[%s14188_s0 + $0x3e6] sm:$0x1]  ;;  %6710 = vmatmul.msk.f32.gmra.mxu1 %vm995_vm7, %v12464_v40  ;;  %3896 = vadd.xlane.f32.xlu0 %v3895_v35  ;;  %v989_v22 = vrot.slane %v278_v62, 3  ;;  %v991_v1 = vrot.slane %v279_v33, 2  ;;  %v993_v39 = vrot.slane %v12423_v16, 1 }
 0x232   :  { %v984_v5 = vsel %vm544_vm1, %v983_v45, %v982_v10  ;;  %v2882_v37 = vld [vmem:[%s14188_s0 + $0x3e2] sm:$0x1]  ;;  %v2884_v11 = vld [vmem:[%s14188_s0 + $0x3ea] sm:$0x1]  ;;  %v2283_v43 = vrot.slane %v1586_v36, 7  ;;  %v2285_v23 = vrot.slane %v1587_v58, 6  ;;  %v12515_v48 = vpop.xlane.xlu2 %3875 }
 0x233   :  { %v986_v24 = vsel %vm547_vm2, %v985_v15, %v984_v5  ;;  %v2287_v40 = vrot.slane %v1588_v17, 5  ;;  %v2885_v62 = vld [vmem:[%s14188_s0 + $0x3ee] sm:$0x1]  ;;  %v2289_v16 = vrot.slane %v1589_v7, 4  ;;  %v2291_v35 = vrot.slane %v1590_v28, 3 }
 0x234   :  { %v988_v33 = vsel %vm550_vm3, %v987_v63, %v986_v24  ;;  %v2293_v45 = vrot.slane %v1591_v59, 2  ;;  %v2886_v10 = vld [vmem:[%s14188_s0 + $0x3f2] sm:$0x1]  ;;  %v12491_v14 = vpop.eup %7021  ;;  %v2284_v36 = vsel %vm541_vm0, %v2283_v43, %v1585_v13  ;;  %v2295_v58 = vrot.slane %v1592_v25, 1  ;;  %v2887_v17 = vld [vmem:[%s14188_s0 + $0x3f6] sm:$0x1] }
 0x235   :  { %v990_v15 = vsel %vm553_vm4, %v989_v22, %v988_v33  ;;  %v2888_v7 = vld [vmem:[%s14188_s0 + $0x3fa] sm:$0x1]  ;;  %v3580_v28 = vrot.slane %v2883_v44, 7  ;;  %v12501_v59 = vpop.eup %7023  ;;  %v2286_v5 = vsel %vm544_vm1, %v2285_v23, %v2284_v36  ;;  %v2889_v43 = vld [vmem:[%s14188_s0 + $0x3fe] sm:$0x1]  ;;  %v3582_v13 = vrot.slane %v2884_v11, 6 }
 0x236   :  { %v992_v63 = vsel %vm556_vm5, %v991_v1, %v990_v15  ;;  %v3584_v25 = vrot.slane %v2885_v62, 5  ;;  %v12508_v22 = vpop.eup %7025  ;;  %v2288_v33 = vsel %vm547_vm2, %v2287_v40, %v2286_v5  ;;  %v3586_v52 = vrot.slane %v2886_v10, 4  ;;  %v12521_v15 = vpop.xlane.xlu1 %1281  ;;  %v4179_v5 = vld [vmem:[%s14188_s0 + $0x3e3] sm:$0x1] }
 0x237   :  { %v12511_v24 = vsel %vm559_vm6, %v993_v39, %v992_v63  ;;  %v3581_v44 = vsel %vm541_vm0, %v3580_v28, %v2882_v37  ;;  %v2290_v23 = vsel %vm550_vm3, %v2289_v16, %v2288_v33  ;;  %v3588_v11 = vrot.slane %v2887_v17, 3  ;;  %v1143_v10 = vpop.f32.mrf.mxu0  ;;  %v12527_v28 = vpop.xlane.xlu0 %2578 }
 0x238   :  { %14462 = vst [vmem:[#allocation132_spill] sm:$0xff] %v12511_v24  ;;  %6679 = vmatmul.msk.f32.gmra.mxu0 %vm995_vm7, %v12511_v24  ;;  %v3583_v1 = vsel %vm544_vm1, %v3582_v13, %v3581_v44  ;;  %v3590_v62 = vrot.slane %v2888_v7, 2  ;;  %v2292_v39 = vsel %vm553_vm4, %v2291_v35, %v2290_v23  ;;  %v3592_v36 = vrot.slane %v2889_v43, 1  ;;  %v2444_v7 = vpop.f32.mrf.mxu1  ;;  %v4182_v43 = vld [vmem:[%s14188_s0 + $0x3ef] sm:$0x1] }
 0x239   :  { %v3585_v40 = vsel %vm547_vm2, %v3584_v25, %v3583_v1  ;;  %v5120_v37 = vmul.f32 %v12182_v32, %v12439_v26  ;;  %v2294_v63 = vsel %vm556_vm5, %v2293_v45, %v2292_v39  ;;  %v5267_v17 = vsel %vm5261_vm10, %v12358_v57, %v11410_v46  ;;  %v4180_v26 = vld [vmem:[%s14188_s0 + $0x3e7] sm:$0x1]  ;;  %v4183_v13 = vld [vmem:[%s14188_s0 + $0x3f3] sm:$0x1]  ;;  %v4184_v44 = vld [vmem:[%s14188_s0 + $0x3f7] sm:$0x1] }
 0x23a   :  { %v3587_v16 = vsel %vm550_vm3, %v3586_v52, %v3585_v40  ;;  %v1229_v35 = vmul.f32 %v12182_v32, %v12451_v54  ;;  %v4181_v52 = vld [vmem:[%s14188_s0 + $0x3eb] sm:$0x1]  ;;  %v12546_v45 = vsel %vm559_vm6, %v2295_v58, %v2294_v63  ;;  %v12552_v54 = vsel %vm5294_vm11, %v5267_v17, %v11498_v4  ;;  %v4185_v23 = vld [vmem:[%s14188_s0 + $0x3fb] sm:$0x1]  ;;  %v3741_v63 = vpop.f32.mrf.mxu2 }
 0x23b   :  { %14463 = vst [vmem:[#allocation133_spill] sm:$0xff] %v12546_v45  ;;  %v3589_v46 = vsel %vm553_vm4, %v3588_v11, %v3587_v16  ;;  %v5192_v57 = vsel %vm1240_vm8, %v5120_v37, 0.0  ;;  %6711 = vmatmul.msk.f32.gmra.mxu1 %vm995_vm7, %v12546_v45  ;;  %v5343_v25 = vsel %vm5327_vm12, %v12552_v54, -inf  ;;  %v1144_v33 = vadd.f32 %v11995_v3, %v1143_v10  ;;  %v5038_v16 = vpop.f32.mrf.mxu3 }
 0x23c   :  { %v3591_v58 = vsel %vm556_vm5, %v3590_v62, %v3589_v46  ;;  %5193 = vadd.xlane.f32.xlu2 %v5192_v57  ;;  %v1304_v4 = vsel %vm1240_vm8, %v1229_v35, 0.0  ;;  %5344 = vmax.xlane.f32.xlu1 %v5343_v25  ;;  %v2445_v11 = vadd.f32 %v11995_v3, %v2444_v7  ;;  %v4186_v62 = vld [vmem:[%s14188_s0 + $0x3ff] sm:$0x1]  ;;  %v4877_v39 = vrot.slane %v4180_v26, 7 }
 0x23d   :  { %v12574_v1 = vsel %vm559_vm6, %v3592_v36, %v3591_v58  ;;  %1305 = vadd.xlane.f32.xlu0 %v1304_v4  ;;  %7027 = vtanh.f32 %v1144_v33  ;;  %v4879_v40 = vrot.slane %v4181_v52, 6  ;;  %v4881_v37 = vrot.slane %v4182_v43, 5  ;;  %v12593_v58 = vpop.xlane.xlu2 %1284 }
 0x23e   :  { %14464 = vst [vmem:[#allocation134_spill] sm:$0xff] %v12574_v1  ;;  %6743 = vmatmul.msk.f32.gmra.mxu2 %vm995_vm7, %v12574_v1  ;;  %v4883_v10 = vrot.slane %v4183_v13, 4  ;;  %7029 = vtanh.f32 %v2445_v11  ;;  %v4878_v36 = vsel %vm541_vm0, %v4877_v39, %v4179_v5  ;;  %v4885_v17 = vrot.slane %v4184_v44, 3  ;;  %v12601_v33 = vpop.xlane.xlu1 %5172  ;;  %v14500_v1 = vld [vmem:[#allocation38_spill] sm:$0xff] }
 0x23f   :  { %v4887_v35 = vrot.slane %v4185_v23, 2  ;;  %v4880_v7 = vsel %vm544_vm1, %v4879_v40, %v4878_v36  ;;  %v4889_v46 = vrot.slane %v4186_v62, 1  ;;  %v2527_v26 = vmul.f32 %v12182_v32, %v12491_v14  ;;  %v12605_v23 = vpop.xlane.xlu0 %3878 }
 0x240   :  { %v3824_v57 = vmul.f32 %v12182_v32, %v12501_v59  ;;  %v4882_v52 = vsel %vm547_vm2, %v4881_v37, %v4880_v7  ;;  %v5121_v43 = vmul.f32 %v12182_v32, %v12508_v22  ;;  %v3742_v13 = vadd.f32 %v11995_v3, %v3741_v63  ;;  %v2447_v37 = vpop.f32.mrf.mxu1 }
 0x241   :  { %v5039_v5 = vadd.f32 %v11995_v3, %v5038_v16  ;;  %v5235_v25 = vsel %vm5228_vm9, %v11525_v20, %v11584_v29  ;;  %v4884_v14 = vsel %vm550_vm3, %v4883_v10, %v4882_v52  ;;  %v2601_v4 = vsel %vm1240_vm8, %v2527_v26, 0.0  ;;  %v1146_v29 = vpop.f32.mrf.mxu0 }
 0x242   :  { %v3898_v59 = vsel %vm1240_vm8, %v3824_v57, 0.0  ;;  %v4886_v22 = vsel %vm553_vm4, %v4885_v17, %v4884_v14  ;;  %v5195_v44 = vsel %vm1240_vm8, %v5121_v43, 0.0  ;;  %7031 = vtanh.f32 %v3742_v13  ;;  %v3744_v16 = vpop.f32.mrf.mxu2 }
 0x243   :  { %v7028_v11 = vpop.eup %7027  ;;  %v4888_v62 = vsel %vm556_vm5, %v4887_v35, %v4886_v22  ;;  %v5268_v39 = vsel %vm5261_vm10, %v5235_v25, %v11599_v12  ;;  %7033 = vtanh.f32 %v5039_v5  ;;  %v1147_v36 = vadd.f32 %v11995_v3, %v1146_v29  ;;  %v5041_v25 = vpop.f32.mrf.mxu3 }
 0x244   :  { %2602 = vadd.xlane.f32.xlu2 %v2601_v4  ;;  %v7030_v20 = vpop.eup %7029  ;;  %v12611_v40 = vsel %vm559_vm6, %v4889_v46, %v4888_v62  ;;  %3899 = vadd.xlane.f32.xlu1 %v3898_v59  ;;  %v1230_v10 = vmul.f32 %v12182_v32, %v7028_v11  ;;  %v12620_v12 = vsel %vm5294_vm11, %v5268_v39, %v11616_v0 }
 0x245   :  { %14465 = vst [vmem:[#allocation135_spill] sm:$0xff] %v12611_v40  ;;  %5196 = vadd.xlane.f32.xlu0 %v5195_v44  ;;  %6775 = vmatmul.msk.f32.gmra.mxu3 %vm995_vm7, %v12611_v40  ;;  %v2528_v63 = vmul.f32 %v12182_v32, %v7030_v20  ;;  %v2448_v17 = vadd.f32 %v11995_v3, %v2447_v37  ;;  %v5346_v52 = vsel %vm5327_vm12, %v12620_v12, -inf  ;;  %7035 = vtanh.f32 %v1147_v36  ;;  %v12628_v43 = vpop.xlane.xlu2 %5175 }
 0x246   :  { %v3745_v35 = vadd.f32 %v11995_v3, %v3744_v16  ;;  %v1307_v46 = vsel %vm1240_vm8, %v1230_v10, 0.0  ;;  %v12630_v0 = vpop.xlane.xlu1 %2581  ;;  %v5236_v13 = vsel %vm5228_vm9, %v11697_v38, %v11711_v21  ;;  %v5042_v44 = vadd.f32 %v11995_v3, %v5041_v25 }
 0x247   :  { %v2604_v26 = vsel %vm1240_vm8, %v2528_v63, 0.0  ;;  %7037 = vtanh.f32 %v2448_v17  ;;  %v12636_v14 = vpop.xlane.xlu0 %1287  ;;  %v5269_v22 = vsel %vm5261_vm10, %v5236_v13, %v11685_v50 }
 0x248   :  { %v7032_v7 = vpop.eup %7031  ;;  %7039 = vtanh.f32 %v3745_v35  ;;  %v12645_v38 = vsel %vm5294_vm11, %v5269_v22, %v11798_v19  ;;  %v2450_v50 = vpop.f32.mrf.mxu1 }
 0x249   :  { %v7034_v57 = vpop.eup %7033  ;;  %v3825_v5 = vmul.f32 %v12182_v32, %v7032_v7  ;;  %v1149_v59 = vpop.f32.mrf.mxu0  ;;  %v5349_v37 = vsel %vm5327_vm12, %v12645_v38, -inf  ;;  %7041 = vtanh.f32 %v5042_v44  ;;  %v2451_v7 = vadd.f32 %v11995_v3, %v2450_v50 }
 0x24a   :  { %v5122_v4 = vmul.f32 %v12182_v32, %v7034_v57  ;;  %v1150_v21 = vadd.f32 %v11995_v3, %v1149_v59  ;;  %v3747_v63 = vpop.f32.mrf.mxu2  ;;  %v5237_v59 = vsel %vm5228_vm9, %v11787_v34, %v11914_v61 }
 0x24b   :  { %v7036_v11 = vpop.eup %7035  ;;  %v3901_v62 = vsel %vm1240_vm8, %v3825_v5, 0.0  ;;  %v5044_v17 = vpop.f32.mrf.mxu3 }
 0x24c   :  { %5347 = vmax.xlane.f32.xlu2 %v5346_v52  ;;  %1308 = vadd.xlane.f32.xlu1 %v1307_v46  ;;  %v5198_v20 = vsel %vm1240_vm8, %v5122_v4, 0.0  ;;  %7043 = vtanh.f32 %v1150_v21  ;;  %v1231_v10 = vmul.f32 %v12182_v32, %v7036_v11  ;;  %v5045_v52 = vadd.f32 %v11995_v3, %v5044_v17 }
 0x24d   :  { %2605 = vadd.xlane.f32.xlu0 %v2604_v26  ;;  %v7038_v29 = vpop.eup %7037  ;;  %v12652_v19 = vpop.xlane.xlu2 %2584  ;;  %v3748_v26 = vadd.f32 %v11995_v3, %v3747_v63  ;;  %7045 = vtanh.f32 %v2451_v7  ;;  %v5270_v11 = vsel %vm5261_vm10, %v5237_v59, %v11811_v55  ;;  %v5238_v59 = vsel %vm5228_vm9, %v11926_v27, %v12010_v56 }
 0x24e   :  { %v7040_v39 = vpop.eup %7039  ;;  %v2529_v16 = vmul.f32 %v12182_v32, %v7038_v29  ;;  %v12656_v35 = vpop.xlane.xlu1 %3881  ;;  %v1310_v57 = vsel %vm1240_vm8, %v1231_v10, 0.0 }
 0x24f   :  { %v3826_v36 = vmul.f32 %v12182_v32, %v7040_v39  ;;  %v12659_v46 = vpop.xlane.xlu0 %5178  ;;  %v7042_v13 = vpop.eup %7041  ;;  %7047 = vtanh.f32 %v3748_v26 }
 0x250   :  { %v2607_v5 = vsel %vm1240_vm8, %v2529_v16, 0.0  ;;  %7049 = vtanh.f32 %v5045_v52  ;;  %v5123_v22 = vmul.f32 %v12182_v32, %v7042_v13  ;;  %v2453_v21 = vpop.f32.mrf.mxu1 }
 0x251   :  { %v3904_v25 = vsel %vm1240_vm8, %v3826_v36, 0.0  ;;  %v1152_v44 = vpop.f32.mrf.mxu0  ;;  %v2454_v50 = vadd.f32 %v11995_v3, %v2453_v21 }
 0x252   :  { %v7044_v4 = vpop.eup %7043  ;;  %v5201_v39 = vsel %vm1240_vm8, %v5123_v22, 0.0 }
 0x253   :  { %v7046_v61 = vpop.eup %7045  ;;  %v5047_v26 = vpop.f32.mrf.mxu3 }
 0x254   :  { %3902 = vadd.xlane.f32.xlu2 %v3901_v62  ;;  %5199 = vadd.xlane.f32.xlu1 %v5198_v20  ;;  %v1232_v62 = vmul.f32 %v12182_v32, %v7044_v4  ;;  %v1153_v20 = vadd.f32 %v11995_v3, %v1152_v44  ;;  %v2530_v17 = vmul.f32 %v12182_v32, %v7046_v61 }
 0x255   :  { %5350 = vmax.xlane.f32.xlu0 %v5349_v37  ;;  %v12673_v29 = vpop.xlane.xlu2 %5329  ;;  %v12681_v37 = vsel %vm5294_vm11, %v5270_v11, %v11904_v60  ;;  %v7048_v55 = vpop.eup %7047  ;;  %v5271_v61 = vsel %vm5261_vm10, %v5238_v59, %v12023_v47 }
 0x256   :  { %v12676_v34 = vpop.xlane.xlu1 %1290  ;;  %v1313_v63 = vsel %vm1240_vm8, %v1232_v62, 0.0  ;;  %v7050_v16 = vpop.eup %7049  ;;  %v5352_v36 = vsel %vm5327_vm12, %v12681_v37, -inf  ;;  %7051 = vtanh.f32 %v1153_v20  ;;  %v3827_v7 = vmul.f32 %v12182_v32, %v7048_v55 }
 0x257   :  { %v12684_v10 = vpop.xlane.xlu0 %2587  ;;  %7053 = vtanh.f32 %v2454_v50  ;;  %v3750_v60 = vpop.f32.mrf.mxu2  ;;  %v5124_v3 = vmul.f32 %v12182_v32, %v7050_v16  ;;  %v2610_v13 = vsel %vm1240_vm8, %v2530_v17, 0.0 }
 0x258   :  { %v3907_v22 = vsel %vm1240_vm8, %v3827_v7, 0.0 }
 0x259   :  { %v5204_v44 = vsel %vm1240_vm8, %v5124_v3, 0.0  ;;  %v1155_v20 = vpop.f32.mrf.mxu0 }
 0x25c   :  { %1311 = vadd.xlane.f32.xlu2 %v1310_v57  ;;  %2608 = vadd.xlane.f32.xlu1 %v2607_v5  ;;  %v12695_v57 = vld [vmem:[%s14189_s2] ss:$0 sm:$0xff]  ;;  %v7052_v4 = vpop.eup %7051 }
 0x25d   :  { %3905 = vadd.xlane.f32.xlu0 %v3904_v25  ;;  %v3751_v52 = vadd.f32 %v12695_v57, %v3750_v60  ;;  %v5048_v5 = vadd.f32 %v12695_v57, %v5047_v26  ;;  %v7054_v62 = vpop.eup %7053  ;;  %v1233_v27 = vmul.f32 %v12182_v32, %v7052_v4  ;;  %v2456_v50 = vpop.f32.mrf.mxu1  ;;  %v1156_v55 = vadd.f32 %v12695_v57, %v1155_v20 }
 0x25e   :  { %v12707_v11 = vpop.xlane.xlu1 %5181  ;;  %v2531_v56 = vmul.f32 %v12182_v32, %v7054_v62 }
 0x25f   :  { %v12700_v25 = vpop.xlane.xlu2 %3884  ;;  %7055 = vtanh.f32 %v3751_v52  ;;  %v1316_v17 = vsel %vm1240_vm8, %v1233_v27, 0.0  ;;  %v5239_v52 = vsel %vm5228_vm9, %v12136_v30, %v12144_v6 }
 0x260   :  { %7057 = vtanh.f32 %v5048_v5  ;;  %v2613_v60 = vsel %vm1240_vm8, %v2531_v56, 0.0 }
 0x261   :  { %7059 = vtanh.f32 %v1156_v55 }
 0x264   :  { %5202 = vadd.xlane.f32.xlu2 %v5201_v39  ;;  %5353 = vmax.xlane.f32.xlu1 %v5352_v36  ;;  %v12709_v21 = vpop.xlane.xlu0 %5332  ;;  %v3753_v39 = vpop.f32.mrf.mxu2  ;;  %v2457_v36 = vadd.f32 %v12695_v57, %v2456_v50 }
 0x265   :  { %1314 = vadd.xlane.f32.xlu0 %v1313_v63  ;;  %v12718_v63 = vsel %vm5294_vm11, %v5271_v61, %v12040_v53  ;;  %v3754_v16 = vadd.f32 %v12695_v57, %v3753_v39  ;;  %v7056_v47 = vpop.eup %7055 }
 0x266   :  { %v7058_v7 = vpop.eup %7057  ;;  %v5355_v3 = vsel %vm5327_vm12, %v12718_v63, -inf  ;;  %v5050_v5 = vpop.f32.mrf.mxu3 }
 0x267   :  { %7061 = vtanh.f32 %v3754_v16  ;;  %v5125_v59 = vmul.f32 %v12182_v32, %v7058_v7  ;;  %v5051_v62 = vadd.f32 %v12695_v57, %v5050_v5  ;;  %v7060_v20 = vpop.eup %7059 }
 0x268   :  { %7063 = vtanh.f32 %v2457_v36  ;;  %v1234_v55 = vmul.f32 %v12182_v32, %v7060_v20  ;;  %v5240_v20 = vsel %vm5228_vm9, %v12220_v8, %v12327_v9 }
 0x269   :  { %v12726_v26 = vpop.xlane.xlu2 %1293  ;;  %v12728_v53 = vpop.xlane.xlu1 %2590  ;;  %v5207_v27 = vsel %vm1240_vm8, %v5125_v59, 0.0  ;;  %7065 = vtanh.f32 %v5051_v62 }
 0x26c   :  { %2611 = vadd.xlane.f32.xlu2 %v2610_v13  ;;  %3908 = vadd.xlane.f32.xlu1 %v3907_v22  ;;  %v3828_v13 = vmul.f32 %v12182_v32, %v7056_v47  ;;  %v12734_v4 = vpop.xlane.xlu0 %3887  ;;  %v1158_v22 = vpop.f32.mrf.mxu0 }
 0x26d   :  { %5205 = vadd.xlane.f32.xlu0 %v5204_v44  ;;  %v5272_v44 = vsel %vm5261_vm10, %v5239_v52, %v12120_v51  ;;  %v1159_v6 = vadd.f32 %v12695_v57, %v1158_v22  ;;  %v7062_v39 = vpop.eup %7061 }
 0x26e   :  { %v3910_v61 = vsel %vm1240_vm8, %v3828_v13, 0.0  ;;  %v12743_v30 = vsel %vm5294_vm11, %v5272_v44, %v12234_v42  ;;  %v7064_v56 = vpop.eup %7063  ;;  %v3829_v47 = vmul.f32 %v12182_v32, %v7062_v39  ;;  %v1319_v13 = vsel %vm1240_vm8, %v1234_v55, 0.0 }
 0x26f   :  { %v5358_v50 = vsel %vm5327_vm12, %v12743_v30, -inf  ;;  %7067 = vtanh.f32 %v1159_v6  ;;  %v2532_v36 = vmul.f32 %v12182_v32, %v7064_v56  ;;  %v7066_v59 = vpop.eup %7065  ;;  %v5273_v39 = vsel %vm5261_vm10, %v5240_v20, %v12246_v2 }
 0x270   :  { %v3913_v44 = vsel %vm1240_vm8, %v3829_v47, 0.0 }
 0x271   :  { %v3756_v51 = vpop.f32.mrf.mxu2  ;;  %v2616_v22 = vsel %vm1240_vm8, %v2532_v36, 0.0 }
 0x272   :  { %v3757_v7 = vadd.f32 %v12695_v57, %v3756_v51 }
 0x274   :  { %5356 = vmax.xlane.f32.xlu2 %v5355_v3  ;;  %1317 = vadd.xlane.f32.xlu1 %v1316_v17  ;;  %7069 = vtanh.f32 %v3757_v7 }
 0x275   :  { %2614 = vadd.xlane.f32.xlu0 %v2613_v60  ;;  %v2459_v16 = vpop.f32.mrf.mxu1  ;;  %v5053_v60 = vpop.f32.mrf.mxu3 }
 0x276   :  { %v2460_v52 = vadd.f32 %v12695_v57, %v2459_v16  ;;  %v5054_v5 = vadd.f32 %v12695_v57, %v5053_v60  ;;  %v7068_v62 = vpop.eup %7067  ;;  %v12779_v16 = vsel %vm5294_vm11, %v5273_v39, %v12318_v41  ;;  %v5241_v39 = vsel %vm5228_vm9, %v12331_v49, %v12425_v18  ;;  %v12809_v49 = vld [vmem:[%s14190_s3] ss:$0 sm:$0xff] }
 0x278   :  { %7071 = vtanh.f32 %v2460_v52  ;;  %v5361_v52 = vsel %vm5327_vm12, %v12779_v16, -inf }
 0x279   :  { %v12754_v17 = vpop.xlane.xlu1 %5335  ;;  %7073 = vtanh.f32 %v5054_v5 }
 0x27a   :  { %v12750_v42 = vpop.xlane.xlu2 %5184  ;;  %v7070_v9 = vpop.eup %7069 }
 0x27b   :  { %v12757_v3 = vpop.xlane.xlu0 %1296  ;;  %v3830_v5 = vmul.f32 %v12182_v32, %v7070_v9 }
 0x27c   :  { %3911 = vadd.xlane.f32.xlu2 %v3910_v61  ;;  %5208 = vadd.xlane.f32.xlu1 %v5207_v27  ;;  %v5126_v61 = vmul.f32 %v12182_v32, %v7066_v59  ;;  %v1161_v6 = vpop.f32.mrf.mxu0  ;;  %v1235_v27 = vmul.f32 %v12182_v32, %v7068_v62 }
 0x27d   :  { %5359 = vmax.xlane.f32.xlu0 %v5358_v50  ;;  %v1162_v51 = vadd.f32 %v12695_v57, %v1161_v6 }
 0x27e   :  { %v5210_v55 = vsel %vm1240_vm8, %v5126_v61, 0.0  ;;  %v7072_v2 = vpop.eup %7071  ;;  %v1322_v60 = vsel %vm1240_vm8, %v1235_v27, 0.0  ;;  %v3916_v27 = vsel %vm1240_vm8, %v3830_v5, 0.0 }
 0x27f   :  { %v2462_v56 = vpop.f32.mrf.mxu1  ;;  %v7074_v7 = vpop.eup %7073  ;;  %7075 = vtanh.f32 %v1162_v51 }
 0x280   :  { %v2463_v36 = vadd.f32 %v12695_v57, %v2462_v56  ;;  %v5127_v59 = vmul.f32 %v12182_v32, %v7074_v7 }
 0x281   :  { %v12774_v8 = vpop.xlane.xlu1 %3890 }
 0x282   :  { %v12771_v50 = vpop.xlane.xlu2 %2593  ;;  %7077 = vtanh.f32 %v2463_v36  ;;  %v5213_v56 = vsel %vm1240_vm8, %v5127_v59, 0.0  ;;  %v5274_v36 = vsel %vm5261_vm10, %v5241_v39, %v12437_v31 }
 0x283   :  { %v12782_v47 = vpop.xlane.xlu0 %5187 }
 0x284   :  { %1320 = vadd.xlane.f32.xlu2 %v1319_v13  ;;  %2617 = vadd.xlane.f32.xlu1 %v2616_v22  ;;  %v2533_v13 = vmul.f32 %v12182_v32, %v7072_v2 }
 0x285   :  { %3914 = vadd.xlane.f32.xlu0 %v3913_v44  ;;  %v7076_v6 = vpop.eup %7075 }
 0x286   :  { %v2619_v62 = vsel %vm1240_vm8, %v2533_v13, 0.0  ;;  %v1236_v18 = vmul.f32 %v12809_v49, %v7076_v6  ;;  %v14466_v13 = vld [vmem:[#allocation130_spill] sm:$0xff] }
 0x288   :  { %v3759_v41 = vpop.f32.mrf.mxu2  ;;  %v7078_v32 = vpop.eup %7077 }
 0x289   :  { %v3760_v44 = vadd.f32 %v12695_v57, %v3759_v41  ;;  %v12816_v41 = vsel %vm5294_vm11, %v5274_v36, %v14466_v13 }
 0x28b   :  { %7079 = vtanh.f32 %v3760_v44 }
 0x28c   :  { %5211 = vadd.xlane.f32.xlu2 %v5210_v55  ;;  %5362 = vmax.xlane.f32.xlu1 %v5361_v52  ;;  %v5056_v22 = vpop.f32.mrf.mxu3 }
 0x28d   :  { %1323 = vadd.xlane.f32.xlu0 %v1322_v60  ;;  %v5057_v20 = vadd.f32 %v12695_v57, %v5056_v22  ;;  %v12793_v61 = vpop.xlane.xlu2 %5338  ;;  %v12800_v51 = vpop.xlane.xlu1 %1299  ;;  %v2534_v60 = vmul.f32 %v12809_v49, %v7078_v32  ;;  %v1325_v22 = vsel %vm1240_vm8, %v1236_v18, 0.0 }
 0x28e   :  { %v12802_v9 = vpop.xlane.xlu0 %2596 }
 0x28f   :  { %7081 = vtanh.f32 %v5057_v20  ;;  %v2622_v44 = vsel %vm1240_vm8, %v2534_v60, 0.0  ;;  %v5364_v20 = vsel %vm5327_vm12, %v12816_v41, -inf }
 0x291   :  { %v7080_v59 = vpop.eup %7079 }
 0x292   :  { %v1164_v55 = vpop.f32.mrf.mxu0  ;;  %v3831_v32 = vmul.f32 %v12809_v49, %v7080_v59 }
 0x293   :  { %v1165_v7 = vadd.f32 %v12695_v57, %v1164_v55 }
 0x294   :  { %2620 = vadd.xlane.f32.xlu2 %v2619_v62  ;;  %3917 = vadd.xlane.f32.xlu1 %v3916_v27  ;;  %v3762_v2 = vpop.f32.mrf.mxu2  ;;  %v5242_v27 = vsel %vm5228_vm9, %v12521_v15, %v12527_v28 }
 0x295   :  { %5214 = vadd.xlane.f32.xlu0 %v5213_v56  ;;  %v3763_v31 = vadd.f32 %v12695_v57, %v3762_v2  ;;  %v7082_v62 = vpop.eup %7081  ;;  %7083 = vtanh.f32 %v1165_v7  ;;  %v5275_v2 = vsel %vm5261_vm10, %v5242_v27, %v12515_v48  ;;  %v3919_v7 = vsel %vm1240_vm8, %v3831_v32, 0.0 }
 0x296   :  { %v2465_v52 = vpop.f32.mrf.mxu1  ;;  %v5128_v55 = vmul.f32 %v12809_v49, %v7082_v62  ;;  %v12841_v15 = vsel %vm5294_vm11, %v5275_v2, %v12601_v33 }
 0x297   :  { %v2466_v5 = vadd.f32 %v12695_v57, %v2465_v52  ;;  %v12824_v6 = vpop.xlane.xlu2 %3893  ;;  %v12826_v39 = vpop.xlane.xlu1 %5190  ;;  %7085 = vtanh.f32 %v3763_v31  ;;  %v5367_v48 = vsel %vm5327_vm12, %v12841_v15, -inf }
 0x298   :  { %v5216_v13 = vsel %vm1240_vm8, %v5128_v55, 0.0 }
 0x299   :  { %7087 = vtanh.f32 %v2466_v5 }
 0x29b   :  { %v7084_v60 = vpop.eup %7083 }
 0x29c   :  { %5365 = vmax.xlane.f32.xlu2 %v5364_v20  ;;  %1326 = vadd.xlane.f32.xlu1 %v1325_v22  ;;  %v12831_v56 = vpop.xlane.xlu0 %5341  ;;  %v1237_v33 = vmul.f32 %v12809_v49, %v7084_v60 }
 0x29d   :  { %2623 = vadd.xlane.f32.xlu0 %v2622_v44  ;;  %v7086_v52 = vpop.eup %7085 }
 0x29e   :  { %v3832_v20 = vmul.f32 %v12809_v49, %v7086_v52  ;;  %v1328_v27 = vsel %vm1240_vm8, %v1237_v33, 0.0 }
 0x29f   :  { %v5059_v36 = vpop.f32.mrf.mxu3  ;;  %v7088_v5 = vpop.eup %7087 }
 0x2a0   :  { %v5060_v18 = vadd.f32 %v12695_v57, %v5059_v36  ;;  %v1167_v28 = vpop.f32.mrf.mxu0  ;;  %v2535_v62 = vmul.f32 %v12809_v49, %v7088_v5  ;;  %v3922_v36 = vsel %vm1240_vm8, %v3832_v20, 0.0 }
 0x2a1   :  { %v1168_v31 = vadd.f32 %v12695_v57, %v1167_v28  ;;  %v12850_v22 = vpop.xlane.xlu1 %2599 }
 0x2a2   :  { %7089 = vtanh.f32 %v5060_v18  ;;  %v12847_v59 = vpop.xlane.xlu2 %1302  ;;  %v2625_v55 = vsel %vm1240_vm8, %v2535_v62, 0.0  ;;  %v5243_v18 = vsel %vm5228_vm9, %v12593_v58, %v12630_v0 }
 0x2a3   :  { %7091 = vtanh.f32 %v1168_v31 }
 0x2a4   :  { %3920 = vadd.xlane.f32.xlu2 %v3919_v7  ;;  %5217 = vadd.xlane.f32.xlu1 %v5216_v13  ;;  %v12852_v44 = vpop.xlane.xlu0 %3896  ;;  %v5276_v13 = vsel %vm5261_vm10, %v5243_v18, %v12605_v23 }
 0x2a5   :  { %5368 = vmax.xlane.f32.xlu0 %v5367_v48 }
 0x2a8   :  { %v7090_v32 = vpop.eup %7089 }
 0x2a9   :  { %v7092_v2 = vpop.eup %7091  ;;  %v5129_v28 = vmul.f32 %v12809_v49, %v7090_v32 }
 0x2aa   :  { %v3765_v60 = vpop.f32.mrf.mxu2  ;;  %v1238_v31 = vmul.f32 %v12809_v49, %v7092_v2 }
 0x2ab   :  { %v3766_v7 = vadd.f32 %v12695_v57, %v3765_v60  ;;  %v5219_v20 = vsel %vm1240_vm8, %v5129_v28, 0.0 }
 0x2ac   :  { %1329 = vadd.xlane.f32.xlu2 %v1328_v27  ;;  %2626 = vadd.xlane.f32.xlu1 %v2625_v55  ;;  %v12878_v27 = vsel %vm5294_vm11, %v5276_v13, %v12628_v43  ;;  %v1331_v23 = vsel %vm1240_vm8, %v1238_v31, 0.0 }
 0x2ad   :  { %3923 = vadd.xlane.f32.xlu0 %v3922_v36  ;;  %7093 = vtanh.f32 %v3766_v7  ;;  %v5370_v55 = vsel %vm5327_vm12, %v12878_v27, -inf }
 0x2ae   :  { %v5062_v52 = vpop.f32.mrf.mxu3  ;;  %v2468_v5 = vpop.f32.mrf.mxu1 }
 0x2af   :  { %v12867_v48 = vpop.xlane.xlu2 %5193  ;;  %v5063_v58 = vadd.f32 %v12695_v57, %v5062_v52  ;;  %v2469_v0 = vadd.f32 %v12695_v57, %v2468_v5  ;;  %v12871_v33 = vpop.xlane.xlu1 %5344 }
 0x2b0   :  { %v12873_v62 = vpop.xlane.xlu0 %1305 }
 0x2b1   :  { %7095 = vtanh.f32 %v5063_v58  ;;  %v5244_v58 = vsel %vm5228_vm9, %v12636_v14, %v12652_v19 }
 0x2b2   :  { %7097 = vtanh.f32 %v2469_v0 }
 0x2b3   :  { %v7094_v32 = vpop.eup %7093 }
 0x2b4   :  { %5220 = vadd.xlane.f32.xlu2 %v5219_v20  ;;  %5371 = vmax.xlane.f32.xlu1 %v5370_v55  ;;  %v3833_v18 = vmul.f32 %v12809_v49, %v7094_v32  ;;  %v14467_v32 = vld [vmem:[#allocation109_spill] sm:$0xff] }
 0x2b5   :  { %1332 = vadd.xlane.f32.xlu0 %v1331_v23  ;;  %v1170_v36 = vpop.f32.mrf.mxu0  ;;  %v5424_v55 = vsub.f32 %v14467_v32, %v12673_v29 }
 0x2b6   :  { %v1171_v2 = vadd.f32 %v12695_v57, %v1170_v36  ;;  %v3925_v20 = vsel %vm1240_vm8, %v3833_v18, 0.0 }
 0x2b7   :  { %v7096_v60 = vpop.eup %7095  ;;  %v12885_v7 = vpop.xlane.xlu2 %2602  ;;  %v5456_v14 = vmul.f32 1.442695, %v5424_v55 }
 0x2b8   :  { %v7098_v43 = vpop.eup %7097  ;;  %7099 = vtanh.f32 %v1171_v2  ;;  %v12887_v28 = vpop.xlane.xlu1 %3899  ;;  %v5130_v13 = vmul.f32 %v12809_v49, %v7096_v60  ;;  %v5277_v2 = vsel %vm5261_vm10, %v5244_v58, %v12656_v35 }
 0x2b9   :  { %v12889_v52 = vpop.xlane.xlu0 %5196  ;;  %v2471_v31 = vpop.f32.mrf.mxu1  ;;  %v2536_v5 = vmul.f32 %v12809_v49, %v7098_v43  ;;  %v12913_v29 = vsel %vm5294_vm11, %v5277_v2, %v12659_v46  ;;  %v14469_v46 = vld [vmem:[#allocation119_spill] sm:$0xff]  ;;  %v5245_v2 = vsel %vm5228_vm9, %v12676_v34, %v12684_v10 }
 0x2ba   :  { %v2472_v0 = vadd.f32 %v12695_v57, %v2471_v31  ;;  %v5222_v23 = vsel %vm1240_vm8, %v5130_v13, 0.0  ;;  %v5426_v55 = vsub.f32 %v14469_v46, %v12754_v17 }
 0x2bb   :  { %v2628_v36 = vsel %vm1240_vm8, %v2536_v5, 0.0 }
 0x2bc   :  { %7101 = vtanh.f32 %v2472_v0  ;;  %2629 = vadd.xlane.f32.xlu2 %v2628_v36  ;;  %3926 = vadd.xlane.f32.xlu1 %v3925_v20  ;;  %v14468_v0 = vld [vmem:[#allocation113_spill] sm:$0xff]  ;;  %v5460_v17 = vmul.f32 1.442695, %v5426_v55 }
 0x2bd   :  { %5223 = vadd.xlane.f32.xlu0 %v5222_v23  ;;  %7103 = vpow2.f32 %v5456_v14  ;;  %v5425_v20 = vsub.f32 %v14468_v0, %v12709_v21  ;;  %v5373_v23 = vsel %vm5327_vm12, %v12913_v29, -inf  ;;  %v5278_v21 = vsel %vm5261_vm10, %v5245_v2, %v12700_v25  ;;  %v14470_v2 = vld [vmem:[#allocation123_spill] sm:$0xff] }
 0x2be   :  { %v7100_v60 = vpop.eup %7099  ;;  %v12941_v34 = vsel %vm5294_vm11, %v5278_v21, %v12707_v11  ;;  %v5427_v21 = vsub.f32 %v14470_v2, %v12793_v61  ;;  %v5246_v61 = vsel %vm5228_vm9, %v12726_v26, %v12728_v53 }
 0x2bf   :  { %v12904_v19 = vpop.xlane.xlu2 %5347  ;;  %v1239_v18 = vmul.f32 %v12809_v49, %v7100_v60  ;;  %v5458_v60 = vmul.f32 1.442695, %v5425_v20 }
 0x2c0   :  { %v12907_v43 = vpop.xlane.xlu1 %1308 }
 0x2c1   :  { %v12909_v13 = vpop.xlane.xlu0 %2605  ;;  %v3768_v31 = vpop.f32.mrf.mxu2  ;;  %v1334_v58 = vsel %vm1240_vm8, %v1239_v18, 0.0 }
 0x2c2   :  { %v7102_v5 = vpop.eup %7101  ;;  %v3769_v35 = vadd.f32 %v12695_v57, %v3768_v31 }
 0x2c3   :  { %v2537_v32 = vmul.f32 %v12809_v49, %v7102_v5  ;;  %v12936_v5 = vpop.eup %7103 }
 0x2c4   :  { %7105 = vtanh.f32 %v3769_v35  ;;  %5374 = vmax.xlane.f32.xlu2 %v5373_v23  ;;  %1335 = vadd.xlane.f32.xlu1 %v1334_v58  ;;  %v5520_v25 = vsel %vm5327_vm12, %v12936_v5, 0.0  ;;  %v5376_v23 = vsel %vm5327_vm12, %v12941_v34, -inf }
 0x2c5   :  { %v2631_v36 = vsel %vm1240_vm8, %v2537_v32, 0.0  ;;  %7107 = vpow2.f32 %v5458_v60 }
 0x2c6   :  { %2632 = vadd.xlane.f32.xlu0 %v2631_v36 }
 0x2c7   :  { %v12930_v14 = vpop.xlane.xlu2 %3902 }
 0x2c8   :  { %v12932_v18 = vpop.xlane.xlu1 %5199  ;;  %v5065_v35 = vpop.f32.mrf.mxu3 }
 0x2c9   :  { %v12934_v31 = vpop.xlane.xlu0 %5350  ;;  %v5066_v0 = vadd.f32 %v12695_v57, %v5065_v35  ;;  %v14471_v35 = vld [vmem:[#allocation128_spill] sm:$0xff] }
 0x2ca   :  { %v7106_v58 = vpop.eup %7105 }
 0x2cb   :  { %v3834_v10 = vmul.f32 %v12809_v49, %v7106_v58  ;;  %7109 = vtanh.f32 %v5066_v0  ;;  %v12955_v46 = vpop.eup %7107  ;;  %v5428_v58 = vsub.f32 %v14471_v35, %v12831_v56  ;;  %v5429_v0 = vsub.f32 %v12552_v54, %v12871_v33 }
 0x2cc   :  { %7111 = vpow2.f32 %v5460_v17  ;;  %5521 = vadd.xlane.f32.xlu1 %v5520_v25  ;;  %v5247_v17 = vsel %vm5228_vm9, %v12757_v3, %v12771_v50  ;;  %v5523_v25 = vsel %vm5327_vm12, %v12955_v46, 0.0  ;;  %v5248_v54 = vsel %vm5228_vm9, %v12800_v51, %v12802_v9 }
 0x2cd   :  { %v3928_v20 = vsel %vm1240_vm8, %v3834_v10, 0.0  ;;  %v5280_v50 = vsel %vm5261_vm10, %v5247_v17, %v12774_v8  ;;  %v5281_v33 = vsel %vm5261_vm10, %v5248_v54, %v12824_v6  ;;  %v5464_v26 = vmul.f32 1.442695, %v5428_v58 }
 0x2ce   :  { %3929 = vadd.xlane.f32.xlu2 %v3928_v20  ;;  %5377 = vmax.xlane.f32.xlu0 %v5376_v23  ;;  %v5279_v23 = vsel %vm5261_vm10, %v5246_v61, %v12734_v4  ;;  %v12994_v51 = vsel %vm5294_vm11, %v5280_v50, %v12782_v47  ;;  %v12998_v9 = vsel %vm5294_vm11, %v5281_v33, %v12826_v39 }
 0x2cf   :  { %v12949_v57 = vpop.xlane.xlu2 %1311  ;;  %v12990_v8 = vsel %vm5294_vm11, %v5279_v23, %v12750_v42  ;;  %v5382_v4 = vsel %vm5327_vm12, %v12994_v51, -inf  ;;  %v5385_v42 = vsel %vm5327_vm12, %v12998_v9, -inf  ;;  %v5430_v35 = vsub.f32 %v12620_v12, %v12904_v19 }
 0x2d0   :  { %v12951_v11 = vpop.xlane.xlu1 %2608  ;;  %v5379_v6 = vsel %vm5327_vm12, %v12990_v8, -inf  ;;  %v5250_v58 = vsel %vm5228_vm9, %v12873_v62, %v12885_v7 }
 0x2d1   :  { %v12953_v32 = vpop.xlane.xlu0 %3905  ;;  %v7110_v55 = vpop.eup %7109  ;;  %v5468_v62 = vmul.f32 1.442695, %v5430_v35  ;;  %v5252_v35 = vsel %vm5228_vm9, %v12949_v57, %v12951_v11 }
 0x2d2   :  { %v12957_v36 = vpop.eup %7111  ;;  %v5131_v60 = vmul.f32 %v12809_v49, %v7110_v55  ;;  %v5462_v49 = vmul.f32 1.442695, %v5427_v21  ;;  %v5466_v55 = vmul.f32 1.442695, %v5429_v0  ;;  %v5431_v0 = vsub.f32 %v12645_v38, %v12934_v31 }
 0x2d3   :  { %v5526_v3 = vsel %vm5327_vm12, %v12957_v36, 0.0  ;;  %v5283_v38 = vsel %vm5261_vm10, %v5250_v58, %v12887_v28  ;;  %v5285_v57 = vsel %vm5261_vm10, %v5252_v35, %v12953_v32 }
 0x2d4   :  { %v5225_v10 = vsel %vm1240_vm8, %v5131_v60, 0.0  ;;  %7113 = vpow2.f32 %v5462_v49  ;;  %v5470_v31 = vmul.f32 1.442695, %v5431_v0  ;;  %v13046_v54 = vsel %vm5294_vm11, %v5283_v38, %v12889_v52 }
 0x2d5   :  { %5226 = vadd.xlane.f32.xlu1 %v5225_v10  ;;  %7115 = vpow2.f32 %v5464_v26 }
 0x2d6   :  { %5524 = vadd.xlane.f32.xlu2 %v5523_v25  ;;  %5527 = vadd.xlane.f32.xlu0 %v5526_v3  ;;  %7117 = vpow2.f32 %v5466_v55  ;;  %v5249_v3 = vsel %vm5228_vm9, %v12847_v59, %v12850_v22 }
 0x2d7   :  { %v12982_v56 = vpop.xlane.xlu2 %5202  ;;  %v5282_v50 = vsel %vm5261_vm10, %v5249_v3, %v12852_v44  ;;  %7119 = vpow2.f32 %v5468_v62  ;;  %v5391_v44 = vsel %vm5327_vm12, %v13046_v54, -inf }
 0x2d8   :  { %v5354_v53 = vpop.xlane.xlu1 %5353  ;;  %v13042_v28 = vsel %vm5294_vm11, %v5282_v50, %v12867_v48  ;;  %7121 = vpow2.f32 %v5470_v31  ;;  %v13083_v11 = vsel %vm5294_vm11, %v5285_v57, %v12982_v56 }
 0x2d9   :  { %v1315_v20 = vpop.xlane.xlu0 %1314  ;;  %v5432_v10 = vsub.f32 %v12681_v37, %v5354_v53  ;;  %v5251_v37 = vsel %vm5228_vm9, %v12907_v43, %v12909_v13  ;;  %v5388_v13 = vsel %vm5327_vm12, %v13042_v28, -inf }
 0x2da   :  { %v13008_v39 = vpop.eup %7113  ;;  %v5284_v19 = vsel %vm5261_vm10, %v5251_v37, %v12930_v14 }
 0x2db   :  { %v13010_v60 = vpop.eup %7115  ;;  %v5529_v25 = vsel %vm5327_vm12, %v13008_v39, 0.0  ;;  %v5472_v49 = vmul.f32 1.442695, %v5432_v10  ;;  %v13050_v43 = vsel %vm5294_vm11, %v5284_v19, %v12932_v18 }
 0x2dc   :  { %v13012_v17 = vpop.eup %7117  ;;  %v5532_v61 = vsel %vm5327_vm12, %v13010_v60, 0.0  ;;  %v5394_v48 = vsel %vm5327_vm12, %v13050_v43, -inf }
 0x2dd   :  { %5380 = vmax.xlane.f32.xlu1 %v5379_v6  ;;  %v5535_v12 = vsel %vm5327_vm12, %v13012_v17, 0.0  ;;  %7123 = vpow2.f32 %v5472_v49  ;;  %v13058_v26 = vpop.eup %7119 }
 0x2de   :  { %5383 = vmax.xlane.f32.xlu2 %v5382_v4  ;;  %5386 = vmax.xlane.f32.xlu0 %v5385_v42  ;;  %v13060_v18 = vpop.eup %7121  ;;  %v5538_v4 = vsel %vm5327_vm12, %v13058_v26, 0.0 }
 0x2df   :  { %v2612_v47 = vpop.xlane.xlu2 %2611  ;;  %v5541_v42 = vsel %vm5327_vm12, %v13060_v18, 0.0 }
 0x2e0   :  { %v3909_v2 = vpop.xlane.xlu1 %3908  ;;  %v5253_v55 = vsel %vm5228_vm9, %v1315_v20, %v2612_v47 }
 0x2e1   :  { %v13006_v21 = vpop.xlane.xlu0 %5205 }
 0x2e3   :  { %v13062_v53 = vpop.eup %7123 }
 0x2e4   :  { %v5544_v58 = vsel %vm5327_vm12, %v13062_v53, 0.0 }
 0x2e5   :  { %5530 = vadd.xlane.f32.xlu1 %v5529_v25 }
 0x2e6   :  { %5533 = vadd.xlane.f32.xlu2 %v5532_v61  ;;  %5536 = vadd.xlane.f32.xlu0 %v5535_v12  ;;  %v5397_v12 = vsel %vm5327_vm12, %v13083_v11, -inf }
 0x2e7   :  { %v5357_v7 = vpop.xlane.xlu2 %5356 }
 0x2e8   :  { %v1318_v59 = vpop.xlane.xlu1 %1317  ;;  %v5433_v23 = vsub.f32 %v12718_v63, %v5357_v7  ;;  %v5286_v63 = vsel %vm5261_vm10, %v5253_v55, %v3909_v2 }
 0x2e9   :  { %v2615_v22 = vpop.xlane.xlu0 %2614  ;;  %v13087_v2 = vsel %vm5294_vm11, %v5286_v63, %v13006_v21 }
 0x2ea   :  { %v5474_v20 = vmul.f32 1.442695, %v5433_v23  ;;  %v5400_v38 = vsel %vm5327_vm12, %v13087_v2, -inf }
 0x2ec   :  { %7125 = vpow2.f32 %v5474_v20 }
 0x2ed   :  { %5389 = vmax.xlane.f32.xlu1 %v5388_v13 }
 0x2ee   :  { %5392 = vmax.xlane.f32.xlu2 %v5391_v44  ;;  %5395 = vmax.xlane.f32.xlu0 %v5394_v48 }
 0x2ef   :  { %v3912_v52 = vpop.xlane.xlu2 %3911 }
 0x2f0   :  { %v5209_v14 = vpop.xlane.xlu1 %5208 }
 0x2f1   :  { %v5360_v33 = vpop.xlane.xlu0 %5359 }
 0x2f2   :  { %v5434_v6 = vsub.f32 %v12743_v30, %v5360_v33  ;;  %v5254_v30 = vsel %vm5228_vm9, %v1318_v59, %v2615_v22  ;;  %v13098_v37 = vpop.eup %7125 }
 0x2f3   :  { %v5287_v0 = vsel %vm5261_vm10, %v5254_v30, %v3912_v52  ;;  %v5547_v59 = vsel %vm5327_vm12, %v13098_v37, 0.0 }
 0x2f4   :  { %v5476_v10 = vmul.f32 1.442695, %v5434_v6  ;;  %v13090_v3 = vsel %vm5294_vm11, %v5287_v0, %v5209_v14 }
 0x2f5   :  { %5539 = vadd.xlane.f32.xlu1 %v5538_v4  ;;  %v5403_v32 = vsel %vm5327_vm12, %v13090_v3, -inf }
 0x2f6   :  { %5542 = vadd.xlane.f32.xlu2 %v5541_v42  ;;  %5545 = vadd.xlane.f32.xlu0 %v5544_v58  ;;  %7127 = vpow2.f32 %v5476_v10 }
 0x2f7   :  { %v1321_v47 = vpop.xlane.xlu2 %1320 }
 0x2f8   :  { %v2618_v25 = vpop.xlane.xlu1 %2617 }
 0x2f9   :  { %v3915_v61 = vpop.xlane.xlu0 %3914  ;;  %v5255_v50 = vsel %vm5228_vm9, %v1321_v47, %v2618_v25 }
 0x2fc   :  { %v13101_v19 = vpop.eup %7127 }
 0x2fd   :  { %5398 = vmax.xlane.f32.xlu1 %v5397_v12  ;;  %v5550_v22 = vsel %vm5327_vm12, %v13101_v19, 0.0 }
 0x2fe   :  { %5401 = vmax.xlane.f32.xlu2 %v5400_v38  ;;  %5404 = vmax.xlane.f32.xlu0 %v5403_v32 }
 0x2ff   :  { %v5212_v56 = vpop.xlane.xlu2 %5211 }
 0x300   :  { %v5363_v21 = vpop.xlane.xlu1 %5362 }
 0x301   :  { %v1324_v62 = vpop.xlane.xlu0 %1323  ;;  %v5435_v7 = vsub.f32 %v12779_v16, %v5363_v21  ;;  %v5288_v16 = vsel %vm5261_vm10, %v5255_v50, %v3915_v61 }
 0x302   :  { %v13112_v14 = vsel %vm5294_vm11, %v5288_v16, %v5212_v56 }
 0x303   :  { %v5478_v31 = vmul.f32 1.442695, %v5435_v7  ;;  %v5406_v4 = vsel %vm5327_vm12, %v13112_v14, -inf }
 0x305   :  { %7129 = vpow2.f32 %v5478_v31  ;;  %5548 = vadd.xlane.f32.xlu1 %v5547_v59 }
 0x306   :  { %5551 = vadd.xlane.f32.xlu2 %v5550_v22 }
 0x307   :  { %v2621_v49 = vpop.xlane.xlu2 %2620 }
 0x308   :  { %v5256_v13 = vsel %vm5228_vm9, %v1324_v62, %v2621_v49  ;;  %v3918_v44 = vpop.xlane.xlu1 %3917 }
 0x309   :  { %v5215_v48 = vpop.xlane.xlu0 %5214  ;;  %v5289_v52 = vsel %vm5261_vm10, %v5256_v13, %v3918_v44 }
 0x30a   :  { %v13115_v33 = vsel %vm5294_vm11, %v5289_v52, %v5215_v48 }
 0x30b   :  { %v13117_v23 = vpop.eup %7129  ;;  %v5409_v55 = vsel %vm5327_vm12, %v13115_v33, -inf }
 0x30c   :  { %v5553_v6 = vsel %vm5327_vm12, %v13117_v23, 0.0 }
 0x30d   :  { %5554 = vadd.xlane.f32.xlu0 %v5553_v6  ;;  %5407 = vmax.xlane.f32.xlu1 %v5406_v4 }
 0x30e   :  { %5410 = vmax.xlane.f32.xlu2 %v5409_v55 }
 0x30f   :  { %v5366_v42 = vpop.xlane.xlu2 %5365 }
 0x310   :  { %v1327_v35 = vpop.xlane.xlu1 %1326  ;;  %v5436_v58 = vsub.f32 %v12816_v41, %v5366_v42 }
 0x311   :  { %v2624_v63 = vpop.xlane.xlu0 %2623 }
 0x312   :  { %v5480_v20 = vmul.f32 1.442695, %v5436_v58  ;;  %v5257_v30 = vsel %vm5228_vm9, %v1327_v35, %v2624_v63 }
 0x314   :  { %7131 = vpow2.f32 %v5480_v20  ;;  %v14326_v20 = vmov 1  }
 0x315   :  { %6780 = vset.pattern.permute.xlu2 %v14326_v20 }
 0x317   :  { %v3921_v47 = vpop.xlane.xlu2 %3920 }
 0x318   :  { %v5218_v0 = vpop.xlane.xlu1 %5217  ;;  %v5290_v10 = vsel %vm5261_vm10, %v5257_v30, %v3921_v47 }
 0x319   :  { %v5369_v25 = vpop.xlane.xlu0 %5368  ;;  %v13130_v57 = vsel %vm5294_vm11, %v5290_v10, %v5218_v0 }
 0x31a   :  { %v5437_v61 = vsub.f32 %v12841_v15, %v5369_v25  ;;  %v13132_v12 = vpop.eup %7131  ;;  %v5412_v41 = vsel %vm5327_vm12, %v13130_v57, -inf  ;;  %v14322_v25 = vmov 2  }
 0x31b   :  { %5413 = vmax.xlane.f32.xlu0 %v5412_v41  ;;  %v5556_v32 = vsel %vm5327_vm12, %v13132_v12, 0.0 }
 0x31c   :  { %v5482_v38 = vmul.f32 1.442695, %v5437_v61  ;;  %5557 = vadd.xlane.f32.xlu1 %v5556_v32  ;;  %6786 = vset.pattern.permute.xlu0 %v14322_v25 }
 0x31e   :  { %7133 = vpow2.f32 %v5482_v38 }
 0x31f   :  { %v1330_v56 = vpop.xlane.xlu2 %1329 }
 0x320   :  { %v2627_v21 = vpop.xlane.xlu1 %2626 }
 0x321   :  { %v3924_v62 = vpop.xlane.xlu0 %3923  ;;  %v5258_v15 = vsel %vm5228_vm9, %v1330_v56, %v2627_v21 }
 0x322   :  { %v5291_v59 = vsel %vm5261_vm10, %v5258_v15, %v3924_v62  ;;  %v14324_v62 = vmov 0  }
 0x323   :  { %6782 = vset.pattern.permute.xlu1 %v14324_v62 }
 0x324   :  { %v13138_v7 = vpop.eup %7133 }
 0x325   :  { %v5559_v31 = vsel %vm5327_vm12, %v13138_v7, 0.0 }
 0x326   :  { %5560 = vadd.xlane.f32.xlu2 %v5559_v31 }
 0x327   :  { %v5221_v22 = vpop.xlane.xlu2 %5220 }
 0x328   :  { %v13145_v50 = vsel %vm5294_vm11, %v5291_v59, %v5221_v22  ;;  %v5372_v49 = vpop.xlane.xlu1 %5371 }
 0x329   :  { %v1333_v13 = vpop.xlane.xlu0 %1332  ;;  %v5438_v44 = vsub.f32 %v12878_v27, %v5372_v49  ;;  %v5415_v48 = vsel %vm5327_vm12, %v13145_v50, -inf }
 0x32a   :  { %5416 = vmax.xlane.f32.xlu1 %v5415_v48 }
 0x32b   :  { %v5484_v16 = vmul.f32 1.442695, %v5438_v44 }
 0x32d   :  { %7135 = vpow2.f32 %v5484_v16 }
 0x32f   :  { %v2630_v52 = vpop.xlane.xlu2 %2629 }
 0x330   :  { %v5259_v55 = vsel %vm5228_vm9, %v1333_v13, %v2630_v52  ;;  %v3927_v6 = vpop.xlane.xlu1 %3926 }
 0x331   :  { %v5224_v4 = vpop.xlane.xlu0 %5223  ;;  %v5292_v42 = vsel %vm5261_vm10, %v5259_v55, %v3927_v6 }
 0x332   :  { %v13153_v35 = vsel %vm5294_vm11, %v5292_v42, %v5224_v4 }
 0x333   :  { %v13155_v58 = vpop.eup %7135  ;;  %v5418_v27 = vsel %vm5327_vm12, %v13153_v35, -inf }
 0x334   :  { %v5562_v63 = vsel %vm5327_vm12, %v13155_v58, 0.0  ;;  %5419 = vmax.xlane.f32.xlu2 %v5418_v27 }
 0x335   :  { %5563 = vadd.xlane.f32.xlu0 %v5562_v63 }
 0x337   :  { %v5375_v30 = vpop.xlane.xlu2 %5374 }
 0x338   :  { %v1336_v47 = vpop.xlane.xlu1 %1335  ;;  %v5439_v0 = vsub.f32 %v12913_v29, %v5375_v30 }
 0x339   :  { %v2633_v10 = vpop.xlane.xlu0 %2632 }
 0x33a   :  { %v5486_v61 = vmul.f32 1.442695, %v5439_v0  ;;  %v5260_v15 = vsel %vm5228_vm9, %v1336_v47, %v2633_v10 }
 0x33c   :  { %7137 = vpow2.f32 %v5486_v61 }
 0x340   :  { %v5522_v41 = vpop.xlane.xlu1 %5521 }
 0x341   :  { %7139 = vrcp.f32 %v5522_v41  ;;  %v3930_v38 = vpop.xlane.xlu2 %3929  ;;  %v13164_v32 = vpop.xlane.xlu0 %5377 }
 0x342   :  { %v13166_v56 = vpop.eup %7137  ;;  %v5293_v59 = vsel %vm5261_vm10, %v5260_v15, %v3930_v38 }
 0x343   :  { %v5565_v21 = vsel %vm5327_vm12, %v13166_v56, 0.0 }
 0x344   :  { %5566 = vadd.xlane.f32.xlu1 %v5565_v21 }
 0x347   :  { %v7140_v29 = vpop.eup %7139 }
 0x348   :  { %v13173_v31 = vmul.f32 %v7140_v29, %v12936_v5  ;;  %v5227_v22 = vpop.xlane.xlu1 %5226 }
 0x349   :  { %v5525_v49 = vpop.xlane.xlu2 %5524  ;;  %v13182_v13 = vsel %vm5294_vm11, %v5293_v59, %v5227_v22  ;;  %v5528_v44 = vpop.xlane.xlu0 %5527  ;;  %v5440_v22 = vsub.f32 %v12941_v34, %v13164_v32 }
 0x34a   :  { %6608 = vst.msk [vmem:[%s14191_s5] sm:$0xff] %vm5327_vm12, %v13173_v31  ;;  %7141 = vrcp.f32 %v5525_v49  ;;  %v5421_v5 = vsel %vm5327_vm12, %v13182_v13, -inf }
 0x34b   :  { %7143 = vrcp.f32 %v5528_v44  ;;  %5422 = vmax.xlane.f32.xlu0 %v5421_v5  ;;  %v5488_v44 = vmul.f32 1.442695, %v5440_v22 }
 0x34c   :  { %5905 = vperm.xlu2 %6780, %v13173_v31  }
 0x350   :  { %v7142_v48 = vpop.eup %7141  ;;  %v5381_v55 = vpop.xlane.xlu1 %5380 }
 0x351   :  { %v7144_v16 = vpop.eup %7143  ;;  %v13188_v52 = vmul.f32 %v7142_v48, %v12955_v46  ;;  %v13190_v6 = vpop.xlane.xlu2 %5383  ;;  %v5441_v42 = vsub.f32 %v12990_v8, %v5381_v55 }
 0x352   :  { %v13193_v4 = vmul.f32 %v7144_v16, %v12957_v36  ;;  %v13196_v27 = vpop.xlane.xlu0 %5386 }
 0x353   :  { %6609 = vst.msk [vmem:[%s14191_s5 + $0x8] sm:$0xff] %vm5327_vm12, %v13188_v52  ;;  %v5490_v46 = vmul.f32 1.442695, %v5441_v42 }
 0x354   :  { %6610 = vst.msk [vmem:[%s14191_s5 + $0x10] sm:$0xff] %vm5327_vm12, %v13193_v4  ;;  %6781 = vset.pattern.permute.xlu2 %v14322_v25 }
 0x355   :  { %6129 = vperm.xlu2 %6781, %v13173_v31   ;;  %7145 = vpow2.f32 %v5490_v46 }
 0x358   :  { %v5531_v36 = vpop.xlane.xlu1 %5530 }
 0x359   :  { %v5534_v8 = vpop.xlane.xlu2 %5533  ;;  %7147 = vrcp.f32 %v5531_v36 }
 0x35a   :  { %v5537_v63 = vpop.xlane.xlu0 %5536  ;;  %7149 = vrcp.f32 %v5534_v8 }
 0x35b   :  { %v13210_v30 = vpop.eup %7145  ;;  %7151 = vrcp.f32 %v5537_v63 }
 0x35c   :  { %v5571_v47 = vsel %vm5327_vm12, %v13210_v30, 0.0 }
 0x35d   :  { %5687 = vperm.xlu1 %6782, %v13188_v52   ;;  %6785 = vset.pattern.permute.xlu2 %v14324_v62 }
 0x35e   :  { %5572 = vadd.xlane.f32.xlu0 %v5571_v47 }
 0x35f   :  { %v7148_v0 = vpop.eup %7147 }
 0x360   :  { %v7150_v10 = vpop.eup %7149  ;;  %v13217_v61 = vmul.f32 %v7148_v0, %v13008_v39  ;;  %v5390_v41 = vpop.xlane.xlu1 %5389 }
 0x361   :  { %v13219_v38 = vpop.xlane.xlu2 %5392  ;;  %v7152_v21 = vpop.eup %7151  ;;  %v13222_v29 = vmul.f32 %v7150_v10, %v13010_v60 }
 0x362   :  { %v13224_v15 = vpop.xlane.xlu0 %5395  ;;  %6611 = vst.msk [vmem:[%s14191_s5 + $0x18] sm:$0xff] %vm5327_vm12, %v13217_v61  ;;  %v13232_v59 = vmul.f32 %v7152_v21, %v13012_v17 }
 0x363   :  { %6612 = vst.msk [vmem:[%s14191_s5 + $0x20] sm:$0xff] %vm5327_vm12, %v13222_v29 }
 0x364   :  { %6613 = vst.msk [vmem:[%s14191_s5 + $0x28] sm:$0xff] %vm5327_vm12, %v13232_v59 }
 0x365   :  { %6783 = vset.pattern.permute.xlu1 %v14326_v20 }
 0x366   :  { %5909 = vperm.xlu1 %6783, %v13188_v52  }
 0x368   :  { %v5540_v39 = vpop.xlane.xlu1 %5539 }
 0x369   :  { %v5543_v60 = vpop.xlane.xlu2 %5542  ;;  %7153 = vrcp.f32 %v5540_v39 }
 0x36a   :  { %v5546_v17 = vpop.xlane.xlu0 %5545  ;;  %7155 = vrcp.f32 %v5543_v60  ;;  %v5444_v60 = vsub.f32 %v13042_v28, %v5390_v41 }
 0x36b   :  { %7157 = vrcp.f32 %v5546_v17 }
 0x36c   :  { %7159 = vpow2.f32 %v5488_v44  ;;  %v5496_v22 = vmul.f32 1.442695, %v5444_v60 }
 0x36e   :  { %6784 = vset.pattern.permute.xlu1 %v14322_v25 }
 0x36f   :  { %6133 = vperm.xlu1 %6784, %v13188_v52   ;;  %v7154_v49 = vpop.eup %7153 }
 0x370   :  { %v7156_v5 = vpop.eup %7155  ;;  %v13251_v48 = vmul.f32 %v7154_v49, %v13058_v26  ;;  %v13253_v16 = vpop.xlane.xlu1 %5398 }
 0x371   :  { %v13255_v55 = vpop.xlane.xlu2 %5401  ;;  %v7158_v42 = vpop.eup %7157  ;;  %v13258_v46 = vmul.f32 %v7156_v5, %v13060_v18  ;;  %v5447_v60 = vsub.f32 %v13083_v11, %v13253_v16 }
 0x372   :  { %6137 = vperm.xlu0 %6786, %v13193_v4   ;;  %6614 = vst.msk [vmem:[%s14191_s5 + $0x30] sm:$0xff] %vm5327_vm12, %v13251_v48  ;;  %v13267_v34 = vmul.f32 %v7158_v42, %v13062_v53  ;;  %v13280_v26 = vpop.xlane.xlu0 %5404  ;;  %v13282_v32 = vpop.eup %7159 }
 0x373   :  { %6615 = vst.msk [vmem:[%s14191_s5 + $0x38] sm:$0xff] %vm5327_vm12, %v13258_v46  ;;  %v5568_v36 = vsel %vm5327_vm12, %v13282_v32, 0.0 }
 0x374   :  { %6616 = vst.msk [vmem:[%s14191_s5 + $0x40] sm:$0xff] %vm5327_vm12, %v13267_v34 }
 0x377   :  { %6789 = vset.pattern.permute.xlu1 %v14324_v62 }
 0x378   :  { %v5549_v18 = vpop.xlane.xlu1 %5548 }
 0x379   :  { %v5552_v53 = vpop.xlane.xlu2 %5551  ;;  %7161 = vrcp.f32 %v5549_v18 }
 0x37a   :  { %7163 = vrcp.f32 %v5552_v53 }
 0x37e   :  { %5569 = vadd.xlane.f32.xlu2 %v5568_v36 }
 0x37f   :  { %v7162_v8 = vpop.eup %7161 }
 0x380   :  { %v5555_v63 = vpop.xlane.xlu0 %5554  ;;  %v7164_v47 = vpop.eup %7163  ;;  %v13287_v0 = vmul.f32 %v7162_v8, %v13098_v37  ;;  %v5442_v37 = vsub.f32 %v12994_v51, %v13190_v6 }
 0x381   :  { %7165 = vrcp.f32 %v5555_v63  ;;  %v13290_v10 = vmul.f32 %v7164_v47, %v13101_v19  ;;  %v5408_v39 = vpop.xlane.xlu1 %5407  ;;  %v13313_v44 = vpop.xlane.xlu2 %5410 }
 0x382   :  { %6617 = vst.msk [vmem:[%s14191_s5 + $0x48] sm:$0xff] %vm5327_vm12, %v13287_v0  ;;  %v5492_v17 = vmul.f32 1.442695, %v5442_v37  ;;  %v5443_v37 = vsub.f32 %v12998_v9, %v13196_v27 }
 0x383   :  { %6618 = vst.msk [vmem:[%s14191_s5 + $0x50] sm:$0xff] %vm5327_vm12, %v13290_v10 }
 0x384   :  { %7167 = vpow2.f32 %v5492_v17 }
 0x387   :  { %v7166_v21 = vpop.eup %7165 }
 0x388   :  { %v13305_v19 = vmul.f32 %v7166_v21, %v13117_v23 }
 0x38a   :  { %6619 = vst.msk [vmem:[%s14191_s5 + $0x58] sm:$0xff] %vm5327_vm12, %v13305_v19  ;;  %v13315_v51 = vpop.eup %7167 }
 0x38b   :  { %v5574_v5 = vsel %vm5327_vm12, %v13315_v51, 0.0 }
 0x38e   :  { %v13333_v18 = vpop.xlane.xlu0 %5413 }
 0x38f   :  { %v5558_v49 = vpop.xlane.xlu1 %5557 }
 0x390   :  { %7169 = vrcp.f32 %v5558_v49 }
 0x391   :  { %7171 = vpow2.f32 %v5496_v22  ;;  %v5502_v22 = vmul.f32 1.442695, %v5447_v60 }
 0x396   :  { %v7170_v23 = vpop.eup %7169  ;;  %5692 = vperm.xlu2 %6785, %v13193_v4  }
 0x397   :  { %v13319_v28 = vmul.f32 %v7170_v23, %v13132_v12  ;;  %v13321_v6 = vpop.eup %7171  ;;  %v5450_v23 = vsub.f32 %v13112_v14, %v5408_v39  ;;  %v14473_v39 = vld [vmem:[#allocation9_spill] sm:$0xff] }
 0x398   :  { %v5580_v42 = vsel %vm5327_vm12, %v13321_v6, 0.0 }
 0x399   :  { %v5561_v41 = vpop.xlane.xlu2 %5560  ;;  %6620 = vst.msk [vmem:[%s14191_s5 + $0x60] sm:$0xff] %vm5327_vm12, %v13319_v28  ;;  %5575 = vadd.xlane.f32.xlu1 %v5574_v5  ;;  %v5508_v5 = vmul.f32 1.442695, %v5450_v23 }
 0x39a   :  { %7173 = vrcp.f32 %v5561_v41 }
 0x39c   :  { %5581 = vadd.xlane.f32.xlu0 %v5580_v42 }
 0x39d   :  { %v5417_v63 = vpop.xlane.xlu1 %5416 }
 0x39e   :  { %5697 = vperm.xlu2 %6785, %v13217_v61   ;;  %v5453_v16 = vsub.f32 %v13145_v50, %v5417_v63  ;;  %v5445_v63 = vsub.f32 %v13046_v54, %v13219_v38 }
 0x3a0   :  { %v7174_v12 = vpop.eup %7173  ;;  %v5514_v60 = vmul.f32 1.442695, %v5453_v16 }
 0x3a1   :  { %v13336_v53 = vmul.f32 %v7174_v12, %v13138_v7 }
 0x3a3   :  { %6621 = vst.msk [vmem:[%s14191_s5 + $0x68] sm:$0xff] %vm5327_vm12, %v13336_v53 }
 0x3a6   :  { %6787 = vset.pattern.permute.xlu2 %v14326_v20 }
 0x3a7   :  { %5917 = vperm.xlu2 %6787, %v13217_v61   ;;  %v13380_v9 = vpop.xlane.xlu2 %5419 }
 0x3a8   :  { %v5564_v36 = vpop.xlane.xlu0 %5563 }
 0x3a9   :  { %7175 = vrcp.f32 %v5564_v36 }
 0x3af   :  { %v7176_v8 = vpop.eup %7175  ;;  %6788 = vset.pattern.permute.xlu2 %v14322_v25 }
 0x3b0   :  { %v13347_v47 = vmul.f32 %v7176_v8, %v13155_v58  ;;  %6157 = vperm.xlu0 %6786, %v13258_v46   ;;  %6141 = vperm.xlu2 %6788, %v13217_v61   ;;  %v14472_v8 = vld [vmem:[#allocation8_spill] sm:$0xff] }
 0x3b2   :  { %6622 = vst.msk [vmem:[%s14191_s5 + $0x70] sm:$0xff] %vm5327_vm12, %v13347_v47  ;;  %5702 = vperm.xlu1 %6789, %v13222_v29  }
 0x3b7   :  { %v5567_v7 = vpop.xlane.xlu1 %5566 }
 0x3b8   :  { %7177 = vrcp.f32 %v5567_v7  ;;  %6792 = vset.pattern.permute.xlu2 %v14324_v62 }
 0x3ba   :  { %6790 = vset.pattern.permute.xlu1 %v14326_v20 }
 0x3bb   :  { %5921 = vperm.xlu1 %6790, %v13222_v29  }
 0x3be   :  { %v7178_v58 = vpop.eup %7177  ;;  %v13374_v17 = vpop.xlane.xlu0 %5422 }
 0x3bf   :  { %v13361_v21 = vmul.f32 %v7178_v58, %v13166_v56  ;;  %v5494_v56 = vmul.f32 1.442695, %v5443_v37 }
 0x3c1   :  { %6623 = vst.msk [vmem:[%s14191_s5 + $0x78] sm:$0xff] %vm5327_vm12, %v13361_v21  ;;  %7179 = vpow2.f32 %v5494_v56  ;;  %v13403_v56 = vpop.permute.xlu2 %5905 }
 0x3c2   :  { %7181 = vpow2.f32 %v5502_v22  ;;  %v5498_v22 = vmul.f32 1.442695, %v5445_v63  ;;  %v14476_v63 = vld [vmem:[#allocation14_spill] sm:$0xff] }
 0x3c3   :  { %6791 = vset.pattern.permute.xlu1 %v14322_v25 }
 0x3c4   :  { %6145 = vperm.xlu1 %6791, %v13222_v29  }
 0x3c7   :  { %v13378_v42 = vpop.eup %7179 }
 0x3c8   :  { %v13382_v27 = vpop.eup %7181  ;;  %v5577_v36 = vsel %vm5327_vm12, %v13378_v42, 0.0 }
 0x3c9   :  { %v5589_v37 = vsel %vm5327_vm12, %v13382_v27, 0.0  ;;  %v13412_v54 = vpop.permute.xlu2 %6129 }
 0x3cc   :  { %6795 = vset.pattern.permute.xlu1 %v14324_v62 }
 0x3cf   :  { %v5688_v49 = vpop.permute.xlu1 %5687 }
 0x3d0   :  { %v5873_v7 = vmul.f32 %v5688_v49, %v14472_v8 }
 0x3d1   :  { %v5573_v41 = vpop.xlane.xlu0 %5572 }
 0x3d2   :  { %7183 = vrcp.f32 %v5573_v41  ;;  %v14474_v41 = vld [vmem:[#allocation6_spill] sm:$0xff] }
 0x3d3   :  { %7185 = vpow2.f32 %v5508_v5 }
 0x3d4   :  { %7187 = vpow2.f32 %v5514_v60 }
 0x3d5   :  { %7189 = vpow2.f32 %v5498_v22  ;;  %v14477_v22 = vld [vmem:[#allocation15_spill] sm:$0xff] }
 0x3d8   :  { %v7184_v11 = vpop.eup %7183  ;;  %v5910_v12 = vpop.permute.xlu1 %5909 }
 0x3d9   :  { %v13389_v14 = vmul.f32 %v7184_v11, %v13210_v30  ;;  %v6065_v58 = vmul.f32 %v5910_v12, %v14473_v39  ;;  %5578 = vadd.xlane.f32.xlu2 %v5577_v36  ;;  %v13401_v30 = vpop.eup %7185 }
 0x3da   :  { %5590 = vadd.xlane.f32.xlu0 %v5589_v37  ;;  %v5598_v49 = vsel %vm5327_vm12, %v13401_v30, 0.0  ;;  %v13410_v12 = vpop.eup %7187 }
 0x3db   :  { %6625 = vst.msk [vmem:[%s14191_s5 + $0x88] sm:$0xff] %vm5327_vm12, %v13389_v14  ;;  %v6097_v50 = vadd.f32 %v6065_v58, %v5873_v7  ;;  %v5607_v38 = vsel %vm5327_vm12, %v13410_v12, 0.0  ;;  %v13416_v16 = vpop.eup %7189 }
 0x3dc   :  { %v5583_v36 = vsel %vm5327_vm12, %v13416_v16, 0.0 }
 0x3e1   :  { %v6134_v23 = vpop.permute.xlu1 %6133 }
 0x3e2   :  { %5599 = vadd.xlane.f32.xlu0 %v5598_v49  ;;  %v6289_v5 = vmul.f32 %v6134_v23, %v14474_v41 }
 0x3e4   :  { %v13408_v11 = vadd.f32 %v6289_v5, %v6097_v50 }
 0x3e6   :  { %14475 = vst [vmem:[#allocation130_spill] sm:$0xff] %v13408_v11  ;;  %v14518_v11 = vld [vmem:[#allocation72_spill] sm:$0xff] }
 0x3ea   :  { %5608 = vadd.xlane.f32.xlu0 %v5607_v38 }
 0x3ee   :  { %5584 = vadd.xlane.f32.xlu1 %v5583_v36  ;;  %v14478_v36 = vld [vmem:[#allocation16_spill] sm:$0xff] }
 0x3f1   :  { %v5570_v8 = vpop.xlane.xlu2 %5569  ;;  %5707 = vperm.xlu2 %6792, %v13232_v59  }
 0x3f2   :  { %7191 = vrcp.f32 %v5570_v8 }
 0x3f8   :  { %v7192_v7 = vpop.eup %7191 }
 0x3f9   :  { %v13422_v39 = vmul.f32 %v7192_v7, %v13282_v32  ;;  %v13424_v58 = vpop.permute.xlu2 %5692  ;;  %6793 = vset.pattern.permute.xlu2 %v14326_v20  ;;  %v13437_v32 = vpop.permute.xlu0 %6137 }
 0x3fa   :  { %5925 = vperm.xlu2 %6793, %v13232_v59  }
 0x3fb   :  { %6624 = vst.msk [vmem:[%s14191_s5 + $0x80] sm:$0xff] %vm5327_vm12, %v13422_v39 }
 0x3fe   :  { %6169 = vperm.xlu0 %6786, %v13290_v10  }
 0x401   :  { %v5698_v37 = vpop.permute.xlu2 %5697 }
 0x402   :  { %6794 = vset.pattern.permute.xlu2 %v14322_v25  ;;  %v5875_v60 = vmul.f32 %v5698_v37, %v14476_v63 }
 0x403   :  { %6149 = vperm.xlu2 %6794, %v13232_v59  }
 0x406   :  { %6181 = vperm.xlu0 %6786, %v13336_v53  }
 0x407   :  { %5712 = vperm.xlu1 %6795, %v13251_v48  }
 0x409   :  { %v5918_v50 = vpop.permute.xlu2 %5917 }
 0x40a   :  { %v6067_v49 = vmul.f32 %v5918_v50, %v14477_v22 }
 0x40b   :  { %6798 = vset.pattern.permute.xlu2 %v14324_v62 }
 0x40c   :  { %v6099_v23 = vadd.f32 %v6067_v49, %v5875_v60  ;;  %v5576_v41 = vpop.xlane.xlu1 %5575 }
 0x40d   :  { %7193 = vrcp.f32 %v5576_v41 }
 0x40e   :  { %6193 = vperm.xlu0 %6786, %v13422_v39  }
 0x40f   :  { %v5582_v5 = vpop.xlane.xlu0 %5581  ;;  %6796 = vset.pattern.permute.xlu1 %v14326_v20 }
 0x410   :  { %7195 = vrcp.f32 %v5582_v5  ;;  %5929 = vperm.xlu1 %6796, %v13251_v48   ;;  %v14480_v5 = vld [vmem:[#allocation18_spill] sm:$0xff] }
 0x411   :  { %v6142_v38 = vpop.permute.xlu2 %6141 }
 0x412   :  { %v6291_v8 = vmul.f32 %v6142_v38, %v14478_v36  ;;  %v14481_v36 = vld [vmem:[#allocation20_spill] sm:$0xff] }
 0x413   :  { %v7194_v7 = vpop.eup %7193 }
 0x414   :  { %v13448_v37 = vmul.f32 %v7194_v7, %v13315_v51  ;;  %v13450_v50 = vadd.f32 %v6291_v8, %v6099_v23  ;;  %v5446_v51 = vsub.f32 %v13050_v43, %v13224_v15  ;;  %v5448_v43 = vsub.f32 %v13087_v2, %v13255_v55 }
 0x416   :  { %14479 = vst [vmem:[#allocation109_spill] sm:$0xff] %v13450_v50  ;;  %v7196_v63 = vpop.eup %7195  ;;  %v5500_v22 = vmul.f32 1.442695, %v5446_v51  ;;  %v5504_v15 = vmul.f32 1.442695, %v5448_v43  ;;  %v14482_v51 = vld [vmem:[#allocation19_spill] sm:$0xff] }
 0x417   :  { %6626 = vst.msk [vmem:[%s14191_s5 + $0x90] sm:$0xff] %vm5327_vm12, %v13448_v37  ;;  %v13458_v60 = vmul.f32 %v7196_v63, %v13321_v6  ;;  %v14484_v43 = vmov 0  }
 0x418   :  { %6797 = vset.pattern.permute.xlu1 %v14322_v25  ;;  %7197 = vpow2.f32 %v5500_v22 }
 0x419   :  { %6628 = vst.msk [vmem:[%s14191_s5 + $0xa0] sm:$0xff] %vm5327_vm12, %v13458_v60  ;;  %6153 = vperm.xlu1 %6797, %v13251_v48   ;;  %7199 = vpow2.f32 %v5504_v15 }
 0x41e   :  { %v13470_v6 = vpop.eup %7197 }
 0x41f   :  { %v5586_v23 = vsel %vm5327_vm12, %v13470_v6, 0.0 }
 0x421   :  { %6800 = vset.pattern.permute.xlu1 %v14324_v62  ;;  %v13481_v62 = vpop.eup %7199 }
 0x424   :  { %v5703_v49 = vpop.permute.xlu1 %5702 }
 0x425   :  { %v5876_v38 = vmul.f32 %v5703_v49, %v14480_v5  ;;  %v13486_v49 = vpop.permute.xlu0 %6157 }
 0x42c   :  { %5587 = vadd.xlane.f32.xlu2 %v5586_v23  ;;  %v5592_v23 = vsel %vm5327_vm12, %v13481_v62, 0.0 }
 0x42d   :  { %v5922_v41 = vpop.permute.xlu1 %5921 }
 0x42e   :  { %v6068_v8 = vmul.f32 %v5922_v41, %v14481_v36 }
 0x430   :  { %v6100_v7 = vadd.f32 %v6068_v8, %v5876_v38 }
 0x436   :  { %v6146_v63 = vpop.permute.xlu1 %6145 }
 0x437   :  { %v6292_v22 = vmul.f32 %v6146_v63, %v14482_v51  ;;  %v14485_v63 = vld [vmem:[#allocation23_spill] sm:$0xff] }
 0x439   :  { %v13479_v25 = vadd.f32 %v6292_v22, %v6100_v7 }
 0x43b   :  { %14483 = vst [vmem:[#allocation113_spill] sm:$0xff] %v13479_v25 }
 0x443   :  { %5593 = vadd.xlane.f32.xlu1 %v5592_v23  ;;  %v14486_v23 = vld [vmem:[#allocation25_spill] sm:$0xff] }
 0x444   :  { %5722 = vperm.xlu2 %6798, %v13267_v34  }
 0x44c   :  { %v5579_v41 = vpop.xlane.xlu2 %5578  ;;  %6799 = vset.pattern.permute.xlu2 %v14326_v20 }
 0x44d   :  { %v5591_v2 = vpop.xlane.xlu0 %5590  ;;  %7201 = vrcp.f32 %v5579_v41  ;;  %5937 = vperm.xlu2 %6799, %v13267_v34  }
 0x44e   :  { %7203 = vrcp.f32 %v5591_v2 }
 0x453   :  { %v7202_v55 = vpop.eup %7201 }
 0x454   :  { %v7204_v5 = vpop.eup %7203  ;;  %v13491_v38 = vmul.f32 %v7202_v55, %v13378_v42  ;;  %v5708_v36 = vpop.permute.xlu2 %5707 }
 0x455   :  { %v13494_v8 = vmul.f32 %v7204_v5, %v13382_v27  ;;  %v5600_v7 = vpop.xlane.xlu0 %5599  ;;  %6802 = vset.pattern.permute.xlu2 %v14484_v43  ;;  %v5877_v51 = vmul.f32 %v5708_v36, %v14485_v63  ;;  %v5449_v5 = vsub.f32 %v13090_v3, %v13280_v26 }
 0x456   :  { %6627 = vst.msk [vmem:[%s14191_s5 + $0x98] sm:$0xff] %vm5327_vm12, %v13491_v38  ;;  %7205 = vrcp.f32 %v5600_v7  ;;  %6205 = vperm.xlu0 %6786, %v13491_v38  }
 0x457   :  { %6631 = vst.msk [vmem:[%s14191_s5 + $0xb8] sm:$0xff] %vm5327_vm12, %v13494_v8  ;;  %v5506_v26 = vmul.f32 1.442695, %v5449_v5  ;;  %v14490_v5 = vld [vmem:[#allocation29_spill] sm:$0xff] }
 0x45c   :  { %v7206_v42 = vpop.eup %7205  ;;  %5727 = vperm.xlu1 %6800, %v13287_v0   ;;  %v5926_v27 = vpop.permute.xlu2 %5925 }
 0x45d   :  { %v13510_v15 = vmul.f32 %v7206_v42, %v13401_v30  ;;  %v5609_v22 = vpop.xlane.xlu0 %5608  ;;  %v6069_v41 = vmul.f32 %v5926_v27, %v14486_v23  ;;  %v14487_v42 = vld [vmem:[#allocation22_spill] sm:$0xff]  ;;  %v5451_v23 = vsub.f32 %v13115_v33, %v13313_v44  ;;  %v14493_v44 = vmov 1  }
 0x45e   :  { %7207 = vrcp.f32 %v5609_v22  ;;  %6832 = vset.pattern.permute.xlu0 %v14326_v20 }
 0x45f   :  { %6634 = vst.msk [vmem:[%s14191_s5 + $0xd0] sm:$0xff] %vm5327_vm12, %v13510_v15  ;;  %v6101_v2 = vadd.f32 %v6069_v41, %v5877_v51  ;;  %5913 = vperm.xlu0 %6832, %v13193_v4   ;;  %v5510_v41 = vmul.f32 1.442695, %v5451_v23 }
 0x461   :  { %v5585_v55 = vpop.xlane.xlu1 %5584 }
 0x462   :  { %7209 = vrcp.f32 %v5585_v55  ;;  %v14489_v55 = vld [vmem:[#allocation26_spill] sm:$0xff] }
 0x463   :  { %7211 = vpow2.f32 %v5506_v26  ;;  %v14491_v26 = vld [vmem:[#allocation27_spill] sm:$0xff] }
 0x464   :  { %v7208_v30 = vpop.eup %7207  ;;  %6801 = vset.pattern.permute.xlu1 %v14326_v20  ;;  %v6150_v36 = vpop.permute.xlu2 %6149  ;;  %7213 = vpow2.f32 %v5510_v41 }
 0x465   :  { %v13525_v7 = vmul.f32 %v7208_v30, %v13410_v12  ;;  %v6293_v27 = vmul.f32 %v6150_v36, %v14487_v42  ;;  %5941 = vperm.xlu1 %6801, %v13287_v0  }
 0x467   :  { %6637 = vst.msk [vmem:[%s14191_s5 + $0xe8] sm:$0xff] %vm5327_vm12, %v13525_v7  ;;  %v13534_v63 = vadd.f32 %v6293_v27, %v6101_v2  ;;  %5933 = vperm.xlu0 %6832, %v13258_v46  }
 0x468   :  { %v7210_v3 = vpop.eup %7209 }
 0x469   :  { %14488 = vst [vmem:[#allocation119_spill] sm:$0xff] %v13534_v63  ;;  %v13538_v51 = vmul.f32 %v7210_v3, %v13416_v16  ;;  %v13547_v12 = vpop.eup %7211 }
 0x46a   :  { %v5595_v22 = vsel %vm5327_vm12, %v13547_v12, 0.0  ;;  %v13558_v27 = vpop.eup %7213 }
 0x46b   :  { %6629 = vst.msk [vmem:[%s14191_s5 + $0xa8] sm:$0xff] %vm5327_vm12, %v13538_v51  ;;  %v5601_v33 = vsel %vm5327_vm12, %v13558_v27, 0.0 }
 0x46d   :  { %6804 = vset.pattern.permute.xlu1 %v14484_v43 }
 0x46f   :  { %5945 = vperm.xlu0 %6832, %v13290_v10  }
 0x476   :  { %5596 = vadd.xlane.f32.xlu2 %v5595_v22 }
 0x477   :  { %5957 = vperm.xlu0 %6832, %v13336_v53  }
 0x479   :  { %v5713_v16 = vpop.permute.xlu1 %5712 }
 0x47a   :  { %v5878_v30 = vmul.f32 %v5713_v16, %v14489_v55  ;;  %v13579_v55 = vpop.permute.xlu0 %6169 }
 0x47f   :  { %5969 = vperm.xlu0 %6832, %v13422_v39  }
 0x482   :  { %v5930_v2 = vpop.permute.xlu1 %5929 }
 0x483   :  { %v6070_v36 = vmul.f32 %v5930_v2, %v14490_v5 }
 0x485   :  { %v6102_v42 = vadd.f32 %v6070_v36, %v5878_v30  ;;  %v5452_v30 = vsub.f32 %v13130_v57, %v13333_v18  ;;  %v14494_v36 = vld [vmem:[#allocation35_spill] sm:$0xff] }
 0x487   :  { %5981 = vperm.xlu0 %6832, %v13491_v38  }
 0x48b   :  { %v6154_v3 = vpop.permute.xlu1 %6153 }
 0x48c   :  { %v6294_v22 = vmul.f32 %v6154_v3, %v14491_v26  ;;  %v5512_v26 = vmul.f32 1.442695, %v5452_v30 }
 0x48e   :  { %v13561_v20 = vadd.f32 %v6294_v22, %v6102_v42  ;;  %5737 = vperm.xlu2 %6802, %v13305_v19   ;;  %v14495_v42 = vld [vmem:[#allocation37_spill] sm:$0xff] }
 0x48f   :  { %5602 = vadd.xlane.f32.xlu1 %v5601_v33  ;;  %v13589_v33 = vpop.permute.xlu0 %6181 }
 0x490   :  { %14492 = vst [vmem:[#allocation123_spill] sm:$0xff] %v13561_v20  ;;  %v14501_v20 = vld [vmem:[#allocation41_spill] sm:$0xff] }
 0x496   :  { %6803 = vset.pattern.permute.xlu2 %v14493_v44 }
 0x497   :  { %5949 = vperm.xlu2 %6803, %v13305_v19  }
 0x49f   :  { %v5588_v16 = vpop.xlane.xlu2 %5587  ;;  %6806 = vset.pattern.permute.xlu2 %v14484_v43 }
 0x4a0   :  { %7215 = vrcp.f32 %v5588_v16 }
 0x4a1   :  { %7217 = vpow2.f32 %v5512_v26 }
 0x4a6   :  { %v7216_v23 = vpop.eup %7215 }
 0x4a7   :  { %v13570_v41 = vmul.f32 %v7216_v23, %v13470_v6  ;;  %v5723_v2 = vpop.permute.xlu2 %5722  ;;  %v13592_v57 = vpop.eup %7217 }
 0x4a8   :  { %5742 = vperm.xlu1 %6804, %v13319_v28   ;;  %v5880_v6 = vmul.f32 %v5723_v2, %v14494_v36  ;;  %v5604_v2 = vsel %vm5327_vm12, %v13592_v57, 0.0  ;;  %v5454_v36 = vsub.f32 %v13153_v35, %v13380_v9 }
 0x4a9   :  { %6630 = vst.msk [vmem:[%s14191_s5 + $0xb0] sm:$0xff] %vm5327_vm12, %v13570_v41  ;;  %5993 = vperm.xlu0 %6832, %v13570_v41  }
 0x4af   :  { %v5938_v5 = vpop.permute.xlu2 %5937 }
 0x4b0   :  { %v6072_v3 = vmul.f32 %v5938_v5, %v14495_v42  ;;  %6805 = vset.pattern.permute.xlu1 %v14493_v44  ;;  %v13599_v5 = vpop.permute.xlu0 %6193 }
 0x4b1   :  { %5953 = vperm.xlu1 %6805, %v13319_v28   ;;  %14496 = vst [vmem:[#allocation128_spill] sm:$0xff] %v13599_v5 }
 0x4b2   :  { %v13587_v22 = vadd.f32 %v6072_v3, %v5880_v6  ;;  %v5516_v6 = vmul.f32 1.442695, %v5454_v36  ;;  %v14498_v3 = vld [vmem:[#allocation11_spill] sm:$0xff]  ;;  %v14502_v36 = vld [vmem:[#allocation13_spill] sm:$0xff] }
 0x4b3   :  { %v5874_v26 = vmul.f32 %v13424_v58, %v14498_v3  ;;  %v14505_v3 = vld [vmem:[#allocation49_spill] sm:$0xff] }
 0x4b6   :  { %v5594_v16 = vpop.xlane.xlu1 %5593 }
 0x4b7   :  { %7219 = vrcp.f32 %v5594_v16  ;;  %v14499_v16 = vld [vmem:[#allocation12_spill] sm:$0xff] }
 0x4b8   :  { %7221 = vpow2.f32 %v5516_v6 }
 0x4b9   :  { %6808 = vset.pattern.permute.xlu1 %v14484_v43 }
 0x4bd   :  { %v7220_v18 = vpop.eup %7219 }
 0x4be   :  { %v13595_v23 = vmul.f32 %v7220_v18, %v13481_v62  ;;  %v13613_v5 = vpop.eup %7221 }
 0x4bf   :  { %v5610_v9 = vsel %vm5327_vm12, %v13613_v5, 0.0 }
 0x4c0   :  { %6632 = vst.msk [vmem:[%s14191_s5 + $0xc0] sm:$0xff] %vm5327_vm12, %v13595_v23  ;;  %5605 = vadd.xlane.f32.xlu2 %v5604_v2 }
 0x4c8   :  { %v13606_v30 = vpop.permute.xlu0 %6205 }
 0x4c9   :  { %14497 = vst [vmem:[#allocation8_spill] sm:$0xff] %v13606_v30 }
 0x4ce   :  { %v5728_v62 = vpop.permute.xlu1 %5727 }
 0x4cf   :  { %v5881_v2 = vmul.f32 %v5728_v62, %v14500_v1  ;;  %v6290_v1 = vmul.f32 %v13437_v32, %v14502_v36  ;;  %v5455_v32 = vsub.f32 %v13182_v13, %v13374_v17 }
 0x4d1   :  { %v5914_v42 = vpop.permute.xlu0 %5913 }
 0x4d2   :  { %v6066_v18 = vmul.f32 %v5914_v42, %v14499_v16 }
 0x4d4   :  { %v6098_v40 = vadd.f32 %v6066_v18, %v5874_v26  ;;  %v5518_v26 = vmul.f32 1.442695, %v5455_v32 }
 0x4d7   :  { %v5942_v63 = vpop.permute.xlu1 %5941 }
 0x4d8   :  { %v6073_v50 = vmul.f32 %v5942_v63, %v14501_v20  ;;  %5752 = vperm.xlu2 %6806, %v13347_v47   ;;  %v13627_v63 = vadd.f32 %v6290_v1, %v6098_v40  ;;  %v14504_v40 = vld [vmem:[#allocation47_spill] sm:$0xff]  ;;  %v14507_v1 = vld [vmem:[#allocation50_spill] sm:$0xff] }
 0x4da   :  { %v13618_v35 = vadd.f32 %v6073_v50, %v5881_v2  ;;  %14503 = vst [vmem:[#allocation9_spill] sm:$0xff] %v13627_v63  ;;  %v14506_v2 = vmov 2  }
 0x4db   :  { %5611 = vadd.xlane.f32.xlu1 %v5610_v9 }
 0x4e0   :  { %6807 = vset.pattern.permute.xlu2 %v14493_v44 }
 0x4e1   :  { %5961 = vperm.xlu2 %6807, %v13347_v47  }
 0x4e9   :  { %v5597_v58 = vpop.xlane.xlu2 %5596  ;;  %6810 = vset.pattern.permute.xlu2 %v14484_v43 }
 0x4ea   :  { %7223 = vrcp.f32 %v5597_v58 }
 0x4eb   :  { %7225 = vpow2.f32 %v5518_v26 }
 0x4f0   :  { %v7224_v20 = vpop.eup %7223 }
 0x4f1   :  { %v13630_v50 = vmul.f32 %v7224_v20, %v13547_v12  ;;  %v5738_v6 = vpop.permute.xlu2 %5737  ;;  %v13648_v9 = vpop.eup %7225 }
 0x4f2   :  { %v5883_v42 = vmul.f32 %v5738_v6, %v14504_v40  ;;  %v5613_v17 = vsel %vm5327_vm12, %v13648_v9, 0.0  ;;  %v14508_v6 = vld [vmem:[#allocation53_spill] sm:$0xff] }
 0x4f3   :  { %6633 = vst.msk [vmem:[%s14191_s5 + $0xc8] sm:$0xff] %vm5327_vm12, %v13630_v50  ;;  %6005 = vperm.xlu0 %6832, %v13630_v50  }
 0x4f4   :  { %5757 = vperm.xlu1 %6808, %v13361_v21  }
 0x4f9   :  { %v5950_v62 = vpop.permute.xlu2 %5949 }
 0x4fa   :  { %v6075_v12 = vmul.f32 %v5950_v62, %v14505_v3 }
 0x4fc   :  { %v13643_v16 = vadd.f32 %v6075_v12, %v5883_v42  ;;  %6809 = vset.pattern.permute.xlu1 %v14493_v44 }
 0x4fd   :  { %5965 = vperm.xlu1 %6809, %v13361_v21  }
 0x502   :  { %v5603_v18 = vpop.xlane.xlu1 %5602 }
 0x503   :  { %7227 = vrcp.f32 %v5603_v18 }
 0x505   :  { %6813 = vset.pattern.permute.xlu1 %v14506_v2 }
 0x506   :  { %6165 = vperm.xlu1 %6813, %v13287_v0  }
 0x509   :  { %v7228_v13 = vpop.eup %7227 }
 0x50a   :  { %v13654_v58 = vmul.f32 %v7228_v13, %v13558_v27  ;;  %5614 = vadd.xlane.f32.xlu2 %v5613_v17  ;;  %v14510_v13 = vld [vmem:[#allocation61_spill] sm:$0xff] }
 0x50c   :  { %6635 = vst.msk [vmem:[%s14191_s5 + $0xd8] sm:$0xff] %vm5327_vm12, %v13654_v58 }
 0x50e   :  { %6814 = vset.pattern.permute.xlu1 %v14484_v43 }
 0x50f   :  { %5772 = vperm.xlu1 %6814, %v13448_v37  }
 0x517   :  { %6815 = vset.pattern.permute.xlu1 %v14493_v44 }
 0x518   :  { %5977 = vperm.xlu1 %6815, %v13448_v37  }
 0x51a   :  { %v5743_v36 = vpop.permute.xlu1 %5742 }
 0x51b   :  { %v5884_v20 = vmul.f32 %v5743_v36, %v14507_v1 }
 0x520   :  { %6819 = vset.pattern.permute.xlu1 %v14506_v2 }
 0x521   :  { %6177 = vperm.xlu1 %6819, %v13319_v28  }
 0x522   :  { %5767 = vperm.xlu2 %6810, %v13389_v14  }
 0x523   :  { %v5954_v27 = vpop.permute.xlu1 %5953 }
 0x524   :  { %v6076_v32 = vmul.f32 %v5954_v27, %v14508_v6  ;;  %v13732_v6 = vpop.permute.xlu0 %5933 }
 0x526   :  { %v13670_v62 = vadd.f32 %v6076_v32, %v5884_v20 }
 0x529   :  { %6820 = vset.pattern.permute.xlu1 %v14484_v43 }
 0x52a   :  { %5787 = vperm.xlu1 %6820, %v13538_v51   ;;  %6811 = vset.pattern.permute.xlu2 %v14493_v44 }
 0x52b   :  { %5973 = vperm.xlu2 %6811, %v13389_v14  }
 0x532   :  { %6821 = vset.pattern.permute.xlu1 %v14493_v44 }
 0x533   :  { %5989 = vperm.xlu1 %6821, %v13538_v51   ;;  %v5606_v40 = vpop.xlane.xlu2 %5605  ;;  %6812 = vset.pattern.permute.xlu2 %v14506_v2 }
 0x534   :  { %7229 = vrcp.f32 %v5606_v40  ;;  %6161 = vperm.xlu2 %6812, %v13267_v34   ;;  %v14511_v40 = vld [vmem:[#allocation63_spill] sm:$0xff] }
 0x53a   :  { %v7230_v42 = vpop.eup %7229 }
 0x53b   :  { %v13681_v3 = vmul.f32 %v7230_v42, %v13592_v57  ;;  %6825 = vset.pattern.permute.xlu1 %v14506_v2  ;;  %v5753_v12 = vpop.permute.xlu2 %5752  ;;  %v14509_v57 = vld [vmem:[#allocation59_spill] sm:$0xff] }
 0x53c   :  { %6189 = vperm.xlu1 %6825, %v13361_v21   ;;  %6816 = vset.pattern.permute.xlu2 %v14484_v43  ;;  %v5886_v18 = vmul.f32 %v5753_v12, %v14509_v57  ;;  %v14512_v12 = vld [vmem:[#allocation65_spill] sm:$0xff] }
 0x53d   :  { %6636 = vst.msk [vmem:[%s14191_s5 + $0xe0] sm:$0xff] %vm5327_vm12, %v13681_v3  ;;  %6017 = vperm.xlu0 %6832, %v13681_v3   ;;  %5782 = vperm.xlu2 %6816, %v13458_v60  }
 0x543   :  { %v5962_v26 = vpop.permute.xlu2 %5961 }
 0x544   :  { %v6078_v17 = vmul.f32 %v5962_v26, %v14510_v13  ;;  %6826 = vset.pattern.permute.xlu1 %v14484_v43  ;;  %v13744_v13 = vpop.permute.xlu0 %5945 }
 0x545   :  { %5802 = vperm.xlu1 %6826, %v13595_v23   ;;  %6839 = vset.pattern.permute.xlu0 %v14506_v2 }
 0x546   :  { %v13698_v36 = vadd.f32 %v6078_v17, %v5886_v18  ;;  %6817 = vset.pattern.permute.xlu2 %v14493_v44  ;;  %6217 = vperm.xlu0 %6839, %v13570_v41   ;;  %v14513_v17 = vld [vmem:[#allocation39_spill] sm:$0xff] }
 0x547   :  { %5985 = vperm.xlu2 %6817, %v13458_v60  }
 0x54d   :  { %6827 = vset.pattern.permute.xlu1 %v14493_v44 }
 0x54e   :  { %6001 = vperm.xlu1 %6827, %v13595_v23   ;;  %v5612_v27 = vpop.xlane.xlu1 %5611  ;;  %6840 = vset.pattern.permute.xlu0 %v14484_v43 }
 0x54f   :  { %7231 = vrcp.f32 %v5612_v27  ;;  %6818 = vset.pattern.permute.xlu2 %v14506_v2  ;;  %5682 = vperm.xlu0 %6840, %v13173_v31  }
 0x550   :  { %6173 = vperm.xlu2 %6818, %v13305_v19  }
 0x555   :  { %v7232_v1 = vpop.eup %7231 }
 0x556   :  { %v13710_v20 = vmul.f32 %v7232_v1, %v13613_v5  ;;  %6831 = vset.pattern.permute.xlu1 %v14506_v2 }
 0x557   :  { %6201 = vperm.xlu1 %6831, %v13448_v37   ;;  %5717 = vperm.xlu0 %6840, %v13258_v46  }
 0x558   :  { %6638 = vst.msk [vmem:[%s14191_s5 + $0xf0] sm:$0xff] %vm5327_vm12, %v13710_v20  ;;  %6822 = vset.pattern.permute.xlu2 %v14484_v43 }
 0x559   :  { %5797 = vperm.xlu2 %6822, %v13494_v8  }
 0x55f   :  { %6833 = vset.pattern.permute.xlu1 %v14484_v43  ;;  %5732 = vperm.xlu0 %6840, %v13290_v10  }
 0x560   :  { %5817 = vperm.xlu1 %6833, %v13654_v58  }
 0x561   :  { %6823 = vset.pattern.permute.xlu2 %v14493_v44 }
 0x562   :  { %5997 = vperm.xlu2 %6823, %v13494_v8  }
 0x566   :  { %v5758_v5 = vpop.permute.xlu1 %5757 }
 0x567   :  { %5747 = vperm.xlu0 %6840, %v13336_v53   ;;  %v5887_v42 = vmul.f32 %v5758_v5, %v14511_v40  ;;  %v13755_v40 = vpop.permute.xlu0 %5957 }
 0x568   :  { %6834 = vset.pattern.permute.xlu1 %v14493_v44 }
 0x569   :  { %6013 = vperm.xlu1 %6834, %v13654_v58  }
 0x56a   :  { %6824 = vset.pattern.permute.xlu2 %v14506_v2 }
 0x56b   :  { %6185 = vperm.xlu2 %6824, %v13347_v47  }
 0x56f   :  { %v5966_v32 = vpop.permute.xlu1 %5965  ;;  %5762 = vperm.xlu0 %6840, %v13422_v39  }
 0x570   :  { %v6079_v26 = vmul.f32 %v5966_v32, %v14512_v12 }
 0x571   :  { %6838 = vset.pattern.permute.xlu1 %v14506_v2 }
 0x572   :  { %v13738_v57 = vadd.f32 %v6079_v26, %v5887_v42  ;;  %6213 = vperm.xlu1 %6838, %v13538_v51  }
 0x573   :  { %6828 = vset.pattern.permute.xlu2 %v14484_v43 }
 0x574   :  { %5812 = vperm.xlu2 %6828, %v13510_v15  }
 0x577   :  { %5777 = vperm.xlu0 %6840, %v13491_v38  }
 0x578   :  { %v6166_v18 = vpop.permute.xlu1 %6165 }
 0x579   :  { %v6297_v27 = vmul.f32 %v6166_v18, %v14513_v17  ;;  %v14515_v18 = vld [vmem:[#allocation74_spill] sm:$0xff] }
 0x57a   :  { %6841 = vset.pattern.permute.xlu1 %v14484_v43 }
 0x57b   :  { %v13749_v1 = vadd.f32 %v6297_v27, %v13618_v35  ;;  %5832 = vperm.xlu1 %6841, %v13710_v20   ;;  %v14516_v27 = vld [vmem:[#allocation77_spill] sm:$0xff] }
 0x57c   :  { %6829 = vset.pattern.permute.xlu2 %v14493_v44 }
 0x57d   :  { %14514 = vst [vmem:[#allocation6_spill] sm:$0xff] %v13749_v1  ;;  %6009 = vperm.xlu2 %6829, %v13510_v15   ;;  %v5615_v5 = vpop.xlane.xlu2 %5614  ;;  %v14517_v1 = vld [vmem:[#allocation71_spill] sm:$0xff] }
 0x57e   :  { %7233 = vrcp.f32 %v5615_v5 }
 0x57f   :  { %5792 = vperm.xlu0 %6840, %v13570_v41  }
 0x581   :  { %v5773_v32 = vpop.permute.xlu1 %5772 }
 0x582   :  { %v5890_v17 = vmul.f32 %v5773_v32, %v14515_v18  ;;  %v14519_v18 = vld [vmem:[#allocation51_spill] sm:$0xff] }
 0x583   :  { %6842 = vset.pattern.permute.xlu1 %v14493_v44 }
 0x584   :  { %v7234_v42 = vpop.eup %7233  ;;  %6025 = vperm.xlu1 %6842, %v13710_v20  }
 0x585   :  { %v13760_v35 = vmul.f32 %v7234_v42, %v13648_v9  ;;  %6830 = vset.pattern.permute.xlu2 %v14506_v2  ;;  %v5768_v12 = vpop.permute.xlu2 %5767  ;;  %v13773_v9 = vpop.permute.xlu0 %5969 }
 0x586   :  { %6197 = vperm.xlu2 %6830, %v13389_v14   ;;  %v5889_v25 = vmul.f32 %v5768_v12, %v14517_v1  ;;  %v14521_v1 = vld [vmem:[#allocation34_spill] sm:$0xff] }
 0x587   :  { %6639 = vst.msk [vmem:[%s14191_s5 + $0xf8] sm:$0xff] %vm5327_vm12, %v13760_v35  ;;  %5807 = vperm.xlu0 %6840, %v13630_v50  }
 0x58a   :  { %v5978_v26 = vpop.permute.xlu1 %5977 }
 0x58b   :  { %v6082_v5 = vmul.f32 %v5978_v26, %v14516_v27 }
 0x58c   :  { %6843 = vset.pattern.permute.xlu1 %v14506_v2 }
 0x58d   :  { %v13775_v42 = vadd.f32 %v6082_v5, %v5890_v17  ;;  %6225 = vperm.xlu1 %6843, %v13595_v23   ;;  %v5974_v63 = vpop.permute.xlu2 %5973 }
 0x58e   :  { %v6081_v45 = vmul.f32 %v5974_v63, %v14518_v11  ;;  %6835 = vset.pattern.permute.xlu2 %v14484_v43  ;;  %v13791_v11 = vpop.permute.xlu0 %5981 }
 0x58f   :  { %5827 = vperm.xlu2 %6835, %v13525_v7   ;;  %5822 = vperm.xlu0 %6840, %v13681_v3  }
 0x590   :  { %v13783_v32 = vadd.f32 %v6081_v45, %v5889_v25 }
 0x593   :  { %v6178_v26 = vpop.permute.xlu1 %6177 }
 0x594   :  { %v6300_v27 = vmul.f32 %v6178_v26, %v14519_v18  ;;  %v14524_v18 = vld [vmem:[#allocation86_spill] sm:$0xff] }
 0x595   :  { %6237 = vperm.xlu1 %6843, %v13654_v58   ;;  %v6162_v17 = vpop.permute.xlu2 %6161 }
 0x596   :  { %v13788_v5 = vadd.f32 %v6300_v27, %v13670_v62  ;;  %v6296_v12 = vmul.f32 %v6162_v17, %v14521_v1  ;;  %v13800_v63 = vpop.permute.xlu0 %5993  ;;  %v7248_v62 = vmov 3   ;;  %v14525_v17 = vld [vmem:[#allocation83_spill] sm:$0xff] }
 0x597   :  { %6836 = vset.pattern.permute.xlu2 %v14493_v44  ;;  %5837 = vperm.xlu0 %6840, %v13760_v35   ;;  %14523 = vst [vmem:[#allocation16_spill] sm:$0xff] %v13800_v63 }
 0x598   :  { %14520 = vst [vmem:[#allocation14_spill] sm:$0xff] %v13788_v5  ;;  %v13796_v45 = vadd.f32 %v6296_v12, %v13587_v22  ;;  %6021 = vperm.xlu2 %6836, %v13525_v7   ;;  %v14526_v12 = vld [vmem:[#allocation89_spill] sm:$0xff] }
 0x59a   :  { %14522 = vst [vmem:[#allocation15_spill] sm:$0xff] %v13796_v45  ;;  %v14527_v45 = vld [vmem:[#allocation84_spill] sm:$0xff] }
 0x59c   :  { %v5788_v25 = vpop.permute.xlu1 %5787 }
 0x59d   :  { %6249 = vperm.xlu1 %6843, %v13710_v20   ;;  %v5783_v43 = vpop.permute.xlu2 %5782  ;;  %v5893_v27 = vmul.f32 %v5788_v25, %v14524_v18 }
 0x59e   :  { %v5892_v1 = vmul.f32 %v5783_v43, %v14525_v17  ;;  %v14528_v43 = vld [vmem:[#allocation46_spill] sm:$0xff] }
 0x59f   :  { %6844 = vset.pattern.permute.xlu0 %v14493_v44  ;;  %v13811_v44 = vpop.permute.xlu0 %6005 }
 0x5a0   :  { %6837 = vset.pattern.permute.xlu2 %v14506_v2  ;;  %6029 = vperm.xlu0 %6844, %v13760_v35  }
 0x5a1   :  { %6209 = vperm.xlu2 %6837, %v13458_v60  }
 0x5a5   :  { %6847 = vset.pattern.permute.xlu1 %v7248_v62  ;;  %v5990_v22 = vpop.permute.xlu1 %5989  ;;  %v5986_v26 = vpop.permute.xlu2 %5985 }
 0x5a6   :  { %v6085_v5 = vmul.f32 %v5990_v22, %v14526_v12  ;;  %v6084_v24 = vmul.f32 %v5986_v26, %v14527_v45  ;;  %6357 = vperm.xlu1 %6847, %v13188_v52   ;;  %v14529_v22 = vld [vmem:[#allocation62_spill] sm:$0xff]  ;;  %v14532_v12 = vld [vmem:[#allocation96_spill] sm:$0xff] }
 0x5a8   :  { %v13813_v63 = vadd.f32 %v6085_v5, %v5893_v27  ;;  %v13815_v30 = vadd.f32 %v6084_v24, %v5892_v1  ;;  %6845 = vset.pattern.permute.xlu0 %v14506_v2 }
 0x5a9   :  { %6221 = vperm.xlu2 %6837, %v13494_v8   ;;  %6229 = vperm.xlu0 %6845, %v13630_v50  }
 0x5ad   :  { %v6174_v25 = vpop.permute.xlu2 %6173 }
 0x5ae   :  { %v6299_v18 = vmul.f32 %v6174_v25, %v14528_v43  ;;  %6369 = vperm.xlu1 %6847, %v13222_v29   ;;  %v6190_v45 = vpop.permute.xlu1 %6189 }
 0x5af   :  { %v6303_v52 = vmul.f32 %v6190_v45, %v14529_v22  ;;  %v13823_v26 = vpop.permute.xlu0 %6017 }
 0x5b0   :  { %v13826_v5 = vadd.f32 %v6299_v18, %v13643_v16  ;;  %v14531_v16 = vld [vmem:[#allocation95_spill] sm:$0xff]  ;;  %v14533_v18 = vld [vmem:[#allocation98_spill] sm:$0xff] }
 0x5b1   :  { %v13829_v24 = vadd.f32 %v6303_v52, %v13738_v57  ;;  %6233 = vperm.xlu2 %6837, %v13510_v15   ;;  %6241 = vperm.xlu0 %6845, %v13681_v3  }
 0x5b3   :  { %14530 = vst [vmem:[#allocation18_spill] sm:$0xff] %v13829_v24 }
 0x5b5   :  { %v5798_v2 = vpop.permute.xlu2 %5797 }
 0x5b6   :  { %6377 = vperm.xlu1 %6847, %v13251_v48   ;;  %v5895_v1 = vmul.f32 %v5798_v2, %v14531_v16  ;;  %v14534_v48 = vld [vmem:[#allocation101_spill] sm:$0xff] }
 0x5b7   :  { %v5803_v27 = vpop.permute.xlu1 %5802 }
 0x5b8   :  { %v13834_v29 = vpop.permute.xlu0 %6217  ;;  %v5896_v45 = vmul.f32 %v5803_v27, %v14533_v18 }
 0x5b9   :  { %6245 = vperm.xlu2 %6837, %v13525_v7   ;;  %6253 = vperm.xlu0 %6845, %v13760_v35  }
 0x5bd   :  { %v5998_v17 = vpop.permute.xlu2 %5997 }
 0x5be   :  { %v6087_v57 = vmul.f32 %v5998_v17, %v14532_v12  ;;  %6389 = vperm.xlu1 %6847, %v13287_v0   ;;  %v14535_v17 = vld [vmem:[#allocation58_spill] sm:$0xff]  ;;  %v14536_v12 = vld [vmem:[#allocation32_spill] sm:$0xff] }
 0x5c0   :  { %v13841_v25 = vadd.f32 %v6087_v57, %v5895_v1  ;;  %v6002_v43 = vpop.permute.xlu1 %6001  ;;  %v14537_v57 = vld [vmem:[#allocation75_spill] sm:$0xff] }
 0x5c1   :  { %v6088_v22 = vmul.f32 %v6002_v43, %v14534_v48  ;;  %6846 = vset.pattern.permute.xlu2 %v7248_v62  ;;  %6848 = vset.pattern.permute.xlu0 %v7248_v62  ;;  %v5683_v52 = vpop.permute.xlu0 %5682  ;;  %v6071_v62 = vmul.f32 %v13732_v6, %v14536_v12  ;;  %v14539_v48 = vld [vmem:[#allocation44_spill] sm:$0xff]  ;;  %v14540_v6 = vld [vmem:[#allocation43_spill] sm:$0xff] }
 0x5c2   :  { %6353 = vperm.xlu2 %6846, %v13173_v31   ;;  %6361 = vperm.xlu0 %6848, %v13193_v4   ;;  %v14538_v31 = vld [vmem:[#allocation31_spill] sm:$0xff] }
 0x5c3   :  { %v13847_v24 = vadd.f32 %v6088_v22, %v5896_v45  ;;  %v6074_v22 = vmul.f32 %v13744_v13, %v14539_v48 }
 0x5c5   :  { %v6186_v2 = vpop.permute.xlu2 %6185 }
 0x5c6   :  { %v6302_v16 = vmul.f32 %v6186_v2, %v14535_v17  ;;  %6401 = vperm.xlu1 %6847, %v13319_v28  }
 0x5c8   :  { %v13852_v0 = vadd.f32 %v6302_v16, %v13698_v36 }
 0x5c9   :  { %v6202_v27 = vpop.permute.xlu1 %6201  ;;  %v5718_v1 = vpop.permute.xlu0 %5717 }
 0x5ca   :  { %v6306_v43 = vmul.f32 %v6202_v27, %v14537_v57  ;;  %6365 = vperm.xlu2 %6846, %v13217_v61   ;;  %v5879_v4 = vmul.f32 %v5718_v1, %v14538_v31  ;;  %6381 = vperm.xlu0 %6848, %v13258_v46   ;;  %v14542_v27 = vld [vmem:[#allocation107_spill] sm:$0xff] }
 0x5cc   :  { %v13861_v18 = vadd.f32 %v6306_v43, %v13775_v42  ;;  %v6103_v28 = vadd.f32 %v6071_v62, %v5879_v4  ;;  %v14541_v42 = vld [vmem:[#allocation2_spill] sm:$0xff]  ;;  %v14544_v62 = vld [vmem:[#allocation3_spill] sm:$0xff] }
 0x5cd   :  { %v5872_v16 = vmul.f32 %v5683_v52, %v14541_v42  ;;  %v6064_v13 = vmul.f32 %v13403_v56, %v14544_v62  ;;  %v14549_v56 = vld [vmem:[#allocation4_spill] sm:$0xff]  ;;  %v14550_v42 = vld [vmem:[#allocation70_spill] sm:$0xff]  ;;  %v14553_v62 = vld [vmem:[#allocation87_spill] sm:$0xff] }
 0x5ce   :  { %v5813_v45 = vpop.permute.xlu2 %5812  ;;  %6413 = vperm.xlu1 %6847, %v13361_v21   ;;  %v14543_v21 = vld [vmem:[#allocation108_spill] sm:$0xff] }
 0x5cf   :  { %v5898_v1 = vmul.f32 %v5813_v45, %v14542_v27  ;;  %v6096_v4 = vadd.f32 %v6064_v13, %v5872_v16  ;;  %v14547_v45 = vld [vmem:[#allocation111_spill] sm:$0xff] }
 0x5d1   :  { %v5733_v36 = vpop.permute.xlu0 %5732 }
 0x5d2   :  { %6373 = vperm.xlu2 %6846, %v13232_v59   ;;  %v5882_v2 = vmul.f32 %v5733_v36, %v14540_v6  ;;  %v5818_v61 = vpop.permute.xlu1 %5817  ;;  %6393 = vperm.xlu0 %6848, %v13290_v10   ;;  %v14545_v59 = vld [vmem:[#allocation57_spill] sm:$0xff]  ;;  %v14546_v10 = vld [vmem:[#allocation55_spill] sm:$0xff] }
 0x5d3   :  { %v6077_v43 = vmul.f32 %v13755_v40, %v14545_v59  ;;  %v5899_v36 = vmul.f32 %v5818_v61, %v14547_v45  ;;  %v14552_v61 = vld [vmem:[#allocation66_spill] sm:$0xff] }
 0x5d4   :  { %v6106_v17 = vadd.f32 %v6074_v22, %v5882_v2  ;;  %v14548_v22 = vld [vmem:[#allocation115_spill] sm:$0xff]  ;;  %v6288_v2 = vmul.f32 %v13412_v54, %v14549_v56  ;;  %v14557_v45 = vld [vmem:[#allocation42_spill] sm:$0xff] }
 0x5d5   :  { %v14560_v56 = vld [vmem:[#allocation54_spill] sm:$0xff] }
 0x5d6   :  { %6425 = vperm.xlu1 %6847, %v13448_v37  }
 0x5d7   :  { %v6010_v46 = vpop.permute.xlu2 %6009 }
 0x5d8   :  { %v6090_v12 = vmul.f32 %v6010_v46, %v14543_v21 }
 0x5d9   :  { %v5748_v57 = vpop.permute.xlu0 %5747 }
 0x5da   :  { %v13877_v31 = vadd.f32 %v6090_v12, %v5898_v1  ;;  %6385 = vperm.xlu2 %6846, %v13267_v34   ;;  %v5885_v37 = vmul.f32 %v5748_v57, %v14546_v10  ;;  %6405 = vperm.xlu0 %6848, %v13336_v53   ;;  %v13889_v34 = vadd.f32 %v6288_v2, %v6096_v4  ;;  %v14551_v1 = vld [vmem:[#allocation67_spill] sm:$0xff]  ;;  %v14554_v57 = vld [vmem:[#allocation30_spill] sm:$0xff] }
 0x5db   :  { %v6014_v52 = vpop.permute.xlu1 %6013  ;;  %v6080_v16 = vmul.f32 %v13773_v9, %v14551_v1  ;;  %v6295_v59 = vmul.f32 %v13486_v49, %v14554_v57  ;;  %v14555_v10 = vld [vmem:[#allocation79_spill] sm:$0xff]  ;;  %v6301_v2 = vmul.f32 %v13589_v33, %v14560_v56  ;;  %v14563_v1 = vld [vmem:[#allocation82_spill] sm:$0xff] }
 0x5dc   :  { %v6109_v48 = vadd.f32 %v6077_v43, %v5885_v37  ;;  %v6091_v6 = vmul.f32 %v6014_v52, %v14548_v22  ;;  %v14556_v37 = vld [vmem:[#allocation78_spill] sm:$0xff]  ;;  %v14559_v22 = vld [vmem:[#allocation124_spill] sm:$0xff] }
 0x5de   :  { %v13886_v46 = vadd.f32 %v6091_v6, %v5899_v36  ;;  %6437 = vperm.xlu1 %6847, %v13538_v51  }
 0x5e0   :  { %v6198_v40 = vpop.permute.xlu2 %6197 }
 0x5e1   :  { %v6305_v27 = vmul.f32 %v6198_v40, %v14550_v42  ;;  %v5763_v53 = vpop.permute.xlu0 %5762  ;;  %v14562_v40 = vld [vmem:[#allocation131_spill] sm:$0xff] }
 0x5e2   :  { %6397 = vperm.xlu2 %6846, %v13305_v19   ;;  %v5888_v21 = vmul.f32 %v5763_v53, %v14552_v61  ;;  %6417 = vperm.xlu0 %6848, %v13422_v39   ;;  %v13909_v19 = vadd.f32 %v6295_v59, %v6103_v28  ;;  %v14564_v61 = vld [vmem:[#allocation99_spill] sm:$0xff] }
 0x5e3   :  { %v13898_v54 = vadd.f32 %v6305_v27, %v13783_v32  ;;  %v6083_v32 = vmul.f32 %v13791_v11, %v14555_v10  ;;  %v13930_v27 = vadd.f32 %v6301_v2, %v6109_v48  ;;  %v14569_v10 = vld [vmem:[#allocation8_spill] sm:$0xff] }
 0x5e4   :  { %v13900_v12 = vadd.f32 %v6080_v16, %v5888_v21  ;;  %v6214_v51 = vpop.permute.xlu1 %6213 }
 0x5e5   :  { %v6309_v13 = vmul.f32 %v6214_v51, %v14553_v62  ;;  %v14565_v62 = vld [vmem:[#allocation117_spill] sm:$0xff] }
 0x5e6   :  { %6449 = vperm.xlu1 %6847, %v13595_v23   ;;  %v6298_v23 = vmul.f32 %v13579_v55, %v14557_v45  ;;  %v6092_v48 = vmul.f32 %v13823_v26, %v14565_v62 }
 0x5e7   :  { %v13907_v9 = vadd.f32 %v6309_v13, %v13813_v63 }
 0x5e8   :  { %v13919_v63 = vadd.f32 %v6298_v23, %v6106_v17 }
 0x5e9   :  { %v5828_v43 = vpop.permute.xlu2 %5827  ;;  %v5778_v39 = vpop.permute.xlu0 %5777 }
 0x5ea   :  { %6409 = vperm.xlu2 %6846, %v13347_v47   ;;  %v5891_v52 = vmul.f32 %v5778_v39, %v14556_v37  ;;  %6429 = vperm.xlu0 %6848, %v13491_v38   ;;  %v14558_v47 = vld [vmem:[#allocation122_spill] sm:$0xff]  ;;  %v14568_v39 = vld [vmem:[#allocation80_spill] sm:$0xff] }
 0x5eb   :  { %v5901_v11 = vmul.f32 %v5828_v43, %v14558_v47 }
 0x5ec   :  { %v6115_v4 = vadd.f32 %v6083_v32, %v5891_v52  ;;  %v6307_v32 = vmul.f32 %v14569_v10, %v14568_v39  ;;  %v14570_v52 = vld [vmem:[#allocation90_spill] sm:$0xff]  ;;  %v14584_v10 = vld [vmem:[#allocation104_spill] sm:$0xff] }
 0x5ed   :  { %v5833_v49 = vpop.permute.xlu1 %5832 }
 0x5ee   :  { %6461 = vperm.xlu1 %6847, %v13654_v58   ;;  %v14561_v58 = vld [vmem:[#allocation126_spill] sm:$0xff] }
 0x5ef   :  { %v5902_v17 = vmul.f32 %v5833_v49, %v14561_v58  ;;  %v14571_v49 = vld [vmem:[#allocation112_spill] sm:$0xff]  ;;  %v14576_v58 = vld [vmem:[#allocation127_spill] sm:$0xff] }
 0x5f1   :  { %v5793_v28 = vpop.permute.xlu0 %5792 }
 0x5f2   :  { %6421 = vperm.xlu2 %6846, %v13389_v14   ;;  %v6022_v36 = vpop.permute.xlu2 %6021  ;;  %6441 = vperm.xlu0 %6848, %v13570_v41  }
 0x5f3   :  { %v6093_v6 = vmul.f32 %v6022_v36, %v14559_v22  ;;  %v14572_v36 = vld [vmem:[#allocation91_spill] sm:$0xff] }
 0x5f5   :  { %v6125_v38 = vadd.f32 %v6093_v6, %v5901_v11  ;;  %v14574_v6 = vld [vmem:[#allocation106_spill] sm:$0xff] }
 0x5f6   :  { %6473 = vperm.xlu1 %6847, %v13710_v20   ;;  %v6026_v55 = vpop.permute.xlu1 %6025 }
 0x5f7   :  { %v6094_v42 = vmul.f32 %v6026_v55, %v14562_v40 }
 0x5f9   :  { %v6126_v14 = vadd.f32 %v6094_v42, %v5902_v17  ;;  %v5808_v53 = vpop.permute.xlu0 %5807 }
 0x5fa   :  { %6433 = vperm.xlu2 %6846, %v13458_v60   ;;  %6453 = vperm.xlu0 %6848, %v13630_v50   ;;  %v14566_v60 = vld [vmem:[#allocation116_spill] sm:$0xff] }
 0x5fb   :  { %v6210_v41 = vpop.permute.xlu2 %6209 }
 0x5fc   :  { %v6308_v16 = vmul.f32 %v6210_v41, %v14563_v1  ;;  %v14578_v1 = vld [vmem:[#allocation133_spill] sm:$0xff] }
 0x5fe   :  { %v13936_v33 = vadd.f32 %v6308_v16, %v13815_v30  ;;  %v14567_v30 = vld [vmem:[#allocation94_spill] sm:$0xff] }
 0x5ff   :  { %v6226_v20 = vpop.permute.xlu1 %6225 }
 0x600   :  { %v6312_v21 = vmul.f32 %v6226_v20, %v14564_v61  ;;  %v14579_v20 = vld [vmem:[#allocation121_spill] sm:$0xff] }
 0x601   :  { %v5823_v51 = vpop.permute.xlu0 %5822 }
 0x602   :  { %v13942_v13 = vadd.f32 %v6312_v21, %v13847_v24  ;;  %6445 = vperm.xlu2 %6846, %v13494_v8   ;;  %v5900_v50 = vmul.f32 %v5823_v51, %v14566_v60  ;;  %6465 = vperm.xlu0 %6848, %v13681_v3   ;;  %v5894_v24 = vmul.f32 %v5793_v28, %v14570_v52  ;;  %v14573_v3 = vld [vmem:[#allocation16_spill] sm:$0xff]  ;;  %v14580_v21 = vld [vmem:[#allocation102_spill] sm:$0xff] }
 0x603   :  { %v6222_v57 = vpop.permute.xlu2 %6221  ;;  %v13955_v8 = vadd.f32 %v6307_v32, %v6115_v4  ;;  %v6086_v47 = vmul.f32 %v14573_v3, %v14572_v36  ;;  %v14575_v28 = vld [vmem:[#allocation92_spill] sm:$0xff]  ;;  %v5897_v51 = vmul.f32 %v5808_v53, %v14580_v21 }
 0x604   :  { %v6124_v59 = vadd.f32 %v6092_v48, %v5900_v50  ;;  %v6311_v43 = vmul.f32 %v6222_v57, %v14567_v30  ;;  %v6310_v2 = vmul.f32 %v13834_v29, %v14575_v28  ;;  %v14581_v48 = vld [vmem:[#allocation7_spill] sm:$0xff] }
 0x605   :  { %v6118_v22 = vadd.f32 %v6086_v47, %v5894_v24  ;;  %v14588_v47 = vld [vmem:[#allocation118_spill] sm:$0xff] }
 0x606   :  { %v13951_v37 = vadd.f32 %v6311_v43, %v13841_v25 }
 0x607   :  { %v6238_v26 = vpop.permute.xlu1 %6237  ;;  %v13971_v40 = vadd.f32 %v6310_v2, %v6118_v22 }
 0x608   :  { %v6315_v45 = vmul.f32 %v6238_v26, %v14571_v49 }
 0x609   :  { %v5838_v23 = vpop.permute.xlu0 %5837 }
 0x60a   :  { %v13960_v11 = vadd.f32 %v6315_v45, %v13886_v46  ;;  %6457 = vperm.xlu2 %6846, %v13510_v15   ;;  %6477 = vperm.xlu0 %6848, %v13760_v35   ;;  %v14577_v35 = vld [vmem:[#allocation132_spill] sm:$0xff]  ;;  %v14587_v45 = vld [vmem:[#allocation113_spill] sm:$0xff] }
 0x60b   :  { %v6234_v25 = vpop.permute.xlu2 %6233  ;;  %v5903_v42 = vmul.f32 %v5838_v23, %v14577_v35 }
 0x60c   :  { %v6314_v56 = vmul.f32 %v6234_v25, %v14574_v6 }
 0x60e   :  { %v13968_v4 = vadd.f32 %v6314_v56, %v13877_v31  ;;  %v14590_v56 = vld [vmem:[#allocation109_spill] sm:$0xff] }
 0x60f   :  { %v6250_v55 = vpop.permute.xlu1 %6249 }
 0x610   :  { %v6318_v17 = vmul.f32 %v6250_v55, %v14576_v58  ;;  %v14591_v55 = vld [vmem:[#allocation28_spill] sm:$0xff] }
 0x612   :  { %v13973_v46 = vadd.f32 %v6318_v17, %v6126_v14  ;;  %6469 = vperm.xlu2 %6846, %v13525_v7   ;;  %v6030_v15 = vpop.permute.xlu0 %6029  ;;  %v14582_v14 = vld [vmem:[#allocation103_spill] sm:$0xff]  ;;  %v14583_v7 = vld [vmem:[#allocation130_spill] sm:$0xff] }
 0x613   :  { %v6246_v41 = vpop.permute.xlu2 %6245  ;;  %v6095_v16 = vmul.f32 %v6030_v15, %v14578_v1  ;;  %v6089_v50 = vmul.f32 %v13811_v44, %v14582_v14  ;;  %v14586_v44 = vld [vmem:[#allocation21_spill] sm:$0xff]  ;;  %v14592_v17 = vld [vmem:[#allocation123_spill] sm:$0xff] }
 0x614   :  { %v6317_v29 = vmul.f32 %v6246_v41, %v14579_v20  ;;  %v14593_v41 = vld [vmem:[#allocation134_spill] sm:$0xff] }
 0x615   :  { %v6127_v61 = vadd.f32 %v6095_v16, %v5903_v42  ;;  %v6121_v43 = vadd.f32 %v6089_v50, %v5897_v51 }
 0x616   :  { %v13979_v31 = vadd.f32 %v6317_v29, %v6125_v38  ;;  %v14585_v38 = vld [vmem:[#allocation5_spill] sm:$0xff]  ;;  %v14595_v29 = vld [vmem:[#allocation119_spill] sm:$0xff] }
 0x618   :  { %v6358_v62 = vpop.permute.xlu1 %6357 }
 0x619   :  { %v6513_v60 = vmul.f32 %v6358_v62, %v14581_v48  ;;  %v14596_v62 = vld [vmem:[#allocation40_spill] sm:$0xff] }
 0x61b   :  { %v6545_v57 = vadd.f32 %v6513_v60, %v14583_v7  ;;  %v6230_v30 = vpop.permute.xlu0 %6229  ;;  %v14597_v60 = vld [vmem:[#allocation6_spill] sm:$0xff] }
 0x61c   :  { %v6354_v39 = vpop.permute.xlu2 %6353  ;;  %v6313_v32 = vmul.f32 %v6230_v30, %v14584_v10  ;;  %v14599_v30 = vld [vmem:[#allocation10_spill] sm:$0xff] }
 0x61d   :  { %6577 = vst.msk [vmem:[%s14192_s4 + $0x8] sm:$0xff] %vm995_vm7, %v6545_v57  ;;  %v6512_v53 = vmul.f32 %v6354_v39, %v14585_v38  ;;  %v14600_v39 = vld [vmem:[#allocation15_spill] sm:$0xff] }
 0x61e   :  { %v13992_v26 = vadd.f32 %v6313_v32, %v6121_v43  ;;  %v14601_v32 = vld [vmem:[#allocation9_spill] sm:$0xff] }
 0x61f   :  { %v6544_v52 = vadd.f32 %v6512_v53, %v13889_v34  ;;  %v14589_v34 = vld [vmem:[#allocation17_spill] sm:$0xff] }
 0x620   :  { %v6370_v24 = vpop.permute.xlu1 %6369 }
 0x621   :  { %6576 = vst.msk [vmem:[%s14192_s4] sm:$0xff] %vm995_vm7, %v6544_v52  ;;  %v6516_v49 = vmul.f32 %v6370_v24, %v14586_v44  ;;  %v14602_v52 = vld [vmem:[#allocation52_spill] sm:$0xff]  ;;  %v14603_v44 = vld [vmem:[#allocation14_spill] sm:$0xff] }
 0x623   :  { %v6548_v23 = vadd.f32 %v6516_v49, %v14587_v45  ;;  %v6242_v36 = vpop.permute.xlu0 %6241 }
 0x624   :  { %v6366_v3 = vpop.permute.xlu2 %6365  ;;  %v6316_v25 = vmul.f32 %v6242_v36, %v14588_v47  ;;  %v14604_v36 = vld [vmem:[#allocation48_spill] sm:$0xff]  ;;  %v14605_v47 = vld [vmem:[#allocation33_spill] sm:$0xff] }
 0x625   :  { %6580 = vst.msk [vmem:[%s14192_s4 + $0x20] sm:$0xff] %vm995_vm7, %v6548_v23  ;;  %v6515_v22 = vmul.f32 %v6366_v3, %v14589_v34 }
 0x626   :  { %v14007_v6 = vadd.f32 %v6316_v25, %v6124_v59  ;;  %v14594_v59 = vld [vmem:[#allocation24_spill] sm:$0xff] }
 0x627   :  { %v6547_v28 = vadd.f32 %v6515_v22, %v14590_v56 }
 0x628   :  { %v6378_v2 = vpop.permute.xlu1 %6377 }
 0x629   :  { %6579 = vst.msk [vmem:[%s14192_s4 + $0x18] sm:$0xff] %vm995_vm7, %v6547_v28  ;;  %v6518_v58 = vmul.f32 %v6378_v2, %v14591_v55  ;;  %v14606_v28 = vld [vmem:[#allocation64_spill] sm:$0xff]  ;;  %v14607_v55 = vld [vmem:[#allocation18_spill] sm:$0xff] }
 0x62b   :  { %v6550_v15 = vadd.f32 %v6518_v58, %v14592_v17  ;;  %v6254_v35 = vpop.permute.xlu0 %6253 }
 0x62c   :  { %v6374_v42 = vpop.permute.xlu2 %6373  ;;  %v6319_v1 = vmul.f32 %v6254_v35, %v14593_v41  ;;  %v14609_v35 = vld [vmem:[#allocation45_spill] sm:$0xff] }
 0x62d   :  { %6582 = vst.msk [vmem:[%s14192_s4 + $0x30] sm:$0xff] %vm995_vm7, %v6550_v15  ;;  %v6517_v16 = vmul.f32 %v6374_v42, %v14594_v59 }
 0x62e   :  { %v14022_v20 = vadd.f32 %v6319_v1, %v6127_v61  ;;  %v14598_v61 = vld [vmem:[#allocation36_spill] sm:$0xff] }
 0x62f   :  { %v6549_v21 = vadd.f32 %v6517_v16, %v14595_v29  ;;  %v14610_v16 = vld [vmem:[#allocation76_spill] sm:$0xff] }
 0x630   :  { %v6390_v51 = vpop.permute.xlu1 %6389 }
 0x631   :  { %6581 = vst.msk [vmem:[%s14192_s4 + $0x28] sm:$0xff] %vm995_vm7, %v6549_v21  ;;  %v6521_v48 = vmul.f32 %v6390_v51, %v14596_v62 }
 0x633   :  { %v6553_v14 = vadd.f32 %v6521_v48, %v14597_v60  ;;  %v14612_v48 = vld [vmem:[#allocation56_spill] sm:$0xff] }
 0x634   :  { %v6386_v50 = vpop.permute.xlu2 %6385  ;;  %v6362_v7 = vpop.permute.xlu0 %6361 }
 0x635   :  { %6585 = vst.msk [vmem:[%s14192_s4 + $0x48] sm:$0xff] %vm995_vm7, %v6553_v14  ;;  %v6520_v57 = vmul.f32 %v6386_v50, %v14598_v61  ;;  %v6514_v43 = vmul.f32 %v6362_v7, %v14599_v30  ;;  %v14615_v30 = vld [vmem:[#allocation128_spill] sm:$0xff] }
 0x637   :  { %v6552_v10 = vadd.f32 %v6520_v57, %v14600_v39  ;;  %v6546_v38 = vadd.f32 %v6514_v43, %v14601_v32  ;;  %v14614_v57 = vld [vmem:[#allocation68_spill] sm:$0xff] }
 0x638   :  { %v6402_v53 = vpop.permute.xlu1 %6401  ;;  %v6304_v43 = vmul.f32 %v14615_v30, %v14614_v57 }
 0x639   :  { %6584 = vst.msk [vmem:[%s14192_s4 + $0x40] sm:$0xff] %vm995_vm7, %v6552_v10  ;;  %v6524_v24 = vmul.f32 %v6402_v53, %v14602_v52  ;;  %v14616_v10 = vld [vmem:[#allocation85_spill] sm:$0xff] }
 0x63a   :  { %6578 = vst.msk [vmem:[%s14192_s4 + $0x10] sm:$0xff] %vm995_vm7, %v6546_v38  ;;  %v6336_v38 = vadd.f32 %v6304_v43, %v13900_v12  ;;  %v14617_v53 = vld [vmem:[#allocation69_spill] sm:$0xff] }
 0x63b   :  { %v6556_v49 = vadd.f32 %v6524_v24, %v14603_v44 }
 0x63c   :  { %v6398_v45 = vpop.permute.xlu2 %6397  ;;  %v6382_v23 = vpop.permute.xlu0 %6381 }
 0x63d   :  { %6588 = vst.msk [vmem:[%s14192_s4 + $0x60] sm:$0xff] %vm995_vm7, %v6556_v49  ;;  %v6523_v3 = vmul.f32 %v6398_v45, %v14604_v36  ;;  %v6519_v25 = vmul.f32 %v6382_v23, %v14605_v47  ;;  %v14620_v47 = vld [vmem:[#allocation81_spill] sm:$0xff] }
 0x63f   :  { %v6555_v34 = vadd.f32 %v6523_v3, %v13826_v5  ;;  %v6551_v22 = vadd.f32 %v6519_v25, %v13909_v19  ;;  %v14608_v5 = vld [vmem:[#allocation60_spill] sm:$0xff] }
 0x640   :  { %v6414_v56 = vpop.permute.xlu1 %6413 }
 0x641   :  { %6587 = vst.msk [vmem:[%s14192_s4 + $0x58] sm:$0xff] %vm995_vm7, %v6555_v34  ;;  %v6527_v2 = vmul.f32 %v6414_v56, %v14606_v28 }
 0x642   :  { %6583 = vst.msk [vmem:[%s14192_s4 + $0x38] sm:$0xff] %vm995_vm7, %v6551_v22 }
 0x643   :  { %v6559_v58 = vadd.f32 %v6527_v2, %v14607_v55 }
 0x644   :  { %v6410_v17 = vpop.permute.xlu2 %6409  ;;  %v6394_v15 = vpop.permute.xlu0 %6393 }
 0x645   :  { %6591 = vst.msk [vmem:[%s14192_s4 + $0x78] sm:$0xff] %vm995_vm7, %v6559_v58  ;;  %v6526_v19 = vmul.f32 %v6410_v17, %v14608_v5  ;;  %v6522_v42 = vmul.f32 %v6394_v15, %v14609_v35  ;;  %v14623_v17 = vld [vmem:[#allocation93_spill] sm:$0xff] }
 0x647   :  { %v6558_v41 = vadd.f32 %v6526_v19, %v13852_v0  ;;  %v6554_v1 = vadd.f32 %v6522_v42, %v13919_v63  ;;  %v14611_v0 = vld [vmem:[#allocation73_spill] sm:$0xff] }
 0x648   :  { %v6426_v59 = vpop.permute.xlu1 %6425 }
 0x649   :  { %6590 = vst.msk [vmem:[%s14192_s4 + $0x70] sm:$0xff] %vm995_vm7, %v6558_v41  ;;  %v6530_v29 = vmul.f32 %v6426_v59, %v14610_v16  ;;  %v14626_v16 = vld [vmem:[#allocation105_spill] sm:$0xff] }
 0x64a   :  { %6586 = vst.msk [vmem:[%s14192_s4 + $0x50] sm:$0xff] %vm995_vm7, %v6554_v1 }
 0x64b   :  { %v6562_v21 = vadd.f32 %v6530_v29, %v13861_v18  ;;  %v14613_v18 = vld [vmem:[#allocation88_spill] sm:$0xff] }
 0x64c   :  { %v6422_v51 = vpop.permute.xlu2 %6421  ;;  %v6406_v62 = vpop.permute.xlu0 %6405 }
 0x64d   :  { %6594 = vst.msk [vmem:[%s14192_s4 + $0x90] sm:$0xff] %vm995_vm7, %v6562_v21  ;;  %v6529_v63 = vmul.f32 %v6422_v51, %v14611_v0  ;;  %v6525_v60 = vmul.f32 %v6406_v62, %v14612_v48  ;;  %v14627_v62 = vld [vmem:[#allocation120_spill] sm:$0xff] }
 0x64f   :  { %v6561_v14 = vadd.f32 %v6529_v63, %v13898_v54  ;;  %v6557_v50 = vadd.f32 %v6525_v60, %v13930_v27 }
 0x650   :  { %v6438_v7 = vpop.permute.xlu1 %6437 }
 0x651   :  { %6593 = vst.msk [vmem:[%s14192_s4 + $0x88] sm:$0xff] %vm995_vm7, %v6561_v14  ;;  %v6533_v61 = vmul.f32 %v6438_v7, %v14613_v18 }
 0x652   :  { %6589 = vst.msk [vmem:[%s14192_s4 + $0x68] sm:$0xff] %vm995_vm7, %v6557_v50 }
 0x653   :  { %v6565_v54 = vadd.f32 %v6533_v61, %v13907_v9  ;;  %v14618_v9 = vld [vmem:[#allocation100_spill] sm:$0xff] }
 0x654   :  { %v6434_v39 = vpop.permute.xlu2 %6433  ;;  %v6418_v27 = vpop.permute.xlu0 %6417 }
 0x655   :  { %6597 = vst.msk [vmem:[%s14192_s4 + $0xa8] sm:$0xff] %vm995_vm7, %v6565_v54  ;;  %v6532_v32 = vmul.f32 %v6434_v39, %v14616_v10  ;;  %v6528_v52 = vmul.f32 %v6418_v27, %v14617_v53 }
 0x657   :  { %v6564_v24 = vadd.f32 %v6532_v32, %v13936_v33  ;;  %v6560_v44 = vadd.f32 %v6528_v52, %v6336_v38  ;;  %v14619_v33 = vld [vmem:[#allocation97_spill] sm:$0xff] }
 0x658   :  { %v6450_v49 = vpop.permute.xlu1 %6449 }
 0x659   :  { %6596 = vst.msk [vmem:[%s14192_s4 + $0xa0] sm:$0xff] %vm995_vm7, %v6564_v24  ;;  %v6536_v45 = vmul.f32 %v6450_v49, %v14618_v9 }
 0x65a   :  { %6592 = vst.msk [vmem:[%s14192_s4 + $0x80] sm:$0xff] %vm995_vm7, %v6560_v44 }
 0x65b   :  { %v6568_v12 = vadd.f32 %v6536_v45, %v13942_v13  ;;  %v14621_v13 = vld [vmem:[#allocation114_spill] sm:$0xff] }
 0x65c   :  { %v6446_v23 = vpop.permute.xlu2 %6445  ;;  %v6430_v36 = vpop.permute.xlu0 %6429 }
 0x65d   :  { %6600 = vst.msk [vmem:[%s14192_s4 + $0xc0] sm:$0xff] %vm995_vm7, %v6568_v12  ;;  %v6535_v3 = vmul.f32 %v6446_v23, %v14619_v33  ;;  %v6531_v25 = vmul.f32 %v6430_v36, %v14620_v47 }
 0x65f   :  { %v6567_v34 = vadd.f32 %v6535_v3, %v13951_v37  ;;  %v6563_v22 = vadd.f32 %v6531_v25, %v13955_v8  ;;  %v14622_v37 = vld [vmem:[#allocation110_spill] sm:$0xff] }
 0x660   :  { %v6462_v56 = vpop.permute.xlu1 %6461 }
 0x661   :  { %6599 = vst.msk [vmem:[%s14192_s4 + $0xb8] sm:$0xff] %vm995_vm7, %v6567_v34  ;;  %v6539_v28 = vmul.f32 %v6462_v56, %v14621_v13 }
 0x662   :  { %6595 = vst.msk [vmem:[%s14192_s4 + $0x98] sm:$0xff] %vm995_vm7, %v6563_v22 }
 0x663   :  { %v6571_v2 = vadd.f32 %v6539_v28, %v13960_v11  ;;  %v14624_v11 = vld [vmem:[#allocation129_spill] sm:$0xff] }
 0x664   :  { %v6458_v55 = vpop.permute.xlu2 %6457  ;;  %v6442_v58 = vpop.permute.xlu0 %6441 }
 0x665   :  { %6603 = vst.msk [vmem:[%s14192_s4 + $0xd8] sm:$0xff] %vm995_vm7, %v6571_v2  ;;  %v6538_v8 = vmul.f32 %v6458_v55, %v14622_v37  ;;  %v6534_v15 = vmul.f32 %v6442_v58, %v14623_v17 }
 0x667   :  { %v6570_v5 = vadd.f32 %v6538_v8, %v13968_v4  ;;  %v6566_v19 = vadd.f32 %v6534_v15, %v13971_v40  ;;  %v14625_v4 = vld [vmem:[#allocation125_spill] sm:$0xff] }
 0x668   :  { %v6474_v35 = vpop.permute.xlu1 %6473 }
 0x669   :  { %6602 = vst.msk [vmem:[%s14192_s4 + $0xd0] sm:$0xff] %vm995_vm7, %v6570_v5  ;;  %v6542_v42 = vmul.f32 %v6474_v35, %v14624_v11 }
 0x66a   :  { %6598 = vst.msk [vmem:[%s14192_s4 + $0xb0] sm:$0xff] %vm995_vm7, %v6566_v19 }
 0x66b   :  { %v6574_v41 = vadd.f32 %v6542_v42, %v13973_v46 }
 0x66c   :  { %v6470_v1 = vpop.permute.xlu2 %6469  ;;  %v6454_v59 = vpop.permute.xlu0 %6453 }
 0x66d   :  { %6606 = vst.msk [vmem:[%s14192_s4 + $0xf0] sm:$0xff] %vm995_vm7, %v6574_v41  ;;  %v6541_v40 = vmul.f32 %v6470_v1, %v14625_v4  ;;  %v6537_v29 = vmul.f32 %v6454_v59, %v14626_v16 }
 0x66f   :  { %v6573_v21 = vadd.f32 %v6541_v40, %v13979_v31  ;;  %v6569_v51 = vadd.f32 %v6537_v29, %v13992_v26  ;;  %v14628_v26 = vld [vmem:[#allocation135_spill] sm:$0xff] }
 0x671   :  { %6605 = vst.msk [vmem:[%s14192_s4 + $0xe8] sm:$0xff] %vm995_vm7, %v6573_v21 }
 0x672   :  { %6601 = vst.msk [vmem:[%s14192_s4 + $0xc8] sm:$0xff] %vm995_vm7, %v6569_v51 }
 0x674   :  { %v6466_v46 = vpop.permute.xlu0 %6465 }
 0x675   :  { %v6540_v0 = vmul.f32 %v6466_v46, %v14627_v62 }
 0x677   :  { %v6572_v63 = vadd.f32 %v6540_v0, %v14007_v6 }
 0x679   :  { %6604 = vst.msk [vmem:[%s14192_s4 + $0xe0] sm:$0xff] %vm995_vm7, %v6572_v63 }
 0x67c   :  { %v6478_v31 = vpop.permute.xlu0 %6477 }
 0x67d   :  { %v6543_v48 = vmul.f32 %v6478_v31, %v14628_v26 }
 0x67f   :  { %v6575_v60 = vadd.f32 %v6543_v48, %v14022_v20 }
 0x681   :  { %6607 = vst.msk [vmem:[%s14192_s4 + $0xf8] sm:$0xff] %vm995_vm7, %v6575_v60 }

</bundles_post_ra>
